<compile_context>
chip_gen: v6e
topology: v6e:2x2x1
jax: 0.10.0
libtpu: 0.0.40
codegen_flags: <defaults>
</compile_context>

<pallas_src>
import math
import jax
import jax.numpy as jnp
from jax import lax
from jax.experimental import pallas as pl
from jax.experimental.pallas import tpu as pltpu


# ----------------------------- configuration ------------------------------ #
B = 2            # batch
C = 4            # in_channels
IMG = 16         # img_size (cubic)
P = 8            # patch_size (cubic)
T_DIM = 8        # clinical-variable dimension
HIDDEN = 32      # hidden_size
NUM_HEADS = 4    # only used for the divisibility check in the torch module
SPATIAL_DIMS = 3

GRID_D = IMG // P
N_SPATIAL = GRID_D ** SPATIAL_DIMS          # number of image patches (8)
N_PATCHES = N_SPATIAL + 1                   # +1 clinical token (9)
PATCH_DIM = C * P ** SPATIAL_DIMS           # 4 * 512 = 2048


# ------------------------------ Pallas kernel ------------------------------ #
def patch_embed_kernel(patches_ref, clin_ref, wp_ref, we_ref,
                       pos_img_ref, pos_clin_ref,
                       img_out_ref, clin_out_ref):
    # patches_ref : (B*Ns, PATCH_DIM) f32    wp_ref      : (PATCH_DIM, HIDDEN) f32
    # clin_ref    : (B, T_DIM)        f32    we_ref      : (T_DIM, HIDDEN)     f32
    # pos_img_ref : (Ns, HIDDEN)      f32    pos_clin_ref: (1, HIDDEN)         f32
    # img_out_ref : (B, Ns, HIDDEN)   f32    clin_out_ref: (B, HIDDEN)         f32

    # Image tokens: one f32 MXU matmul over all B*Ns patches (conv-as-matmul).
    img_tok = jnp.dot(patches_ref[...], wp_ref[...],
                      preferred_element_type=jnp.float32,
                      precision=lax.Precision.HIGHEST)
    bn, ns, h = img_out_ref.shape
    # pos_img already has the conv bias folded in (init-time); broadcast over batch.
    img_out_ref[...] = img_tok.reshape(bn, ns, h) + pos_img_ref[...][None, :, :]

    # Clinical token: tiny matmul; pos_clin has the EHR bias + pos row 0 folded in.
    clin_tok = jnp.dot(clin_ref[...], we_ref[...],
                       preferred_element_type=jnp.float32,
                       precision=lax.Precision.HIGHEST)
    clin_out_ref[...] = clin_tok + pos_clin_ref[...]


# ---------------------- one-time parameter fusion (init) ------------------- #
def fuse_params(w_conv, b_conv, w_ehr, b_ehr, pos_emb):
    """Hoisted parameter prep: run ONCE at model init, not per forward call."""
    hidden = w_conv.shape[0]
    # conv (kernel==stride) as matmul: flattened OIDHW -> [PATCH_DIM, HIDDEN],
    # feature order (C, pd, ph, pw) matches the patch extraction below.
    w_patch = jnp.asarray(w_conv.reshape(hidden, -1).T, jnp.float32)
    w_ehr_f = jnp.asarray(w_ehr, jnp.float32)
    pos = jnp.asarray(pos_emb.reshape(-1, hidden), jnp.float32)      # [N_PATCHES, H]
    pos_clin = pos[:1] + b_ehr[None, :].astype(jnp.float32)          # [1, H]
    pos_img = pos[1:] + b_conv[None, :].astype(jnp.float32)          # [N_SPATIAL, H]
    return w_patch, w_ehr_f, pos_img, pos_clin


# ------------------------------ forward (per call) -------------------------- #
@jax.jit
def patch_embedding_forward(img, clin_var, w_patch, w_ehr_f, pos_img, pos_clin):
    """Forward pass of PatchEmbeddingBlock (pos_embed='conv', dropout_rate=0)."""
    Bn, Cn, D, H, W = img.shape
    gd, gh, gw = D // P, H // P, W // P
    n_spatial = gd * gh * gw

    # TODO(synk): patch extraction stays one XLA reshape/transpose (full-image HBM
    # round trip); fusing it into the pallas_call (index_map over (gd,gh,gw) blocks or
    # in-kernel strided DMA with memory_space=pl.ANY) only matters at production sizes.
    patches = img.reshape(Bn, Cn, gd, P, gh, P, gw, P)
    patches = patches.transpose(0, 2, 4, 6, 1, 3, 5, 7)      # [B,gd,gh,gw,C,P,P,P]
    patches = patches.reshape(Bn * n_spatial, PATCH_DIM)     # [B*Ns, PATCH_DIM]

    img_tok, clin_tok = pl.pallas_call(
        patch_embed_kernel,
        out_shape=(jax.ShapeDtypeStruct((Bn, n_spatial, HIDDEN), jnp.float32),
                   jax.ShapeDtypeStruct((Bn, HIDDEN), jnp.float32)),
        in_specs=[pl.BlockSpec(memory_space=pltpu.MemorySpace.VMEM)] * 6,
        out_specs=(pl.BlockSpec(memory_space=pltpu.MemorySpace.VMEM),
                   pl.BlockSpec(memory_space=pltpu.MemorySpace.VMEM)),
    )(patches, clin_var.astype(jnp.float32), w_patch, w_ehr_f, pos_img, pos_clin)

    # TODO(synk): final token assembly (clinical token in front) is one ~2.3 KB XLA
    # concat; doing it in-kernel needs a sublane-offset-1 store into the 9-token block.
    # TODO(synk): HIDDEN=32 < 128 lanes -> masked partial stores; a lane-dense (…,128)
    # output slab is only worth it if the downstream consumer accepts the padded layout.
    return jnp.concatenate([clin_tok[:, None, :], img_tok], axis=1)  # [B, Np, H]


# ------------------------- pure-JAX reference (check) ----------------------- #
def reference(img, clin_var, w_conv, b_conv, w_ehr, b_ehr, pos_emb):
    conv_out = lax.conv_general_dilated(
        img, w_conv, window_strides=(P, P, P), padding="VALID",
        dimension_numbers=("NCDHW", "OIDHW", "NCDHW"),
        precision=lax.Precision.HIGHEST)
    conv_out = conv_out + b_conv[None, :, None, None, None]
    x = conv_out.reshape(B, HIDDEN, -1).transpose(0, 2, 1)            # [B, Ns, H]
    ehr = jnp.dot(clin_var, w_ehr, precision=lax.Precision.HIGHEST) + b_ehr
    x = jnp.concatenate([ehr[:, None, :], x], axis=1)                 # [B, Np, H]
    return x + pos_emb                                                # broadcast over B


# ---------------------------------- main ----------------------------------- #
if __name__ == "__main__":
    assert HIDDEN % NUM_HEADS == 0

    key = jax.random.PRNGKey(0)
    k_img, k_clin, k_wc, k_bc, k_we, k_be, k_pos = jax.random.split(key, 7)

    img = jax.random.normal(k_img, (B, C, IMG, IMG, IMG), dtype=jnp.float32)
    clin_var = jax.random.normal(k_clin, (B, T_DIM), dtype=jnp.float32)

    # deterministic synthetic parameters (shapes follow the torch module __init__)
    fan_in_conv = C * P ** SPATIAL_DIMS
    w_conv = jax.random.normal(k_wc, (HIDDEN, C, P, P, P), dtype=jnp.float32) / math.sqrt(fan_in_conv)
    b_conv = jax.random.normal(k_bc, (HIDDEN,), dtype=jnp.float32) * 0.01
    # nn.Linear(t_dim, hidden): trunc_normal(std=0.02) weight, zero bias
    w_ehr = 0.02 * jax.random.truncated_normal(k_we, -2.0, 2.0, (T_DIM, HIDDEN), dtype=jnp.float32)
    b_ehr = jnp.zeros((HIDDEN,), dtype=jnp.float32)
    # position embeddings: trunc_normal(std=0.02)
    pos_emb = 0.02 * jax.random.truncated_normal(k_pos, -2.0, 2.0, (1, N_PATCHES, HIDDEN),
                                                 dtype=jnp.float32)
    # note: cls_token exists in __init__ but is unused in forward()

    # one-time parameter fusion (hoisted out of the per-call path)
    w_patch, w_ehr_f, pos_img, pos_clin = fuse_params(w_conv, b_conv, w_ehr, b_ehr, pos_emb)

    out = patch_embedding_forward(img, clin_var, w_patch, w_ehr_f, pos_img, pos_clin)
    out = jax.block_until_ready(out)

    ref = reference(img, clin_var, w_conv, b_conv, w_ehr, b_ehr, pos_emb)
    assert out.shape == (B, N_PATCHES, HIDDEN)
    # f32 end-to-end -> tight tolerance (was 5e-2 with bf16 MXU operands)
    assert jnp.allclose(out, ref, atol=1e-4, rtol=1e-4), (
        f"max abs err {jnp.max(jnp.abs(out - ref))}")

    print("KERNEL_OK")
</pallas_src>

<mosaic_0001>
module attributes {stable_mosaic.version = 11 : i64} {
  func.func @patch_embed_kernel(%arg0: memref<16x2048xf32, #tpu.memory_space<vmem>>, %arg1: memref<2x8xf32, #tpu.memory_space<vmem>>, %arg2: memref<2048x32xf32, #tpu.memory_space<vmem>>, %arg3: memref<8x32xf32, #tpu.memory_space<vmem>>, %arg4: memref<8x32xf32, #tpu.memory_space<vmem>>, %arg5: memref<1x32xf32, #tpu.memory_space<vmem>>, %arg6: memref<2x8x32xf32, #tpu.memory_space<vmem>>, %arg7: memref<2x32xf32, #tpu.memory_space<vmem>>) attributes {dimension_semantics = [], scalar_prefetch = 0 : i64, scratch_operands = 0 : i64, tpu.core_type = #tpu.core_type<tc>} {
    %c0 = arith.constant 0 : index
    %c0_0 = arith.constant 0 : index
    %0 = vector.load %arg0[%c0, %c0_0] : memref<16x2048xf32, #tpu.memory_space<vmem>>, vector<16x2048xf32>
    %c0_1 = arith.constant 0 : index
    %c0_2 = arith.constant 0 : index
    %1 = vector.load %arg2[%c0_1, %c0_2] : memref<2048x32xf32, #tpu.memory_space<vmem>>, vector<2048x32xf32>
    %cst = arith.constant dense<0.000000e+00> : vector<16x32xf32>
    %2 = tpu.matmul %0, %1, %cst {dimension_numbers = #tpu.dot_dimension_numbers<[1], [0], [0], [1], [0, 0, 1, 1], [], []>, precision = #tpu.contract_precision<fp32>} : vector<16x2048xf32>, vector<2048x32xf32>, vector<16x32xf32> -> vector<16x32xf32>
    %3 = vector.shape_cast %2 : vector<16x32xf32> to vector<2x8x32xf32>
    %c0_3 = arith.constant 0 : index
    %c0_4 = arith.constant 0 : index
    %4 = vector.load %arg4[%c0_3, %c0_4] : memref<8x32xf32, #tpu.memory_space<vmem>>, vector<8x32xf32>
    %5 = vector.shape_cast %4 : vector<8x32xf32> to vector<1x8x32xf32>
    %6 = vector.broadcast %5 : vector<1x8x32xf32> to vector<2x8x32xf32>
    %7 = arith.addf %3, %6 : vector<2x8x32xf32>
    %c0_5 = arith.constant 0 : index
    %c0_6 = arith.constant 0 : index
    %c0_7 = arith.constant 0 : index
    %8 = vector.load %arg6[%c0_5, %c0_6, %c0_7] : memref<2x8x32xf32, #tpu.memory_space<vmem>>, vector<2x8x32xf32>
    tpu.vector_store %arg6[%c0_5, %c0_6, %c0_7], %7 {strides = array<i32>} : memref<2x8x32xf32, #tpu.memory_space<vmem>>, vector<2x8x32xf32>,
    %c0_8 = arith.constant 0 : index
    %c0_9 = arith.constant 0 : index
    %9 = vector.load %arg1[%c0_8, %c0_9] : memref<2x8xf32, #tpu.memory_space<vmem>>, vector<2x8xf32>
    %c0_10 = arith.constant 0 : index
    %c0_11 = arith.constant 0 : index
    %10 = vector.load %arg3[%c0_10, %c0_11] : memref<8x32xf32, #tpu.memory_space<vmem>>, vector<8x32xf32>
    %cst_12 = arith.constant dense<0.000000e+00> : vector<2x32xf32>
    %11 = tpu.matmul %9, %10, %cst_12 {dimension_numbers = #tpu.dot_dimension_numbers<[1], [0], [0], [1], [0, 0, 1, 1], [], []>, precision = #tpu.contract_precision<fp32>} : vector<2x8xf32>, vector<8x32xf32>, vector<2x32xf32> -> vector<2x32xf32>
    %c0_13 = arith.constant 0 : index
    %c0_14 = arith.constant 0 : index
    %12 = vector.load %arg5[%c0_13, %c0_14] : memref<1x32xf32, #tpu.memory_space<vmem>>, vector<1x32xf32>
    %13 = vector.broadcast %12 : vector<1x32xf32> to vector<2x32xf32>
    %14 = arith.addf %11, %13 : vector<2x32xf32>
    %c0_15 = arith.constant 0 : index
    %c0_16 = arith.constant 0 : index
    %15 = vector.load %arg7[%c0_15, %c0_16] : memref<2x32xf32, #tpu.memory_space<vmem>>, vector<2x32xf32>
    tpu.vector_store %arg7[%c0_15, %c0_16], %14 {strides = array<i32>} : memref<2x32xf32, #tpu.memory_space<vmem>>, vector<2x32xf32>,
    return
  }
}

</mosaic_0001>

<bundles_post_ra>
// kernel: patch_embedding_forward.1
= control target key start
LH: loop header
LB: loop body
LE: loop exit
PB: predicated region body
PF: predicated region fallthrough
CT: control target
= control target key end

     0   :  { %vm7672_vm0 = vcmask 64512   ;;  %vm10002_vm1 = vmmov 0   ;;  %vm7660_vm2 = vcmask 261120   ;;  %vm8122_vm3 = vcmask 254976   ;;  %s16428_s2 = inlined_call_operand.vmem [shape: f32[2048,32], index: 2, kind: input, shape index: {}]   ;;  %s16429_s0 = inlined_call_operand.vmem [shape: f32[16,2048], index: 0, kind: input, shape index: {}]   ;;  %s16430_s1 = inlined_call_operand.vmem [shape: f32[2,8], index: 1, kind: input, shape index: {}]   ;;  %s16431_s3 = inlined_call_operand.vmem [shape: f32[8,32], index: 3, kind: input, shape index: {}]   ;;  %s16432_s5 = inlined_call_operand.vmem [shape: f32[1,32], index: 5, kind: input, shape index: {}]   ;;  %s16433_s4 = inlined_call_operand.vmem [shape: f32[8,32], index: 4, kind: input, shape index: {}]   ;;  %s16434_s6 = inlined_call_operand.vmem [shape: f32[2,8,32], index: 6, kind: output, shape index: {0}]   ;;  %s16435_s7 = inlined_call_operand.vmem [shape: f32[2,32], index: 7, kind: output, shape index: {1}]  }
   0x1   :  { %v88_v0 = vld [vmem:[%s16428_s2 + $0xf8] sm:$0xff]  ;;  %v87_v2 = vld [vmem:[%s16428_s2 + $0xf0] sm:$0xff]  ;;  %v86_v7 = vld [vmem:[%s16428_s2 + $0xe8] sm:$0xff] }
   0x2   :  { %v72_v1 = vld [vmem:[%s16428_s2 + $0x78] sm:$0xff]  ;;  %v10052_v3 = vand.u32 4294901760, %v88_v0  ;;  %v10056_v5 = vand.u32 4294901760, %v87_v2  ;;  %v71_v6 = vld [vmem:[%s16428_s2 + $0x70] sm:$0xff]  ;;  %v70_v8 = vld [vmem:[%s16428_s2 + $0x68] sm:$0xff]  ;;  %v10069_v10 = vand.u32 4294901760, %v86_v7 }
   0x3   :  { %v10054_v4 = vand.u32 4294901760, %v72_v1  ;;  %v10067_v9 = vand.u32 4294901760, %v71_v6  ;;  %v10071_v11 = vand.u32 4294901760, %v70_v8  ;;  %v85_v12 = vld [vmem:[%s16428_s2 + $0xe0] sm:$0xff]  ;;  %v84_v14 = vld [vmem:[%s16428_s2 + $0xd8] sm:$0xff]  ;;  %v10100_v20 = vld [vmem:[%s16428_s2 + $0xd0] sm:$0xff] }
   0x4   :  { %v69_v13 = vld [vmem:[%s16428_s2 + $0x60] sm:$0xff]  ;;  %8133 = vmatprep.subr.mxu0 %v10052_v3  ;;  %v10083_v15 = vand.u32 4294901760, %v85_v12  ;;  %v10087_v17 = vand.u32 4294901760, %v84_v14  ;;  %v10090_v18 = vsub.f32 %v88_v0, %v10052_v3  ;;  %v10095_v19 = vld [vmem:[%s16428_s2 + $0x58] sm:$0xff]  ;;  %v10105_v21 = vld [vmem:[%s16428_s2 + $0x50] sm:$0xff]  ;;  %v10115_v24 = vand.u32 4294901760, %v10100_v20 }
   0x5   :  { %v10085_v16 = vand.u32 4294901760, %v69_v13  ;;  %8134 = vmatpush3.msra.mxu0 %v10054_v4  ;;  %v10109_v22 = vand.u32 4294901760, %v10095_v19  ;;  %v10112_v23 = vsub.f32 %v72_v1, %v10054_v4  ;;  %v10118_v25 = vsub.f32 %v87_v2, %v10056_v5  ;;  %v10123_v26 = vld [vmem:[%s16428_s2 + $0xc8] sm:$0xff]  ;;  %v10133_v28 = vld [vmem:[%s16428_s2 + $0xc0] sm:$0xff]  ;;  %v10185_v46 = vld [vmem:[%s16428_s2 + $0xb8] sm:$0xff] }
   0x6   :  { %v10128_v27 = vld [vmem:[%s16428_s2 + $0x48] sm:$0xff]  ;;  %8135 = vmatprep.subr.mxu0 %v10056_v5  ;;  %v16449_v29 = vand.u32 4294901760, %v10090_v18  ;;  %v10138_v30 = vand.u32 4294901760, %v10105_v21  ;;  %v10141_v31 = vsub.f32 %v71_v6, %v10067_v9  ;;  %v10144_v32 = vand.u32 4294901760, %v10123_v26  ;;  %v10158_v37 = vld [vmem:[%s16428_s2 + $0x40] sm:$0xff]  ;;  %v10198_v51 = vld [vmem:[%s16428_s2 + $0x38] sm:$0xff] }
   0x7   :  { %8136 = vmatpush3.msra.mxu0 %v10067_v9  ;;  %v16448_v33 = vand.u32 4294901760, %v10112_v23  ;;  %v16446_v34 = vand.u32 4294901760, %v10118_v25  ;;  %v10150_v35 = vsub.f32 %v86_v7, %v10069_v10  ;;  %v10153_v36 = vand.u32 4294901760, %v10128_v27  ;;  %v10208_v56 = vld [vmem:[%s16428_s2 + $0xb0] sm:$0xff]  ;;  %v10238_v2 = vld [vmem:[%s16428_s2 + $0xa8] sm:$0xff] }
   0x8   :  { %17091 = vst [vmem:[#allocation2_spill] sm:$0xff] %v10138_v30  ;;  %17092 = vst [vmem:[#allocation3_spill] sm:$0xff] %v10144_v32  ;;  %8137 = vmatprep.subr.mxu0 %v10069_v10  ;;  %v556_v38 = vsub.f32 %v10090_v18, %v16449_v29  ;;  %v16445_v39 = vand.u32 4294901760, %v10141_v31  ;;  %v10166_v40 = vsub.f32 %v70_v8, %v10071_v11  ;;  %v10169_v41 = vand.u32 4294901760, %v10133_v28  ;;  %v10223_v61 = vld [vmem:[%s16428_s2 + $0x30] sm:$0xff] }
   0x9   :  { %17093 = vst [vmem:[#allocation4_spill] sm:$0xff] %v10153_v36  ;;  %8138 = vmatpush3.msra.mxu0 %v10071_v11  ;;  %v444_v42 = vsub.f32 %v10112_v23, %v16448_v33  ;;  %v563_v43 = vsub.f32 %v10118_v25, %v16446_v34  ;;  %v16443_v44 = vand.u32 4294901760, %v10150_v35  ;;  %v10180_v45 = vsub.f32 %v85_v12, %v10083_v15  ;;  %v10374_v33 = vld [vmem:[%s16428_s2 + $0x88] sm:$0xff] }
   0xa   :  { %17094 = vst [vmem:[#allocation5_spill] sm:$0xff] %v10169_v41  ;;  %8139 = vmatprep.subr.mxu0 %v10083_v15  ;;  %v557_v47 = vand.u32 4294901760, %v556_v38  ;;  %v451_v48 = vsub.f32 %v10141_v31, %v16445_v39  ;;  %v16441_v49 = vand.u32 4294901760, %v10166_v40  ;;  %v10193_v50 = vand.u32 4294901760, %v10158_v37 }
   0xb   :  { %8140 = vmatpush3.msra.mxu0 %v10085_v16  ;;  %v445_v52 = vand.u32 4294901760, %v444_v42  ;;  %v564_v53 = vand.u32 4294901760, %v563_v43  ;;  %v570_v54 = vsub.f32 %v10150_v35, %v16443_v44  ;;  %v16440_v55 = vand.u32 4294901760, %v10180_v45  ;;  %v10347_v44 = vld [vmem:[%s16428_s2 + $0x90] sm:$0xff] }
   0xc   :  { %17095 = vst [vmem:[#allocation6_spill] sm:$0xff] %v10193_v50  ;;  %8141 = vmatprep.subr.mxu0 %v10087_v17  ;;  %8171 = vmatprep.subr.mxu1 %v557_v47  ;;  %v452_v57 = vand.u32 4294901760, %v451_v48  ;;  %v458_v58 = vsub.f32 %v10166_v40, %v16441_v49  ;;  %v10215_v59 = vsub.f32 %v69_v13, %v10085_v16  ;;  %v10218_v60 = vand.u32 4294901760, %v10185_v46  ;;  %v10252_v13 = vld [vmem:[%s16428_s2 + $0x28] sm:$0xff]  ;;  %v10331_v49 = vld [vmem:[%s16428_s2 + $0x18] sm:$0xff] }
   0xd   :  { %8142 = vmatpush3.msra.mxu0 %v10109_v22  ;;  %8172 = vmatpush3.msra.mxu1 %v445_v52  ;;  %v571_v62 = vand.u32 4294901760, %v570_v54  ;;  %v577_v63 = vsub.f32 %v10180_v45, %v16440_v55  ;;  %v10230_v0 = vsub.f32 %v84_v14, %v10087_v17  ;;  %v10233_v1 = vand.u32 4294901760, %v10198_v51 }
   0xe   :  { %17096 = vst [vmem:[#allocation7_spill] sm:$0xff] %v10218_v60  ;;  %8143 = vmatprep.subr.mxu0 %v10115_v24  ;;  %8173 = vmatprep.subr.mxu1 %v564_v53  ;;  %v459_v6 = vand.u32 4294901760, %v458_v58  ;;  %v16438_v7 = vand.u32 4294901760, %v10215_v59  ;;  %v10244_v8 = vsub.f32 %v10095_v19, %v10109_v22  ;;  %v10247_v12 = vand.u32 4294901760, %v10208_v56 }
   0xf   :  { %17097 = vst [vmem:[#allocation8_spill] sm:$0xff] %v10233_v1  ;;  %8144 = vmatpush3.msra.mxu0 %v10138_v30  ;;  %8174 = vmatpush3.msra.mxu1 %v452_v57  ;;  %v578_v14 = vand.u32 4294901760, %v577_v63  ;;  %v16436_v38 = vand.u32 4294901760, %v10230_v0  ;;  %v10258_v42 = vsub.f32 %v10100_v20, %v10115_v24  ;;  %v10261_v19 = vand.u32 4294901760, %v10223_v61  ;;  %v10278_v20 = vld [vmem:[%s16428_s2 + $0xa0] sm:$0xff] }
  0x10   :  { %17098 = vst [vmem:[#allocation9_spill] sm:$0xff] %v10247_v12  ;;  %8145 = vmatprep.subr.mxu0 %v10144_v32  ;;  %8175 = vmatprep.subr.mxu1 %v571_v62  ;;  %v465_v43 = vsub.f32 %v10215_v59, %v16438_v7  ;;  %v16437_v47 = vand.u32 4294901760, %v10244_v8  ;;  %v10270_v48 = vsub.f32 %v10105_v21, %v10138_v30  ;;  %v10273_v52 = vand.u32 4294901760, %v10238_v2 }
  0x11   :  { %17099 = vst [vmem:[#allocation10_spill] sm:$0xff] %v10261_v19  ;;  %8146 = vmatpush3.msra.mxu0 %v10153_v36  ;;  %8176 = vmatpush3.msra.mxu1 %v459_v6  ;;  %v584_v53 = vsub.f32 %v10230_v0, %v16436_v38  ;;  %v16439_v54 = vand.u32 4294901760, %v10258_v42  ;;  %v10287_v21 = vsub.f32 %v10123_v26, %v10144_v32  ;;  %v10290_v57 = vand.u32 4294901760, %v10252_v13  ;;  %v10304_v26 = vld [vmem:[%s16428_s2 + $0x20] sm:$0xff] }
  0x12   :  { %17100 = vst [vmem:[#allocation11_spill] sm:$0xff] %v10273_v52  ;;  %8147 = vmatprep.subr.mxu0 %v10169_v41  ;;  %8177 = vmatprep.subr.mxu1 %v578_v14  ;;  %v466_v58 = vand.u32 4294901760, %v465_v43  ;;  %v472_v62 = vsub.f32 %v10244_v8, %v16437_v47  ;;  %v16442_v63 = vand.u32 4294901760, %v10270_v48  ;;  %v10299_v6 = vsub.f32 %v10128_v27, %v10153_v36  ;;  %v10317_v27 = vld [vmem:[%s16428_s2 + $0x98] sm:$0xff] }
  0x13   :  { %17101 = vst [vmem:[#allocation12_spill] sm:$0xff] %v10290_v57  ;;  %8148 = vmatpush3.msra.mxu0 %v10193_v50  ;;  %v585_v38 = vand.u32 4294901760, %v584_v53  ;;  %v591_v14 = vsub.f32 %v10258_v42, %v16439_v54  ;;  %v16444_v43 = vand.u32 4294901760, %v10287_v21  ;;  %v10312_v47 = vand.u32 4294901760, %v10278_v20 }
  0x14   :  { %8178 = vmatpush3.msra.mxu1 %v466_v58  ;;  %8149 = vmatprep.subr.mxu0 %v10218_v60  ;;  %v473_v7 = vand.u32 4294901760, %v472_v62  ;;  %v479_v53 = vsub.f32 %v10270_v48, %v16442_v63  ;;  %v16447_v54 = vand.u32 4294901760, %v10299_v6  ;;  %v10326_v55 = vsub.f32 %v10133_v28, %v10169_v41  ;;  %v25_v41 = vld [vmem:[%s16429_s0] sm:$0xff] }
  0x15   :  { %17102 = vst [vmem:[#allocation13_spill] sm:$0xff] %v10312_v47  ;;  %8179 = vmatprep.subr.mxu1 %v585_v38  ;;  %8150 = vmatpush3.msra.mxu0 %v10233_v1  ;;  %v592_v58 = vand.u32 4294901760, %v591_v14  ;;  %v598_v62 = vsub.f32 %v10287_v21, %v16444_v43  ;;  %v10338_v63 = vand.u32 4294901760, %v10304_v26  ;;  %v10342_v28 = vsub.f32 %v10158_v37, %v10193_v50  ;;  %v10360_v37 = vld [vmem:[%s16428_s2 + $0x10] sm:$0xff] }
  0x16   :  { %8180 = vmatpush3.msra.mxu1 %v473_v7  ;;  %8151 = vmatprep.subr.mxu0 %v10247_v12  ;;  %v480_v38 = vand.u32 4294901760, %v479_v53  ;;  %v486_v14 = vsub.f32 %v10299_v6, %v16447_v54  ;;  %v16452_v43 = vand.u32 4294901760, %v10326_v55  ;;  %v10355_v39 = vand.u32 4294901760, %v10317_v27 }
  0x17   :  { %17103 = vst [vmem:[#allocation14_spill] sm:$0xff] %v10338_v63  ;;  %8181 = vmatprep.subr.mxu1 %v592_v58  ;;  %8152 = vmatpush3.msra.mxu0 %v10261_v19  ;;  %v599_v7 = vand.u32 4294901760, %v598_v62  ;;  %v16453_v53 = vand.u32 4294901760, %v10342_v28  ;;  %v10366_v34 = vsub.f32 %v10185_v46, %v10218_v60  ;;  %v10369_v54 = vand.u32 4294901760, %v10331_v49 }
  0x18   :  { %17104 = vst [vmem:[#allocation15_spill] sm:$0xff] %v10355_v39  ;;  %8182 = vmatpush3.msra.mxu1 %v480_v38  ;;  %8153 = vmatprep.subr.mxu0 %v10273_v52  ;;  %v487_v58 = vand.u32 4294901760, %v486_v14  ;;  %v605_v62 = vsub.f32 %v10326_v55, %v16452_v43  ;;  %v10382_v46 = vsub.f32 %v10198_v51, %v10233_v1  ;;  %v10385_v29 = vand.u32 4294901760, %v10347_v44  ;;  %v10402_v51 = vld [vmem:[%s16428_s2 + $0x8] sm:$0xff] }
  0x19   :  { %17105 = vst [vmem:[#allocation16_spill] sm:$0xff] %v10369_v54  ;;  %8183 = vmatprep.subr.mxu1 %v599_v7  ;;  %8154 = vmatpush3.msra.mxu0 %v10290_v57  ;;  %v493_v38 = vsub.f32 %v10342_v28, %v16453_v53  ;;  %v10394_v60 = vsub.f32 %v10208_v56, %v10247_v12  ;;  %v10397_v43 = vand.u32 4294901760, %v10360_v37  ;;  %v10411_v56 = vand.u32 4294901760, %v10374_v33  ;;  %v10416_v12 = vld [vmem:[%s16428_s2 + $0x80] sm:$0xff] }
  0x1a   :  { %17106 = vst [vmem:[#allocation17_spill] sm:$0xff] %v10385_v29  ;;  %8184 = vmatpush3.msra.mxu1 %v487_v58  ;;  %8155 = vmatprep.subr.mxu0 %v10312_v47  ;;  %v606_v7 = vand.u32 4294901760, %v605_v62  ;;  %v10408_v14 = vsub.f32 %v10223_v61, %v10261_v19  ;;  %v17110_v1 = vand.u32 4294901760, %v10366_v34  ;;  %v10425_v61 = vsub.f32 %v10238_v2, %v10273_v52  ;;  %v10442_v2 = vld [vmem:[%s16428_s2] sm:$0xff] }
  0x1b   :  { %17107 = vst [vmem:[#allocation18_spill] sm:$0xff] %v10397_v43  ;;  %17109 = vst [vmem:[#allocation20_spill] sm:$0xff] %v10411_v56  ;;  %8156 = vmatpush3.msra.mxu0 %v10338_v63  ;;  %v494_v58 = vand.u32 4294901760, %v493_v38  ;;  %v16470_v53 = vand.u32 4294901760, %v10394_v60  ;;  %v17112_v19 = vand.u32 4294901760, %v10382_v46  ;;  %v10433_v38 = vand.u32 4294901760, %v10402_v51 }
  0x1c   :  { %17108 = vst [vmem:[#allocation19_spill] sm:$0xff] %v10408_v14  ;;  %v612_v62 = vsub.f32 %v10366_v34, %v17110_v1  ;;  %17111 = vst [vmem:[#allocation21_spill] sm:$0xff] %v10425_v61  ;;  %8185 = vmatprep.subr.mxu1 %v606_v7  ;;  %8157 = vmatprep.subr.mxu0 %v10355_v39  ;;  %v10437_v1 = vsub.f32 %v10252_v13, %v10290_v57  ;;  %v10450_v52 = vand.u32 4294901760, %v10416_v12  ;;  %v26_v13 = vld [vmem:[%s16429_s0 + $0x8] sm:$0xff] }
  0x1d   :  { %v500_v50 = vsub.f32 %v10382_v46, %v17112_v19  ;;  %8186 = vmatpush3.msra.mxu1 %v494_v58  ;;  %8158 = vmatpush3.msra.mxu0 %v10369_v54  ;;  %v619_v19 = vsub.f32 %v10394_v60, %v16470_v53  ;;  %v17114_v58 = vand.u32 4294901760, %v10408_v14  ;;  %v10462_v53 = vsub.f32 %v10278_v20, %v10312_v47 }
  0x1e   :  { %17113 = vst [vmem:[#allocation22_spill] sm:$0xff] %v10437_v1  ;;  %v613_v7 = vand.u32 4294901760, %v612_v62  ;;  %8159 = vmatprep.subr.mxu0 %v10385_v29  ;;  %v10476_v36 = vsub.f32 %v10304_v26, %v10338_v63  ;;  %v10491_v26 = vand.u32 4294901760, %v25_v41 }
  0x1f   :  { %v501_v57 = vand.u32 4294901760, %v500_v50  ;;  %v507_v62 = vsub.f32 %v10408_v14, %v17114_v58  ;;  %v620_v32 = vand.u32 4294901760, %v619_v19  ;;  %8160 = vmatpush3.msra.mxu0 %v10397_v43  ;;  %v17115_v50 = vand.u32 4294901760, %v10425_v61 }
  0x20   :  { %8187 = vmatprep.subr.mxu1 %v613_v7  ;;  %v10472_v58 = vand.u32 4294901760, %v10442_v2  ;;  %17116 = vst [vmem:[#allocation23_spill] sm:$0xff] %v10476_v36  ;;  %8161 = vmatprep.subr.mxu0 %v10411_v56  ;;  %v17117_v7 = vand.u32 4294901760, %v10437_v1  ;;  %v16481_v47 = vand.u32 4294901760, %v10462_v53  ;;  %v10483_v14 = vand.u32 4294901760, %v26_v13  ;;  %17119 = vst [vmem:[#allocation25_spill] sm:$0xff] %v10491_v26 }
  0x21   :  { %v626_v30 = vsub.f32 %v10425_v61, %v17115_v50  ;;  %8188 = vmatpush3.msra.mxu1 %v501_v57  ;;  %v508_v20 = vand.u32 4294901760, %v507_v62  ;;  %8162 = vmatpush3.msra.mxu0 %v10433_v38  ;;  %v16482_v61 = vand.u32 4294901760, %v10476_v36  ;;  %v10489_v57 = vsub.f32 %v10317_v27, %v10355_v39 }
  0x22   :  { %v514_v19 = vsub.f32 %v10437_v1, %v17117_v7  ;;  %17118 = vst [vmem:[#allocation24_spill] sm:$0xff] %v10483_v14  ;;  %8189 = vmatprep.subr.mxu1 %v620_v32  ;;  %8163 = vmatprep.subr.mxu0 %v10450_v52  ;;  %v633_v7 = vsub.f32 %v10462_v53, %v16481_v47 }
  0x23   :  { %v627_v50 = vand.u32 4294901760, %v626_v30  ;;  %8190 = vmatpush3.msra.mxu1 %v508_v20  ;;  %v10498_v30 = vsub.f32 %v26_v13, %v10483_v14  ;;  %v10502_v32 = vsub.f32 %v10331_v49, %v10369_v54  ;;  %8164 = vmatpush3.msra.mxu0 %v10472_v58  ;;  %v521_v27 = vsub.f32 %v10476_v36, %v16482_v61 }
  0x24   :  { %v515_v62 = vand.u32 4294901760, %v514_v19  ;;  %v10510_v19 = vsub.f32 %v25_v41, %v10491_v26  ;;  %v10514_v13 = vsub.f32 %v10347_v44, %v10385_v29  ;;  %v634_v47 = vand.u32 4294901760, %v633_v7  ;;  %8209 = vmatprep.subr.mxu0 %v10090_v18  ;;  %665 = vmatprep.mubr.f32.mxu1 %v10483_v14 }
  0x25   :  { %17120 = vst [vmem:[#allocation26_spill] sm:$0xff] %v10502_v32  ;;  %8191 = vmatprep.subr.mxu1 %v627_v50  ;;  %v16487_v49 = vand.u32 4294901760, %v10498_v30  ;;  %v16490_v50 = vand.u32 4294901760, %v10502_v32  ;;  %v10521_v61 = vsub.f32 %v10360_v37, %v10397_v43  ;;  %v522_v20 = vand.u32 4294901760, %v521_v27 }
  0x26   :  { %8192 = vmatpush3.msra.mxu1 %v515_v62  ;;  %v17121_v41 = vand.u32 4294901760, %v10489_v57  ;;  %v17122_v62 = vand.u32 4294901760, %v10510_v19  ;;  %v17123_v14 = vand.u32 4294901760, %v10514_v13  ;;  %v10548_v43 = vsub.f32 %v10402_v51, %v10433_v38 }
  0x27   :  { %8193 = vmatprep.subr.mxu1 %v634_v47  ;;  %v412_v7 = vsub.f32 %v10498_v30, %v16487_v49  ;;  %v528_v37 = vsub.f32 %v10502_v32, %v16490_v50  ;;  %v17124_v29 = vand.u32 4294901760, %v10521_v61 }
  0x28   :  { %v640_v54 = vsub.f32 %v10489_v57, %v17121_v41  ;;  %v10538_v41 = vsub.f32 %v10374_v33, %v10411_v56  ;;  %8194 = vmatpush3.msra.mxu1 %v522_v20  ;;  %v418_v47 = vsub.f32 %v10510_v19, %v17122_v62  ;;  %v647_v49 = vsub.f32 %v10514_v13, %v17123_v14 }
  0x29   :  { %v413_v50 = vand.u32 4294901760, %v412_v7  ;;  %v529_v27 = vand.u32 4294901760, %v528_v37  ;;  %v535_v33 = vsub.f32 %v10521_v61, %v17124_v29  ;;  %v16497_v62 = vand.u32 4294901760, %v10548_v43 }
  0x2a   :  { %v641_v44 = vand.u32 4294901760, %v640_v54  ;;  %v16498_v54 = vand.u32 4294901760, %v10538_v41  ;;  %v419_v20 = vand.u32 4294901760, %v418_v47  ;;  %v648_v56 = vand.u32 4294901760, %v647_v49  ;;  %v42_v47 = vld [vmem:[%s16429_s0 + $0x88] sm:$0xff] }
  0x2b   :  { %v10557_v14 = vsub.f32 %v10416_v12, %v10450_v52  ;;  %414 = vmatprep.mubr.f32.mxu0 %v413_v50  ;;  %v536_v51 = vand.u32 4294901760, %v535_v33  ;;  %v10564_v29 = vsub.f32 %v10442_v2, %v10472_v58  ;;  %v542_v49 = vsub.f32 %v10548_v43, %v16497_v62  ;;  %v17132_v62 = vld [vmem:[#allocation5_spill] sm:$0xff] }
  0x2c   :  { %8195 = vmatprep.subr.mxu1 %v641_v44  ;;  %v654_v7 = vsub.f32 %v10538_v41, %v16498_v54  ;;  %420 = vmatmul.mubr.f32.vlgmr.msra.gmra.mxu0 %v419_v20  ;;  %v41_v20 = vld [vmem:[%s16429_s0 + $0x80] sm:$0xff] }
  0x2d   :  { %8196 = vmatpush3.msra.mxu1 %v529_v27  ;;  %17125 = vst [vmem:[#allocation27_spill] sm:$0xff] %v10564_v29  ;;  %v16496_v12 = vand.u32 4294901760, %v10557_v14  ;;  %8210 = vmatpush3.msra.mxu0 %v10112_v23  ;;  %v16495_v44 = vand.u32 4294901760, %v10564_v29  ;;  %v543_v37 = vand.u32 4294901760, %v542_v49 }
  0x2e   :  { %8197 = vmatprep.subr.mxu1 %v648_v56  ;;  %v655_v50 = vand.u32 4294901760, %v654_v7  ;;  %8211 = vmatprep.subr.mxu0 %v10118_v25  ;;  %v10596_v7 = vand.u32 4294901760, %v41_v20 }
  0x2f   :  { %8198 = vmatpush3.msra.mxu1 %v536_v51  ;;  %v661_v2 = vsub.f32 %v10557_v14, %v16496_v12  ;;  %8212 = vmatpush3.msra.mxu0 %v10141_v31  ;;  %v549_v56 = vsub.f32 %v10564_v29, %v16495_v44  ;;  %v10590_v51 = vand.u32 4294901760, %v42_v47  ;;  %v17131_v12 = vld [vmem:[#allocation4_spill] sm:$0xff] }
  0x30   :  { %8199 = vmatprep.subr.mxu1 %v655_v50  ;;  %8213 = vmatprep.subr.mxu0 %v10150_v35  ;;  %v10610_v50 = vsub.f32 %v41_v20, %v10596_v7  ;;  %v17130_v20 = vld [vmem:[#allocation3_spill] sm:$0xff] }
  0x31   :  { %8200 = vmatpush3.msra.mxu1 %v543_v37  ;;  %v662_v27 = vand.u32 4294901760, %v661_v2  ;;  %8214 = vmatpush3.msra.mxu0 %v10166_v40  ;;  %v550_v33 = vand.u32 4294901760, %v549_v56  ;;  %17126 = vst [vmem:[#allocation28_spill] sm:$0xff] %v10590_v51  ;;  %v10603_v49 = vsub.f32 %v42_v47, %v10590_v51  ;;  %v17127_v56 = vld [vmem:[#allocation19_spill] sm:$0xff]  ;;  %v17128_v47 = vld [vmem:[#allocation2_spill] sm:$0xff] }
  0x32   :  { %8215 = vmatprep.subr.mxu0 %v10180_v45  ;;  %v16503_v2 = vand.u32 4294901760, %v10610_v50 }
  0x33   :  { %8201 = vmatprep.subr.mxu1 %v662_v27  ;;  %8216 = vmatpush3.msra.mxu0 %v10215_v59  ;;  %v16499_v37 = vand.u32 4294901760, %v10603_v49 }
  0x34   :  { %8202 = vmatpush3.msra.mxu1 %v550_v33  ;;  %8217 = vmatprep.subr.mxu0 %v10230_v0  ;;  %v17129_v33 = vld [vmem:[#allocation21_spill] sm:$0xff]  ;;  %v433_v44 = vsub.f32 %v10610_v50, %v16503_v2 }
  0x35   :  { %667 = vmatmul.mubr.f32.vlgmr.msra.gmra.mxu1 %v10491_v26  ;;  %8247 = vmatprep.subr.mxu1 %v10052_v3  ;;  %v427_v27 = vsub.f32 %v10603_v49, %v16499_v37  ;;  %v17133_v37 = vld [vmem:[#allocation6_spill] sm:$0xff]  ;;  %v17134_v26 = vld [vmem:[#allocation7_spill] sm:$0xff]  ;;  %v17136_v2 = vld [vmem:[#allocation9_spill] sm:$0xff] }
  0x36   :  { %8218 = vmatpush3.msra.mxu0 %v10244_v8  ;;  %8248 = vmatpush3.msra.mxu1 %v10054_v4 }
  0x37   :  { %8219 = vmatprep.subr.mxu0 %v10258_v42  ;;  %8249 = vmatprep.subr.mxu1 %v10056_v5  ;;  %v428_v54 = vand.u32 4294901760, %v427_v27  ;;  %v17138_v27 = vld [vmem:[#allocation11_spill] sm:$0xff] }
  0x38   :  { %8220 = vmatpush3.msra.mxu0 %v10270_v48  ;;  %8250 = vmatpush3.msra.mxu1 %v10067_v9 }
  0x39   :  { %8221 = vmatprep.subr.mxu0 %v10287_v21  ;;  %8251 = vmatprep.subr.mxu1 %v10069_v10 }
  0x3a   :  { %8222 = vmatpush3.msra.mxu0 %v10299_v6  ;;  %8252 = vmatpush3.msra.mxu1 %v10071_v11 }
  0x3b   :  { %8223 = vmatprep.subr.mxu0 %v10326_v55  ;;  %8253 = vmatprep.subr.mxu1 %v10083_v15 }
  0x3c   :  { %8224 = vmatpush3.msra.mxu0 %v10342_v28  ;;  %8254 = vmatpush3.msra.mxu1 %v10085_v16 }
  0x3d   :  { %8225 = vmatprep.subr.mxu0 %v10366_v34  ;;  %8255 = vmatprep.subr.mxu1 %v10087_v17 }
  0x3e   :  { %8226 = vmatpush3.msra.mxu0 %v10382_v46  ;;  %8256 = vmatpush3.msra.mxu1 %v10109_v22 }
  0x3f   :  { %8227 = vmatprep.subr.mxu0 %v10394_v60  ;;  %8257 = vmatprep.subr.mxu1 %v10115_v24 }
  0x40   :  { %8228 = vmatpush3.msra.mxu0 %v17127_v56  ;;  %8258 = vmatpush3.msra.mxu1 %v17128_v47 }
  0x41   :  { %8229 = vmatprep.subr.mxu0 %v17129_v33  ;;  %8259 = vmatprep.subr.mxu1 %v17130_v20  ;;  %v17135_v20 = vld [vmem:[#allocation8_spill] sm:$0xff] }
  0x42   :  { %8230 = vmatpush3.msra.mxu0 %v10437_v1  ;;  %8260 = vmatpush3.msra.mxu1 %v17131_v12  ;;  %v434_v1 = vand.u32 4294901760, %v433_v44  ;;  %v17140_v44 = vld [vmem:[#allocation13_spill] sm:$0xff] }
  0x43   :  { %8231 = vmatprep.subr.mxu0 %v10462_v53  ;;  %8261 = vmatprep.subr.mxu1 %v17132_v62 }
  0x44   :  { %8232 = vmatpush3.msra.mxu0 %v10476_v36  ;;  %8262 = vmatpush3.msra.mxu1 %v17133_v37  ;;  %v17137_v36 = vld [vmem:[#allocation10_spill] sm:$0xff] }
  0x45   :  { %8233 = vmatprep.subr.mxu0 %v10489_v57  ;;  %8263 = vmatprep.subr.mxu1 %v17134_v26 }
  0x46   :  { %8234 = vmatpush3.msra.mxu0 %v10502_v32  ;;  %8264 = vmatpush3.msra.mxu1 %v17135_v20  ;;  %v17139_v32 = vld [vmem:[#allocation12_spill] sm:$0xff] }
  0x47   :  { %8235 = vmatprep.subr.mxu0 %v10514_v13  ;;  %8265 = vmatprep.subr.mxu1 %v17136_v2 }
  0x48   :  { %429 = vmatprep.mubr.f32.mxu0 %v428_v54  ;;  %8236 = vmatpush3.msra.mxu0 %v10521_v61  ;;  %v17142_v54 = vand.u32 4294901760, %v10112_v23  ;;  %v17149_v23 = vand.u32 4294901760, %v10150_v35  ;;  %v17154_v35 = vand.u32 4294901760, %v10510_v19 }
  0x49   :  { %8266 = vmatpush3.msra.mxu1 %v17137_v36  ;;  %435 = vmatmul.mubr.f32.gmra.mxu0 %v434_v1  ;;  %v17141_v1 = vand.u32 4294901760, %v10090_v18  ;;  %v17148_v18 = vld [vmem:[#allocation20_spill] sm:$0xff] }
  0x4a   :  { %8237 = vmatprep.subr.mxu0 %v10538_v41  ;;  %8267 = vmatprep.subr.mxu1 %v17138_v27 }
  0x4b   :  { %8238 = vmatpush3.msra.mxu0 %v10548_v43  ;;  %8268 = vmatpush3.msra.mxu1 %v17139_v32 }
  0x4c   :  { %8239 = vmatprep.subr.mxu0 %v10557_v14  ;;  %8269 = vmatprep.subr.mxu1 %v17140_v44  ;;  %v17143_v44 = vld [vmem:[#allocation16_spill] sm:$0xff] }
  0x4d   :  { %8240 = vmatpush3.msra.mxu0 %v10564_v29  ;;  %809 = vmatprep.mubr.f32.mxu0 %v10498_v30  ;;  %v17144_v29 = vand.u32 4294901760, %v10118_v25  ;;  %v17150_v25 = vand.u32 4294901760, %v10166_v40  ;;  %v17156_v40 = vand.u32 4294901760, %v10244_v8  ;;  %v17163_v8 = vand.u32 4294901760, %v10326_v55  ;;  %v103_v55 = vld [vmem:[%s16428_s2 + $0x170] sm:$0xff] }
  0x4e   :  { %8270 = vmatpush3.msra.mxu1 %v10338_v63  ;;  %672 = vmatprep.mubr.f32.mxu1 %v10590_v51  ;;  %v17145_v63 = vld [vmem:[#allocation17_spill] sm:$0xff]  ;;  %v17146_v51 = vld [vmem:[#allocation18_spill] sm:$0xff] }
  0x4f   :  { %812 = vmatmul.mubr.f32.vlgmr.msra.gmra.mxu0 %v10510_v19  ;;  %8271 = vmatprep.subr.mxu1 %v10355_v39  ;;  %v17147_v39 = vand.u32 4294901760, %v10141_v31  ;;  %v17152_v31 = vand.u32 4294901760, %v10498_v30  ;;  %v17159_v30 = vand.u32 4294901760, %v10270_v48  ;;  %v17172_v19 = vld [vmem:[#allocation22_spill] sm:$0xff] }
  0x50   :  { %8285 = vmatprep.subr.mxu0 %v17141_v1  ;;  %674 = vmatmul.mubr.f32.gmra.mxu1 %v10596_v7  ;;  %v17155_v1 = vand.u32 4294901760, %v10230_v0  ;;  %v17161_v0 = vand.u32 4294901760, %v10287_v21  ;;  %v17168_v21 = vand.u32 4294901760, %v17127_v56  ;;  %v17175_v56 = vand.u32 4294901760, %v10462_v53 }
  0x51   :  { %8286 = vmatpush3.msra.mxu0 %v17142_v54  ;;  %8272 = vmatpush3.msra.mxu1 %v17143_v44  ;;  %v101_v54 = vld [vmem:[%s16428_s2 + $0x160] sm:$0xff]  ;;  %v17179_v53 = vand.u32 4294901760, %v10489_v57 }
  0x52   :  { %8287 = vmatprep.subr.mxu0 %v17144_v29  ;;  %8273 = vmatprep.subr.mxu1 %v17145_v63  ;;  %v17151_v29 = vand.u32 4294901760, %v10180_v45  ;;  %v17157_v45 = vand.u32 4294901760, %v10258_v42  ;;  %v17165_v42 = vand.u32 4294901760, %v10366_v34  ;;  %v10802_v57 = vand.u32 4294901760, %v101_v54 }
  0x53   :  { %818 = vmatprep.mubr.f32.mxu0 %v10603_v49  ;;  %8274 = vmatpush3.msra.mxu1 %v17146_v51 }
  0x54   :  { %8288 = vmatpush3.msra.mxu0 %v17147_v39  ;;  %8275 = vmatprep.subr.mxu1 %v17148_v18  ;;  %v17153_v39 = vand.u32 4294901760, %v10215_v59  ;;  %v17158_v59 = vand.u32 4294901760, %v10603_v49  ;;  %v17173_v49 = vand.u32 4294901760, %v17172_v19  ;;  %17183 = vst [vmem:[#allocation5_spill] sm:$0xff] %v10802_v57  ;;  %v17198_v19 = vld [vmem:[#allocation24_spill] sm:$0xff] }
  0x55   :  { %821 = vmatmul.mubr.f32.gmra.mxu0 %v10610_v50  ;;  %8289 = vmatprep.subr.mxu0 %v17149_v23 }
  0x56   :  { %8276 = vmatpush3.msra.mxu1 %v10433_v38  ;;  %8290 = vmatpush3.msra.mxu0 %v17150_v25  ;;  %v17177_v25 = vld [vmem:[#allocation23_spill] sm:$0xff] }
  0x57   :  { %8277 = vmatprep.subr.mxu1 %v10450_v52  ;;  %8291 = vmatprep.subr.mxu0 %v17151_v29 }
  0x58   :  { %8278 = vmatpush3.msra.mxu1 %v10472_v58  ;;  %925 = vmatprep.mubr.f32.mxu1 %v17152_v31  ;;  %v100_v31 = vld [vmem:[%s16428_s2 + $0x158] sm:$0xff] }
  0x59   :  { %8292 = vmatpush3.msra.mxu0 %v17153_v39  ;;  %929 = vmatmul.mubr.f32.vlgmr.msra.gmra.mxu1 %v17154_v35 }
  0x5a   :  { %8293 = vmatprep.subr.mxu0 %v17155_v1  ;;  %8323 = vmatprep.subr.mxu1 %v10052_v3  ;;  %v17160_v3 = vand.u32 4294901760, %v10610_v50 }
  0x5b   :  { %8294 = vmatpush3.msra.mxu0 %v17156_v40  ;;  %8324 = vmatpush3.msra.mxu1 %v10054_v4  ;;  %v17162_v4 = vand.u32 4294901760, %v10299_v6  ;;  %v102_v6 = vld [vmem:[%s16428_s2 + $0x168] sm:$0xff]  ;;  %v116_v40 = vld [vmem:[%s16428_s2 + $0x1d8] sm:$0xff] }
  0x5c   :  { %8295 = vmatprep.subr.mxu0 %v17157_v45  ;;  %8325 = vmatprep.subr.mxu1 %v10056_v5  ;;  %v104_v5 = vld [vmem:[%s16428_s2 + $0x178] sm:$0xff] }
  0x5d   :  { %936 = vmatprep.mubr.f32.mxu1 %v17158_v59  ;;  %8296 = vmatpush3.msra.mxu0 %v17159_v30  ;;  %v10727_v48 = vand.u32 4294901760, %v104_v5  ;;  %v17184_v59 = vand.u32 4294901760, %v10514_v13  ;;  %v115_v13 = vld [vmem:[%s16428_s2 + $0x1d0] sm:$0xff] }
  0x5e   :  { %8326 = vmatpush3.msra.mxu1 %v10067_v9  ;;  %8297 = vmatprep.subr.mxu0 %v17161_v0  ;;  %v17164_v9 = vand.u32 4294901760, %v10342_v28  ;;  %v17185_v0 = vand.u32 4294901760, %v10521_v61 }
  0x5f   :  { %940 = vmatmul.mubr.f32.gmra.mxu1 %v17160_v3  ;;  %8327 = vmatprep.subr.mxu1 %v10069_v10  ;;  %v120_v10 = vld [vmem:[%s16428_s2 + $0x1f8] sm:$0xff]  ;;  %v99_v3 = vld [vmem:[%s16428_s2 + $0x150] sm:$0xff] }
  0x60   :  { %8298 = vmatpush3.msra.mxu0 %v17162_v4  ;;  %8328 = vmatpush3.msra.mxu1 %v10071_v11  ;;  %v17166_v11 = vand.u32 4294901760, %v10382_v46  ;;  %v10741_v34 = vand.u32 4294901760, %v120_v10  ;;  %v10760_v46 = vand.u32 4294901760, %v103_v55  ;;  %v10823_v4 = vand.u32 4294901760, %v100_v31 }
  0x61   :  { %8299 = vmatprep.subr.mxu0 %v17163_v8  ;;  %8329 = vmatprep.subr.mxu1 %v10083_v15  ;;  %v119_v15 = vld [vmem:[%s16428_s2 + $0x1f0] sm:$0xff] }
  0x62   :  { %8300 = vmatpush3.msra.mxu0 %v17164_v9  ;;  %8330 = vmatpush3.msra.mxu1 %v10085_v16  ;;  %v17167_v16 = vand.u32 4294901760, %v10394_v60  ;;  %v10756_v60 = vsub.f32 %v104_v5, %v10727_v48  ;;  %v10758_v28 = vand.u32 4294901760, %v119_v15  ;;  %17170 = vst [vmem:[#allocation19_spill] sm:$0xff] %v10760_v46  ;;  %v10779_v23 = vsub.f32 %v120_v10, %v10741_v34  ;;  %v114_v9 = vld [vmem:[%s16428_s2 + $0x1c8] sm:$0xff] }
  0x63   :  { %8301 = vmatprep.subr.mxu0 %v17165_v42  ;;  %8331 = vmatprep.subr.mxu1 %v10087_v17  ;;  %v118_v17 = vld [vmem:[%s16428_s2 + $0x1e8] sm:$0xff]  ;;  %v10788_v29 = vsub.f32 %v103_v55, %v10760_v46  ;;  %17186 = vst [vmem:[#allocation6_spill] sm:$0xff] %v10823_v4  ;;  %v10831_v5 = vand.u32 4294901760, %v116_v40  ;;  %v10850_v10 = vsub.f32 %v101_v54, %v10802_v57  ;;  %v10852_v42 = vand.u32 4294901760, %v99_v3 }
  0x64   :  { %8302 = vmatpush3.msra.mxu0 %v17166_v11  ;;  %8332 = vmatpush3.msra.mxu1 %v10109_v22  ;;  %v17169_v22 = vand.u32 4294901760, %v17129_v33  ;;  %v10765_v50 = vand.u32 4294901760, %v118_v17  ;;  %v117_v33 = vld [vmem:[%s16428_s2 + $0x1e0] sm:$0xff]  ;;  %v16515_v39 = vand.u32 4294901760, %v10756_v60  ;;  %v10795_v35 = vsub.f32 %v119_v15, %v10758_v28 }
  0x65   :  { %8303 = vmatprep.subr.mxu0 %v17167_v16  ;;  %8333 = vmatprep.subr.mxu1 %v10115_v24  ;;  %v17171_v24 = vld [vmem:[#allocation3_spill] sm:$0xff]  ;;  %v16517_v30 = vand.u32 4294901760, %v10779_v23  ;;  %17188 = vst [vmem:[#allocation7_spill] sm:$0xff] %v10831_v5  ;;  %v16513_v8 = vand.u32 4294901760, %v10788_v29  ;;  %17190 = vst [vmem:[#allocation8_spill] sm:$0xff] %v10852_v42  ;;  %v17191_v55 = vand.u32 4294901760, %v10557_v14 }
  0x66   :  { %8304 = vmatpush3.msra.mxu0 %v17168_v21  ;;  %8334 = vmatpush3.msra.mxu1 %v17128_v47  ;;  %17174 = vst [vmem:[#allocation2_spill] sm:$0xff] %v10765_v50  ;;  %v10770_v47 = vand.u32 4294901760, %v102_v6  ;;  %v10808_v45 = vsub.f32 %v118_v17, %v10765_v50  ;;  %v16514_v61 = vand.u32 4294901760, %v10795_v35  ;;  %v17193_v17 = vld [vmem:[#allocation13_spill] sm:$0xff]  ;;  %v17194_v21 = vld [vmem:[#allocation27_spill] sm:$0xff] }
  0x67   :  { %8305 = vmatprep.subr.mxu0 %v17169_v22  ;;  %8335 = vmatprep.subr.mxu1 %v17171_v24  ;;  %v10873_v22 = vsub.f32 %v100_v31, %v10823_v4  ;;  %v113_v24 = vld [vmem:[%s16428_s2 + $0x1c0] sm:$0xff]  ;;  %v10893_v54 = vsub.f32 %v10788_v29, %v16513_v8  ;;  %v17200_v31 = vld [vmem:[#allocation25_spill] sm:$0xff] }
  0x68   :  { %8306 = vmatpush3.msra.mxu0 %v17173_v49  ;;  %8336 = vmatpush3.msra.mxu1 %v17131_v12  ;;  %17176 = vst [vmem:[#allocation21_spill] sm:$0xff] %v10770_v47  ;;  %v17178_v12 = vand.u32 4294901760, %v17177_v25  ;;  %v16512_v11 = vand.u32 4294901760, %v10808_v45  ;;  %v17199_v49 = vld [vmem:[#allocation14_spill] sm:$0xff] }
  0x69   :  { %8307 = vmatprep.subr.mxu0 %v17175_v56  ;;  %8337 = vmatprep.subr.mxu1 %v17132_v62  ;;  %v17180_v62 = vld [vmem:[#allocation26_spill] sm:$0xff] }
  0x6a   :  { %8308 = vmatpush3.msra.mxu0 %v17178_v12  ;;  %8338 = vmatpush3.msra.mxu1 %v17133_v37  ;;  %v17181_v1 = vand.u32 4294901760, %v17180_v62  ;;  %v10800_v37 = vand.u32 4294901760, %v117_v33  ;;  %v97_v25 = vld [vmem:[%s16428_s2 + $0x140] sm:$0xff]  ;;  %v10899_v12 = vsub.f32 %v116_v40, %v10831_v5  ;;  %v17201_v62 = vld [vmem:[#allocation15_spill] sm:$0xff]  ;;  %v16518_v40 = vand.u32 4294901760, %v10850_v10 }
  0x6b   :  { %8309 = vmatprep.subr.mxu0 %v17179_v53  ;;  %8339 = vmatprep.subr.mxu1 %v17134_v26  ;;  %v10814_v26 = vsub.f32 %v102_v6, %v10770_v47  ;;  %v17195_v6 = vand.u32 4294901760, %v17194_v21  ;;  %v96_v53 = vld [vmem:[%s16428_s2 + $0x138] sm:$0xff]  ;;  %v10937_v21 = vand.u32 4294901760, %v97_v25 }
  0x6c   :  { %8310 = vmatpush3.msra.mxu0 %v17181_v1  ;;  %17182 = vst [vmem:[#allocation4_spill] sm:$0xff] %v10800_v37  ;;  %8340 = vmatpush3.msra.mxu1 %v17135_v20  ;;  %v17187_v20 = vand.u32 4294901760, %v10538_v41  ;;  %v17189_v41 = vand.u32 4294901760, %v10548_v43  ;;  %v10856_v15 = vsub.f32 %v117_v33, %v10800_v37  ;;  %v10864_v43 = vsub.f32 %v10779_v23, %v16517_v30 }
  0x6d   :  { %8311 = vmatprep.subr.mxu0 %v17184_v59  ;;  %8341 = vmatprep.subr.mxu1 %v17136_v2  ;;  %v10836_v2 = vsub.f32 %v10756_v60, %v16515_v39  ;;  %v16511_v16 = vand.u32 4294901760, %v10814_v26  ;;  %v10888_v33 = vsub.f32 %v10795_v35, %v16514_v61  ;;  %v10907_v1 = vsub.f32 %v99_v3, %v10852_v42 }
  0x6e   :  { %8312 = vmatpush3.msra.mxu0 %v17185_v0  ;;  %8342 = vmatpush3.msra.mxu1 %v17137_v36  ;;  %v98_v36 = vld [vmem:[%s16428_s2 + $0x148] sm:$0xff]  ;;  %v10912_v59 = vsub.f32 %v10808_v45, %v16512_v11  ;;  %v16516_v0 = vand.u32 4294901760, %v10856_v15  ;;  %17205 = vst [vmem:[#allocation18_spill] sm:$0xff] %v10937_v21  ;;  %v16520_v11 = vand.u32 4294901760, %v10899_v12  ;;  %v10961_v61 = vsub.f32 %v10850_v10, %v16518_v40 }
  0x6f   :  { %8313 = vmatprep.subr.mxu0 %v17187_v20  ;;  %8343 = vmatprep.subr.mxu1 %v17138_v27  ;;  %v10866_v27 = vand.u32 4294901760, %v115_v13  ;;  %v10877_v14 = vand.u32 4294901760, %v98_v36  ;;  %17202 = vst [vmem:[#allocation12_spill] sm:$0xff] %v10907_v1  ;;  %v10922_v3 = vsub.f32 %v10814_v26, %v16511_v16  ;;  %v94_v16 = vld [vmem:[%s16428_s2 + $0x128] sm:$0xff]  ;;  %v11040_v20 = vld [vmem:[%s16428_s2 + $0x1a0] sm:$0xff] }
  0x70   :  { %8314 = vmatpush3.msra.mxu0 %v17189_v41  ;;  %8344 = vmatpush3.msra.mxu1 %v17139_v32  ;;  %v10875_v32 = vand.u32 4294901760, %v114_v9  ;;  %v10924_v41 = vand.u32 4294901760, %v113_v24  ;;  %v10956_v8 = vsub.f32 %v10856_v15, %v16516_v0  ;;  %v11023_v40 = vand.u32 4294901760, %v94_v16 }
  0x71   :  { %8315 = vmatprep.subr.mxu0 %v17191_v55  ;;  %17192 = vst [vmem:[#allocation9_spill] sm:$0xff] %v10866_v27  ;;  %8345 = vmatprep.subr.mxu1 %v17193_v17  ;;  %17197 = vst [vmem:[#allocation11_spill] sm:$0xff] %v10877_v14  ;;  %v112_v55 = vld [vmem:[%s16428_s2 + $0x1b8] sm:$0xff]  ;;  %v10930_v17 = vsub.f32 %v115_v13, %v10866_v27 }
  0x72   :  { %8316 = vmatpush3.msra.mxu0 %v17195_v6  ;;  %17196 = vst [vmem:[#allocation10_spill] sm:$0xff] %v10875_v32  ;;  %1106 = vmatprep.mubr.f32.mxu0 %v17198_v19  ;;  %17203 = vst [vmem:[#allocation16_spill] sm:$0xff] %v10924_v41  ;;  %v10939_v6 = vand.u32 4294901760, %v96_v53  ;;  %v10963_v39 = vand.u32 4294901760, %v112_v55  ;;  %v10985_v13 = vsub.f32 %v113_v24, %v10924_v41 }
  0x73   :  { %8346 = vmatpush3.msra.mxu1 %v17199_v49  ;;  %1108 = vmatmul.mubr.f32.vlgmr.msra.gmra.mxu0 %v17200_v31  ;;  %v16519_v49 = vand.u32 4294901760, %v10873_v22  ;;  %v16523_v30 = vand.u32 4294901760, %v10930_v17  ;;  %17215 = vst [vmem:[#allocation14_spill] sm:$0xff] %v11023_v40 }
  0x74   :  { %8347 = vmatprep.subr.mxu1 %v17201_v62  ;;  %8361 = vmatprep.subr.mxu0 %v10741_v34  ;;  %17206 = vst [vmem:[#allocation20_spill] sm:$0xff] %v10939_v6  ;;  %v17207_v62 = vld [vmem:[#allocation28_spill] sm:$0xff]  ;;  %17209 = vst [vmem:[#allocation22_spill] sm:$0xff] %v10963_v39  ;;  %v10993_v0 = vsub.f32 %v96_v53, %v10939_v6 }
  0x75   :  { %8348 = vmatpush3.msra.mxu1 %v17143_v44  ;;  %8362 = vmatpush3.msra.mxu0 %v10727_v48  ;;  %v10935_v44 = vsub.f32 %v98_v36, %v10877_v14  ;;  %v10979_v36 = vld [vmem:[%s16428_s2 + $0x1a8] sm:$0xff]  ;;  %17210 = vst [vmem:[#allocation23_spill] sm:$0xff] %v10985_v13  ;;  %v10998_v56 = vsub.f32 %v10873_v22, %v16519_v49  ;;  %v93_v49 = vld [vmem:[%s16428_s2 + $0x120] sm:$0xff] }
  0x76   :  { %8349 = vmatprep.subr.mxu1 %v17145_v63  ;;  %8363 = vmatprep.subr.mxu0 %v10758_v28  ;;  %v10948_v63 = vsub.f32 %v114_v9, %v10875_v32  ;;  %v95_v9 = vld [vmem:[%s16428_s2 + $0x130] sm:$0xff]  ;;  %17212 = vst [vmem:[#allocation13_spill] sm:$0xff] %v10993_v0  ;;  %v11030_v53 = vsub.f32 %v10930_v17, %v16523_v30  ;;  %v92_v30 = vld [vmem:[%s16428_s2 + $0x118] sm:$0xff] }
  0x77   :  { %17204 = vst [vmem:[#allocation17_spill] sm:$0xff] %v10935_v44  ;;  %1113 = vmatprep.mubr.f32.mxu0 %v17207_v62  ;;  %8350 = vmatpush3.msra.mxu1 %v17146_v51  ;;  %v111_v51 = vld [vmem:[%s16428_s2 + $0x1b0] sm:$0xff] }
  0x78   :  { %17208 = vst [vmem:[#allocation3_spill] sm:$0xff] %v10948_v63  ;;  %8364 = vmatpush3.msra.mxu0 %v10760_v46  ;;  %8351 = vmatprep.subr.mxu1 %v17148_v18  ;;  %v10990_v18 = vsub.f32 %v97_v25, %v10937_v21  ;;  %v11008_v24 = vand.u32 4294901760, %v111_v51  ;;  %v11010_v25 = vand.u32 4294901760, %v95_v9 }
  0x79   :  { %1115 = vmatmul.mubr.f32.gmra.mxu0 %v10596_v7  ;;  %8365 = vmatprep.subr.mxu0 %v10765_v50  ;;  %v11057_v50 = vand.u32 4294901760, %v93_v49 }
  0x7a   :  { %8352 = vmatpush3.msra.mxu1 %v10433_v38  ;;  %17211 = vst [vmem:[#allocation26_spill] sm:$0xff] %v10990_v18  ;;  %8366 = vmatpush3.msra.mxu0 %v10770_v47  ;;  %v11006_v38 = vsub.f32 %v10899_v12, %v16520_v11  ;;  %17213 = vst [vmem:[#allocation27_spill] sm:$0xff] %v11010_v25  ;;  %v11021_v11 = vand.u32 4294901760, %v10979_v36 }
  0x7b   :  { %8353 = vmatprep.subr.mxu1 %v10450_v52  ;;  %8367 = vmatprep.subr.mxu0 %v10800_v37  ;;  %17219 = vst [vmem:[#allocation15_spill] sm:$0xff] %v11057_v50  ;;  %v17220_v37 = vand.u32 4294901760, %v10864_v43  ;;  %v91_v43 = vld [vmem:[%s16428_s2 + $0x110] sm:$0xff] }
  0x7c   :  { %8354 = vmatpush3.msra.mxu1 %v10472_v58  ;;  %17214 = vst [vmem:[#allocation24_spill] sm:$0xff] %v11021_v11  ;;  %1217 = vmatprep.mubr.f32.mxu1 %v17198_v19  ;;  %v17216_v58 = vand.u32 4294901760, %v10907_v1  ;;  %v11044_v19 = vsub.f32 %v112_v55, %v10963_v39  ;;  %v11090_v55 = vsub.f32 %v111_v51, %v11008_v24  ;;  %v17225_v51 = vand.u32 4294901760, %v10985_v13 }
  0x7d   :  { %8368 = vmatpush3.msra.mxu0 %v10802_v57  ;;  %1219 = vmatmul.mubr.f32.vlgmr.msra.gmra.mxu1 %v17200_v31  ;;  %v17218_v57 = vand.u32 4294901760, %v10935_v44  ;;  %v1503_v31 = vand.u32 4294901760, %v11006_v38  ;;  %v11085_v38 = vand.u32 4294901760, %v11040_v20 }
  0x7e   :  { %v11035_v52 = vsub.f32 %v10907_v1, %v17216_v58  ;;  %17217 = vst [vmem:[#allocation25_spill] sm:$0xff] %v11044_v19  ;;  %8369 = vmatprep.subr.mxu0 %v10831_v5  ;;  %8399 = vmatprep.subr.mxu1 %v17220_v37  ;;  %v11065_v5 = vsub.f32 %v95_v9, %v11010_v25  ;;  %v17221_v58 = vand.u32 4294901760, %v10948_v63  ;;  %v17222_v37 = vand.u32 4294901760, %v10836_v2  ;;  %v28_v2 = vld [vmem:[%s16429_s0 + $0x18] sm:$0xff] }
  0x7f   :  { %v11055_v47 = vsub.f32 %v10935_v44, %v17218_v57  ;;  %8370 = vmatpush3.msra.mxu0 %v10823_v4  ;;  %v11075_v57 = vld [vmem:[%s16428_s2 + $0x198] sm:$0xff]  ;;  %v11082_v9 = vsub.f32 %v94_v16, %v11023_v40  ;;  %17223 = vst [vmem:[#allocation28_spill] sm:$0xff] %v11090_v55  ;;  %1224 = vmatprep.mubr.f32.mxu1 %v17207_v62  ;;  %v1510_v16 = vand.u32 4294901760, %v11030_v53  ;;  %v107_v44 = vld [vmem:[%s16428_s2 + $0x190] sm:$0xff]  ;;  %v11143_v62 = vld [vmem:[%s16428_s2 + $0x188] sm:$0xff]  ;;  %v17237_v1 = vand.u32 4294901760, %v10956_v8 }
  0x80   :  { %v11070_v46 = vsub.f32 %v10948_v63, %v17221_v58  ;;  %8400 = vmatpush3.msra.mxu1 %v17222_v37  ;;  %8371 = vmatprep.subr.mxu0 %v10866_v27  ;;  %v11087_v58 = vand.u32 4294901760, %v92_v30  ;;  %v17224_v37 = vand.u32 4294901760, %v10888_v33  ;;  %v11106_v4 = vsub.f32 %v10985_v13, %v17225_v51  ;;  %v27_v63 = vld [vmem:[%s16429_s0 + $0x10] sm:$0xff]  ;;  %v44_v13 = vld [vmem:[%s16429_s0 + $0x98] sm:$0xff] }
  0x81   :  { %8372 = vmatpush3.msra.mxu0 %v10852_v42  ;;  %v17226_v33 = vand.u32 4294901760, %v10893_v54  ;;  %v11117_v53 = vsub.f32 %v93_v49, %v11057_v50  ;;  %v11125_v27 = vand.u32 4294901760, %v11075_v57  ;;  %1226 = vmatmul.mubr.f32.gmra.mxu1 %v10596_v7  ;;  %v17230_v49 = vand.u32 4294901760, %v10993_v0  ;;  %v90_v7 = vld [vmem:[%s16428_s2 + $0x108] sm:$0xff] }
  0x82   :  { %8401 = vmatprep.subr.mxu1 %v17224_v37  ;;  %v17228_v37 = vand.u32 4294901760, %v10990_v18  ;;  %8373 = vmatprep.subr.mxu0 %v10875_v32  ;;  %v1517_v54 = vand.u32 4294901760, %v11070_v46  ;;  %v11148_v42 = vand.u32 4294901760, %v28_v2  ;;  %v17232_v46 = vand.u32 4294901760, %v10912_v59 }
  0x83   :  { %8402 = vmatpush3.msra.mxu1 %v17226_v33  ;;  %17227 = vst [vmem:[#allocation29_spill] sm:$0xff] %v11117_v53  ;;  %17229 = vst [vmem:[#allocation30_spill] sm:$0xff] %v11125_v27  ;;  %v11136_v33 = vsub.f32 %v10993_v0, %v17230_v49  ;;  %8374 = vmatpush3.msra.mxu0 %v10877_v14  ;;  %v11154_v49 = vsub.f32 %v92_v30, %v11087_v58  ;;  %v17234_v59 = vand.u32 4294901760, %v10922_v3  ;;  %v43_v14 = vld [vmem:[%s16429_s0 + $0x90] sm:$0xff] }
  0x84   :  { %v11122_v51 = vsub.f32 %v10990_v18, %v17228_v37  ;;  %v11138_v37 = vand.u32 4294901760, %v91_v43  ;;  %17231 = vst [vmem:[#allocation31_spill] sm:$0xff] %v11148_v42  ;;  %8403 = vmatprep.subr.mxu1 %v17232_v46  ;;  %v11159_v0 = vsub.f32 %v10979_v36, %v11021_v11  ;;  %v11161_v18 = vand.u32 4294901760, %v27_v63  ;;  %8375 = vmatprep.subr.mxu0 %v10924_v41 }
  0x85   :  { %8404 = vmatpush3.msra.mxu1 %v17234_v59  ;;  %v1524_v30 = vand.u32 4294901760, %v11106_v4  ;;  %v17235_v46 = vand.u32 4294901760, %v11044_v19  ;;  %v11175_v36 = vand.u32 4294901760, %v107_v44  ;;  %8376 = vmatpush3.msra.mxu0 %v10937_v21  ;;  %v11183_v59 = vand.u32 4294901760, %v11143_v62  ;;  %v89_v21 = vld [vmem:[%s16428_s2 + $0x100] sm:$0xff] }
  0x86   :  { %17233 = vst [vmem:[#allocation32_spill] sm:$0xff] %v11161_v18  ;;  %8405 = vmatprep.subr.mxu1 %v17237_v1  ;;  %v1412_v3 = vand.u32 4294901760, %v11122_v51  ;;  %v11185_v4 = vand.u32 4294901760, %v90_v7  ;;  %v17238_v8 = vand.u32 4294901760, %v10961_v61  ;;  %8377 = vmatprep.subr.mxu0 %v10963_v39  ;;  %v1419_v1 = vand.u32 4294901760, %v11136_v33 }
  0x87   :  { %v11173_v32 = vsub.f32 %v11044_v19, %v17235_v46  ;;  %17236 = vst [vmem:[#allocation33_spill] sm:$0xff] %v11175_v36  ;;  %v11189_v46 = vsub.f32 %v11040_v20, %v11085_v38  ;;  %v11199_v51 = vsub.f32 %v91_v43, %v11138_v37  ;;  %v11205_v20 = vsub.f32 %v28_v2, %v11148_v42  ;;  %v105_v43 = vld [vmem:[%s16428_s2 + $0x180] sm:$0xff] }
  0x88   :  { %8406 = vmatpush3.msra.mxu1 %v17238_v8  ;;  %v11207_v41 = vand.u32 4294901760, %v44_v13  ;;  %8378 = vmatpush3.msra.mxu0 %v10939_v6  ;;  %v17240_v61 = vand.u32 4294901760, %v11090_v55  ;;  %v11218_v39 = vsub.f32 %v27_v63, %v11161_v18  ;;  %v11222_v2 = vsub.f32 %v11075_v57, %v11125_v27 }
  0x89   :  { %8407 = vmatprep.subr.mxu1 %v1503_v31  ;;  %v17241_v31 = vand.u32 4294901760, %v10998_v56  ;;  %8379 = vmatprep.subr.mxu0 %v11008_v24  ;;  %v17242_v33 = vand.u32 4294901760, %v11065_v5  ;;  %v11232_v19 = vand.u32 4294901760, %v43_v14  ;;  %v11236_v63 = vsub.f32 %v90_v7, %v11185_v4 }
  0x8a   :  { %17239 = vst [vmem:[#allocation34_spill] sm:$0xff] %v11207_v41  ;;  %v1537_v8 = vsub.f32 %v11090_v55, %v17240_v61  ;;  %v1531_v61 = vand.u32 4294901760, %v11173_v32  ;;  %8380 = vmatpush3.msra.mxu0 %v11010_v25  ;;  %v11239_v57 = vand.u32 4294901760, %v89_v21  ;;  %v11242_v32 = vsub.f32 %v107_v44, %v11175_v36  ;;  %1583 = vmatprep.mubr.f32.mxu1 %v11148_v42  ;;  %v17287_v42 = vld [vmem:[#allocation27_spill] sm:$0xff] }
  0x8b   :  { %8408 = vmatpush3.msra.mxu1 %v17241_v31  ;;  %v1425_v6 = vsub.f32 %v11065_v5, %v17242_v33  ;;  %17243 = vst [vmem:[#allocation35_spill] sm:$0xff] %v11232_v19  ;;  %v17245_v31 = vand.u32 4294901760, %v11035_v52  ;;  %8381 = vmatprep.subr.mxu0 %v11021_v11  ;;  %v11247_v33 = vand.u32 4294901760, %v105_v43  ;;  %v11252_v7 = vsub.f32 %v44_v13, %v11207_v41 }
  0x8c   :  { %8409 = vmatprep.subr.mxu1 %v1510_v16  ;;  %17244 = vst [vmem:[#allocation36_spill] sm:$0xff] %v11239_v57  ;;  %v16572_v16 = vand.u32 4294901760, %v11205_v20  ;;  %8382 = vmatpush3.msra.mxu0 %v11023_v40  ;;  %v1538_v56 = vand.u32 4294901760, %v1537_v8  ;;  %v17246_v44 = vand.u32 4294901760, %v11159_v0  ;;  %v17247_v25 = vand.u32 4294901760, %v11055_v47 }
  0x8d   :  { %8410 = vmatpush3.msra.mxu1 %v17245_v31  ;;  %8383 = vmatprep.subr.mxu0 %v11085_v38  ;;  %v17248_v13 = vand.u32 4294901760, %v11082_v9  ;;  %v11268_v8 = vsub.f32 %v43_v14, %v11232_v19  ;;  %v1426_v47 = vand.u32 4294901760, %v1425_v6  ;;  %v11279_v31 = vsub.f32 %v89_v21, %v11239_v57 }
  0x8e   :  { %8411 = vmatprep.subr.mxu1 %v1517_v54  ;;  %v1544_v52 = vsub.f32 %v11159_v0, %v17246_v44  ;;  %v11272_v44 = vsub.f32 %v11143_v62, %v11183_v59  ;;  %8384 = vmatpush3.msra.mxu0 %v11057_v50  ;;  %v1330_v14 = vsub.f32 %v11205_v20, %v16572_v16  ;;  %v17251_v62 = vand.u32 4294901760, %v11117_v53 }
  0x8f   :  { %8412 = vmatpush3.msra.mxu1 %v17247_v25  ;;  %v1432_v54 = vsub.f32 %v11082_v9, %v17248_v13  ;;  %v17249_v25 = vand.u32 4294901760, %v11189_v46  ;;  %17250 = vst [vmem:[#allocation37_spill] sm:$0xff] %v11279_v31  ;;  %8385 = vmatprep.subr.mxu0 %v11125_v27  ;;  %v17254_v55 = vand.u32 4294901760, %v11222_v2 }
  0x90   :  { %8413 = vmatprep.subr.mxu1 %v1524_v30  ;;  %v1439_v6 = vsub.f32 %v11117_v53, %v17251_v62  ;;  %8386 = vmatpush3.msra.mxu0 %v11087_v58  ;;  %v1545_v21 = vand.u32 4294901760, %v1544_v52 }
  0x91   :  { %v1551_v11 = vsub.f32 %v11189_v46, %v17249_v25  ;;  %8414 = vmatpush3.msra.mxu1 %v1412_v3  ;;  %v11291_v25 = vsub.f32 %v105_v43, %v11247_v33  ;;  %v17253_v3 = vand.u32 4294901760, %v11218_v39  ;;  %v1558_v16 = vsub.f32 %v11222_v2, %v17254_v55  ;;  %8387 = vmatprep.subr.mxu0 %v11175_v36 }
  0x92   :  { %8415 = vmatprep.subr.mxu1 %v1531_v61  ;;  %v1433_v62 = vand.u32 4294901760, %v1432_v54  ;;  %v17255_v43 = vand.u32 4294901760, %v11154_v49  ;;  %8388 = vmatpush3.msra.mxu0 %v11138_v37  ;;  %v17256_v55 = vand.u32 4294901760, %v11242_v32  ;;  %v1331_v54 = vand.u32 4294901760, %v1330_v14 }
  0x93   :  { %17252 = vst [vmem:[#allocation38_spill] sm:$0xff] %v11291_v25  ;;  %v1336_v13 = vsub.f32 %v11218_v39, %v17253_v3  ;;  %8416 = vmatpush3.msra.mxu1 %v1419_v1  ;;  %v1552_v3 = vand.u32 4294901760, %v1551_v11  ;;  %8389 = vmatprep.subr.mxu0 %v11183_v59  ;;  %v1440_v36 = vand.u32 4294901760, %v1439_v6  ;;  %v1559_v30 = vand.u32 4294901760, %v1558_v16 }
  0x94   :  { %v1446_v61 = vsub.f32 %v11154_v49, %v17255_v43  ;;  %8417 = vmatprep.subr.mxu1 %v1538_v56  ;;  %v1565_v27 = vsub.f32 %v11242_v32, %v17256_v55  ;;  %v17257_v43 = vand.u32 4294901760, %v11252_v7  ;;  %8390 = vmatpush3.msra.mxu0 %v11185_v4  ;;  %v17258_v55 = vand.u32 4294901760, %v11199_v51 }
  0x95   :  { %8418 = vmatpush3.msra.mxu1 %v1426_v47  ;;  %v1337_v11 = vand.u32 4294901760, %v1336_v13  ;;  %8391 = vmatprep.subr.mxu0 %v11247_v33  ;;  %v17259_v6 = vand.u32 4294901760, %v11268_v8  ;;  %v17261_v13 = vand.u32 4294901760, %v11236_v63 }
  0x96   :  { %v1345_v52 = vsub.f32 %v11252_v7, %v17257_v43  ;;  %8419 = vmatprep.subr.mxu1 %v1545_v21  ;;  %v1453_v1 = vsub.f32 %v11199_v51, %v17258_v55  ;;  %v1447_v14 = vand.u32 4294901760, %v1446_v61  ;;  %v17260_v21 = vand.u32 4294901760, %v11272_v44  ;;  %8392 = vmatpush3.msra.mxu0 %v11239_v57 }
  0x97   :  { %8420 = vmatpush3.msra.mxu1 %v1433_v62  ;;  %v1351_v43 = vsub.f32 %v11268_v8, %v17259_v6  ;;  %v1566_v16 = vand.u32 4294901760, %v1565_v27  ;;  %v1460_v55 = vsub.f32 %v11236_v63, %v17261_v13  ;;  %1332 = vmatprep.mubr.f32.mxu0 %v1331_v54  ;;  %v17262_v61 = vand.u32 4294901760, %v11291_v25  ;;  %v17266_v54 = vld [vmem:[#allocation3_spill] sm:$0xff]  ;;  %v17273_v13 = vld [vmem:[#allocation5_spill] sm:$0xff] }
  0x98   :  { %v1572_v56 = vsub.f32 %v11272_v44, %v17260_v21  ;;  %8421 = vmatprep.subr.mxu1 %v1552_v3  ;;  %v1346_v62 = vand.u32 4294901760, %v1345_v52  ;;  %1338 = vmatmul.mubr.f32.vlgmr.msra.gmra.mxu0 %v1337_v11  ;;  %v1454_v6 = vand.u32 4294901760, %v1453_v1  ;;  %v17263_v21 = vand.u32 4294901760, %v11279_v31  ;;  %v17265_v1 = vld [vmem:[#allocation19_spill] sm:$0xff]  ;;  %v17268_v11 = vld [vmem:[#allocation17_spill] sm:$0xff] }
  0x99   :  { %8422 = vmatpush3.msra.mxu1 %v1440_v36  ;;  %v1579_v47 = vsub.f32 %v11291_v25, %v17262_v61  ;;  %8437 = vmatprep.subr.mxu0 %v10779_v23  ;;  %v1352_v27 = vand.u32 4294901760, %v1351_v43  ;;  %v1461_v36 = vand.u32 4294901760, %v1460_v55  ;;  %v17271_v43 = vld [vmem:[#allocation4_spill] sm:$0xff]  ;;  %v17274_v55 = vld [vmem:[#allocation25_spill] sm:$0xff] }
  0x9a   :  { %8423 = vmatprep.subr.mxu1 %v1559_v30  ;;  %v1467_v3 = vsub.f32 %v11279_v31, %v17263_v21  ;;  %v1573_v57 = vand.u32 4294901760, %v1572_v56  ;;  %8438 = vmatpush3.msra.mxu0 %v10756_v60  ;;  %v17267_v56 = vld [vmem:[#allocation2_spill] sm:$0xff]  ;;  %v17276_v61 = vld [vmem:[#allocation13_spill] sm:$0xff]  ;;  %v17278_v21 = vld [vmem:[#allocation28_spill] sm:$0xff] }
  0x9b   :  { %8424 = vmatpush3.msra.mxu1 %v1447_v14  ;;  %8439 = vmatprep.subr.mxu0 %v10795_v35  ;;  %v1580_v52 = vand.u32 4294901760, %v1579_v47  ;;  %v17269_v47 = vld [vmem:[#allocation21_spill] sm:$0xff]  ;;  %v17270_v14 = vld [vmem:[#allocation23_spill] sm:$0xff] }
  0x9c   :  { %8425 = vmatprep.subr.mxu1 %v1566_v16  ;;  %1347 = vmatprep.mubr.f32.mxu0 %v1346_v62  ;;  %v1468_v30 = vand.u32 4294901760, %v1467_v3  ;;  %v17272_v16 = vld [vmem:[#allocation26_spill] sm:$0xff]  ;;  %v17275_v62 = vld [vmem:[#allocation7_spill] sm:$0xff]  ;;  %v17279_v3 = vld [vmem:[#allocation9_spill] sm:$0xff] }
  0x9d   :  { %8426 = vmatpush3.msra.mxu1 %v1454_v6  ;;  %8440 = vmatpush3.msra.mxu0 %v10788_v29  ;;  %v17277_v6 = vld [vmem:[#allocation6_spill] sm:$0xff] }
  0x9e   :  { %1353 = vmatmul.mubr.f32.gmra.mxu0 %v1352_v27  ;;  %8427 = vmatprep.subr.mxu1 %v1573_v57  ;;  %v17264_v57 = vld [vmem:[#allocation12_spill] sm:$0xff] }
  0x9f   :  { %8441 = vmatprep.subr.mxu0 %v10808_v45  ;;  %8428 = vmatpush3.msra.mxu1 %v1461_v36  ;;  %v17280_v27 = vld [vmem:[#allocation8_spill] sm:$0xff]  ;;  %v17281_v36 = vld [vmem:[#allocation10_spill] sm:$0xff] }
  0xa0   :  { %8442 = vmatpush3.msra.mxu0 %v10814_v26  ;;  %8429 = vmatprep.subr.mxu1 %v1580_v52  ;;  %v17282_v52 = vld [vmem:[#allocation11_spill] sm:$0xff] }
  0xa1   :  { %8443 = vmatprep.subr.mxu0 %v10856_v15  ;;  %8430 = vmatpush3.msra.mxu1 %v1468_v30  ;;  %v17283_v30 = vld [vmem:[#allocation16_spill] sm:$0xff] }
  0xa2   :  { %8444 = vmatpush3.msra.mxu0 %v10850_v10  ;;  %1585 = vmatmul.mubr.f32.vlgmr.msra.gmra.mxu1 %v11161_v18  ;;  %v17286_v18 = vld [vmem:[#allocation20_spill] sm:$0xff] }
  0xa3   :  { %8445 = vmatprep.subr.mxu0 %v10899_v12  ;;  %8475 = vmatprep.subr.mxu1 %v10741_v34 }
  0xa4   :  { %8446 = vmatpush3.msra.mxu0 %v10873_v22  ;;  %8476 = vmatpush3.msra.mxu1 %v10727_v48 }
  0xa5   :  { %8447 = vmatprep.subr.mxu0 %v10930_v17  ;;  %8477 = vmatprep.subr.mxu1 %v10758_v28 }
  0xa6   :  { %1590 = vmatprep.mubr.f32.mxu1 %v11207_v41  ;;  %8448 = vmatpush3.msra.mxu0 %v17264_v57  ;;  %v17285_v41 = vld [vmem:[#allocation22_spill] sm:$0xff] }
  0xa7   :  { %8478 = vmatpush3.msra.mxu1 %v17265_v1  ;;  %8449 = vmatprep.subr.mxu0 %v17266_v54 }
  0xa8   :  { %1592 = vmatmul.mubr.f32.gmra.mxu1 %v11232_v19  ;;  %8479 = vmatprep.subr.mxu1 %v17267_v56  ;;  %v17284_v19 = vld [vmem:[#allocation18_spill] sm:$0xff] }
  0xa9   :  { %8450 = vmatpush3.msra.mxu0 %v17268_v11  ;;  %8480 = vmatpush3.msra.mxu1 %v17269_v47 }
  0xaa   :  { %8451 = vmatprep.subr.mxu0 %v17270_v14  ;;  %8481 = vmatprep.subr.mxu1 %v17271_v43 }
  0xab   :  { %8452 = vmatpush3.msra.mxu0 %v17272_v16  ;;  %8482 = vmatpush3.msra.mxu1 %v17273_v13 }
  0xac   :  { %8453 = vmatprep.subr.mxu0 %v17274_v55  ;;  %8483 = vmatprep.subr.mxu1 %v17275_v62 }
  0xad   :  { %8454 = vmatpush3.msra.mxu0 %v17276_v61  ;;  %8484 = vmatpush3.msra.mxu1 %v17277_v6 }
  0xae   :  { %8455 = vmatprep.subr.mxu0 %v17278_v21  ;;  %8485 = vmatprep.subr.mxu1 %v17279_v3 }
  0xaf   :  { %8456 = vmatpush3.msra.mxu0 %v11065_v5  ;;  %8486 = vmatpush3.msra.mxu1 %v17280_v27 }
  0xb0   :  { %8457 = vmatprep.subr.mxu0 %v11159_v0  ;;  %8487 = vmatprep.subr.mxu1 %v17281_v36 }
  0xb1   :  { %8458 = vmatpush3.msra.mxu0 %v11082_v9  ;;  %8488 = vmatpush3.msra.mxu1 %v17282_v52 }
  0xb2   :  { %8459 = vmatprep.subr.mxu0 %v11189_v46  ;;  %8489 = vmatprep.subr.mxu1 %v17283_v30 }
  0xb3   :  { %8460 = vmatpush3.msra.mxu0 %v11117_v53  ;;  %8490 = vmatpush3.msra.mxu1 %v17284_v19  ;;  %v17288_v53 = vld [vmem:[#allocation24_spill] sm:$0xff] }
  0xb4   :  { %8461 = vmatprep.subr.mxu0 %v11222_v2  ;;  %8491 = vmatprep.subr.mxu1 %v17285_v41 }
  0xb5   :  { %8462 = vmatpush3.msra.mxu0 %v11154_v49  ;;  %8492 = vmatpush3.msra.mxu1 %v17286_v18 }
  0xb6   :  { %8463 = vmatprep.subr.mxu0 %v11242_v32  ;;  %8493 = vmatprep.subr.mxu1 %v11008_v24 }
  0xb7   :  { %8464 = vmatpush3.msra.mxu0 %v11199_v51  ;;  %8494 = vmatpush3.msra.mxu1 %v17287_v42  ;;  %v17289_v42 = vld [vmem:[#allocation30_spill] sm:$0xff] }
  0xb8   :  { %8465 = vmatprep.subr.mxu0 %v11272_v44  ;;  %8495 = vmatprep.subr.mxu1 %v17288_v53  ;;  %v17290_v53 = vand.u32 4294901760, %v10779_v23  ;;  %v17295_v23 = vand.u32 4294901760, %v10808_v45  ;;  %v17301_v45 = vand.u32 4294901760, %v11218_v39 }
  0xb9   :  { %8466 = vmatpush3.msra.mxu0 %v11236_v63  ;;  %8496 = vmatpush3.msra.mxu1 %v11023_v40  ;;  %v17291_v40 = vand.u32 4294901760, %v10756_v60  ;;  %v17296_v60 = vand.u32 4294901760, %v10814_v26  ;;  %v17303_v26 = vand.u32 4294901760, %v10873_v22  ;;  %v17308_v22 = vand.u32 4294901760, %v17266_v54  ;;  %v135_v54 = vld [vmem:[%s16428_s2 + $0x270] sm:$0xff] }
  0xba   :  { %8467 = vmatprep.subr.mxu0 %v11291_v25  ;;  %8497 = vmatprep.subr.mxu1 %v11085_v38  ;;  %v17292_v25 = vld [vmem:[#allocation33_spill] sm:$0xff] }
  0xbb   :  { %8468 = vmatpush3.msra.mxu0 %v11279_v31  ;;  %1727 = vmatprep.mubr.f32.mxu0 %v11205_v20  ;;  %v17293_v31 = vand.u32 4294901760, %v10795_v35  ;;  %v17297_v35 = vand.u32 4294901760, %v10856_v15  ;;  %v17304_v15 = vand.u32 4294901760, %v10930_v17  ;;  %v17310_v17 = vand.u32 4294901760, %v17270_v14  ;;  %v150_v14 = vld [vmem:[%s16428_s2 + $0x2e8] sm:$0xff] }
  0xbc   :  { %8498 = vmatpush3.msra.mxu1 %v11057_v50  ;;  %1730 = vmatmul.mubr.f32.vlgmr.msra.gmra.mxu0 %v11218_v39  ;;  %v17294_v50 = vand.u32 4294901760, %v10788_v29  ;;  %v17300_v29 = vand.u32 4294901760, %v10850_v10  ;;  %v17305_v10 = vand.u32 4294901760, %v11252_v7  ;;  %v17306_v39 = vand.u32 4294901760, %v17264_v57 }
  0xbd   :  { %8499 = vmatprep.subr.mxu1 %v17289_v42  ;;  %8513 = vmatprep.subr.mxu0 %v17290_v53  ;;  %v17302_v53 = vand.u32 4294901760, %v10899_v12  ;;  %v136_v12 = vld [vmem:[%s16428_s2 + $0x278] sm:$0xff] }
  0xbe   :  { %8500 = vmatpush3.msra.mxu1 %v11087_v58  ;;  %8514 = vmatpush3.msra.mxu0 %v17291_v40  ;;  %v17298_v40 = vld [vmem:[#allocation36_spill] sm:$0xff]  ;;  %v11472_v57 = vand.u32 4294901760, %v136_v12 }
  0xbf   :  { %8501 = vmatprep.subr.mxu1 %v17292_v25  ;;  %8515 = vmatprep.subr.mxu0 %v17293_v31  ;;  %v151_v31 = vld [vmem:[%s16428_s2 + $0x2f0] sm:$0xff] }
  0xc0   :  { %1736 = vmatprep.mubr.f32.mxu0 %v11252_v7  ;;  %8502 = vmatpush3.msra.mxu1 %v11138_v37 }
  0xc1   :  { %8516 = vmatpush3.msra.mxu0 %v17294_v50  ;;  %8503 = vmatprep.subr.mxu1 %v11183_v59  ;;  %v17299_v50 = vand.u32 4294901760, %v11205_v20  ;;  %v17311_v20 = vand.u32 4294901760, %v17272_v16  ;;  %v17317_v16 = vand.u32 4294901760, %v11159_v0  ;;  %v11511_v0 = vand.u32 4294901760, %v150_v14 }
  0xc2   :  { %1739 = vmatmul.mubr.f32.gmra.mxu0 %v11268_v8  ;;  %8517 = vmatprep.subr.mxu0 %v17295_v23  ;;  %v17325_v23 = vand.u32 4294901760, %v11222_v2  ;;  %v147_v2 = vld [vmem:[%s16428_s2 + $0x2d0] sm:$0xff] }
  0xc3   :  { %8504 = vmatpush3.msra.mxu1 %v11185_v4  ;;  %8518 = vmatpush3.msra.mxu0 %v17296_v60  ;;  %17321 = vst [vmem:[#allocation3_spill] sm:$0xff] %v11511_v0 }
  0xc4   :  { %8505 = vmatprep.subr.mxu1 %v11247_v33  ;;  %8519 = vmatprep.subr.mxu0 %v17297_v35 }
  0xc5   :  { %8506 = vmatpush3.msra.mxu1 %v17298_v40  ;;  %1843 = vmatprep.mubr.f32.mxu1 %v17299_v50  ;;  %v17326_v50 = vand.u32 4294901760, %v11154_v49  ;;  %v131_v49 = vld [vmem:[%s16428_s2 + $0x250] sm:$0xff] }
  0xc6   :  { %8520 = vmatpush3.msra.mxu0 %v17300_v29  ;;  %1847 = vmatmul.mubr.f32.vlgmr.msra.gmra.mxu1 %v17301_v45  ;;  %v17329_v45 = vand.u32 4294901760, %v11242_v32 }
  0xc7   :  { %8521 = vmatprep.subr.mxu0 %v17302_v53  ;;  %8551 = vmatprep.subr.mxu1 %v10741_v34  ;;  %v17307_v34 = vand.u32 4294901760, %v11268_v8  ;;  %v17312_v8 = vand.u32 4294901760, %v17274_v55  ;;  %v11500_v55 = vand.u32 4294901760, %v135_v54 }
  0xc8   :  { %8522 = vmatpush3.msra.mxu0 %v17303_v26  ;;  %8552 = vmatpush3.msra.mxu1 %v10727_v48  ;;  %v152_v48 = vld [vmem:[%s16428_s2 + $0x2f8] sm:$0xff]  ;;  %v146_v26 = vld [vmem:[%s16428_s2 + $0x2c8] sm:$0xff] }
  0xc9   :  { %8523 = vmatprep.subr.mxu0 %v17304_v15  ;;  %8553 = vmatprep.subr.mxu1 %v10758_v28  ;;  %v17309_v28 = vand.u32 4294901760, %v17268_v11  ;;  %v11464_v7 = vand.u32 4294901760, %v152_v48  ;;  %v11483_v11 = vand.u32 4294901760, %v151_v31  ;;  %17318 = vst [vmem:[#allocation19_spill] sm:$0xff] %v11500_v55  ;;  %v11535_v60 = vsub.f32 %v135_v54, %v11500_v55  ;;  %v17340_v54 = vld [vmem:[#allocation14_spill] sm:$0xff] }
  0xca   :  { %1854 = vmatprep.mubr.f32.mxu1 %v17305_v10  ;;  %8524 = vmatpush3.msra.mxu0 %v17306_v39  ;;  %v11564_v15 = vsub.f32 %v150_v14, %v11511_v0 }
  0xcb   :  { %8554 = vmatpush3.msra.mxu1 %v17265_v1  ;;  %8525 = vmatprep.subr.mxu0 %v17308_v22  ;;  %v17313_v1 = vand.u32 4294901760, %v17276_v61  ;;  %17315 = vst [vmem:[#allocation12_spill] sm:$0xff] %v11483_v11  ;;  %v17320_v61 = vand.u32 4294901760, %v11189_v46  ;;  %v17334_v22 = vand.u32 4294901760, %v11272_v44 }
  0xcc   :  { %1858 = vmatmul.mubr.f32.gmra.mxu1 %v17307_v34  ;;  %8555 = vmatprep.subr.mxu1 %v17267_v56  ;;  %v17314_v56 = vand.u32 4294901760, %v17278_v21  ;;  %v133_v21 = vld [vmem:[%s16428_s2 + $0x260] sm:$0xff]  ;;  %v17333_v34 = vld [vmem:[#allocation27_spill] sm:$0xff] }
  0xcd   :  { %8526 = vmatpush3.msra.mxu0 %v17309_v28  ;;  %8556 = vmatpush3.msra.mxu1 %v17269_v47  ;;  %v17316_v47 = vand.u32 4294901760, %v11065_v5  ;;  %v134_v5 = vld [vmem:[%s16428_s2 + $0x268] sm:$0xff] }
  0xce   :  { %8527 = vmatprep.subr.mxu0 %v17310_v17  ;;  %8557 = vmatprep.subr.mxu1 %v17271_v43  ;;  %v11492_v43 = vsub.f32 %v152_v48, %v11464_v7  ;;  %v11525_v46 = vand.u32 4294901760, %v134_v5  ;;  %v16593_v48 = vand.u32 4294901760, %v11535_v60  ;;  %v130_v28 = vld [vmem:[%s16428_s2 + $0x248] sm:$0xff]  ;;  %v17337_v17 = vand.u32 4294901760, %v11236_v63 }
  0xcf   :  { %8528 = vmatpush3.msra.mxu0 %v17311_v20  ;;  %8558 = vmatpush3.msra.mxu1 %v17273_v13  ;;  %v11498_v13 = vsub.f32 %v136_v12, %v11472_v57  ;;  %v17336_v12 = vld [vmem:[#allocation24_spill] sm:$0xff]  ;;  %v11599_v20 = vand.u32 4294901760, %v131_v49 }
  0xd0   :  { %8529 = vmatprep.subr.mxu0 %v17312_v8  ;;  %8559 = vmatprep.subr.mxu1 %v17275_v62  ;;  %v17319_v62 = vand.u32 4294901760, %v11082_v9  ;;  %v17322_v9 = vld [vmem:[#allocation29_spill] sm:$0xff]  ;;  %17324 = vst [vmem:[#allocation2_spill] sm:$0xff] %v11525_v46  ;;  %v11570_v32 = vsub.f32 %v134_v5, %v11525_v46  ;;  %v145_v8 = vld [vmem:[%s16428_s2 + $0x2c0] sm:$0xff] }
  0xd1   :  { %8530 = vmatpush3.msra.mxu0 %v17313_v1  ;;  %8560 = vmatpush3.msra.mxu1 %v17277_v6  ;;  %v149_v6 = vld [vmem:[%s16428_s2 + $0x2e0] sm:$0xff]  ;;  %v16596_v35 = vand.u32 4294901760, %v11498_v13  ;;  %17338 = vst [vmem:[#allocation5_spill] sm:$0xff] %v11599_v20  ;;  %v17343_v5 = vld [vmem:[#allocation37_spill] sm:$0xff] }
  0xd2   :  { %8531 = vmatprep.subr.mxu0 %v17314_v56  ;;  %8561 = vmatprep.subr.mxu1 %v17279_v3  ;;  %v11520_v3 = vsub.f32 %v151_v31, %v11483_v11  ;;  %v11544_v29 = vand.u32 4294901760, %v149_v6  ;;  %v11601_v31 = vand.u32 4294901760, %v146_v26  ;;  %v17341_v56 = vld [vmem:[#allocation38_spill] sm:$0xff] }
  0xd3   :  { %8532 = vmatpush3.msra.mxu0 %v17316_v47  ;;  %8562 = vmatpush3.msra.mxu1 %v17280_v27  ;;  %v17323_v27 = vand.u32 4294901760, %v17322_v9  ;;  %v17342_v47 = vand.u32 4294901760, %v17341_v56  ;;  %v129_v9 = vld [vmem:[%s16428_s2 + $0x240] sm:$0xff] }
  0xd4   :  { %8533 = vmatprep.subr.mxu0 %v17317_v16  ;;  %8563 = vmatprep.subr.mxu1 %v17281_v36  ;;  %v16597_v36 = vand.u32 4294901760, %v11492_v43  ;;  %17327 = vst [vmem:[#allocation17_spill] sm:$0xff] %v11544_v29  ;;  %17339 = vst [vmem:[#allocation25_spill] sm:$0xff] %v11601_v31  ;;  %v11607_v1 = vsub.f32 %v149_v6, %v11544_v29  ;;  %v16592_v16 = vand.u32 4294901760, %v11564_v15  ;;  %v11625_v6 = vand.u32 4294901760, %v130_v28 }
  0xd5   :  { %8534 = vmatpush3.msra.mxu0 %v17319_v62  ;;  %8564 = vmatpush3.msra.mxu1 %v17282_v52  ;;  %v132_v52 = vld [vmem:[%s16428_s2 + $0x258] sm:$0xff]  ;;  %v17344_v62 = vand.u32 4294901760, %v17343_v5  ;;  %v11661_v56 = vsub.f32 %v146_v26, %v11601_v31 }
  0xd6   :  { %8535 = vmatprep.subr.mxu0 %v17320_v61  ;;  %8565 = vmatprep.subr.mxu1 %v17283_v30  ;;  %v148_v30 = vld [vmem:[%s16428_s2 + $0x2d8] sm:$0xff]  ;;  %v11554_v53 = vand.u32 4294901760, %v132_v52  ;;  %v11577_v39 = vsub.f32 %v11492_v43, %v16597_v36  ;;  %17345 = vst [vmem:[#allocation7_spill] sm:$0xff] %v11625_v6  ;;  %v11677_v26 = vsub.f32 %v130_v28, %v11625_v6  ;;  %v127_v36 = vld [vmem:[%s16428_s2 + $0x230] sm:$0xff] }
  0xd7   :  { %8536 = vmatpush3.msra.mxu0 %v17323_v27  ;;  %8566 = vmatpush3.msra.mxu1 %v17284_v19  ;;  %v11546_v19 = vand.u32 4294901760, %v133_v21  ;;  %v11572_v10 = vand.u32 4294901760, %v148_v30  ;;  %17352 = vst [vmem:[#allocation9_spill] sm:$0xff] %v11661_v56  ;;  %v11754_v61 = vand.u32 4294901760, %v127_v36 }
  0xd8   :  { %8537 = vmatprep.subr.mxu0 %v17325_v23  ;;  %8567 = vmatprep.subr.mxu1 %v17285_v41  ;;  %17330 = vst [vmem:[#allocation23_spill] sm:$0xff] %v11554_v53  ;;  %v16595_v41 = vand.u32 4294901760, %v11520_v3  ;;  %v11613_v63 = vsub.f32 %v132_v52, %v11554_v53  ;;  %v17346_v52 = vld [vmem:[#allocation31_spill] sm:$0xff]  ;;  %17354 = vst [vmem:[#allocation10_spill] sm:$0xff] %v11677_v26 }
  0xd9   :  { %8538 = vmatpush3.msra.mxu0 %v17326_v50  ;;  %17328 = vst [vmem:[#allocation21_spill] sm:$0xff] %v11546_v19  ;;  %8568 = vmatpush3.msra.mxu1 %v17286_v18  ;;  %v17331_v18 = vand.u32 4294901760, %v11199_v51  ;;  %17332 = vst [vmem:[#allocation4_spill] sm:$0xff] %v11572_v10  ;;  %v11587_v51 = vand.u32 4294901760, %v147_v2  ;;  %v11597_v44 = vsub.f32 %v133_v21, %v11546_v19  ;;  %v16594_v21 = vand.u32 4294901760, %v11570_v32  ;;  %v17347_v23 = vld [vmem:[#allocation15_spill] sm:$0xff] }
  0xda   :  { %8539 = vmatprep.subr.mxu0 %v17329_v45  ;;  %8569 = vmatprep.subr.mxu1 %v11008_v24  ;;  %v11585_v24 = vsub.f32 %v11498_v13, %v16596_v35  ;;  %v11618_v14 = vsub.f32 %v11520_v3, %v16595_v41  ;;  %v11632_v27 = vsub.f32 %v148_v30, %v11572_v10  ;;  %v11642_v45 = vand.u32 4294901760, %v145_v8 }
  0xdb   :  { %8540 = vmatpush3.msra.mxu0 %v17331_v18  ;;  %8570 = vmatpush3.msra.mxu1 %v17333_v34  ;;  %17335 = vst [vmem:[#allocation26_spill] sm:$0xff] %v11587_v51  ;;  %v11640_v50 = vsub.f32 %v11535_v60, %v16593_v48  ;;  %v144_v18 = vld [vmem:[%s16428_s2 + $0x2b8] sm:$0xff]  ;;  %v11648_v30 = vsub.f32 %v147_v2, %v11587_v51  ;;  %v17350_v34 = vld [vmem:[#allocation32_spill] sm:$0xff]  ;;  %17364 = vst [vmem:[#allocation36_spill] sm:$0xff] %v11754_v61 }
  0xdc   :  { %8541 = vmatprep.subr.mxu0 %v17334_v22  ;;  %8571 = vmatprep.subr.mxu1 %v17336_v12  ;;  %17348 = vst [vmem:[#allocation13_spill] sm:$0xff] %v11642_v45  ;;  %v11653_v22 = vsub.f32 %v131_v49, %v11599_v20  ;;  %v16598_v12 = vand.u32 4294901760, %v11607_v1  ;;  %v11669_v2 = vsub.f32 %v11564_v15, %v16592_v16  ;;  %v11671_v49 = vand.u32 4294901760, %v129_v9  ;;  %v17356_v16 = vld [vmem:[#allocation34_spill] sm:$0xff] }
  0xdd   :  { %8542 = vmatpush3.msra.mxu0 %v17337_v17  ;;  %8572 = vmatpush3.msra.mxu1 %v17340_v54  ;;  %17349 = vst [vmem:[#allocation6_spill] sm:$0xff] %v11648_v30  ;;  %v16599_v17 = vand.u32 4294901760, %v11597_v44  ;;  %v128_v54 = vld [vmem:[%s16428_s2 + $0x238] sm:$0xff]  ;;  %v11684_v5 = vand.u32 4294901760, %v144_v18  ;;  %v16602_v48 = vand.u32 4294901760, %v11648_v30 }
  0xde   :  { %8543 = vmatprep.subr.mxu0 %v17342_v47  ;;  %8573 = vmatprep.subr.mxu1 %v11085_v38  ;;  %17351 = vst [vmem:[#allocation28_spill] sm:$0xff] %v11653_v22  ;;  %17353 = vst [vmem:[#allocation8_spill] sm:$0xff] %v11671_v49  ;;  %v16600_v47 = vand.u32 4294901760, %v11613_v63  ;;  %v11693_v28 = vand.u32 4294901760, %v128_v54  ;;  %v11704_v41 = vsub.f32 %v11607_v1, %v16598_v12 }
  0xdf   :  { %8544 = vmatpush3.msra.mxu0 %v17344_v62  ;;  %2024 = vmatprep.mubr.f32.mxu0 %v17346_v52  ;;  %17355 = vst [vmem:[#allocation11_spill] sm:$0xff] %v11684_v5  ;;  %v16601_v62 = vand.u32 4294901760, %v11632_v27  ;;  %v11709_v35 = vsub.f32 %v11597_v44, %v16599_v17  ;;  %v11742_v12 = vsub.f32 %v144_v18, %v11684_v5  ;;  %v125_v18 = vld [vmem:[%s16428_s2 + $0x220] sm:$0xff] }
  0xe0   :  { %8574 = vmatpush3.msra.mxu1 %v17347_v23  ;;  %2026 = vmatmul.mubr.f32.vlgmr.msra.gmra.mxu0 %v17350_v34  ;;  %v143_v23 = vld [vmem:[%s16428_s2 + $0x2b0] sm:$0xff]  ;;  %17357 = vst [vmem:[#allocation16_spill] sm:$0xff] %v11693_v28  ;;  %v11725_v17 = vsub.f32 %v11613_v63, %v16600_v47  ;;  %v17365_v47 = vand.u32 4294901760, %v11661_v56 }
  0xe1   :  { %8575 = vmatprep.subr.mxu1 %v17289_v42  ;;  %8589 = vmatprep.subr.mxu0 %v11464_v7  ;;  %v11720_v42 = vsub.f32 %v129_v9, %v11671_v49  ;;  %v11727_v38 = vand.u32 4294901760, %v143_v23  ;;  %v126_v9 = vld [vmem:[%s16428_s2 + $0x228] sm:$0xff]  ;;  %17362 = vst [vmem:[#allocation30_spill] sm:$0xff] %v11742_v12 }
  0xe2   :  { %8576 = vmatpush3.msra.mxu1 %v11087_v58  ;;  %8590 = vmatpush3.msra.mxu0 %v11472_v57  ;;  %v11682_v58 = vsub.f32 %v11570_v32, %v16594_v21  ;;  %v11697_v21 = vsub.f32 %v145_v8, %v11642_v45  ;;  %v16603_v8 = vand.u32 4294901760, %v11653_v22 }
  0xe3   :  { %8577 = vmatprep.subr.mxu1 %v17292_v25  ;;  %8591 = vmatprep.subr.mxu0 %v11483_v11  ;;  %v17359_v25 = vld [vmem:[#allocation35_spill] sm:$0xff]  ;;  %17360 = vst [vmem:[#allocation22_spill] sm:$0xff] %v11720_v42  ;;  %17361 = vst [vmem:[#allocation20_spill] sm:$0xff] %v11727_v38 }
  0xe4   :  { %2031 = vmatprep.mubr.f32.mxu0 %v17356_v16  ;;  %17358 = vst [vmem:[#allocation18_spill] sm:$0xff] %v11697_v21  ;;  %8578 = vmatpush3.msra.mxu1 %v11138_v37  ;;  %v11772_v37 = vsub.f32 %v11661_v56, %v17365_v47  ;;  %v17369_v47 = vand.u32 4294901760, %v11577_v39  ;;  %v17372_v39 = vand.u32 4294901760, %v11618_v14  ;;  %v29_v14 = vld [vmem:[%s16429_s0 + $0x20] sm:$0xff]  ;;  %v17383_v11 = vand.u32 4294901760, %v11682_v58 }
  0xe5   :  { %8592 = vmatpush3.msra.mxu0 %v11500_v55  ;;  %8579 = vmatprep.subr.mxu1 %v11183_v59  ;;  %v11735_v59 = vsub.f32 %v11632_v27, %v16601_v62  ;;  %v11752_v62 = vsub.f32 %v11648_v30, %v16602_v48  ;;  %v11767_v48 = vsub.f32 %v11653_v22, %v16603_v8  ;;  %v11785_v8 = vld [vmem:[%s16428_s2 + $0x2a0] sm:$0xff]  ;;  %v46_v55 = vld [vmem:[%s16429_s0 + $0xa8] sm:$0xff] }
  0xe6   :  { %2033 = vmatmul.mubr.f32.gmra.mxu0 %v17359_v25  ;;  %8593 = vmatprep.subr.mxu0 %v11511_v0  ;;  %v11820_v0 = vld [vmem:[%s16428_s2 + $0x298] sm:$0xff] }
  0xe7   :  { %8580 = vmatpush3.msra.mxu1 %v11185_v4  ;;  %8594 = vmatpush3.msra.mxu0 %v11525_v46  ;;  %v11747_v4 = vsub.f32 %v128_v54, %v11693_v28  ;;  %v142_v54 = vld [vmem:[%s16428_s2 + $0x2a8] sm:$0xff]  ;;  %v11799_v46 = vand.u32 4294901760, %v125_v18 }
  0xe8   :  { %8581 = vmatprep.subr.mxu1 %v11247_v33  ;;  %8595 = vmatprep.subr.mxu0 %v11544_v29  ;;  %v11780_v33 = vand.u32 4294901760, %v126_v9  ;;  %v11789_v29 = vsub.f32 %v143_v23, %v11727_v38  ;;  %v124_v23 = vld [vmem:[%s16428_s2 + $0x218] sm:$0xff] }
  0xe9   :  { %17363 = vst [vmem:[#allocation33_spill] sm:$0xff] %v11747_v4  ;;  %8582 = vmatpush3.msra.mxu1 %v17298_v40  ;;  %2135 = vmatprep.mubr.f32.mxu1 %v17346_v52  ;;  %v17368_v40 = vand.u32 4294901760, %v11677_v26  ;;  %v11810_v52 = vsub.f32 %v127_v36, %v11754_v61 }
  0xea   :  { %8596 = vmatpush3.msra.mxu0 %v11546_v19  ;;  %17366 = vst [vmem:[#allocation29_spill] sm:$0xff] %v11780_v33  ;;  %17367 = vst [vmem:[#allocation27_spill] sm:$0xff] %v11789_v29  ;;  %2137 = vmatmul.mubr.f32.vlgmr.msra.gmra.mxu1 %v17350_v34  ;;  %v11827_v34 = vand.u32 4294901760, %v142_v54 }
  0xeb   :  { %8597 = vmatprep.subr.mxu0 %v11572_v10  ;;  %v11797_v19 = vsub.f32 %v11677_v26, %v17368_v40  ;;  %8627 = vmatprep.subr.mxu1 %v17369_v47  ;;  %v17370_v40 = vand.u32 4294901760, %v11697_v21  ;;  %v17371_v47 = vand.u32 4294901760, %v11585_v24  ;;  %v11840_v24 = vsub.f32 %v126_v9, %v11780_v33  ;;  %v123_v26 = vld [vmem:[%s16428_s2 + $0x210] sm:$0xff] }
  0xec   :  { %8598 = vmatpush3.msra.mxu0 %v11554_v53  ;;  %2142 = vmatprep.mubr.f32.mxu1 %v17356_v16  ;;  %v11847_v53 = vand.u32 4294901760, %v124_v23  ;;  %v8165_v16 = vpop.f32.mrf.mxu0  ;;  %v17375_v9 = vand.u32 4294901760, %v11640_v50  ;;  %v17380_v50 = vand.u32 4294901760, %v11669_v2  ;;  %v17387_v2 = vand.u32 4294901760, %v11810_v52 }
  0xed   :  { %v11815_v10 = vsub.f32 %v11697_v21, %v17370_v40  ;;  %8628 = vmatpush3.msra.mxu1 %v17371_v47  ;;  %8599 = vmatprep.subr.mxu0 %v11587_v51  ;;  %v11831_v40 = vand.u32 4294901760, %v11785_v8  ;;  %v30_v21 = vld [vmem:[%s16429_s0 + $0x28] sm:$0xff]  ;;  %17373 = vst [vmem:[#allocation24_spill] sm:$0xff] %v11840_v24  ;;  %v17374_v47 = vand.u32 4294901760, %v11720_v42  ;;  %v11864_v51 = vand.u32 4294901760, %v11820_v0 }
  0xee   :  { %8629 = vmatprep.subr.mxu1 %v17372_v39  ;;  %8600 = vmatpush3.msra.mxu0 %v11599_v20  ;;  %v139_v20 = vld [vmem:[%s16428_s2 + $0x290] sm:$0xff]  ;;  %v11899_v39 = vsub.f32 %v142_v54, %v11827_v34 }
  0xef   :  { %v11845_v36 = vsub.f32 %v11720_v42, %v17374_v47  ;;  %8630 = vmatpush3.msra.mxu1 %v17375_v9  ;;  %v11861_v47 = vsub.f32 %v125_v18, %v11799_v46  ;;  %v17377_v42 = vand.u32 4294901760, %v11742_v12  ;;  %8601 = vmatprep.subr.mxu0 %v11601_v31  ;;  %v17378_v18 = vand.u32 4294901760, %v11747_v4  ;;  %v8166_v31 = vpop.f32.mrf.mxu0 }
  0xf0   :  { %2144 = vmatmul.mubr.f32.gmra.mxu1 %v17359_v25  ;;  %v122_v25 = vld [vmem:[%s16428_s2 + $0x208] sm:$0xff]  ;;  %8631 = vmatprep.subr.mxu1 %v17380_v50  ;;  %17381 = vst [vmem:[#allocation37_spill] sm:$0xff] %v11899_v39  ;;  %v11906_v22 = vadd.f32 %v8166_v31, %v8165_v16  ;;  %v11913_v50 = vsub.f32 %v124_v23, %v11847_v53  ;;  %v11915_v54 = vand.u32 4294901760, %v139_v20  ;;  %v17385_v31 = vand.u32 4294901760, %v11704_v41  ;;  %v137_v23 = vld [vmem:[%s16428_s2 + $0x280] sm:$0xff] }
  0xf1   :  { %17376 = vst [vmem:[#allocation14_spill] sm:$0xff] %v11861_v47  ;;  %v11869_v56 = vsub.f32 %v11742_v12, %v17377_v42  ;;  %v11880_v9 = vsub.f32 %v11747_v4, %v17378_v18  ;;  %v11886_v42 = vld [vmem:[%s16428_s2 + $0x288] sm:$0xff]  ;;  %v11891_v12 = vand.u32 4294901760, %v30_v21  ;;  %8602 = vmatpush3.msra.mxu0 %v11625_v6  ;;  %v11896_v18 = vand.u32 4294901760, %v123_v26  ;;  %8632 = vmatpush3.msra.mxu1 %v17383_v11  ;;  %v45_v41 = vld [vmem:[%s16429_s0 + $0xa0] sm:$0xff] }
  0xf2   :  { %v11901_v4 = vand.u32 4294901760, %v29_v14  ;;  %8603 = vmatprep.subr.mxu0 %v11642_v45  ;;  %v17384_v6 = vand.u32 4294901760, %v11789_v29  ;;  %8633 = vmatprep.subr.mxu1 %v17385_v31  ;;  %v11927_v58 = vand.u32 4294901760, %v11886_v42  ;;  %v11929_v16 = vand.u32 4294901760, %v122_v25 }
  0xf3   :  { %17379 = vst [vmem:[#allocation38_spill] sm:$0xff] %v11891_v12  ;;  %8604 = vmatpush3.msra.mxu0 %v11671_v49  ;;  %v17386_v31 = vand.u32 4294901760, %v11709_v35  ;;  %v2337_v11 = vand.u32 4294901760, %v11880_v9  ;;  %v11948_v49 = vsub.f32 %v11810_v52, %v17387_v2  ;;  %v11954_v45 = vsub.f32 %v30_v21, %v11891_v12  ;;  %2501 = vmatprep.mubr.f32.mxu1 %v11891_v12  ;;  %v17428_v12 = vld [vmem:[#allocation33_spill] sm:$0xff] }
  0xf4   :  { %17382 = vst [vmem:[#allocation31_spill] sm:$0xff] %v11901_v4  ;;  %v11920_v30 = vsub.f32 %v11789_v29, %v17384_v6  ;;  %v11936_v6 = vsub.f32 %v11785_v8, %v11831_v40  ;;  %8605 = vmatprep.subr.mxu0 %v11684_v5  ;;  %v121_v8 = vld [vmem:[%s16428_s2 + $0x200] sm:$0xff]  ;;  %v11956_v29 = vand.u32 4294901760, %v46_v55  ;;  %v17389_v35 = vand.u32 4294901760, %v11735_v59 }
  0xf5   :  { %8634 = vmatpush3.msra.mxu1 %v17386_v31  ;;  %8606 = vmatpush3.msra.mxu0 %v11693_v28  ;;  %v11962_v9 = vsub.f32 %v123_v26, %v11896_v18  ;;  %v11966_v31 = vsub.f32 %v29_v14, %v11901_v4  ;;  %v11970_v5 = vsub.f32 %v11820_v0, %v11864_v51  ;;  %v17390_v21 = vand.u32 4294901760, %v11725_v17  ;;  %v8203_v2 = vpop.f32.mrf.mxu1 }
  0xf6   :  { %17388 = vst [vmem:[#allocation15_spill] sm:$0xff] %v11956_v29  ;;  %8635 = vmatprep.subr.mxu1 %v17389_v35  ;;  %8607 = vmatprep.subr.mxu0 %v11727_v38  ;;  %v2456_v59 = vand.u32 4294901760, %v11920_v30  ;;  %v11977_v26 = vand.u32 4294901760, %v137_v23  ;;  %v11979_v28 = vand.u32 4294901760, %v45_v41  ;;  %v17392_v14 = vand.u32 4294901760, %v11752_v62 }
  0xf7   :  { %8636 = vmatpush3.msra.mxu1 %v17390_v21  ;;  %8608 = vmatpush3.msra.mxu0 %v11754_v61  ;;  %v11985_v0 = vsub.f32 %v122_v25, %v11929_v16  ;;  %v11988_v21 = vand.u32 4294901760, %v121_v8  ;;  %v11991_v30 = vsub.f32 %v139_v20, %v11915_v54  ;;  %v17394_v35 = vand.u32 4294901760, %v11767_v48  ;;  %v8204_v17 = vpop.f32.mrf.mxu1 }
  0xf8   :  { %17391 = vst [vmem:[#allocation32_spill] sm:$0xff] %v11979_v28  ;;  %8637 = vmatprep.subr.mxu1 %v17392_v14  ;;  %8609 = vmatprep.subr.mxu0 %v11827_v34  ;;  %v2344_v62 = vand.u32 4294901760, %v11948_v49  ;;  %v12000_v25 = vsub.f32 %v46_v55, %v11956_v29  ;;  %v17395_v38 = vand.u32 4294901760, %v11772_v37  ;;  %v17396_v48 = vand.u32 4294901760, %v11899_v39 }
  0xf9   :  { %17393 = vst [vmem:[#allocation34_spill] sm:$0xff] %v11988_v21  ;;  %8638 = vmatpush3.msra.mxu1 %v17394_v35  ;;  %8610 = vmatpush3.msra.mxu0 %v11780_v33  ;;  %v16660_v35 = vand.u32 4294901760, %v11966_v31  ;;  %v16661_v49 = vand.u32 4294901760, %v11970_v5  ;;  %v8205_v14 = vadd.f32 %v8204_v17, %v8203_v2  ;;  %v17397_v61 = vand.u32 4294901760, %v11797_v19 }
  0xfa   :  { %8639 = vmatprep.subr.mxu1 %v17395_v38  ;;  %v2462_v20 = vsub.f32 %v11899_v39, %v17396_v48  ;;  %8611 = vmatprep.subr.mxu0 %v11831_v40  ;;  %v17398_v55 = vand.u32 4294901760, %v11840_v24  ;;  %v12018_v33 = vsub.f32 %v45_v41, %v11979_v28  ;;  %v12022_v48 = vsub.f32 %v11886_v42, %v11927_v58 }
  0xfb   :  { %8640 = vmatpush3.msra.mxu1 %v17397_v61  ;;  %v17399_v2 = vand.u32 4294901760, %v11815_v10  ;;  %8612 = vmatpush3.msra.mxu0 %v11799_v46  ;;  %v17400_v19 = vand.u32 4294901760, %v11936_v6  ;;  %v12031_v17 = vsub.f32 %v121_v8, %v11988_v21  ;;  %v12035_v41 = vadd.f32 %v8205_v14, %v11906_v22 }
  0xfc   :  { %v2350_v38 = vsub.f32 %v11840_v24, %v17398_v55  ;;  %v17401_v42 = vand.u32 4294901760, %v11845_v36  ;;  %8613 = vmatprep.subr.mxu0 %v11864_v51  ;;  %v17402_v10 = vand.u32 4294901760, %v11954_v45  ;;  %v17403_v37 = vand.u32 4294901760, %v11861_v47 }
  0xfd   :  { %8641 = vmatprep.subr.mxu1 %v17399_v2  ;;  %v2469_v61 = vsub.f32 %v11936_v6, %v17400_v19  ;;  %v12048_v55 = vsub.f32 %v137_v23, %v11977_v26  ;;  %v17404_v22 = vand.u32 4294901760, %v11869_v56  ;;  %8614 = vmatpush3.msra.mxu0 %v11847_v53  ;;  %v2463_v36 = vand.u32 4294901760, %v2462_v20 }
  0xfe   :  { %8642 = vmatpush3.msra.mxu1 %v17401_v42  ;;  %v2248_v2 = vsub.f32 %v11954_v45, %v17402_v10  ;;  %v2357_v19 = vsub.f32 %v11861_v47, %v17403_v37  ;;  %v2254_v14 = vsub.f32 %v11966_v31, %v16660_v35  ;;  %v2476_v42 = vsub.f32 %v11970_v5, %v16661_v49 }
  0xff   :  { %8643 = vmatprep.subr.mxu1 %v17404_v22  ;;  %8615 = vmatprep.subr.mxu0 %v11915_v54  ;;  %v2351_v23 = vand.u32 4294901760, %v2350_v38  ;;  %v17405_v56 = vand.u32 4294901760, %v11913_v50  ;;  %v2470_v35 = vand.u32 4294901760, %v2469_v61  ;;  %v17406_v49 = vand.u32 4294901760, %v11991_v30 }
 0x100   :  { %8644 = vmatpush3.msra.mxu1 %v2337_v11  ;;  %8616 = vmatpush3.msra.mxu0 %v11896_v18  ;;  %v2249_v38 = vand.u32 4294901760, %v2248_v2  ;;  %v2358_v8 = vand.u32 4294901760, %v2357_v19  ;;  %v2255_v61 = vand.u32 4294901760, %v2254_v14  ;;  %v2477_v22 = vand.u32 4294901760, %v2476_v42 }
 0x101   :  { %v2364_v10 = vsub.f32 %v11913_v50, %v17405_v56  ;;  %8645 = vmatprep.subr.mxu1 %v2456_v59  ;;  %v2483_v37 = vsub.f32 %v11991_v30, %v17406_v49  ;;  %8617 = vmatprep.subr.mxu0 %v11927_v58  ;;  %v17407_v56 = vand.u32 4294901760, %v12000_v25  ;;  %v17408_v49 = vand.u32 4294901760, %v11962_v9 }
 0x102   :  { %8646 = vmatpush3.msra.mxu1 %v2344_v62  ;;  %8618 = vmatpush3.msra.mxu0 %v11929_v16  ;;  %v17409_v19 = vand.u32 4294901760, %v12018_v33  ;;  %v17411_v42 = vand.u32 4294901760, %v11985_v0 }
 0x103   :  { %v2263_v20 = vsub.f32 %v12000_v25, %v17407_v56  ;;  %8647 = vmatprep.subr.mxu1 %v2463_v36  ;;  %v2371_v11 = vsub.f32 %v11962_v9, %v17408_v49  ;;  %8619 = vmatprep.subr.mxu0 %v11977_v26  ;;  %v2365_v2 = vand.u32 4294901760, %v2364_v10  ;;  %v17410_v36 = vand.u32 4294901760, %v12022_v48 }
 0x104   :  { %8648 = vmatpush3.msra.mxu1 %v2351_v23  ;;  %v2269_v56 = vsub.f32 %v12018_v33, %v17409_v19  ;;  %8620 = vmatpush3.msra.mxu0 %v11988_v21  ;;  %v2484_v14 = vand.u32 4294901760, %v2483_v37  ;;  %v2378_v49 = vsub.f32 %v11985_v0, %v17411_v42  ;;  %v17412_v10 = vand.u32 4294901760, %v12048_v55  ;;  %v17417_v42 = vld [vmem:[#allocation19_spill] sm:$0xff] }
 0x105   :  { %v2490_v59 = vsub.f32 %v12022_v48, %v17410_v36  ;;  %8649 = vmatprep.subr.mxu1 %v2470_v35  ;;  %2250 = vmatprep.mubr.f32.mxu0 %v2249_v38  ;;  %v2264_v23 = vand.u32 4294901760, %v2263_v20  ;;  %v2372_v19 = vand.u32 4294901760, %v2371_v11  ;;  %v17413_v36 = vand.u32 4294901760, %v12031_v17 }
 0x106   :  { %8650 = vmatpush3.msra.mxu1 %v2358_v8  ;;  %v2497_v62 = vsub.f32 %v12048_v55, %v17412_v10  ;;  %2256 = vmatmul.mubr.f32.vlgmr.msra.gmra.mxu0 %v2255_v61  ;;  %v2270_v37 = vand.u32 4294901760, %v2269_v56  ;;  %v2379_v8 = vand.u32 4294901760, %v2378_v49  ;;  %v17414_v61 = vld [vmem:[#allocation6_spill] sm:$0xff] }
 0x107   :  { %8651 = vmatprep.subr.mxu1 %v2477_v22  ;;  %v2385_v35 = vsub.f32 %v12031_v17, %v17413_v36  ;;  %8665 = vmatprep.subr.mxu0 %v11492_v43  ;;  %v2491_v21 = vand.u32 4294901760, %v2490_v59  ;;  %v17420_v36 = vld [vmem:[#allocation10_spill] sm:$0xff] }
 0x108   :  { %8652 = vmatpush3.msra.mxu1 %v2365_v2  ;;  %8666 = vmatpush3.msra.mxu0 %v11498_v13  ;;  %v2498_v20 = vand.u32 4294901760, %v2497_v62  ;;  %v17415_v62 = vld [vmem:[#allocation12_spill] sm:$0xff] }
 0x109   :  { %8653 = vmatprep.subr.mxu1 %v2484_v14  ;;  %8667 = vmatprep.subr.mxu0 %v11520_v3  ;;  %v2386_v22 = vand.u32 4294901760, %v2385_v35  ;;  %v8168_v11 = vpop.f32.mrf.mxu0  ;;  %v17416_v14 = vld [vmem:[#allocation28_spill] sm:$0xff] }
 0x10a   :  { %2265 = vmatprep.mubr.f32.mxu0 %v2264_v23  ;;  %8654 = vmatpush3.msra.mxu1 %v2372_v19  ;;  %v17418_v23 = vld [vmem:[#allocation9_spill] sm:$0xff]  ;;  %v17419_v19 = vld [vmem:[#allocation3_spill] sm:$0xff] }
 0x10b   :  { %8668 = vmatpush3.msra.mxu0 %v11535_v60  ;;  %8655 = vmatprep.subr.mxu1 %v2491_v21  ;;  %v8169_v38 = vpop.f32.mrf.mxu0 }
 0x10c   :  { %2271 = vmatmul.mubr.f32.gmra.mxu0 %v2270_v37  ;;  %8669 = vmatprep.subr.mxu0 %v11564_v15  ;;  %v8170_v59 = vadd.f32 %v8169_v38, %v8168_v11  ;;  %v17423_v11 = vld [vmem:[#allocation17_spill] sm:$0xff]  ;;  %v17424_v38 = vld [vmem:[#allocation22_spill] sm:$0xff] }
 0x10d   :  { %8656 = vmatpush3.msra.mxu1 %v2379_v8  ;;  %8670 = vmatpush3.msra.mxu0 %v11570_v32  ;;  %v17421_v8 = vld [vmem:[#allocation2_spill] sm:$0xff] }
 0x10e   :  { %8657 = vmatprep.subr.mxu1 %v2498_v20  ;;  %8671 = vmatprep.subr.mxu0 %v11607_v1  ;;  %v17422_v20 = vld [vmem:[#allocation18_spill] sm:$0xff] }
 0x10f   :  { %8658 = vmatpush3.msra.mxu1 %v2386_v22  ;;  %8672 = vmatpush3.msra.mxu0 %v11597_v44  ;;  %v8241_v21 = vpop.f32.mrf.mxu0 }
 0x110   :  { %2503 = vmatmul.mubr.f32.vlgmr.msra.gmra.mxu1 %v11901_v4  ;;  %8673 = vmatprep.subr.mxu0 %v11632_v27  ;;  %v8206_v2 = vpop.f32.mrf.mxu1  ;;  %v17427_v4 = vld [vmem:[#allocation4_spill] sm:$0xff] }
 0x111   :  { %8703 = vmatprep.subr.mxu1 %v11464_v7  ;;  %8674 = vmatpush3.msra.mxu0 %v11613_v63  ;;  %v8242_v56 = vpop.f32.mrf.mxu0 }
 0x112   :  { %8704 = vmatpush3.msra.mxu1 %v11472_v57  ;;  %8675 = vmatprep.subr.mxu0 %v17414_v61  ;;  %v8243_v49 = vadd.f32 %v8242_v56, %v8241_v21  ;;  %v8207_v10 = vpop.f32.mrf.mxu1  ;;  %v17425_v56 = vld [vmem:[#allocation21_spill] sm:$0xff] }
 0x113   :  { %8705 = vmatprep.subr.mxu1 %v17415_v62  ;;  %2508 = vmatprep.mubr.f32.mxu1 %v11956_v29  ;;  %v8208_v37 = vadd.f32 %v8207_v10, %v8206_v2  ;;  %v17429_v2 = vld [vmem:[#allocation23_spill] sm:$0xff]  ;;  %v17431_v10 = vld [vmem:[#allocation26_spill] sm:$0xff] }
 0x114   :  { %8676 = vmatpush3.msra.mxu0 %v17416_v14  ;;  %8706 = vmatpush3.msra.mxu1 %v17417_v42  ;;  %v814_v35 = vadd.f32 %v8243_v49, %v12035_v41  ;;  %v17430_v49 = vld [vmem:[#allocation27_spill] sm:$0xff] }
 0x115   :  { %2510 = vmatmul.mubr.f32.gmra.mxu1 %v11979_v28  ;;  %8677 = vmatprep.subr.mxu0 %v17418_v23  ;;  %v8244_v22 = vpop.f32.mrf.mxu0  ;;  %v676_v21 = vadd.f32 %v8208_v37, %v8170_v59  ;;  %v17426_v28 = vld [vmem:[#allocation30_spill] sm:$0xff]  ;;  %v17432_v37 = vld [vmem:[#allocation5_spill] sm:$0xff] }
 0x116   :  { %8707 = vmatprep.subr.mxu1 %v17419_v19  ;;  %8678 = vmatpush3.msra.mxu0 %v17420_v36 }
 0x117   :  { %8708 = vmatpush3.msra.mxu1 %v17421_v8  ;;  %8679 = vmatprep.subr.mxu0 %v17422_v20  ;;  %v8245_v29 = vpop.f32.mrf.mxu0 }
 0x118   :  { %8709 = vmatprep.subr.mxu1 %v17423_v11  ;;  %8680 = vmatpush3.msra.mxu0 %v17424_v38  ;;  %v8246_v41 = vadd.f32 %v8245_v29, %v8244_v22  ;;  %v17434_v29 = vld [vmem:[#allocation7_spill] sm:$0xff] }
 0x119   :  { %8710 = vmatpush3.msra.mxu1 %v17425_v56  ;;  %8681 = vmatprep.subr.mxu0 %v17426_v28  ;;  %v8279_v59 = vpop.f32.mrf.mxu1  ;;  %v17433_v28 = vld [vmem:[#allocation25_spill] sm:$0xff] }
 0x11a   :  { %8711 = vmatprep.subr.mxu1 %v17427_v4  ;;  %8682 = vmatpush3.msra.mxu0 %v17428_v12  ;;  %v823_v38 = vadd.f32 %v8246_v41, %v676_v21  ;;  %v17436_v21 = vld [vmem:[#allocation8_spill] sm:$0xff] }
 0x11b   :  { %8712 = vmatpush3.msra.mxu1 %v17429_v2  ;;  %8683 = vmatprep.subr.mxu0 %v17430_v49  ;;  %v8280_v12 = vpop.f32.mrf.mxu1  ;;  %v17435_v49 = vld [vmem:[#allocation13_spill] sm:$0xff] }
 0x11c   :  { %8713 = vmatprep.subr.mxu1 %v17431_v10  ;;  %8684 = vmatpush3.msra.mxu0 %v11810_v52  ;;  %v8281_v22 = vadd.f32 %v8280_v12, %v8279_v59  ;;  %v17439_v59 = vld [vmem:[#allocation20_spill] sm:$0xff] }
 0x11d   :  { %8714 = vmatpush3.msra.mxu1 %v17432_v37  ;;  %8685 = vmatprep.subr.mxu0 %v11899_v39 }
 0x11e   :  { %8715 = vmatprep.subr.mxu1 %v17433_v28  ;;  %8686 = vmatpush3.msra.mxu0 %v11840_v24  ;;  %v12144_v41 = vadd.f32 %v8281_v22, %v814_v35  ;;  %v17437_v28 = vld [vmem:[#allocation11_spill] sm:$0xff]  ;;  %v17438_v24 = vld [vmem:[#allocation16_spill] sm:$0xff]  ;;  %v17441_v22 = vld [vmem:[#allocation29_spill] sm:$0xff] }
 0x11f   :  { %8716 = vmatpush3.msra.mxu1 %v17434_v29  ;;  %8687 = vmatprep.subr.mxu0 %v11936_v6  ;;  %v8282_v39 = vpop.f32.mrf.mxu1 }
 0x120   :  { %8717 = vmatprep.subr.mxu1 %v17435_v49  ;;  %8688 = vmatpush3.msra.mxu0 %v11861_v47 }
 0x121   :  { %8718 = vmatpush3.msra.mxu1 %v17436_v21  ;;  %8689 = vmatprep.subr.mxu0 %v11970_v5  ;;  %v8283_v12 = vpop.f32.mrf.mxu1  ;;  %v17440_v21 = vld [vmem:[#allocation36_spill] sm:$0xff] }
 0x122   :  { %8719 = vmatprep.subr.mxu1 %v17437_v28  ;;  %8690 = vmatpush3.msra.mxu0 %v11913_v50  ;;  %v8284_v47 = vadd.f32 %v8283_v12, %v8282_v39  ;;  %v17442_v39 = vand.u32 4294901760, %v11492_v43  ;;  %v17445_v12 = vand.u32 4294901760, %v11535_v60  ;;  %v17446_v43 = vand.u32 4294901760, %v11564_v15 }
 0x123   :  { %8720 = vmatpush3.msra.mxu1 %v17438_v24  ;;  %8691 = vmatprep.subr.mxu0 %v11991_v30  ;;  %v17450_v60 = vand.u32 4294901760, %v11954_v45  ;;  %v17452_v15 = vand.u32 4294901760, %v11966_v31 }
 0x124   :  { %8721 = vmatprep.subr.mxu1 %v17439_v59  ;;  %8692 = vmatpush3.msra.mxu0 %v11962_v9  ;;  %v12156_v35 = vadd.f32 %v8284_v47, %v823_v38  ;;  %v17443_v47 = vand.u32 4294901760, %v11498_v13  ;;  %v17444_v38 = vand.u32 4294901760, %v11520_v3  ;;  %v17447_v13 = vand.u32 4294901760, %v11570_v32 }
 0x125   :  { %8722 = vmatpush3.msra.mxu1 %v17440_v21  ;;  %8693 = vmatprep.subr.mxu0 %v12022_v48  ;;  %v17448_v3 = vand.u32 4294901760, %v11607_v1  ;;  %v17454_v32 = vand.u32 4294901760, %v11613_v63  ;;  %v17455_v1 = vand.u32 4294901760, %v17414_v61 }
 0x126   :  { %8723 = vmatprep.subr.mxu1 %v11827_v34  ;;  %8694 = vmatpush3.msra.mxu0 %v11985_v0 }
 0x127   :  { %8724 = vmatpush3.msra.mxu1 %v17441_v22  ;;  %8695 = vmatprep.subr.mxu0 %v12048_v55 }
 0x128   :  { %8725 = vmatprep.subr.mxu1 %v11831_v40  ;;  %8696 = vmatpush3.msra.mxu0 %v12031_v17 }
 0x129   :  { %2645 = vmatprep.mubr.f32.mxu0 %v11954_v45  ;;  %8726 = vmatpush3.msra.mxu1 %v11799_v46 }
 0x12a   :  { %2648 = vmatmul.mubr.f32.vlgmr.msra.gmra.mxu0 %v11966_v31  ;;  %8727 = vmatprep.subr.mxu1 %v11864_v51  ;;  %v17457_v31 = vand.u32 4294901760, %v17416_v14  ;;  %v17461_v14 = vand.u32 4294901760, %v17422_v20 }
 0x12b   :  { %8741 = vmatprep.subr.mxu0 %v17442_v39  ;;  %8728 = vmatpush3.msra.mxu1 %v11847_v53  ;;  %v17449_v39 = vld [vmem:[#allocation34_spill] sm:$0xff] }
 0x12c   :  { %8742 = vmatpush3.msra.mxu0 %v17443_v47  ;;  %8729 = vmatprep.subr.mxu1 %v11915_v54  ;;  %v17451_v47 = vand.u32 4294901760, %v11597_v44  ;;  %v17456_v44 = vand.u32 4294901760, %v12000_v25 }
 0x12d   :  { %8743 = vmatprep.subr.mxu0 %v17444_v38  ;;  %2654 = vmatprep.mubr.f32.mxu0 %v12000_v25  ;;  %v17453_v38 = vand.u32 4294901760, %v11632_v27  ;;  %v17459_v27 = vand.u32 4294901760, %v17418_v23  ;;  %v168_v25 = vld [vmem:[%s16428_s2 + $0x378] sm:$0xff] }
 0x12e   :  { %8730 = vmatpush3.msra.mxu1 %v11896_v18  ;;  %8744 = vmatpush3.msra.mxu0 %v17445_v12  ;;  %v17463_v12 = vld [vmem:[#allocation22_spill] sm:$0xff] }
 0x12f   :  { %2657 = vmatmul.mubr.f32.gmra.mxu0 %v12018_v33  ;;  %8731 = vmatprep.subr.mxu1 %v11927_v58 }
 0x130   :  { %8745 = vmatprep.subr.mxu0 %v17446_v43  ;;  %8732 = vmatpush3.msra.mxu1 %v11929_v16  ;;  %v17464_v43 = vand.u32 4294901760, %v17463_v12 }
 0x131   :  { %8746 = vmatpush3.msra.mxu0 %v17447_v13  ;;  %8733 = vmatprep.subr.mxu1 %v11977_v26  ;;  %v12231_v13 = vand.u32 4294901760, %v168_v25 }
 0x132   :  { %8747 = vmatprep.subr.mxu0 %v17448_v3  ;;  %8734 = vmatpush3.msra.mxu1 %v17449_v39 }
 0x133   :  { %2761 = vmatprep.mubr.f32.mxu1 %v17450_v60  ;;  %8748 = vmatpush3.msra.mxu0 %v17451_v47  ;;  %v8317_v45 = vpop.f32.mrf.mxu0  ;;  %17465 = vst [vmem:[#allocation6_spill] sm:$0xff] %v12231_v13  ;;  %v17470_v47 = vld [vmem:[#allocation27_spill] sm:$0xff] }
 0x134   :  { %2765 = vmatmul.mubr.f32.vlgmr.msra.gmra.mxu1 %v17452_v15  ;;  %8749 = vmatprep.subr.mxu0 %v17453_v38  ;;  %v17471_v15 = vand.u32 4294901760, %v17470_v47  ;;  %v182_v38 = vld [vmem:[%s16428_s2 + $0x3e8] sm:$0xff]  ;;  %v179_v47 = vld [vmem:[%s16428_s2 + $0x3d0] sm:$0xff] }
 0x135   :  { %8779 = vmatprep.subr.mxu1 %v11464_v7  ;;  %8750 = vmatpush3.msra.mxu0 %v17454_v32  ;;  %v184_v7 = vld [vmem:[%s16428_s2 + $0x3f8] sm:$0xff]  ;;  %v8318_v63 = vpop.f32.mrf.mxu0  ;;  %v17473_v32 = vand.u32 4294901760, %v11810_v52  ;;  %v17478_v52 = vld [vmem:[#allocation24_spill] sm:$0xff] }
 0x136   :  { %8780 = vmatpush3.msra.mxu1 %v11472_v57  ;;  %8751 = vmatprep.subr.mxu0 %v17455_v1  ;;  %v17458_v57 = vand.u32 4294901760, %v12018_v33  ;;  %v8319_v61 = vadd.f32 %v8318_v63, %v8317_v45  ;;  %v12225_v33 = vand.u32 4294901760, %v184_v7  ;;  %v12260_v1 = vsub.f32 %v168_v25, %v12231_v13  ;;  %v181_v25 = vld [vmem:[%s16428_s2 + $0x3e0] sm:$0xff] }
 0x137   :  { %8781 = vmatprep.subr.mxu1 %v17415_v62  ;;  %2772 = vmatprep.mubr.f32.mxu1 %v17456_v44  ;;  %v17460_v62 = vand.u32 4294901760, %v17420_v36  ;;  %v17466_v36 = vld [vmem:[#allocation30_spill] sm:$0xff] }
 0x138   :  { %8752 = vmatpush3.msra.mxu0 %v17457_v31  ;;  %8782 = vmatpush3.msra.mxu1 %v17417_v42  ;;  %17462 = vst [vmem:[#allocation35_spill] sm:$0xff] %v12225_v33  ;;  %v1110_v42 = vadd.f32 %v8319_v61, %v12144_v41  ;;  %v17468_v41 = vld [vmem:[#allocation33_spill] sm:$0xff]  ;;  %v17481_v61 = vand.u32 4294901760, %v11936_v6 }
 0x139   :  { %2776 = vmatmul.mubr.f32.gmra.mxu1 %v17458_v57  ;;  %8753 = vmatprep.subr.mxu0 %v17459_v27  ;;  %v8320_v23 = vpop.f32.mrf.mxu0  ;;  %v17469_v3 = vand.u32 4294901760, %v17468_v41  ;;  %v17474_v31 = vld [vmem:[#allocation37_spill] sm:$0xff]  ;;  %v17479_v57 = vand.u32 4294901760, %v17478_v52  ;;  %v12274_v27 = vand.u32 4294901760, %v182_v38  ;;  %v17486_v41 = vand.u32 4294901760, %v11970_v5 }
 0x13a   :  { %8783 = vmatprep.subr.mxu1 %v17419_v19  ;;  %8754 = vmatpush3.msra.mxu0 %v17460_v62  ;;  %v183_v19 = vld [vmem:[%s16428_s2 + $0x3f0] sm:$0xff]  ;;  %v180_v6 = vld [vmem:[%s16428_s2 + $0x3d8] sm:$0xff]  ;;  %v17489_v5 = vand.u32 4294901760, %v11913_v50  ;;  %v12355_v52 = vand.u32 4294901760, %v179_v47 }
 0x13b   :  { %8784 = vmatpush3.msra.mxu1 %v17421_v8  ;;  %8755 = vmatprep.subr.mxu0 %v17461_v14  ;;  %v17467_v8 = vand.u32 4294901760, %v17466_v36  ;;  %v8321_v20 = vpop.f32.mrf.mxu0  ;;  %17480 = vst [vmem:[#allocation19_spill] sm:$0xff] %v12274_v27  ;;  %v17483_v36 = vld [vmem:[#allocation14_spill] sm:$0xff] }
 0x13c   :  { %8785 = vmatprep.subr.mxu1 %v17423_v11  ;;  %8756 = vmatpush3.msra.mxu0 %v17464_v43  ;;  %v167_v11 = vld [vmem:[%s16428_s2 + $0x370] sm:$0xff]  ;;  %v8322_v60 = vadd.f32 %v8321_v20, %v8320_v23  ;;  %v164_v23 = vld [vmem:[%s16428_s2 + $0x358] sm:$0xff]  ;;  %17494 = vst [vmem:[#allocation17_spill] sm:$0xff] %v12355_v52 }
 0x13d   :  { %8786 = vmatpush3.msra.mxu1 %v17425_v56  ;;  %8757 = vmatprep.subr.mxu0 %v17467_v8  ;;  %v12248_v56 = vand.u32 4294901760, %v183_v19  ;;  %v8355_v44 = vpop.f32.mrf.mxu1  ;;  %v12269_v63 = vand.u32 4294901760, %v167_v11  ;;  %v17484_v8 = vand.u32 4294901760, %v17483_v36  ;;  %v17485_v20 = vld [vmem:[#allocation8_spill] sm:$0xff]  ;;  %v177_v36 = vld [vmem:[%s16428_s2 + $0x3c0] sm:$0xff] }
 0x13e   :  { %8787 = vmatprep.subr.mxu1 %v17427_v4  ;;  %8758 = vmatpush3.msra.mxu0 %v17469_v3  ;;  %v12254_v4 = vsub.f32 %v184_v7, %v12225_v33  ;;  %v1117_v45 = vadd.f32 %v8322_v60, %v12156_v35  ;;  %v17475_v7 = vand.u32 4294901760, %v17474_v31  ;;  %v17491_v31 = vand.u32 4294901760, %v11991_v30 }
 0x13f   :  { %8788 = vmatpush3.msra.mxu1 %v17429_v2  ;;  %8759 = vmatprep.subr.mxu0 %v17471_v15  ;;  %17472 = vst [vmem:[#allocation12_spill] sm:$0xff] %v12248_v56  ;;  %v166_v2 = vld [vmem:[%s16428_s2 + $0x368] sm:$0xff]  ;;  %17476 = vst [vmem:[#allocation28_spill] sm:$0xff] %v12269_v63  ;;  %v8356_v35 = vpop.f32.mrf.mxu1  ;;  %v12292_v43 = vsub.f32 %v183_v19, %v12248_v56  ;;  %v12305_v3 = vsub.f32 %v167_v11, %v12269_v63  ;;  %v12307_v19 = vand.u32 4294901760, %v181_v25  ;;  %v163_v15 = vld [vmem:[%s16428_s2 + $0x350] sm:$0xff] }
 0x140   :  { %8789 = vmatprep.subr.mxu1 %v17431_v10  ;;  %8760 = vmatpush3.msra.mxu0 %v17473_v32  ;;  %v17477_v10 = vld [vmem:[#allocation25_spill] sm:$0xff]  ;;  %v12285_v62 = vand.u32 4294901760, %v166_v2  ;;  %v16680_v14 = vand.u32 4294901760, %v12254_v4  ;;  %v8357_v12 = vadd.f32 %v8356_v35, %v8355_v44  ;;  %v12322_v11 = vand.u32 4294901760, %v164_v23 }
 0x141   :  { %8790 = vmatpush3.msra.mxu1 %v17432_v37  ;;  %8761 = vmatprep.subr.mxu0 %v17475_v7  ;;  %v165_v37 = vld [vmem:[%s16428_s2 + $0x360] sm:$0xff]  ;;  %17487 = vst [vmem:[#allocation3_spill] sm:$0xff] %v12307_v19  ;;  %v8358_v32 = vpop.f32.mrf.mxu1  ;;  %v12328_v44 = vsub.f32 %v182_v38, %v12274_v27  ;;  %v162_v38 = vld [vmem:[%s16428_s2 + $0x348] sm:$0xff]  ;;  %v17493_v30 = vand.u32 4294901760, %v11962_v9  ;;  %v16676_v9 = vand.u32 4294901760, %v12305_v3 }
 0x142   :  { %8791 = vmatprep.subr.mxu1 %v17477_v10  ;;  %8762 = vmatpush3.msra.mxu0 %v17479_v57  ;;  %17482 = vst [vmem:[#allocation9_spill] sm:$0xff] %v12285_v62  ;;  %v12311_v60 = vadd.f32 %v8357_v12, %v1110_v42  ;;  %17490 = vst [vmem:[#allocation2_spill] sm:$0xff] %v12322_v11  ;;  %v178_v42 = vld [vmem:[%s16428_s2 + $0x3c8] sm:$0xff]  ;;  %v12334_v7 = vsub.f32 %v166_v2, %v12285_v62  ;;  %v16677_v10 = vand.u32 4294901760, %v12292_v43 }
 0x143   :  { %8792 = vmatpush3.msra.mxu1 %v17434_v29  ;;  %8763 = vmatprep.subr.mxu0 %v17481_v61  ;;  %v16678_v29 = vand.u32 4294901760, %v12260_v1  ;;  %v12341_v50 = vsub.f32 %v12254_v4, %v16680_v14  ;;  %v12357_v57 = vand.u32 4294901760, %v163_v15  ;;  %v17496_v61 = vand.u32 4294901760, %v12022_v48  ;;  %v17515_v14 = vld [vmem:[#allocation15_spill] sm:$0xff] }
 0x144   :  { %8793 = vmatprep.subr.mxu1 %v17435_v49  ;;  %8764 = vmatpush3.msra.mxu0 %v17484_v8  ;;  %v12309_v49 = vand.u32 4294901760, %v165_v37  ;;  %v12366_v12 = vand.u32 4294901760, %v178_v42  ;;  %v12372_v8 = vsub.f32 %v181_v25, %v12307_v19  ;;  %v12378_v48 = vsub.f32 %v164_v23, %v12322_v11  ;;  %v161_v23 = vld [vmem:[%s16428_s2 + $0x340] sm:$0xff] }
 0x145   :  { %8794 = vmatpush3.msra.mxu1 %v17485_v20  ;;  %8765 = vmatprep.subr.mxu0 %v17486_v41  ;;  %v12353_v2 = vsub.f32 %v12260_v1, %v16678_v29  ;;  %17495 = vst [vmem:[#allocation21_spill] sm:$0xff] %v12357_v57  ;;  %v12381_v20 = vand.u32 4294901760, %v162_v38  ;;  %v17517_v29 = vld [vmem:[#allocation32_spill] sm:$0xff] }
 0x146   :  { %17488 = vst [vmem:[#allocation10_spill] sm:$0xff] %v12309_v49  ;;  %8795 = vmatprep.subr.mxu1 %v17437_v28  ;;  %8766 = vmatpush3.msra.mxu0 %v17489_v5  ;;  %v12336_v28 = vand.u32 4294901760, %v180_v6  ;;  %17497 = vst [vmem:[#allocation4_spill] sm:$0xff] %v12366_v12  ;;  %v12406_v5 = vsub.f32 %v163_v15, %v12357_v57 }
 0x147   :  { %8796 = vmatpush3.msra.mxu1 %v17438_v24  ;;  %8767 = vmatprep.subr.mxu0 %v17491_v31  ;;  %v8359_v24 = vpop.f32.mrf.mxu1  ;;  %17499 = vst [vmem:[#allocation23_spill] sm:$0xff] %v12378_v48  ;;  %17500 = vst [vmem:[#allocation26_spill] sm:$0xff] %v12381_v20  ;;  %v12408_v31 = vand.u32 4294901760, %v177_v36 }
 0x148   :  { %17492 = vst [vmem:[#allocation18_spill] sm:$0xff] %v12336_v28  ;;  %8797 = vmatprep.subr.mxu1 %v17439_v59  ;;  %8768 = vmatpush3.msra.mxu0 %v17493_v30  ;;  %v8360_v35 = vadd.f32 %v8359_v24, %v8358_v32  ;;  %v12363_v59 = vsub.f32 %v165_v37, %v12309_v49  ;;  %v16675_v37 = vand.u32 4294901760, %v12328_v44  ;;  %v17501_v32 = vand.u32 4294901760, %v12048_v55  ;;  %v176_v24 = vld [vmem:[%s16428_s2 + $0x3b8] sm:$0xff] }
 0x149   :  { %8798 = vmatpush3.msra.mxu1 %v17440_v21  ;;  %8769 = vmatprep.subr.mxu0 %v17496_v61  ;;  %v17498_v21 = vand.u32 4294901760, %v11985_v0  ;;  %v16679_v0 = vand.u32 4294901760, %v12334_v7  ;;  %v17503_v55 = vand.u32 4294901760, %v12031_v17  ;;  %17504 = vst [vmem:[#allocation7_spill] sm:$0xff] %v12406_v5  ;;  %17505 = vst [vmem:[#allocation13_spill] sm:$0xff] %v12408_v31  ;;  %v12414_v30 = vsub.f32 %v179_v47, %v12355_v52  ;;  %v17509_v61 = vld [vmem:[#allocation31_spill] sm:$0xff] }
 0x14a   :  { %8799 = vmatprep.subr.mxu1 %v11827_v34  ;;  %v12383_v41 = vadd.f32 %v8360_v35, %v1117_v45  ;;  %v12392_v34 = vsub.f32 %v12292_v43, %v16677_v10  ;;  %v12399_v45 = vsub.f32 %v180_v6, %v12336_v28  ;;  %v17507_v6 = vld [vmem:[#allocation38_spill] sm:$0xff]  ;;  %v16681_v17 = vand.u32 4294901760, %v12372_v8  ;;  %v160_v35 = vld [vmem:[%s16428_s2 + $0x338] sm:$0xff] }
 0x14b   :  { %8770 = vmatpush3.msra.mxu0 %v17498_v21  ;;  %8800 = vmatpush3.msra.mxu1 %v17441_v22  ;;  %17506 = vst [vmem:[#allocation11_spill] sm:$0xff] %v12414_v30  ;;  %v16682_v15 = vand.u32 4294901760, %v12363_v59  ;;  %v12429_v47 = vsub.f32 %v178_v42, %v12366_v12  ;;  %v12439_v21 = vsub.f32 %v162_v38, %v12381_v20  ;;  %v17521_v25 = vand.u32 4294901760, %v12406_v5 }
 0x14c   :  { %8771 = vmatprep.subr.mxu0 %v17501_v32  ;;  %17502 = vst [vmem:[#allocation5_spill] sm:$0xff] %v12399_v45  ;;  %8801 = vmatprep.subr.mxu1 %v11831_v40  ;;  %v12421_v40 = vsub.f32 %v12305_v3, %v16676_v9  ;;  %v12441_v32 = vand.u32 4294901760, %v161_v23  ;;  %v16684_v38 = vand.u32 4294901760, %v12399_v45  ;;  %v12457_v9 = vand.u32 4294901760, %v160_v35 }
 0x14d   :  { %8772 = vmatpush3.msra.mxu0 %v17503_v55  ;;  %2942 = vmatprep.mubr.f32.mxu0 %v17507_v6  ;;  %17508 = vst [vmem:[#allocation16_spill] sm:$0xff] %v12429_v47  ;;  %17510 = vst [vmem:[#allocation20_spill] sm:$0xff] %v12439_v21  ;;  %v16683_v55 = vand.u32 4294901760, %v12378_v48  ;;  %v12478_v22 = vsub.f32 %v12363_v59, %v16682_v15  ;;  %v159_v15 = vld [vmem:[%s16428_s2 + $0x330] sm:$0xff] }
 0x14e   :  { %8802 = vmatpush3.msra.mxu1 %v11799_v46  ;;  %2944 = vmatmul.mubr.f32.vlgmr.msra.gmra.mxu0 %v17509_v61  ;;  %v12436_v46 = vsub.f32 %v12328_v44, %v16675_v37  ;;  %17511 = vst [vmem:[#allocation36_spill] sm:$0xff] %v12441_v32  ;;  %v12452_v37 = vand.u32 4294901760, %v176_v24  ;;  %17513 = vst [vmem:[#allocation34_spill] sm:$0xff] %v12457_v9  ;;  %v12485_v42 = vsub.f32 %v161_v23, %v12441_v32 }
 0x14f   :  { %8803 = vmatprep.subr.mxu1 %v11864_v51  ;;  %8817 = vmatprep.subr.mxu0 %v12225_v33  ;;  %v12450_v51 = vsub.f32 %v12334_v7, %v16679_v0  ;;  %v12465_v0 = vsub.f32 %v177_v36, %v12408_v31  ;;  %v12502_v23 = vsub.f32 %v12399_v45, %v16684_v38 }
 0x150   :  { %8804 = vmatpush3.msra.mxu1 %v11847_v53  ;;  %17512 = vst [vmem:[#allocation29_spill] sm:$0xff] %v12452_v37  ;;  %8818 = vmatpush3.msra.mxu0 %v12231_v13  ;;  %v175_v53 = vld [vmem:[%s16428_s2 + $0x3b0] sm:$0xff]  ;;  %17516 = vst [vmem:[#allocation30_spill] sm:$0xff] %v12485_v42  ;;  %v12510_v10 = vsub.f32 %v176_v24, %v12452_v37 }
 0x151   :  { %8805 = vmatprep.subr.mxu1 %v11915_v54  ;;  %17514 = vst [vmem:[#allocation22_spill] sm:$0xff] %v12465_v0  ;;  %8819 = vmatprep.subr.mxu0 %v12248_v56  ;;  %v12473_v54 = vsub.f32 %v12372_v8, %v16681_v17  ;;  %v12490_v17 = vsub.f32 %v12378_v48, %v16683_v55  ;;  %v12504_v36 = vand.u32 4294901760, %v175_v53  ;;  %v158_v55 = vld [vmem:[%s16428_s2 + $0x328] sm:$0xff]  ;;  %v17522_v56 = vand.u32 4294901760, %v12429_v47 }
 0x152   :  { %2949 = vmatprep.mubr.f32.mxu0 %v17515_v14  ;;  %8806 = vmatpush3.msra.mxu1 %v11896_v18  ;;  %17518 = vst [vmem:[#allocation33_spill] sm:$0xff] %v12510_v10  ;;  %v17520_v18 = vand.u32 4294901760, %v12414_v30  ;;  %v17539_v48 = vand.u32 4294901760, %v12436_v46  ;;  %v17547_v45 = vand.u32 4294901760, %v12502_v23 }
 0x153   :  { %8820 = vmatpush3.msra.mxu0 %v12269_v63  ;;  %8807 = vmatprep.subr.mxu1 %v11927_v58  ;;  %v12515_v58 = vsub.f32 %v160_v35, %v12457_v9  ;;  %v12525_v63 = vsub.f32 %v12406_v5, %v17521_v25  ;;  %v12540_v25 = vsub.f32 %v12429_v47, %v17522_v56  ;;  %v17523_v35 = vand.u32 4294901760, %v12439_v21  ;;  %v173_v56 = vld [vmem:[%s16428_s2 + $0x3a0] sm:$0xff]  ;;  %v12583_v47 = vld [vmem:[%s16428_s2 + $0x398] sm:$0xff] }
 0x154   :  { %2951 = vmatmul.mubr.f32.gmra.mxu0 %v17517_v29  ;;  %8821 = vmatprep.subr.mxu0 %v12274_v27  ;;  %v12520_v38 = vsub.f32 %v12414_v30, %v17520_v18  ;;  %v157_v27 = vld [vmem:[%s16428_s2 + $0x320] sm:$0xff]  ;;  %v12535_v18 = vand.u32 4294901760, %v159_v15  ;;  %v17543_v33 = vand.u32 4294901760, %v12473_v54 }
 0x155   :  { %8808 = vmatpush3.msra.mxu1 %v11929_v16  ;;  %17519 = vst [vmem:[#allocation27_spill] sm:$0xff] %v12515_v58  ;;  %8822 = vmatpush3.msra.mxu0 %v12285_v62  ;;  %v12548_v16 = vand.u32 4294901760, %v158_v55  ;;  %v12553_v62 = vsub.f32 %v12439_v21, %v17523_v35  ;;  %v12562_v24 = vand.u32 4294901760, %v157_v27  ;;  %v156_v35 = vld [vmem:[%s16428_s2 + $0x318] sm:$0xff]  ;;  %v12569_v21 = vsub.f32 %v175_v53, %v12504_v36 }
 0x156   :  { %8809 = vmatprep.subr.mxu1 %v11977_v26  ;;  %8823 = vmatprep.subr.mxu0 %v12307_v19  ;;  %v174_v26 = vld [vmem:[%s16428_s2 + $0x3a8] sm:$0xff]  ;;  %v17530_v53 = vand.u32 4294901760, %v12485_v42  ;;  %v12615_v5 = vand.u32 4294901760, %v156_v35 }
 0x157   :  { %8810 = vmatpush3.msra.mxu1 %v17449_v39  ;;  %3053 = vmatprep.mubr.f32.mxu1 %v17507_v6  ;;  %17524 = vst [vmem:[#allocation37_spill] sm:$0xff] %v12562_v24  ;;  %17525 = vst [vmem:[#allocation25_spill] sm:$0xff] %v12569_v21  ;;  %v17526_v39 = vand.u32 4294901760, %v12465_v0  ;;  %v12590_v6 = vsub.f32 %v159_v15, %v12535_v18  ;;  %v12592_v19 = vand.u32 4294901760, %v174_v26  ;;  %v17542_v46 = vand.u32 4294901760, %v12569_v21 }
 0x158   :  { %8824 = vmatpush3.msra.mxu0 %v12309_v49  ;;  %3055 = vmatmul.mubr.f32.vlgmr.msra.gmra.mxu1 %v17509_v61  ;;  %v17527_v61 = vand.u32 4294901760, %v12341_v50  ;;  %v32_v50 = vld [vmem:[%s16429_s0 + $0x38] sm:$0xff]  ;;  %v12607_v15 = vsub.f32 %v158_v55, %v12548_v16  ;;  %v8393_v30 = vpop.f32.mrf.mxu0  ;;  %v12624_v55 = vsub.f32 %v157_v27, %v12562_v24  ;;  %v17534_v27 = vand.u32 4294901760, %v12421_v40 }
 0x159   :  { %8825 = vmatprep.subr.mxu0 %v12336_v28  ;;  %v12578_v49 = vsub.f32 %v12465_v0, %v17526_v39  ;;  %v12595_v28 = vand.u32 4294901760, %v173_v56  ;;  %v155_v0 = vld [vmem:[%s16428_s2 + $0x310] sm:$0xff]  ;;  %3060 = vmatprep.mubr.f32.mxu1 %v17515_v14  ;;  %v12627_v39 = vand.u32 4294901760, %v12583_v47 }
 0x15a   :  { %8855 = vmatprep.subr.mxu1 %v17527_v61  ;;  %8826 = vmatpush3.msra.mxu0 %v12322_v11  ;;  %v17528_v61 = vand.u32 4294901760, %v12353_v2  ;;  %17529 = vst [vmem:[#allocation24_spill] sm:$0xff] %v12607_v15  ;;  %v12613_v11 = vsub.f32 %v12485_v42, %v17530_v53  ;;  %v31_v2 = vld [vmem:[%s16429_s0 + $0x30] sm:$0xff]  ;;  %v17533_v53 = vand.u32 4294901760, %v12510_v10 }
 0x15b   :  { %8827 = vmatprep.subr.mxu0 %v12355_v52  ;;  %17532 = vst [vmem:[#allocation14_spill] sm:$0xff] %v12627_v39  ;;  %v12637_v42 = vld [vmem:[%s16428_s2 + $0x390] sm:$0xff]  ;;  %v12667_v14 = vand.u32 4294901760, %v31_v2  ;;  %v12680_v40 = vsub.f32 %v173_v56, %v12595_v28 }
 0x15c   :  { %8856 = vmatpush3.msra.mxu1 %v17528_v61  ;;  %v17531_v61 = vand.u32 4294901760, %v12392_v34  ;;  %v12632_v52 = vsub.f32 %v12510_v10, %v17533_v53  ;;  %8828 = vmatpush3.msra.mxu0 %v12357_v57  ;;  %v12649_v53 = vand.u32 4294901760, %v155_v0  ;;  %v12654_v10 = vld [vmem:[%s16428_s2 + $0x388] sm:$0xff]  ;;  %v12656_v34 = vand.u32 4294901760, %v32_v50  ;;  %v8394_v57 = vpop.f32.mrf.mxu0 }
 0x15d   :  { %3062 = vmatmul.mubr.f32.gmra.mxu1 %v17517_v29  ;;  %8829 = vmatprep.subr.mxu0 %v12366_v12  ;;  %17538 = vst [vmem:[#allocation31_spill] sm:$0xff] %v12667_v14  ;;  %v12674_v12 = vsub.f32 %v156_v35, %v12615_v5  ;;  %v12692_v35 = vsub.f32 %v12569_v21, %v17542_v46  ;;  %v12695_v29 = vand.u32 4294901760, %v12654_v10  ;;  %v169_v46 = vld [vmem:[%s16428_s2 + $0x380] sm:$0xff] }
 0x15e   :  { %8857 = vmatprep.subr.mxu1 %v17531_v61  ;;  %v17535_v61 = vand.u32 4294901760, %v12515_v58  ;;  %17536 = vst [vmem:[#allocation8_spill] sm:$0xff] %v12656_v34  ;;  %8830 = vmatpush3.msra.mxu0 %v12381_v20  ;;  %v8396_v20 = vpop.f32.mrf.mxu0  ;;  %v12716_v54 = vsub.f32 %v32_v50, %v12656_v34  ;;  %v12748_v23 = vand.u32 4294901760, %v169_v46 }
 0x15f   :  { %8858 = vmatpush3.msra.mxu1 %v17534_v27  ;;  %v12662_v27 = vsub.f32 %v174_v26, %v12592_v19  ;;  %v12677_v26 = vand.u32 4294901760, %v12637_v42  ;;  %8831 = vmatprep.subr.mxu0 %v12408_v31  ;;  %v12731_v31 = vsub.f32 %v31_v2, %v12667_v14  ;;  %v17548_v2 = vand.u32 4294901760, %v12490_v17 }
 0x160   :  { %v12647_v13 = vsub.f32 %v12515_v58, %v17535_v61  ;;  %v154_v61 = vld [vmem:[%s16428_s2 + $0x308] sm:$0xff]  ;;  %v8395_v58 = vadd.f32 %v8394_v57, %v8393_v30  ;;  %8859 = vmatprep.subr.mxu1 %v17539_v48  ;;  %v48_v57 = vld [vmem:[%s16429_s0 + $0xb8] sm:$0xff]  ;;  %v17541_v30 = vand.u32 4294901760, %v12450_v51  ;;  %8832 = vmatpush3.msra.mxu0 %v12441_v32  ;;  %v8397_v21 = vpop.f32.mrf.mxu0 }
 0x161   :  { %17537 = vst [vmem:[#allocation38_spill] sm:$0xff] %v12662_v27  ;;  %17540 = vst [vmem:[#allocation15_spill] sm:$0xff] %v12677_v26  ;;  %v12707_v48 = vand.u32 4294901760, %v154_v61  ;;  %8833 = vmatprep.subr.mxu0 %v12452_v37  ;;  %v12733_v50 = vand.u32 4294901760, %v48_v57  ;;  %v8398_v32 = vadd.f32 %v8397_v21, %v8396_v20  ;;  %v3374_v37 = vand.u32 4294901760, %v12692_v35  ;;  %3419 = vmatprep.mubr.f32.mxu1 %v12656_v34  ;;  %v17590_v34 = vld [vmem:[#allocation2_spill] sm:$0xff] }
 0x162   :  { %8860 = vmatpush3.msra.mxu1 %v17541_v30  ;;  %v12698_v56 = vadd.f32 %v8395_v58, %v12311_v60  ;;  %v12705_v30 = vsub.f32 %v155_v0, %v12649_v53  ;;  %v153_v60 = vld [vmem:[%s16428_s2 + $0x300] sm:$0xff]  ;;  %v17544_v0 = vand.u32 4294901760, %v12478_v22  ;;  %v17545_v58 = vand.u32 4294901760, %v12590_v6  ;;  %8834 = vmatpush3.msra.mxu0 %v12457_v9  ;;  %v8431_v35 = vpop.f32.mrf.mxu1 }
 0x163   :  { %8861 = vmatprep.subr.mxu1 %v17543_v33  ;;  %v47_v33 = vld [vmem:[%s16429_s0 + $0xb0] sm:$0xff]  ;;  %17546 = vst [vmem:[#allocation32_spill] sm:$0xff] %v12733_v50  ;;  %v16743_v22 = vand.u32 4294901760, %v12607_v15  ;;  %8835 = vmatprep.subr.mxu0 %v12504_v36  ;;  %v12764_v21 = vadd.f32 %v8398_v32, %v12383_v41  ;;  %v12775_v20 = vsub.f32 %v48_v57, %v12733_v50 }
 0x164   :  { %8862 = vmatpush3.msra.mxu1 %v17544_v0  ;;  %v12727_v51 = vsub.f32 %v12590_v6, %v17545_v58  ;;  %v12742_v58 = vsub.f32 %v12583_v47, %v12627_v39  ;;  %v12752_v9 = vand.u32 4294901760, %v47_v33  ;;  %v17550_v0 = vand.u32 4294901760, %v12520_v38  ;;  %8836 = vmatpush3.msra.mxu0 %v12535_v18 }
 0x165   :  { %8863 = vmatprep.subr.mxu1 %v17547_v45  ;;  %v12750_v45 = vand.u32 4294901760, %v153_v60  ;;  %v12761_v47 = vsub.f32 %v12637_v42, %v12677_v26  ;;  %8837 = vmatprep.subr.mxu0 %v12592_v19  ;;  %v17552_v42 = vand.u32 4294901760, %v12540_v25  ;;  %v3268_v32 = vsub.f32 %v12607_v15, %v16743_v22 }
 0x166   :  { %8864 = vmatpush3.msra.mxu1 %v17548_v2  ;;  %17549 = vst [vmem:[#allocation39_spill] sm:$0xff] %v12752_v9  ;;  %v17551_v2 = vand.u32 4294901760, %v12525_v63  ;;  %v3262_v38 = vand.u32 4294901760, %v12727_v51  ;;  %8838 = vmatpush3.msra.mxu0 %v12548_v16  ;;  %v17553_v63 = vand.u32 4294901760, %v12662_v27  ;;  %v17555_v25 = vand.u32 4294901760, %v12553_v62 }
 0x167   :  { %8865 = vmatprep.subr.mxu1 %v17550_v0  ;;  %v12771_v0 = vsub.f32 %v154_v61, %v12707_v48  ;;  %v17554_v61 = vand.u32 4294901760, %v12680_v40  ;;  %8839 = vmatprep.subr.mxu0 %v12595_v28  ;;  %v12799_v22 = vsub.f32 %v12654_v10, %v12695_v29  ;;  %v12805_v62 = vsub.f32 %v153_v60, %v12750_v45 }
 0x168   :  { %8866 = vmatpush3.msra.mxu1 %v17551_v2  ;;  %v3380_v41 = vsub.f32 %v12662_v27, %v17553_v63  ;;  %v8432_v2 = vpop.f32.mrf.mxu1  ;;  %v12795_v63 = vsub.f32 %v47_v33, %v12752_v9  ;;  %8840 = vmatpush3.msra.mxu0 %v12562_v24  ;;  %v17558_v33 = vand.u32 4294901760, %v12624_v55  ;;  %v17561_v10 = vand.u32 4294901760, %v12632_v52 }
 0x169   :  { %8867 = vmatprep.subr.mxu1 %v17552_v42  ;;  %v3387_v51 = vsub.f32 %v12680_v40, %v17554_v61  ;;  %v8433_v17 = vadd.f32 %v8432_v2, %v8431_v35  ;;  %v17556_v61 = vand.u32 4294901760, %v12578_v49  ;;  %v17559_v35 = vand.u32 4294901760, %v12613_v11  ;;  %8841 = vmatprep.subr.mxu0 %v12627_v39 }
 0x16a   :  { %8868 = vmatpush3.msra.mxu1 %v17555_v25  ;;  %v17557_v25 = vand.u32 4294901760, %v12716_v54  ;;  %v3275_v57 = vsub.f32 %v12624_v55, %v17558_v33  ;;  %v17560_v49 = vand.u32 4294901760, %v12731_v31  ;;  %v8434_v33 = vpop.f32.mrf.mxu1  ;;  %8842 = vmatpush3.msra.mxu0 %v12615_v5  ;;  %v3381_v11 = vand.u32 4294901760, %v3380_v41 }
 0x16b   :  { %8869 = vmatprep.subr.mxu1 %v17556_v61  ;;  %v12822_v61 = vsub.f32 %v169_v46, %v12748_v23  ;;  %v17562_v39 = vand.u32 4294901760, %v12742_v58  ;;  %v17563_v46 = vand.u32 4294901760, %v12647_v13  ;;  %8843 = vmatprep.subr.mxu0 %v12677_v26  ;;  %v17565_v2 = vand.u32 4294901760, %v12761_v47 }
 0x16c   :  { %v3166_v42 = vsub.f32 %v12716_v54, %v17557_v25  ;;  %8870 = vmatpush3.msra.mxu1 %v17559_v35  ;;  %v3172_v60 = vsub.f32 %v12731_v31, %v17560_v49  ;;  %v12825_v25 = vadd.f32 %v8433_v17, %v12698_v56  ;;  %v3269_v35 = vand.u32 4294901760, %v3268_v32  ;;  %v8435_v32 = vpop.f32.mrf.mxu1  ;;  %8844 = vmatpush3.msra.mxu0 %v12649_v53 }
 0x16d   :  { %8871 = vmatprep.subr.mxu1 %v17561_v10  ;;  %v3394_v49 = vsub.f32 %v12742_v58, %v17562_v39  ;;  %v3388_v56 = vand.u32 4294901760, %v3387_v51  ;;  %v17564_v17 = vand.u32 4294901760, %v12674_v12  ;;  %v3276_v39 = vand.u32 4294901760, %v3275_v57  ;;  %8845 = vmatprep.subr.mxu0 %v12695_v29 }
 0x16e   :  { %8872 = vmatpush3.msra.mxu1 %v17563_v46  ;;  %v3401_v13 = vsub.f32 %v12761_v47, %v17565_v2  ;;  %v8436_v51 = vadd.f32 %v8435_v32, %v8434_v33  ;;  %v3173_v26 = vand.u32 4294901760, %v3172_v60  ;;  %v17566_v10 = vand.u32 4294901760, %v12775_v20  ;;  %8846 = vmatpush3.msra.mxu0 %v12707_v48 }
 0x16f   :  { %v3282_v52 = vsub.f32 %v12674_v12, %v17564_v17  ;;  %8873 = vmatprep.subr.mxu1 %v3374_v37  ;;  %v3167_v17 = vand.u32 4294901760, %v3166_v42  ;;  %v16749_v37 = vand.u32 4294901760, %v12822_v61  ;;  %v3395_v57 = vand.u32 4294901760, %v3394_v49  ;;  %8847 = vmatprep.subr.mxu0 %v12748_v23 }
 0x170   :  { %8874 = vmatpush3.msra.mxu1 %v3262_v38  ;;  %v3181_v41 = vsub.f32 %v12775_v20, %v17566_v10  ;;  %v17567_v2 = vand.u32 4294901760, %v12705_v30  ;;  %v16748_v38 = vand.u32 4294901760, %v12805_v62  ;;  %v12858_v33 = vadd.f32 %v8436_v51, %v12764_v21  ;;  %8848 = vmatpush3.msra.mxu0 %v12750_v45 }
 0x171   :  { %8875 = vmatprep.subr.mxu1 %v3381_v11  ;;  %v3283_v42 = vand.u32 4294901760, %v3282_v52  ;;  %v17568_v60 = vand.u32 4294901760, %v12795_v63  ;;  %v17569_v10 = vand.u32 4294901760, %v12799_v22  ;;  %v3402_v32 = vand.u32 4294901760, %v3401_v13  ;;  %3168 = vmatprep.mubr.f32.mxu0 %v3167_v17  ;;  %v17572_v17 = vld [vmem:[#allocation35_spill] sm:$0xff] }
 0x172   :  { %v3289_v46 = vsub.f32 %v12705_v30, %v17567_v2  ;;  %8876 = vmatpush3.msra.mxu1 %v3269_v35  ;;  %v17570_v2 = vand.u32 4294901760, %v12771_v0  ;;  %v3182_v35 = vand.u32 4294901760, %v3181_v41  ;;  %v3415_v52 = vsub.f32 %v12822_v61, %v16749_v37  ;;  %3174 = vmatmul.mubr.f32.vlgmr.msra.gmra.mxu0 %v3173_v26  ;;  %v17586_v37 = vld [vmem:[#allocation10_spill] sm:$0xff] }
 0x173   :  { %v3187_v11 = vsub.f32 %v12795_v63, %v17568_v60  ;;  %v3408_v49 = vsub.f32 %v12799_v22, %v17569_v10  ;;  %8877 = vmatprep.subr.mxu1 %v3388_v56  ;;  %v3303_v56 = vsub.f32 %v12805_v62, %v16748_v38  ;;  %8893 = vmatprep.subr.mxu0 %v12254_v4  ;;  %v17585_v38 = vld [vmem:[#allocation30_spill] sm:$0xff] }
 0x174   :  { %v3296_v21 = vsub.f32 %v12771_v0, %v17570_v2  ;;  %8878 = vmatpush3.msra.mxu1 %v3276_v39  ;;  %v3290_v51 = vand.u32 4294901760, %v3289_v46  ;;  %8894 = vmatpush3.msra.mxu0 %v12260_v1  ;;  %v3416_v39 = vand.u32 4294901760, %v3415_v52  ;;  %v17571_v46 = vld [vmem:[#allocation5_spill] sm:$0xff]  ;;  %v17578_v2 = vld [vmem:[#allocation28_spill] sm:$0xff] }
 0x175   :  { %8879 = vmatprep.subr.mxu1 %v3395_v57  ;;  %v3188_v13 = vand.u32 4294901760, %v3187_v11  ;;  %v3409_v60 = vand.u32 4294901760, %v3408_v49  ;;  %8895 = vmatprep.subr.mxu0 %v12292_v43  ;;  %v3304_v26 = vand.u32 4294901760, %v3303_v56  ;;  %v17573_v57 = vld [vmem:[#allocation23_spill] sm:$0xff]  ;;  %v17576_v49 = vld [vmem:[#allocation12_spill] sm:$0xff] }
 0x176   :  { %8880 = vmatpush3.msra.mxu1 %v3283_v42  ;;  %v3297_v41 = vand.u32 4294901760, %v3296_v21  ;;  %3183 = vmatprep.mubr.f32.mxu0 %v3182_v35  ;;  %v17574_v42 = vld [vmem:[#allocation6_spill] sm:$0xff]  ;;  %v17575_v11 = vld [vmem:[#allocation11_spill] sm:$0xff]  ;;  %v17579_v35 = vld [vmem:[#allocation16_spill] sm:$0xff] }
 0x177   :  { %8881 = vmatprep.subr.mxu1 %v3402_v32  ;;  %8896 = vmatpush3.msra.mxu0 %v12305_v3  ;;  %v17577_v32 = vld [vmem:[#allocation7_spill] sm:$0xff]  ;;  %v17581_v56 = vld [vmem:[#allocation20_spill] sm:$0xff] }
 0x178   :  { %8882 = vmatpush3.msra.mxu1 %v3290_v51  ;;  %3189 = vmatmul.mubr.f32.gmra.mxu0 %v3188_v13  ;;  %v17580_v51 = vld [vmem:[#allocation19_spill] sm:$0xff]  ;;  %v17582_v13 = vld [vmem:[#allocation9_spill] sm:$0xff] }
 0x179   :  { %8883 = vmatprep.subr.mxu1 %v3409_v60  ;;  %8897 = vmatprep.subr.mxu0 %v12328_v44  ;;  %v17583_v60 = vld [vmem:[#allocation22_spill] sm:$0xff] }
 0x17a   :  { %8884 = vmatpush3.msra.mxu1 %v3297_v41  ;;  %8898 = vmatpush3.msra.mxu0 %v12334_v7 }
 0x17b   :  { %8885 = vmatprep.subr.mxu1 %v3416_v39  ;;  %8899 = vmatprep.subr.mxu0 %v12372_v8 }
 0x17c   :  { %8886 = vmatpush3.msra.mxu1 %v3304_v26  ;;  %8900 = vmatpush3.msra.mxu0 %v12363_v59  ;;  %v8469_v10 = vpop.f32.mrf.mxu0  ;;  %v17584_v26 = vld [vmem:[#allocation3_spill] sm:$0xff] }
 0x17d   :  { %3421 = vmatmul.mubr.f32.vlgmr.msra.gmra.mxu1 %v12667_v14  ;;  %8901 = vmatprep.subr.mxu0 %v17571_v46 }
 0x17e   :  { %8931 = vmatprep.subr.mxu1 %v17572_v17  ;;  %8902 = vmatpush3.msra.mxu0 %v17573_v57  ;;  %v8470_v21 = vpop.f32.mrf.mxu0 }
 0x17f   :  { %8932 = vmatpush3.msra.mxu1 %v17574_v42  ;;  %8903 = vmatprep.subr.mxu0 %v17575_v11  ;;  %v8471_v52 = vadd.f32 %v8470_v21, %v8469_v10  ;;  %v17588_v21 = vld [vmem:[#allocation18_spill] sm:$0xff] }
 0x180   :  { %8933 = vmatprep.subr.mxu1 %v17576_v49  ;;  %3426 = vmatprep.mubr.f32.mxu1 %v12733_v50  ;;  %v17589_v50 = vld [vmem:[#allocation27_spill] sm:$0xff] }
 0x181   :  { %8904 = vmatpush3.msra.mxu0 %v17577_v32  ;;  %8934 = vmatpush3.msra.mxu1 %v17578_v2  ;;  %v1732_v41 = vadd.f32 %v8471_v52, %v12825_v25  ;;  %v17592_v25 = vld [vmem:[#allocation17_spill] sm:$0xff] }
 0x182   :  { %3428 = vmatmul.mubr.f32.gmra.mxu1 %v12752_v9  ;;  %8905 = vmatprep.subr.mxu0 %v17579_v35  ;;  %v8472_v39 = vpop.f32.mrf.mxu0  ;;  %v17587_v9 = vld [vmem:[#allocation33_spill] sm:$0xff] }
 0x183   :  { %8935 = vmatprep.subr.mxu1 %v17580_v51  ;;  %8906 = vmatpush3.msra.mxu0 %v17581_v56 }
 0x184   :  { %8936 = vmatpush3.msra.mxu1 %v17582_v13  ;;  %8907 = vmatprep.subr.mxu0 %v17583_v60  ;;  %v8473_v10 = vpop.f32.mrf.mxu0  ;;  %v17591_v60 = vld [vmem:[#allocation25_spill] sm:$0xff] }
 0x185   :  { %8937 = vmatprep.subr.mxu1 %v17584_v26  ;;  %8908 = vmatpush3.msra.mxu0 %v17585_v38  ;;  %v8474_v14 = vadd.f32 %v8473_v10, %v8472_v39  ;;  %v17595_v10 = vld [vmem:[#allocation26_spill] sm:$0xff] }
 0x186   :  { %8938 = vmatpush3.msra.mxu1 %v17586_v37  ;;  %8909 = vmatprep.subr.mxu0 %v17587_v9  ;;  %v8507_v38 = vpop.f32.mrf.mxu1  ;;  %v17593_v37 = vld [vmem:[#allocation21_spill] sm:$0xff]  ;;  %v17594_v9 = vld [vmem:[#allocation4_spill] sm:$0xff] }
 0x187   :  { %8939 = vmatprep.subr.mxu1 %v17588_v21  ;;  %8910 = vmatpush3.msra.mxu0 %v17589_v50  ;;  %v1741_v52 = vadd.f32 %v8474_v14, %v12858_v33  ;;  %v17597_v14 = vld [vmem:[#allocation36_spill] sm:$0xff] }
 0x188   :  { %8940 = vmatpush3.msra.mxu1 %v17590_v34  ;;  %8911 = vmatprep.subr.mxu0 %v17591_v60  ;;  %v8508_v39 = vpop.f32.mrf.mxu1 }
 0x189   :  { %8941 = vmatprep.subr.mxu1 %v17592_v25  ;;  %8912 = vmatpush3.msra.mxu0 %v12590_v6  ;;  %v8509_v60 = vadd.f32 %v8508_v39, %v8507_v38  ;;  %v17596_v25 = vld [vmem:[#allocation13_spill] sm:$0xff] }
 0x18a   :  { %8942 = vmatpush3.msra.mxu1 %v17593_v37  ;;  %8913 = vmatprep.subr.mxu0 %v12662_v27 }
 0x18b   :  { %8943 = vmatprep.subr.mxu1 %v17594_v9  ;;  %8914 = vmatpush3.msra.mxu0 %v12607_v15  ;;  %v12924_v33 = vadd.f32 %v8509_v60, %v1732_v41  ;;  %v17598_v9 = vld [vmem:[#allocation29_spill] sm:$0xff]  ;;  %v17599_v15 = vld [vmem:[#allocation34_spill] sm:$0xff]  ;;  %v17601_v41 = vand.u32 4294901760, %v12254_v4  ;;  %v17606_v4 = vand.u32 4294901760, %v12328_v44  ;;  %v17611_v44 = vand.u32 4294901760, %v12731_v31 }
 0x18c   :  { %8944 = vmatpush3.msra.mxu1 %v17595_v10  ;;  %8915 = vmatprep.subr.mxu0 %v12680_v40  ;;  %v8510_v27 = vpop.f32.mrf.mxu1 }
 0x18d   :  { %8945 = vmatprep.subr.mxu1 %v17596_v25  ;;  %8916 = vmatpush3.msra.mxu0 %v12624_v55 }
 0x18e   :  { %8946 = vmatpush3.msra.mxu1 %v17597_v14  ;;  %8917 = vmatprep.subr.mxu0 %v12742_v58  ;;  %v8511_v38 = vpop.f32.mrf.mxu1 }
 0x18f   :  { %8947 = vmatprep.subr.mxu1 %v17598_v9  ;;  %8918 = vmatpush3.msra.mxu0 %v12674_v12  ;;  %v8512_v39 = vadd.f32 %v8511_v38, %v8510_v27  ;;  %v17600_v27 = vld [vmem:[#allocation14_spill] sm:$0xff]  ;;  %v17603_v38 = vld [vmem:[#allocation15_spill] sm:$0xff] }
 0x190   :  { %8948 = vmatpush3.msra.mxu1 %v17599_v15  ;;  %8919 = vmatprep.subr.mxu0 %v12761_v47 }
 0x191   :  { %8949 = vmatprep.subr.mxu1 %v12504_v36  ;;  %8920 = vmatpush3.msra.mxu0 %v12705_v30  ;;  %v12936_v60 = vadd.f32 %v8512_v39, %v1741_v52  ;;  %v17602_v52 = vand.u32 4294901760, %v12260_v1  ;;  %v17604_v39 = vand.u32 4294901760, %v12292_v43  ;;  %v17607_v1 = vand.u32 4294901760, %v12334_v7 }
 0x192   :  { %8950 = vmatpush3.msra.mxu1 %v12535_v18  ;;  %8921 = vmatprep.subr.mxu0 %v12799_v22  ;;  %v17608_v43 = vand.u32 4294901760, %v12372_v8  ;;  %v17613_v7 = vand.u32 4294901760, %v17573_v57  ;;  %v17614_v8 = vand.u32 4294901760, %v17575_v11 }
 0x193   :  { %8951 = vmatprep.subr.mxu1 %v12592_v19  ;;  %8922 = vmatpush3.msra.mxu0 %v12771_v0 }
 0x194   :  { %8952 = vmatpush3.msra.mxu1 %v12548_v16  ;;  %8923 = vmatprep.subr.mxu0 %v12822_v61 }
 0x195   :  { %8953 = vmatprep.subr.mxu1 %v12595_v28  ;;  %8924 = vmatpush3.msra.mxu0 %v12805_v62 }
 0x196   :  { %3563 = vmatprep.mubr.f32.mxu0 %v12716_v54  ;;  %8954 = vmatpush3.msra.mxu1 %v12562_v24  ;;  %v17605_v24 = vand.u32 4294901760, %v12305_v3  ;;  %v17609_v3 = vand.u32 4294901760, %v12716_v54 }
 0x197   :  { %3566 = vmatmul.mubr.f32.vlgmr.msra.gmra.mxu0 %v12731_v31  ;;  %8955 = vmatprep.subr.mxu1 %v17600_v27  ;;  %v216_v31 = vld [vmem:[%s16428_s2 + $0x4f8] sm:$0xff] }
 0x198   :  { %8969 = vmatprep.subr.mxu0 %v17601_v41  ;;  %8956 = vmatpush3.msra.mxu1 %v12615_v5  ;;  %v17612_v41 = vand.u32 4294901760, %v17571_v46  ;;  %v17616_v46 = vand.u32 4294901760, %v17577_v32  ;;  %v13002_v32 = vand.u32 4294901760, %v216_v31 }
 0x199   :  { %8970 = vmatpush3.msra.mxu0 %v17602_v52  ;;  %8957 = vmatprep.subr.mxu1 %v17603_v38 }
 0x19a   :  { %8971 = vmatprep.subr.mxu0 %v17604_v39  ;;  %3572 = vmatprep.mubr.f32.mxu0 %v12775_v20  ;;  %17620 = vst [vmem:[#allocation5_spill] sm:$0xff] %v13002_v32 }
 0x19b   :  { %8958 = vmatpush3.msra.mxu1 %v12649_v53  ;;  %8972 = vmatpush3.msra.mxu0 %v17605_v24  ;;  %v17610_v24 = vand.u32 4294901760, %v12363_v59  ;;  %v17615_v59 = vand.u32 4294901760, %v12775_v20  ;;  %v17618_v20 = vand.u32 4294901760, %v17579_v35  ;;  %v17624_v35 = vld [vmem:[#allocation30_spill] sm:$0xff] }
 0x19c   :  { %3575 = vmatmul.mubr.f32.gmra.mxu0 %v12795_v63  ;;  %8959 = vmatprep.subr.mxu1 %v12695_v29 }
 0x19d   :  { %8973 = vmatprep.subr.mxu0 %v17606_v4  ;;  %8960 = vmatpush3.msra.mxu1 %v12707_v48 }
 0x19e   :  { %8974 = vmatpush3.msra.mxu0 %v17607_v1  ;;  %8961 = vmatprep.subr.mxu1 %v12748_v23  ;;  %v17625_v1 = vand.u32 4294901760, %v17624_v35 }
 0x19f   :  { %8975 = vmatprep.subr.mxu0 %v17608_v43  ;;  %8962 = vmatpush3.msra.mxu1 %v12750_v45 }
 0x1a0   :  { %3679 = vmatprep.mubr.f32.mxu1 %v17609_v3  ;;  %8976 = vmatpush3.msra.mxu0 %v17610_v24  ;;  %v8545_v54 = vpop.f32.mrf.mxu0  ;;  %v199_v3 = vld [vmem:[%s16428_s2 + $0x470] sm:$0xff]  ;;  %v214_v24 = vld [vmem:[%s16428_s2 + $0x4e8] sm:$0xff] }
 0x1a1   :  { %3683 = vmatmul.mubr.f32.vlgmr.msra.gmra.mxu1 %v17611_v44  ;;  %8977 = vmatprep.subr.mxu0 %v17612_v41  ;;  %v13029_v41 = vsub.f32 %v216_v31, %v13002_v32  ;;  %v198_v31 = vld [vmem:[%s16428_s2 + $0x468] sm:$0xff] }
 0x1a2   :  { %9007 = vmatprep.subr.mxu1 %v17572_v17  ;;  %8978 = vmatpush3.msra.mxu0 %v17613_v7  ;;  %v200_v17 = vld [vmem:[%s16428_s2 + $0x478] sm:$0xff]  ;;  %v8546_v57 = vpop.f32.mrf.mxu0  ;;  %v13066_v35 = vand.u32 4294901760, %v198_v31 }
 0x1a3   :  { %9008 = vmatpush3.msra.mxu1 %v17574_v42  ;;  %8979 = vmatprep.subr.mxu0 %v17614_v8  ;;  %v17617_v42 = vand.u32 4294901760, %v12795_v63  ;;  %v8547_v11 = vadd.f32 %v8546_v57, %v8545_v54  ;;  %v13007_v39 = vand.u32 4294901760, %v200_v17  ;;  %v17630_v7 = vld [vmem:[#allocation25_spill] sm:$0xff] }
 0x1a4   :  { %9009 = vmatprep.subr.mxu1 %v17576_v49  ;;  %3690 = vmatprep.mubr.f32.mxu1 %v17615_v59  ;;  %v17619_v49 = vand.u32 4294901760, %v17581_v56  ;;  %v17626_v56 = vld [vmem:[#allocation10_spill] sm:$0xff]  ;;  %v17631_v8 = vand.u32 4294901760, %v17630_v7  ;;  %v17634_v59 = vand.u32 4294901760, %v12590_v6  ;;  %17643 = vst [vmem:[#allocation12_spill] sm:$0xff] %v13066_v35 }
 0x1a5   :  { %8980 = vmatpush3.msra.mxu0 %v17616_v46  ;;  %9010 = vmatpush3.msra.mxu1 %v17578_v2  ;;  %v17621_v2 = vld [vmem:[#allocation22_spill] sm:$0xff]  ;;  %17623 = vst [vmem:[#allocation35_spill] sm:$0xff] %v13007_v39  ;;  %v2028_v63 = vadd.f32 %v8547_v11, %v12924_v33  ;;  %v13035_v54 = vsub.f32 %v200_v17, %v13007_v39  ;;  %v13042_v46 = vand.u32 4294901760, %v199_v3  ;;  %v17639_v11 = vld [vmem:[#allocation4_spill] sm:$0xff] }
 0x1a6   :  { %3694 = vmatmul.mubr.f32.gmra.mxu1 %v17617_v42  ;;  %8981 = vmatprep.subr.mxu0 %v17618_v20  ;;  %v17622_v52 = vand.u32 4294901760, %v17621_v2  ;;  %v8548_v4 = vpop.f32.mrf.mxu0  ;;  %v17636_v17 = vld [vmem:[#allocation38_spill] sm:$0xff]  ;;  %v13051_v20 = vand.u32 4294901760, %v214_v24 }
 0x1a7   :  { %9011 = vmatprep.subr.mxu1 %v17580_v51  ;;  %8982 = vmatpush3.msra.mxu0 %v17619_v49  ;;  %v215_v51 = vld [vmem:[%s16428_s2 + $0x4f0] sm:$0xff]  ;;  %17635 = vst [vmem:[#allocation6_spill] sm:$0xff] %v13042_v46  ;;  %v17637_v42 = vand.u32 4294901760, %v17636_v17  ;;  %v213_v6 = vld [vmem:[%s16428_s2 + $0x4e0] sm:$0xff]  ;;  %v194_v17 = vld [vmem:[%s16428_s2 + $0x448] sm:$0xff] }
 0x1a8   :  { %9012 = vmatpush3.msra.mxu1 %v17582_v13  ;;  %8983 = vmatprep.subr.mxu0 %v17622_v52  ;;  %v17627_v13 = vld [vmem:[#allocation33_spill] sm:$0xff]  ;;  %v8549_v33 = vpop.f32.mrf.mxu0  ;;  %17638 = vst [vmem:[#allocation11_spill] sm:$0xff] %v13051_v20  ;;  %v17640_v49 = vld [vmem:[#allocation24_spill] sm:$0xff]  ;;  %v13097_v7 = vsub.f32 %v214_v24, %v13051_v20  ;;  %v210_v24 = vld [vmem:[%s16428_s2 + $0x4c8] sm:$0xff] }
 0x1a9   :  { %9013 = vmatprep.subr.mxu1 %v17584_v26  ;;  %8984 = vmatpush3.msra.mxu0 %v17625_v1  ;;  %v17628_v43 = vand.u32 4294901760, %v17627_v13  ;;  %v17629_v26 = vand.u32 4294901760, %v17589_v50  ;;  %v8550_v44 = vadd.f32 %v8549_v33, %v8548_v4  ;;  %v17633_v50 = vld [vmem:[#allocation17_spill] sm:$0xff]  ;;  %v17641_v2 = vand.u32 4294901760, %v17640_v49 }
 0x1aa   :  { %9014 = vmatpush3.msra.mxu1 %v17626_v56  ;;  %v8583_v57 = vpop.f32.mrf.mxu1  ;;  %v17642_v4 = vand.u32 4294901760, %v12680_v40  ;;  %v196_v1 = vld [vmem:[%s16428_s2 + $0x458] sm:$0xff]  ;;  %v16765_v56 = vand.u32 4294901760, %v13035_v54  ;;  %v17644_v33 = vand.u32 4294901760, %v12624_v55  ;;  %v13079_v40 = vsub.f32 %v199_v3, %v13042_v46  ;;  %v195_v55 = vld [vmem:[%s16428_s2 + $0x450] sm:$0xff] }
 0x1ab   :  { %8985 = vmatprep.subr.mxu0 %v17628_v43  ;;  %9015 = vmatprep.subr.mxu1 %v17588_v21  ;;  %v13037_v21 = vand.u32 4294901760, %v215_v51 }
 0x1ac   :  { %8986 = vmatpush3.msra.mxu0 %v17629_v26  ;;  %9016 = vmatpush3.msra.mxu1 %v17590_v34  ;;  %v2035_v34 = vadd.f32 %v8550_v44, %v12936_v60  ;;  %v197_v60 = vld [vmem:[%s16428_s2 + $0x460] sm:$0xff]  ;;  %v8584_v52 = vpop.f32.mrf.mxu1  ;;  %v212_v26 = vld [vmem:[%s16428_s2 + $0x4d8] sm:$0xff]  ;;  %v17646_v44 = vand.u32 4294901760, %v12742_v58 }
 0x1ad   :  { %8987 = vmatprep.subr.mxu0 %v17631_v8  ;;  %17632 = vst [vmem:[#allocation23_spill] sm:$0xff] %v13037_v21  ;;  %9017 = vmatprep.subr.mxu1 %v17633_v50  ;;  %v8585_v13 = vadd.f32 %v8584_v52, %v8583_v57  ;;  %v13073_v43 = vsub.f32 %v215_v51, %v13037_v21  ;;  %v13089_v51 = vand.u32 4294901760, %v197_v60  ;;  %v17648_v8 = vand.u32 4294901760, %v12674_v12 }
 0x1ae   :  { %8988 = vmatpush3.msra.mxu0 %v17634_v59  ;;  %9018 = vmatpush3.msra.mxu1 %v17593_v37  ;;  %v16766_v37 = vand.u32 4294901760, %v13029_v41  ;;  %v13119_v12 = vsub.f32 %v198_v31, %v13066_v35  ;;  %v13121_v50 = vand.u32 4294901760, %v212_v26  ;;  %v13126_v59 = vsub.f32 %v13035_v54, %v16765_v56 }
 0x1af   :  { %8989 = vmatprep.subr.mxu0 %v17637_v42  ;;  %9019 = vmatprep.subr.mxu1 %v17639_v11  ;;  %17647 = vst [vmem:[#allocation28_spill] sm:$0xff] %v13089_v51  ;;  %v16763_v57 = vand.u32 4294901760, %v13073_v43  ;;  %v13135_v31 = vand.u32 4294901760, %v195_v55  ;;  %v16762_v42 = vand.u32 4294901760, %v13079_v40  ;;  %v13145_v52 = vsub.f32 %v197_v60, %v13089_v51 }
 0x1b0   :  { %8990 = vmatpush3.msra.mxu0 %v17641_v2  ;;  %9020 = vmatpush3.msra.mxu1 %v17595_v10  ;;  %v13081_v10 = vand.u32 4294901760, %v213_v6  ;;  %v8586_v3 = vpop.f32.mrf.mxu1  ;;  %v13105_v58 = vsub.f32 %v13029_v41, %v16766_v37  ;;  %17651 = vst [vmem:[#allocation19_spill] sm:$0xff] %v13121_v50  ;;  %v17654_v2 = vand.u32 4294901760, %v12799_v22  ;;  %v17660_v60 = vand.u32 4294901760, %v12822_v61  ;;  %v17673_v37 = vld [vmem:[#allocation32_spill] sm:$0xff] }
 0x1b1   :  { %8991 = vmatprep.subr.mxu0 %v17642_v4  ;;  %9021 = vmatprep.subr.mxu1 %v17596_v25  ;;  %v13091_v25 = vadd.f32 %v8585_v13, %v2028_v63  ;;  %v211_v63 = vld [vmem:[%s16428_s2 + $0x4d0] sm:$0xff]  ;;  %17653 = vst [vmem:[#allocation20_spill] sm:$0xff] %v13135_v31  ;;  %v16761_v4 = vand.u32 4294901760, %v13097_v7  ;;  %v17657_v13 = vand.u32 4294901760, %v12771_v0  ;;  %v16764_v0 = vand.u32 4294901760, %v13119_v12 }
 0x1b2   :  { %8992 = vmatpush3.msra.mxu0 %v17644_v33  ;;  %17645 = vst [vmem:[#allocation7_spill] sm:$0xff] %v13081_v10  ;;  %9022 = vmatpush3.msra.mxu1 %v17597_v14  ;;  %v13107_v14 = vand.u32 4294901760, %v196_v1  ;;  %v13139_v49 = vsub.f32 %v213_v6, %v13081_v10  ;;  %v13179_v61 = vsub.f32 %v212_v26, %v13121_v50  ;;  %v192_v26 = vld [vmem:[%s16428_s2 + $0x438] sm:$0xff] }
 0x1b3   :  { %8993 = vmatprep.subr.mxu0 %v17646_v44  ;;  %9023 = vmatprep.subr.mxu1 %v17598_v9  ;;  %v17650_v9 = vand.u32 4294901760, %v12761_v47  ;;  %v17652_v47 = vand.u32 4294901760, %v12705_v30  ;;  %v13149_v30 = vand.u32 4294901760, %v210_v24 }
 0x1b4   :  { %8994 = vmatpush3.msra.mxu0 %v17648_v8  ;;  %17649 = vst [vmem:[#allocation16_spill] sm:$0xff] %v13107_v14  ;;  %9024 = vmatpush3.msra.mxu1 %v17599_v15  ;;  %v8587_v15 = vpop.f32.mrf.mxu1  ;;  %v13156_v6 = vsub.f32 %v196_v1, %v13107_v14  ;;  %v209_v1 = vld [vmem:[%s16428_s2 + $0x4c0] sm:$0xff]  ;;  %v13191_v8 = vsub.f32 %v13079_v40, %v16762_v42 }
 0x1b5   :  { %8995 = vmatprep.subr.mxu0 %v17650_v9  ;;  %9025 = vmatprep.subr.mxu1 %v12504_v36  ;;  %v8588_v11 = vadd.f32 %v8587_v15, %v8586_v3  ;;  %v13147_v36 = vand.u32 4294901760, %v211_v63  ;;  %17656 = vst [vmem:[#allocation3_spill] sm:$0xff] %v13149_v30  ;;  %v13186_v3 = vsub.f32 %v195_v55, %v13135_v31  ;;  %v16767_v9 = vand.u32 4294901760, %v13139_v49 }
 0x1b6   :  { %8996 = vmatpush3.msra.mxu0 %v17652_v47  ;;  %9026 = vmatpush3.msra.mxu1 %v12535_v18  ;;  %17658 = vst [vmem:[#allocation18_spill] sm:$0xff] %v13156_v6  ;;  %v13158_v18 = vand.u32 4294901760, %v194_v17  ;;  %v13202_v55 = vsub.f32 %v13097_v7, %v16761_v4  ;;  %v16768_v15 = vand.u32 4294901760, %v13145_v52  ;;  %v208_v47 = vld [vmem:[%s16428_s2 + $0x4b8] sm:$0xff]  ;;  %v16769_v4 = vand.u32 4294901760, %v13156_v6 }
 0x1b7   :  { %8997 = vmatprep.subr.mxu0 %v17654_v2  ;;  %17655 = vst [vmem:[#allocation9_spill] sm:$0xff] %v13147_v36  ;;  %9027 = vmatprep.subr.mxu1 %v12592_v19  ;;  %v13160_v22 = vadd.f32 %v8588_v11, %v2035_v34  ;;  %v13169_v19 = vsub.f32 %v13073_v43, %v16763_v57  ;;  %v17661_v34 = vand.u32 4294901760, %v12805_v62  ;;  %17662 = vst [vmem:[#allocation2_spill] sm:$0xff] %v13186_v3  ;;  %v17664_v62 = vld [vmem:[#allocation37_spill] sm:$0xff] }
 0x1b8   :  { %8998 = vmatpush3.msra.mxu0 %v17657_v13  ;;  %17659 = vst [vmem:[#allocation27_spill] sm:$0xff] %v13158_v18  ;;  %9028 = vmatpush3.msra.mxu1 %v12548_v16  ;;  %v193_v16 = vld [vmem:[%s16428_s2 + $0x440] sm:$0xff]  ;;  %v13209_v11 = vsub.f32 %v211_v63, %v13147_v36  ;;  %v13212_v2 = vsub.f32 %v210_v24, %v13149_v30  ;;  %v17667_v13 = vld [vmem:[#allocation31_spill] sm:$0xff]  ;;  %v13243_v57 = vand.u32 4294901760, %v208_v47  ;;  %v191_v63 = vld [vmem:[%s16428_s2 + $0x430] sm:$0xff] }
 0x1b9   :  { %8999 = vmatprep.subr.mxu0 %v17660_v60  ;;  %9029 = vmatprep.subr.mxu1 %v12595_v28  ;;  %v17663_v28 = vld [vmem:[#allocation8_spill] sm:$0xff]  ;;  %v13217_v60 = vsub.f32 %v194_v17, %v13158_v18  ;;  %v13230_v24 = vsub.f32 %v13119_v12, %v16764_v0  ;;  %v13233_v17 = vand.u32 4294901760, %v192_v26  ;;  %v13255_v42 = vsub.f32 %v13145_v52, %v16768_v15 }
 0x1ba   :  { %9000 = vmatpush3.msra.mxu0 %v17661_v34  ;;  %3860 = vmatprep.mubr.f32.mxu0 %v17663_v28  ;;  %17665 = vst [vmem:[#allocation21_spill] sm:$0xff] %v13209_v11  ;;  %17666 = vst [vmem:[#allocation26_spill] sm:$0xff] %v13212_v2  ;;  %v13219_v34 = vand.u32 4294901760, %v209_v1  ;;  %v207_v0 = vld [vmem:[%s16428_s2 + $0x4b0] sm:$0xff]  ;;  %v13270_v15 = vsub.f32 %v13156_v6, %v16769_v4  ;;  %v17693_v6 = vand.u32 4294901760, %v13191_v8 }
 0x1bb   :  { %9030 = vmatpush3.msra.mxu1 %v17664_v62  ;;  %3862 = vmatmul.mubr.f32.vlgmr.msra.gmra.mxu0 %v17667_v13  ;;  %17668 = vst [vmem:[#allocation13_spill] sm:$0xff] %v13217_v60  ;;  %v13221_v62 = vand.u32 4294901760, %v193_v16  ;;  %17671 = vst [vmem:[#allocation34_spill] sm:$0xff] %v13233_v17  ;;  %v13288_v56 = vsub.f32 %v192_v26, %v13233_v17  ;;  %v13305_v26 = vld [vmem:[%s16428_s2 + $0x4a8] sm:$0xff] }
 0x1bc   :  { %9031 = vmatprep.subr.mxu1 %v17600_v27  ;;  %17669 = vst [vmem:[#allocation36_spill] sm:$0xff] %v13219_v34  ;;  %9045 = vmatprep.subr.mxu0 %v13002_v32  ;;  %v16772_v27 = vand.u32 4294901760, %v13179_v61  ;;  %17672 = vst [vmem:[#allocation14_spill] sm:$0xff] %v13243_v57  ;;  %v13277_v44 = vsub.f32 %v209_v1, %v13219_v34  ;;  %v17680_v1 = vand.u32 4294901760, %v13209_v11 }
 0x1bd   :  { %17670 = vst [vmem:[#allocation29_spill] sm:$0xff] %v13221_v62  ;;  %9032 = vmatpush3.msra.mxu1 %v12615_v5  ;;  %9046 = vmatpush3.msra.mxu0 %v13007_v39  ;;  %v13241_v5 = vsub.f32 %v13139_v49, %v16767_v9  ;;  %v13265_v33 = vsub.f32 %v193_v16, %v13221_v62  ;;  %17677 = vst [vmem:[#allocation30_spill] sm:$0xff] %v13288_v56  ;;  %v13295_v9 = vand.u32 4294901760, %v191_v63 }
 0x1be   :  { %9033 = vmatprep.subr.mxu1 %v17603_v38  ;;  %9047 = vmatprep.subr.mxu0 %v13037_v21  ;;  %v190_v38 = vld [vmem:[%s16428_s2 + $0x428] sm:$0xff]  ;;  %17675 = vst [vmem:[#allocation22_spill] sm:$0xff] %v13277_v44  ;;  %v13285_v4 = vsub.f32 %v13179_v61, %v16772_v27  ;;  %v13308_v27 = vsub.f32 %v208_v47, %v13243_v57  ;;  %v189_v47 = vld [vmem:[%s16428_s2 + $0x420] sm:$0xff] }
 0x1bf   :  { %3867 = vmatprep.mubr.f32.mxu0 %v17673_v37  ;;  %9034 = vmatpush3.msra.mxu1 %v12649_v53  ;;  %17674 = vst [vmem:[#allocation15_spill] sm:$0xff] %v13265_v33  ;;  %v17676_v53 = vld [vmem:[#allocation39_spill] sm:$0xff]  ;;  %v13323_v21 = vand.u32 4294901760, %v190_v38 }
 0x1c0   :  { %9048 = vmatpush3.msra.mxu0 %v13042_v46  ;;  %9035 = vmatprep.subr.mxu1 %v12695_v29  ;;  %v13290_v46 = vand.u32 4294901760, %v207_v0  ;;  %v17678_v29 = vand.u32 4294901760, %v13186_v3  ;;  %17679 = vst [vmem:[#allocation10_spill] sm:$0xff] %v13308_v27 }
 0x1c1   :  { %3869 = vmatmul.mubr.f32.gmra.mxu0 %v17676_v53  ;;  %9049 = vmatprep.subr.mxu0 %v13051_v20  ;;  %v13316_v20 = vsub.f32 %v13209_v11, %v17680_v1  ;;  %v17682_v1 = vand.u32 4294901760, %v13217_v60  ;;  %v17687_v11 = vand.u32 4294901760, %v13126_v59  ;;  %v13403_v59 = vld [vmem:[%s16428_s2 + $0x490] sm:$0xff] }
 0x1c2   :  { %9036 = vmatpush3.msra.mxu1 %v12707_v48  ;;  %v13300_v16 = vsub.f32 %v13186_v3, %v17678_v29  ;;  %9050 = vmatpush3.msra.mxu0 %v13066_v35  ;;  %v17681_v29 = vand.u32 4294901760, %v13212_v2  ;;  %v13365_v35 = vld [vmem:[%s16428_s2 + $0x498] sm:$0xff]  ;;  %v13439_v8 = vand.u32 4294901760, %v13403_v59 }
 0x1c3   :  { %9037 = vmatprep.subr.mxu1 %v12748_v23  ;;  %9051 = vmatprep.subr.mxu0 %v13081_v10  ;;  %v13334_v48 = vsub.f32 %v13217_v60, %v17682_v1  ;;  %v13345_v23 = vand.u32 4294901760, %v13305_v26  ;;  %v188_v1 = vld [vmem:[%s16428_s2 + $0x418] sm:$0xff]  ;;  %v13352_v60 = vsub.f32 %v207_v0, %v13290_v46  ;;  %v187_v0 = vld [vmem:[%s16428_s2 + $0x410] sm:$0xff]  ;;  %v34_v10 = vld [vmem:[%s16429_s0 + $0x48] sm:$0xff] }
 0x1c4   :  { %v13321_v3 = vsub.f32 %v13212_v2, %v17681_v29  ;;  %9038 = vmatpush3.msra.mxu1 %v12750_v45  ;;  %v205_v29 = vld [vmem:[%s16428_s2 + $0x4a0] sm:$0xff]  ;;  %3971 = vmatprep.mubr.f32.mxu1 %v17663_v28  ;;  %v13357_v28 = vsub.f32 %v191_v63, %v13295_v9  ;;  %v13360_v2 = vand.u32 4294901760, %v189_v47  ;;  %v13420_v39 = vand.u32 4294901760, %v187_v0  ;;  %17696 = vst [vmem:[#allocation24_spill] sm:$0xff] %v13439_v8 }
 0x1c5   :  { %9052 = vmatpush3.msra.mxu0 %v13089_v51  ;;  %17683 = vst [vmem:[#allocation33_spill] sm:$0xff] %v13352_v60  ;;  %3973 = vmatmul.mubr.f32.vlgmr.msra.gmra.mxu1 %v17667_v13  ;;  %v17685_v13 = vand.u32 4294901760, %v13105_v58  ;;  %v13379_v51 = vand.u32 4294901760, %v205_v29  ;;  %v33_v58 = vld [vmem:[%s16429_s0 + $0x40] sm:$0xff] }
 0x1c6   :  { %9053 = vmatprep.subr.mxu0 %v13121_v50  ;;  %17684 = vst [vmem:[#allocation25_spill] sm:$0xff] %v13357_v28  ;;  %v13377_v50 = vsub.f32 %v190_v38, %v13323_v21  ;;  %v17689_v38 = vand.u32 4294901760, %v13265_v33  ;;  %3978 = vmatprep.mubr.f32.mxu1 %v17673_v37  ;;  %v17694_v37 = vand.u32 4294901760, %v13308_v27 }
 0x1c7   :  { %9083 = vmatprep.subr.mxu1 %v17685_v13  ;;  %9054 = vmatpush3.msra.mxu0 %v13107_v14  ;;  %v17688_v13 = vand.u32 4294901760, %v13277_v44  ;;  %v13398_v14 = vand.u32 4294901760, %v188_v1  ;;  %v13464_v32 = vsub.f32 %v205_v29, %v13379_v51 }
 0x1c8   :  { %17686 = vst [vmem:[#allocation17_spill] sm:$0xff] %v13377_v50  ;;  %9084 = vmatpush3.msra.mxu1 %v17687_v11  ;;  %9055 = vmatprep.subr.mxu0 %v13147_v36  ;;  %v13396_v63 = vsub.f32 %v13265_v33, %v17689_v38  ;;  %v8621_v11 = vpop.f32.mrf.mxu0  ;;  %v13412_v38 = vand.u32 4294901760, %v13365_v35  ;;  %v17692_v36 = vand.u32 4294901760, %v13288_v56 }
 0x1c9   :  { %v13391_v45 = vsub.f32 %v13277_v44, %v17688_v13  ;;  %v17690_v13 = vand.u32 4294901760, %v13169_v19  ;;  %9056 = vmatpush3.msra.mxu0 %v13135_v31  ;;  %v13426_v19 = vsub.f32 %v189_v47, %v13360_v2  ;;  %3980 = vmatmul.mubr.f32.gmra.mxu1 %v17676_v53  ;;  %v13448_v47 = vsub.f32 %v13305_v26, %v13345_v23  ;;  %v186_v26 = vld [vmem:[%s16428_s2 + $0x408] sm:$0xff] }
 0x1ca   :  { %17691 = vst [vmem:[#allocation38_spill] sm:$0xff] %v13412_v38  ;;  %v13417_v33 = vsub.f32 %v13288_v56, %v17692_v36  ;;  %v13434_v56 = vand.u32 4294901760, %v34_v10  ;;  %v8622_v44 = vpop.f32.mrf.mxu0  ;;  %9057 = vmatprep.subr.mxu0 %v13149_v30  ;;  %v17699_v31 = vand.u32 4294901760, %v13202_v55  ;;  %17700 = vst [vmem:[#allocation31_spill] sm:$0xff] %v13464_v32  ;;  %v13479_v30 = vsub.f32 %v187_v0, %v13420_v39  ;;  %v49_v0 = vld [vmem:[%s16429_s0 + $0xc0] sm:$0xff] }
 0x1cb   :  { %9085 = vmatprep.subr.mxu1 %v17690_v13  ;;  %v13431_v13 = vsub.f32 %v13308_v27, %v17694_v37  ;;  %17697 = vst [vmem:[#allocation8_spill] sm:$0xff] %v13448_v47  ;;  %v13450_v37 = vand.u32 4294901760, %v33_v58  ;;  %v8623_v36 = vadd.f32 %v8622_v44, %v8621_v11  ;;  %9058 = vmatpush3.msra.mxu0 %v13158_v18  ;;  %v17701_v44 = vand.u32 4294901760, %v13230_v24 }
 0x1cc   :  { %9086 = vmatpush3.msra.mxu1 %v17693_v6  ;;  %17695 = vst [vmem:[#allocation4_spill] sm:$0xff] %v13434_v56  ;;  %v13444_v6 = vld [vmem:[%s16428_s2 + $0x488] sm:$0xff]  ;;  %v13458_v27 = vsub.f32 %v188_v1, %v13398_v14  ;;  %9059 = vmatprep.subr.mxu0 %v13219_v34  ;;  %v17702_v1 = vand.u32 4294901760, %v13352_v60  ;;  %v8624_v53 = vpop.f32.mrf.mxu0  ;;  %v17703_v18 = vand.u32 4294901760, %v13241_v5  ;;  %v13503_v5 = vsub.f32 %v34_v10, %v13434_v56 }
 0x1cd   :  { %17698 = vst [vmem:[#allocation37_spill] sm:$0xff] %v13450_v37  ;;  %9087 = vmatprep.subr.mxu1 %v17699_v31  ;;  %v50_v31 = vld [vmem:[%s16429_s0 + $0xc8] sm:$0xff]  ;;  %v13482_v29 = vadd.f32 %v8623_v36, %v13091_v25  ;;  %9060 = vmatpush3.msra.mxu0 %v13221_v62  ;;  %v201_v25 = vld [vmem:[%s16428_s2 + $0x480] sm:$0xff]  ;;  %v17705_v36 = vand.u32 4294901760, %v13255_v42  ;;  %v13512_v24 = vand.u32 4294901760, %v186_v26  ;;  %v13515_v62 = vsub.f32 %v33_v58, %v13450_v37 }
 0x1ce   :  { %9088 = vmatpush3.msra.mxu1 %v17701_v44  ;;  %v13476_v11 = vsub.f32 %v13352_v60, %v17702_v1  ;;  %v17704_v44 = vand.u32 4294901760, %v13357_v28  ;;  %v13494_v1 = vand.u32 4294901760, %v13444_v6  ;;  %9061 = vmatprep.subr.mxu0 %v13243_v57  ;;  %v13517_v34 = vand.u32 4294901760, %v50_v31  ;;  %v8625_v10 = vpop.f32.mrf.mxu0 }
 0x1cf   :  { %9089 = vmatprep.subr.mxu1 %v17703_v18  ;;  %v185_v18 = vld [vmem:[%s16428_s2 + $0x400] sm:$0xff]  ;;  %9062 = vmatpush3.msra.mxu0 %v13233_v17  ;;  %v16829_v42 = vand.u32 4294901760, %v13377_v50  ;;  %v8626_v57 = vadd.f32 %v8625_v10, %v8624_v53  ;;  %v17708_v58 = vand.u32 4294901760, %v13270_v15  ;;  %v13536_v17 = vand.u32 4294901760, %v49_v0 }
 0x1d0   :  { %v13491_v55 = vsub.f32 %v13357_v28, %v17704_v44  ;;  %9090 = vmatpush3.msra.mxu1 %v17705_v36  ;;  %17706 = vst [vmem:[#allocation32_spill] sm:$0xff] %v13517_v34  ;;  %v17707_v28 = vand.u32 4294901760, %v13285_v4  ;;  %v13526_v44 = vsub.f32 %v13365_v35, %v13412_v38  ;;  %9063 = vmatprep.subr.mxu0 %v13290_v46  ;;  %v4292_v60 = vand.u32 4294901760, %v13476_v11  ;;  %v8659_v10 = vpop.f32.mrf.mxu1 }
 0x1d1   :  { %v13532_v4 = vand.u32 4294901760, %v201_v25  ;;  %17709 = vst [vmem:[#allocation39_spill] sm:$0xff] %v13536_v17  ;;  %v17710_v36 = vand.u32 4294901760, %v13316_v20  ;;  %9064 = vmatpush3.msra.mxu0 %v13295_v9  ;;  %v13545_v53 = vsub.f32 %v13403_v59, %v13439_v8  ;;  %v13548_v11 = vadd.f32 %v8626_v57, %v13160_v22  ;;  %4337 = vmatprep.mubr.f32.mxu1 %v13434_v56  ;;  %v17750_v56 = vld [vmem:[#allocation33_spill] sm:$0xff] }
 0x1d2   :  { %9091 = vmatprep.subr.mxu1 %v17707_v28  ;;  %v13534_v28 = vand.u32 4294901760, %v185_v18  ;;  %9065 = vmatprep.subr.mxu0 %v13345_v23  ;;  %v4180_v20 = vand.u32 4294901760, %v13491_v55  ;;  %v13559_v35 = vsub.f32 %v50_v31, %v13517_v34  ;;  %v17712_v59 = vand.u32 4294901760, %v13321_v3 }
 0x1d3   :  { %9092 = vmatpush3.msra.mxu1 %v17708_v58  ;;  %v17711_v58 = vand.u32 4294901760, %v13300_v16  ;;  %9066 = vmatpush3.msra.mxu0 %v13323_v21  ;;  %v17713_v57 = vand.u32 4294901760, %v13448_v47  ;;  %v4186_v16 = vsub.f32 %v13377_v50, %v16829_v42  ;;  %v17715_v3 = vand.u32 4294901760, %v13334_v48 }
 0x1d4   :  { %9093 = vmatprep.subr.mxu1 %v17710_v36  ;;  %v13555_v36 = vsub.f32 %v186_v26, %v13512_v24  ;;  %v17714_v26 = vand.u32 4294901760, %v13464_v32  ;;  %9067 = vmatprep.subr.mxu0 %v13379_v51  ;;  %v13583_v42 = vsub.f32 %v13444_v6, %v13494_v1  ;;  %v13589_v48 = vsub.f32 %v185_v18, %v13534_v28 }
 0x1d5   :  { %9094 = vmatpush3.msra.mxu1 %v17711_v58  ;;  %v4298_v22 = vsub.f32 %v13448_v47, %v17713_v57  ;;  %v8660_v58 = vpop.f32.mrf.mxu1  ;;  %v13579_v57 = vsub.f32 %v49_v0, %v13536_v17  ;;  %9068 = vmatpush3.msra.mxu0 %v13360_v2  ;;  %v17718_v0 = vand.u32 4294901760, %v13426_v19  ;;  %v17721_v6 = vand.u32 4294901760, %v13431_v13 }
 0x1d6   :  { %9095 = vmatprep.subr.mxu1 %v17712_v59  ;;  %v4305_v55 = vsub.f32 %v13464_v32, %v17714_v26  ;;  %v8661_v15 = vadd.f32 %v8660_v58, %v8659_v10  ;;  %v17716_v26 = vand.u32 4294901760, %v13391_v45  ;;  %v17719_v10 = vand.u32 4294901760, %v13396_v63  ;;  %9069 = vmatprep.subr.mxu0 %v13412_v38 }
 0x1d7   :  { %9096 = vmatpush3.msra.mxu1 %v17715_v3  ;;  %v17717_v3 = vand.u32 4294901760, %v13503_v5  ;;  %v4193_v31 = vsub.f32 %v13426_v19, %v17718_v0  ;;  %v17720_v45 = vand.u32 4294901760, %v13515_v62  ;;  %v8662_v0 = vpop.f32.mrf.mxu1  ;;  %9070 = vmatpush3.msra.mxu0 %v13398_v14  ;;  %v4299_v63 = vand.u32 4294901760, %v4298_v22 }
 0x1d8   :  { %9097 = vmatprep.subr.mxu1 %v17716_v26  ;;  %v13606_v26 = vsub.f32 %v201_v25, %v13532_v4  ;;  %v17722_v38 = vand.u32 4294901760, %v13526_v44  ;;  %v17723_v25 = vand.u32 4294901760, %v13417_v33  ;;  %9071 = vmatprep.subr.mxu0 %v13439_v8  ;;  %v17725_v58 = vand.u32 4294901760, %v13545_v53 }
 0x1d9   :  { %v4084_v59 = vsub.f32 %v13503_v5, %v17717_v3  ;;  %9098 = vmatpush3.msra.mxu1 %v17719_v10  ;;  %v4090_v18 = vsub.f32 %v13515_v62, %v17720_v45  ;;  %v13609_v3 = vadd.f32 %v8661_v15, %v13482_v29  ;;  %v4187_v10 = vand.u32 4294901760, %v4186_v16  ;;  %v8663_v16 = vpop.f32.mrf.mxu1  ;;  %9072 = vmatpush3.msra.mxu0 %v13420_v39 }
 0x1da   :  { %9099 = vmatprep.subr.mxu1 %v17721_v6  ;;  %v4312_v45 = vsub.f32 %v13526_v44, %v17722_v38  ;;  %v4306_v29 = vand.u32 4294901760, %v4305_v55  ;;  %v17724_v15 = vand.u32 4294901760, %v13458_v27  ;;  %v4194_v38 = vand.u32 4294901760, %v4193_v31  ;;  %9073 = vmatprep.subr.mxu0 %v13494_v1 }
 0x1db   :  { %9100 = vmatpush3.msra.mxu1 %v17723_v25  ;;  %v4319_v33 = vsub.f32 %v13545_v53, %v17725_v58  ;;  %v8664_v55 = vadd.f32 %v8663_v16, %v8662_v0  ;;  %v4091_v8 = vand.u32 4294901760, %v4090_v18  ;;  %v17726_v6 = vand.u32 4294901760, %v13559_v35  ;;  %9074 = vmatpush3.msra.mxu0 %v13512_v24 }
 0x1dc   :  { %v4200_v13 = vsub.f32 %v13458_v27, %v17724_v15  ;;  %9101 = vmatprep.subr.mxu1 %v4292_v60  ;;  %v4085_v15 = vand.u32 4294901760, %v4084_v59  ;;  %v16835_v60 = vand.u32 4294901760, %v13606_v26  ;;  %v4313_v31 = vand.u32 4294901760, %v4312_v45  ;;  %9075 = vmatprep.subr.mxu0 %v13532_v4 }
 0x1dd   :  { %9102 = vmatpush3.msra.mxu1 %v4180_v20  ;;  %v4099_v22 = vsub.f32 %v13559_v35, %v17726_v6  ;;  %v17727_v58 = vand.u32 4294901760, %v13479_v30  ;;  %v16834_v20 = vand.u32 4294901760, %v13589_v48  ;;  %v13642_v0 = vadd.f32 %v8664_v55, %v13548_v11  ;;  %9076 = vmatpush3.msra.mxu0 %v13534_v28 }
 0x1de   :  { %9103 = vmatprep.subr.mxu1 %v4299_v63  ;;  %v4201_v59 = vand.u32 4294901760, %v4200_v13  ;;  %v17728_v18 = vand.u32 4294901760, %v13579_v57  ;;  %v17729_v6 = vand.u32 4294901760, %v13583_v42  ;;  %v4320_v16 = vand.u32 4294901760, %v4319_v33  ;;  %4086 = vmatprep.mubr.f32.mxu0 %v4085_v15  ;;  %v17732_v15 = vld [vmem:[#allocation18_spill] sm:$0xff] }
 0x1df   :  { %v4207_v25 = vsub.f32 %v13479_v30, %v17727_v58  ;;  %9104 = vmatpush3.msra.mxu1 %v4187_v10  ;;  %v17730_v58 = vand.u32 4294901760, %v13555_v36  ;;  %v4100_v10 = vand.u32 4294901760, %v4099_v22  ;;  %v4333_v13 = vsub.f32 %v13606_v26, %v16835_v60  ;;  %4092 = vmatmul.mubr.f32.vlgmr.msra.gmra.mxu0 %v4091_v8  ;;  %v17746_v60 = vld [vmem:[#allocation10_spill] sm:$0xff] }
 0x1e0   :  { %v4105_v63 = vsub.f32 %v13579_v57, %v17728_v18  ;;  %v4326_v45 = vsub.f32 %v13583_v42, %v17729_v6  ;;  %9105 = vmatprep.subr.mxu1 %v4306_v29  ;;  %v4221_v29 = vsub.f32 %v13589_v48, %v16834_v20  ;;  %9121 = vmatprep.subr.mxu0 %v13029_v41  ;;  %v17735_v6 = vld [vmem:[#allocation23_spill] sm:$0xff]  ;;  %v17745_v20 = vld [vmem:[#allocation28_spill] sm:$0xff] }
 0x1e1   :  { %v4214_v11 = vsub.f32 %v13555_v36, %v17730_v58  ;;  %9106 = vmatpush3.msra.mxu1 %v4194_v38  ;;  %v4208_v55 = vand.u32 4294901760, %v4207_v25  ;;  %9122 = vmatpush3.msra.mxu0 %v13035_v54  ;;  %v4334_v38 = vand.u32 4294901760, %v4333_v13  ;;  %v17731_v25 = vld [vmem:[#allocation5_spill] sm:$0xff]  ;;  %v17739_v13 = vld [vmem:[#allocation11_spill] sm:$0xff] }
 0x1e2   :  { %9107 = vmatprep.subr.mxu1 %v4313_v31  ;;  %v4106_v33 = vand.u32 4294901760, %v4105_v63  ;;  %v4327_v18 = vand.u32 4294901760, %v4326_v45  ;;  %9123 = vmatprep.subr.mxu0 %v13073_v43  ;;  %v4222_v8 = vand.u32 4294901760, %v4221_v29  ;;  %v17733_v31 = vld [vmem:[#allocation35_spill] sm:$0xff]  ;;  %v17736_v45 = vld [vmem:[#allocation2_spill] sm:$0xff]  ;;  %v17741_v29 = vld [vmem:[#allocation12_spill] sm:$0xff] }
 0x1e3   :  { %9108 = vmatpush3.msra.mxu1 %v4201_v59  ;;  %v4215_v22 = vand.u32 4294901760, %v4214_v11  ;;  %4101 = vmatprep.mubr.f32.mxu0 %v4100_v10  ;;  %v17734_v59 = vld [vmem:[#allocation21_spill] sm:$0xff]  ;;  %v17738_v11 = vld [vmem:[#allocation26_spill] sm:$0xff] }
 0x1e4   :  { %9109 = vmatprep.subr.mxu1 %v4320_v16  ;;  %9124 = vmatpush3.msra.mxu0 %v13079_v40  ;;  %v17737_v16 = vld [vmem:[#allocation6_spill] sm:$0xff] }
 0x1e5   :  { %9110 = vmatpush3.msra.mxu1 %v4208_v55  ;;  %4107 = vmatmul.mubr.f32.gmra.mxu0 %v4106_v33  ;;  %v17740_v55 = vld [vmem:[#allocation13_spill] sm:$0xff]  ;;  %v17742_v33 = vld [vmem:[#allocation22_spill] sm:$0xff] }
 0x1e6   :  { %9111 = vmatprep.subr.mxu1 %v4327_v18  ;;  %9125 = vmatprep.subr.mxu0 %v13097_v7 }
 0x1e7   :  { %9112 = vmatpush3.msra.mxu1 %v4215_v22  ;;  %9126 = vmatpush3.msra.mxu0 %v13119_v12 }
 0x1e8   :  { %9113 = vmatprep.subr.mxu1 %v4334_v38  ;;  %9127 = vmatprep.subr.mxu0 %v13139_v49  ;;  %v17743_v38 = vld [vmem:[#allocation7_spill] sm:$0xff] }
 0x1e9   :  { %9114 = vmatpush3.msra.mxu1 %v4222_v8  ;;  %9128 = vmatpush3.msra.mxu0 %v13145_v52  ;;  %v17744_v8 = vld [vmem:[#allocation15_spill] sm:$0xff] }
 0x1ea   :  { %4339 = vmatmul.mubr.f32.vlgmr.msra.gmra.mxu1 %v13450_v37  ;;  %9129 = vmatprep.subr.mxu0 %v13179_v61  ;;  %v8697_v63 = vpop.f32.mrf.mxu0  ;;  %v17749_v37 = vld [vmem:[#allocation16_spill] sm:$0xff] }
 0x1eb   :  { %9159 = vmatprep.subr.mxu1 %v17731_v25  ;;  %9130 = vmatpush3.msra.mxu0 %v17732_v15 }
 0x1ec   :  { %9160 = vmatpush3.msra.mxu1 %v17733_v31  ;;  %9131 = vmatprep.subr.mxu0 %v17734_v59  ;;  %v8698_v58 = vpop.f32.mrf.mxu0 }
 0x1ed   :  { %9161 = vmatprep.subr.mxu1 %v17735_v6  ;;  %4344 = vmatprep.mubr.f32.mxu1 %v13517_v34  ;;  %v8699_v10 = vadd.f32 %v8698_v58, %v8697_v63  ;;  %v17747_v58 = vld [vmem:[#allocation19_spill] sm:$0xff] }
 0x1ee   :  { %9132 = vmatpush3.msra.mxu0 %v17736_v45  ;;  %9162 = vmatpush3.msra.mxu1 %v17737_v16 }
 0x1ef   :  { %4346 = vmatmul.mubr.f32.gmra.mxu1 %v13536_v17  ;;  %9133 = vmatprep.subr.mxu0 %v17738_v11  ;;  %v2650_v18 = vadd.f32 %v8699_v10, %v13609_v3  ;;  %v8700_v22 = vpop.f32.mrf.mxu0  ;;  %v17748_v17 = vld [vmem:[#allocation30_spill] sm:$0xff]  ;;  %v17751_v3 = vld [vmem:[#allocation9_spill] sm:$0xff] }
 0x1f0   :  { %9163 = vmatprep.subr.mxu1 %v17739_v13  ;;  %9134 = vmatpush3.msra.mxu0 %v17740_v55  ;;  %v17752_v10 = vld [vmem:[#allocation25_spill] sm:$0xff] }
 0x1f1   :  { %9164 = vmatpush3.msra.mxu1 %v17741_v29  ;;  %9135 = vmatprep.subr.mxu0 %v17742_v33  ;;  %v8701_v63 = vpop.f32.mrf.mxu0 }
 0x1f2   :  { %9165 = vmatprep.subr.mxu1 %v17743_v38  ;;  %9136 = vmatpush3.msra.mxu0 %v17744_v8  ;;  %v8702_v34 = vadd.f32 %v8701_v63, %v8700_v22  ;;  %v17755_v63 = vld [vmem:[#allocation27_spill] sm:$0xff] }
 0x1f3   :  { %9166 = vmatpush3.msra.mxu1 %v17745_v20  ;;  %9137 = vmatprep.subr.mxu0 %v17746_v60  ;;  %v17753_v20 = vld [vmem:[#allocation20_spill] sm:$0xff]  ;;  %v17754_v60 = vld [vmem:[#allocation3_spill] sm:$0xff] }
 0x1f4   :  { %9167 = vmatprep.subr.mxu1 %v17747_v58  ;;  %9138 = vmatpush3.msra.mxu0 %v17748_v17  ;;  %v2659_v8 = vadd.f32 %v8702_v34, %v13642_v0  ;;  %v8735_v38 = vpop.f32.mrf.mxu1  ;;  %v17757_v34 = vld [vmem:[#allocation29_spill] sm:$0xff] }
 0x1f5   :  { %9168 = vmatpush3.msra.mxu1 %v17749_v37  ;;  %9139 = vmatprep.subr.mxu0 %v17750_v56 }
 0x1f6   :  { %9169 = vmatprep.subr.mxu1 %v17751_v3  ;;  %9140 = vmatpush3.msra.mxu0 %v17752_v10  ;;  %v8736_v22 = vpop.f32.mrf.mxu1  ;;  %v17756_v3 = vld [vmem:[#allocation36_spill] sm:$0xff] }
 0x1f7   :  { %9170 = vmatpush3.msra.mxu1 %v17753_v20  ;;  %9141 = vmatprep.subr.mxu0 %v13448_v47  ;;  %v8737_v56 = vadd.f32 %v8736_v22, %v8735_v38  ;;  %v17758_v20 = vld [vmem:[#allocation14_spill] sm:$0xff]  ;;  %v17764_v22 = vand.u32 4294901760, %v13073_v43  ;;  %v17768_v43 = vand.u32 4294901760, %v13139_v49  ;;  %v17774_v49 = vand.u32 4294901760, %v17734_v59 }
 0x1f8   :  { %9171 = vmatprep.subr.mxu1 %v17754_v60  ;;  %9142 = vmatpush3.msra.mxu0 %v13377_v50  ;;  %v17759_v50 = vld [vmem:[#allocation34_spill] sm:$0xff] }
 0x1f9   :  { %9172 = vmatpush3.msra.mxu1 %v17755_v63  ;;  %9143 = vmatprep.subr.mxu0 %v13464_v32  ;;  %v2767_v0 = vadd.f32 %v8737_v56, %v2650_v18  ;;  %v8738_v47 = vpop.f32.mrf.mxu1  ;;  %v17762_v18 = vand.u32 4294901760, %v13035_v54  ;;  %v17767_v54 = vand.u32 4294901760, %v13119_v12  ;;  %v17773_v12 = vand.u32 4294901760, %v17732_v15 }
 0x1fa   :  { %9173 = vmatprep.subr.mxu1 %v17756_v3  ;;  %9144 = vmatpush3.msra.mxu0 %v13426_v19  ;;  %v17778_v15 = vand.u32 4294901760, %v17738_v11  ;;  %v17783_v11 = vld [vmem:[#allocation15_spill] sm:$0xff] }
 0x1fb   :  { %9174 = vmatpush3.msra.mxu1 %v17757_v34  ;;  %9145 = vmatprep.subr.mxu0 %v13526_v44  ;;  %v8739_v32 = vpop.f32.mrf.mxu1 }
 0x1fc   :  { %9175 = vmatprep.subr.mxu1 %v17758_v20  ;;  %9146 = vmatpush3.msra.mxu0 %v13458_v27  ;;  %v8740_v38 = vadd.f32 %v8739_v32, %v8738_v47  ;;  %v17760_v32 = vld [vmem:[#allocation38_spill] sm:$0xff]  ;;  %v17761_v47 = vand.u32 4294901760, %v13029_v41  ;;  %v17766_v41 = vand.u32 4294901760, %v13097_v7  ;;  %v17771_v7 = vand.u32 4294901760, %v13515_v62 }
 0x1fd   :  { %9176 = vmatpush3.msra.mxu1 %v17759_v50  ;;  %9147 = vmatprep.subr.mxu0 %v13545_v53 }
 0x1fe   :  { %9177 = vmatprep.subr.mxu1 %v13290_v46  ;;  %9148 = vmatpush3.msra.mxu0 %v13479_v30  ;;  %v13718_v56 = vadd.f32 %v8740_v38, %v2659_v8  ;;  %v17763_v8 = vld [vmem:[#allocation24_spill] sm:$0xff]  ;;  %v17765_v38 = vand.u32 4294901760, %v13079_v40  ;;  %v17769_v40 = vand.u32 4294901760, %v13503_v5 }
 0x1ff   :  { %9178 = vmatpush3.msra.mxu1 %v13295_v9  ;;  %9149 = vmatprep.subr.mxu0 %v13583_v42 }
 0x200   :  { %9179 = vmatprep.subr.mxu1 %v13345_v23  ;;  %9150 = vmatpush3.msra.mxu0 %v13555_v36 }
 0x201   :  { %9180 = vmatpush3.msra.mxu1 %v13323_v21  ;;  %9151 = vmatprep.subr.mxu0 %v13606_v26 }
 0x202   :  { %9181 = vmatprep.subr.mxu1 %v13379_v51  ;;  %9152 = vmatpush3.msra.mxu0 %v13589_v48 }
 0x203   :  { %4481 = vmatprep.mubr.f32.mxu0 %v13503_v5  ;;  %9182 = vmatpush3.msra.mxu1 %v13360_v2 }
 0x204   :  { %4484 = vmatmul.mubr.f32.vlgmr.msra.gmra.mxu0 %v13515_v62  ;;  %9183 = vmatprep.subr.mxu1 %v17760_v32  ;;  %v17776_v62 = vand.u32 4294901760, %v17736_v45 }
 0x205   :  { %9197 = vmatprep.subr.mxu0 %v17761_v47  ;;  %9184 = vmatpush3.msra.mxu1 %v13398_v14  ;;  %v17770_v47 = vand.u32 4294901760, %v13145_v52  ;;  %v17775_v52 = vand.u32 4294901760, %v13559_v35 }
 0x206   :  { %9198 = vmatpush3.msra.mxu0 %v17762_v18  ;;  %9185 = vmatprep.subr.mxu1 %v17763_v8  ;;  %v17772_v18 = vand.u32 4294901760, %v13179_v61 }
 0x207   :  { %9199 = vmatprep.subr.mxu0 %v17764_v22  ;;  %4490 = vmatprep.mubr.f32.mxu0 %v13559_v35  ;;  %v17779_v35 = vand.u32 4294901760, %v17740_v55  ;;  %v17784_v22 = vand.u32 4294901760, %v17783_v11  ;;  %v17785_v55 = vld [vmem:[#allocation28_spill] sm:$0xff]  ;;  %v228_v11 = vld [vmem:[%s16428_s2 + $0x558] sm:$0xff] }
 0x208   :  { %9186 = vmatpush3.msra.mxu1 %v13420_v39  ;;  %9200 = vmatpush3.msra.mxu0 %v17765_v38 }
 0x209   :  { %4493 = vmatmul.mubr.f32.gmra.mxu0 %v13579_v57  ;;  %9187 = vmatprep.subr.mxu1 %v13494_v1 }
 0x20a   :  { %9201 = vmatprep.subr.mxu0 %v17766_v41  ;;  %9188 = vmatpush3.msra.mxu1 %v13512_v24 }
 0x20b   :  { %9202 = vmatpush3.msra.mxu0 %v17767_v54  ;;  %9189 = vmatprep.subr.mxu1 %v13532_v4  ;;  %v247_v54 = vld [vmem:[%s16428_s2 + $0x5f0] sm:$0xff] }
 0x20c   :  { %9203 = vmatprep.subr.mxu0 %v17768_v43  ;;  %9190 = vmatpush3.msra.mxu1 %v13534_v28  ;;  %v231_v43 = vld [vmem:[%s16428_s2 + $0x570] sm:$0xff] }
 0x20d   :  { %4597 = vmatprep.mubr.f32.mxu1 %v17769_v40  ;;  %9204 = vmatpush3.msra.mxu0 %v17770_v47  ;;  %v17789_v47 = vld [vmem:[#allocation33_spill] sm:$0xff] }
 0x20e   :  { %4601 = vmatmul.mubr.f32.vlgmr.msra.gmra.mxu1 %v17771_v7  ;;  %9205 = vmatprep.subr.mxu0 %v17772_v18  ;;  %v8773_v5 = vpop.f32.mrf.mxu0  ;;  %v17790_v7 = vand.u32 4294901760, %v17789_v47 }
 0x20f   :  { %9235 = vmatprep.subr.mxu1 %v17731_v25  ;;  %9206 = vmatpush3.msra.mxu0 %v17773_v12  ;;  %v17777_v25 = vand.u32 4294901760, %v13579_v57 }
 0x210   :  { %9236 = vmatpush3.msra.mxu1 %v17733_v31  ;;  %9207 = vmatprep.subr.mxu0 %v17774_v49  ;;  %v8774_v61 = vpop.f32.mrf.mxu0  ;;  %v248_v31 = vld [vmem:[%s16428_s2 + $0x5f8] sm:$0xff] }
 0x211   :  { %9237 = vmatprep.subr.mxu1 %v17735_v6  ;;  %4608 = vmatprep.mubr.f32.mxu1 %v17775_v52  ;;  %v8775_v59 = vadd.f32 %v8774_v61, %v8773_v5  ;;  %v17780_v6 = vand.u32 4294901760, %v17742_v33  ;;  %v13789_v38 = vand.u32 4294901760, %v248_v31  ;;  %v17794_v5 = vld [vmem:[#allocation20_spill] sm:$0xff]  ;;  %v13825_v61 = vand.u32 4294901760, %v231_v43 }
 0x212   :  { %9208 = vmatpush3.msra.mxu0 %v17776_v62  ;;  %9238 = vmatpush3.msra.mxu1 %v17737_v16  ;;  %v17782_v16 = vld [vmem:[#allocation7_spill] sm:$0xff]  ;;  %v17795_v52 = vld [vmem:[#allocation8_spill] sm:$0xff]  ;;  %v13823_v62 = vand.u32 4294901760, %v247_v54 }
 0x213   :  { %4612 = vmatmul.mubr.f32.gmra.mxu1 %v17777_v25  ;;  %9209 = vmatprep.subr.mxu0 %v17778_v15  ;;  %v13784_v57 = vadd.f32 %v8775_v59, %v2767_v0  ;;  %v17788_v0 = vand.u32 4294901760, %v17748_v17  ;;  %v17792_v17 = vand.u32 4294901760, %v17752_v10  ;;  %v13818_v49 = vsub.f32 %v248_v31, %v13789_v38  ;;  %17797 = vst [vmem:[#allocation35_spill] sm:$0xff] %v13825_v61  ;;  %v246_v10 = vld [vmem:[%s16428_s2 + $0x5e8] sm:$0xff] }
 0x214   :  { %9239 = vmatprep.subr.mxu1 %v17739_v13  ;;  %9210 = vmatpush3.msra.mxu0 %v17779_v35  ;;  %v8776_v45 = vpop.f32.mrf.mxu0  ;;  %v232_v13 = vld [vmem:[%s16428_s2 + $0x578] sm:$0xff]  ;;  %v230_v15 = vld [vmem:[%s16428_s2 + $0x568] sm:$0xff] }
 0x215   :  { %9240 = vmatpush3.msra.mxu1 %v17741_v29  ;;  %9211 = vmatprep.subr.mxu0 %v17780_v6  ;;  %17781 = vst [vmem:[#allocation5_spill] sm:$0xff] %v13784_v57  ;;  %v17786_v29 = vld [vmem:[#allocation10_spill] sm:$0xff]  ;;  %v13809_v18 = vand.u32 4294901760, %v232_v13  ;;  %v17800_v31 = vld [vmem:[#allocation31_spill] sm:$0xff] }
 0x216   :  { %9241 = vmatprep.subr.mxu1 %v17782_v16  ;;  %9212 = vmatpush3.msra.mxu0 %v17784_v22  ;;  %v17787_v41 = vand.u32 4294901760, %v17786_v29  ;;  %v8777_v33 = vpop.f32.mrf.mxu0  ;;  %v17801_v59 = vand.u32 4294901760, %v17800_v31  ;;  %v245_v6 = vld [vmem:[%s16428_s2 + $0x5e0] sm:$0xff]  ;;  %v16852_v16 = vand.u32 4294901760, %v13818_v49  ;;  %v17804_v22 = vand.u32 4294901760, %v13526_v44  ;;  %v17820_v31 = vld [vmem:[#allocation4_spill] sm:$0xff] }
 0x217   :  { %9242 = vmatpush3.msra.mxu1 %v17785_v55  ;;  %v8778_v40 = vadd.f32 %v8777_v33, %v8776_v45  ;;  %v13840_v35 = vsub.f32 %v232_v13, %v13809_v18  ;;  %v17802_v45 = vand.u32 4294901760, %v13426_v19  ;;  %v13861_v13 = vsub.f32 %v231_v43, %v13825_v61  ;;  %v244_v19 = vld [vmem:[%s16428_s2 + $0x5d8] sm:$0xff]  ;;  %v242_v43 = vld [vmem:[%s16428_s2 + $0x5c8] sm:$0xff]  ;;  %4778 = vmatprep.mubr.f32.mxu0 %v17820_v31 }
 0x218   :  { %9213 = vmatprep.subr.mxu0 %v17787_v41  ;;  %9243 = vmatprep.subr.mxu1 %v17747_v58  ;;  %v17791_v58 = vld [vmem:[#allocation9_spill] sm:$0xff]  ;;  %v13869_v55 = vsub.f32 %v247_v54, %v13823_v62  ;;  %v17806_v29 = vand.u32 4294901760, %v13458_v27  ;;  %v17809_v41 = vand.u32 4294901760, %v13545_v53  ;;  %v13881_v33 = vand.u32 4294901760, %v228_v11  ;;  %v227_v27 = vld [vmem:[%s16428_s2 + $0x550] sm:$0xff] }
 0x219   :  { %9214 = vmatpush3.msra.mxu0 %v17788_v0  ;;  %9244 = vmatpush3.msra.mxu1 %v17749_v37  ;;  %v13815_v12 = vadd.f32 %v8778_v40, %v13718_v56  ;;  %v17796_v37 = vand.u32 4294901760, %v17795_v52  ;;  %v17798_v56 = vld [vmem:[#allocation17_spill] sm:$0xff]  ;;  %v16850_v0 = vand.u32 4294901760, %v13840_v35  ;;  %v17811_v54 = vand.u32 4294901760, %v13479_v30 }
 0x21a   :  { %9215 = vmatprep.subr.mxu0 %v17790_v7  ;;  %9245 = vmatprep.subr.mxu1 %v17791_v58  ;;  %v17799_v25 = vand.u32 4294901760, %v17798_v56  ;;  %17810 = vst [vmem:[#allocation26_spill] sm:$0xff] %v13881_v33  ;;  %v13898_v53 = vsub.f32 %v13818_v49, %v16852_v16  ;;  %v16849_v47 = vand.u32 4294901760, %v13869_v55  ;;  %v16848_v7 = vand.u32 4294901760, %v13861_v13 }
 0x21b   :  { %9216 = vmatpush3.msra.mxu0 %v17792_v17  ;;  %17793 = vst [vmem:[#allocation18_spill] sm:$0xff] %v13815_v12  ;;  %9246 = vmatpush3.msra.mxu1 %v17794_v5  ;;  %v17814_v58 = vand.u32 4294901760, %v13555_v36  ;;  %v13934_v36 = vsub.f32 %v228_v11, %v13881_v33  ;;  %v17819_v56 = vand.u32 4294901760, %v13589_v48 }
 0x21c   :  { %9217 = vmatprep.subr.mxu0 %v17796_v37  ;;  %9247 = vmatprep.subr.mxu1 %v17754_v60  ;;  %v229_v60 = vld [vmem:[%s16428_s2 + $0x560] sm:$0xff]  ;;  %v13939_v37 = vsub.f32 %v13840_v35, %v16850_v0  ;;  %v13964_v48 = vsub.f32 %v13861_v13, %v16848_v7 }
 0x21d   :  { %9218 = vmatpush3.msra.mxu0 %v17799_v25  ;;  %9248 = vmatpush3.msra.mxu1 %v17755_v63  ;;  %v13851_v63 = vand.u32 4294901760, %v246_v10  ;;  %v13876_v44 = vand.u32 4294901760, %v229_v60  ;;  %v225_v25 = vld [vmem:[%s16428_s2 + $0x540] sm:$0xff] }
 0x21e   :  { %9219 = vmatprep.subr.mxu0 %v17801_v59  ;;  %9249 = vmatprep.subr.mxu1 %v17756_v3  ;;  %v13863_v3 = vand.u32 4294901760, %v230_v15 }
 0x21f   :  { %9220 = vmatpush3.msra.mxu0 %v17802_v45  ;;  %17803 = vst [vmem:[#allocation21_spill] sm:$0xff] %v13851_v63  ;;  %9250 = vmatpush3.msra.mxu1 %v17757_v34  ;;  %v13874_v34 = vand.u32 4294901760, %v245_v6  ;;  %17808 = vst [vmem:[#allocation6_spill] sm:$0xff] %v13876_v44  ;;  %v13904_v40 = vsub.f32 %v246_v10, %v13851_v63  ;;  %v13918_v17 = vsub.f32 %v229_v60, %v13876_v44  ;;  %v241_v60 = vld [vmem:[%s16428_s2 + $0x5c0] sm:$0xff]  ;;  %v17822_v45 = vld [vmem:[#allocation37_spill] sm:$0xff] }
 0x220   :  { %9221 = vmatprep.subr.mxu0 %v17804_v22  ;;  %17805 = vst [vmem:[#allocation23_spill] sm:$0xff] %v13863_v3  ;;  %9251 = vmatprep.subr.mxu1 %v17758_v20  ;;  %v243_v20 = vld [vmem:[%s16428_s2 + $0x5d0] sm:$0xff]  ;;  %v13910_v30 = vsub.f32 %v230_v15, %v13863_v3  ;;  %v13941_v10 = vand.u32 4294901760, %v242_v43 }
 0x221   :  { %9222 = vmatpush3.msra.mxu0 %v17806_v29  ;;  %17807 = vst [vmem:[#allocation2_spill] sm:$0xff] %v13874_v34  ;;  %9252 = vmatpush3.msra.mxu1 %v17759_v50  ;;  %v13893_v50 = vand.u32 4294901760, %v244_v19  ;;  %v13920_v5 = vand.u32 4294901760, %v243_v20  ;;  %v13928_v52 = vsub.f32 %v245_v6, %v13874_v34 }
 0x222   :  { %9223 = vmatprep.subr.mxu0 %v17809_v41  ;;  %9253 = vmatprep.subr.mxu1 %v13290_v46  ;;  %v17813_v46 = vand.u32 4294901760, %v13583_v42  ;;  %v226_v42 = vld [vmem:[%s16428_s2 + $0x548] sm:$0xff]  ;;  %17818 = vst [vmem:[#allocation22_spill] sm:$0xff] %v13941_v10  ;;  %v16851_v6 = vand.u32 4294901760, %v13910_v30 }
 0x223   :  { %9224 = vmatpush3.msra.mxu0 %v17811_v54  ;;  %17812 = vst [vmem:[#allocation11_spill] sm:$0xff] %v13893_v50  ;;  %9254 = vmatpush3.msra.mxu1 %v13295_v9  ;;  %17815 = vst [vmem:[#allocation13_spill] sm:$0xff] %v13920_v5  ;;  %v13922_v9 = vand.u32 4294901760, %v227_v27  ;;  %v13952_v15 = vsub.f32 %v244_v19, %v13893_v50  ;;  %v13966_v59 = vand.u32 4294901760, %v226_v42  ;;  %v16853_v22 = vand.u32 4294901760, %v13928_v52 }
 0x224   :  { %9225 = vmatprep.subr.mxu0 %v17813_v46  ;;  %9255 = vmatprep.subr.mxu1 %v13345_v23  ;;  %v17817_v23 = vand.u32 4294901760, %v13606_v26  ;;  %v16847_v26 = vand.u32 4294901760, %v13904_v40  ;;  %v16854_v19 = vand.u32 4294901760, %v13918_v17  ;;  %v13983_v29 = vsub.f32 %v243_v20, %v13920_v5 }
 0x225   :  { %9226 = vmatpush3.msra.mxu0 %v17814_v58  ;;  %17816 = vst [vmem:[#allocation12_spill] sm:$0xff] %v13922_v9  ;;  %9256 = vmatpush3.msra.mxu1 %v13323_v21  ;;  %17821 = vst [vmem:[#allocation19_spill] sm:$0xff] %v13966_v59  ;;  %v13978_v11 = vsub.f32 %v227_v27, %v13922_v9  ;;  %v13988_v54 = vand.u32 4294901760, %v225_v25  ;;  %v13992_v27 = vsub.f32 %v242_v43, %v13941_v10  ;;  %v17828_v43 = vld [vmem:[#allocation32_spill] sm:$0xff] }
 0x226   :  { %9227 = vmatprep.subr.mxu0 %v17817_v23  ;;  %9257 = vmatprep.subr.mxu1 %v13379_v51  ;;  %v13959_v51 = vsub.f32 %v13869_v55, %v16849_v47  ;;  %v13999_v20 = vsub.f32 %v13904_v40, %v16847_v26  ;;  %v14001_v46 = vand.u32 4294901760, %v241_v60  ;;  %v16856_v58 = vand.u32 4294901760, %v13952_v15 }
 0x227   :  { %9228 = vmatpush3.msra.mxu0 %v17819_v56  ;;  %9258 = vmatpush3.msra.mxu1 %v13360_v2  ;;  %v224_v2 = vld [vmem:[%s16428_s2 + $0x538] sm:$0xff]  ;;  %17823 = vst [vmem:[#allocation30_spill] sm:$0xff] %v13978_v11  ;;  %17824 = vst [vmem:[#allocation16_spill] sm:$0xff] %v13988_v54  ;;  %v14014_v26 = vsub.f32 %v226_v42, %v13966_v59  ;;  %v14019_v7 = vsub.f32 %v13910_v30, %v16851_v6  ;;  %v239_v42 = vld [vmem:[%s16428_s2 + $0x5b0] sm:$0xff]  ;;  %v16857_v6 = vand.u32 4294901760, %v13983_v29 }
 0x228   :  { %4780 = vmatmul.mubr.f32.vlgmr.msra.gmra.mxu0 %v17822_v45  ;;  %9259 = vmatprep.subr.mxu1 %v17760_v32  ;;  %v16855_v32 = vand.u32 4294901760, %v13934_v36  ;;  %17825 = vst [vmem:[#allocation25_spill] sm:$0xff] %v13992_v27  ;;  %17826 = vst [vmem:[#allocation3_spill] sm:$0xff] %v14001_v46  ;;  %v14007_v23 = vand.u32 4294901760, %v224_v2  ;;  %v14026_v47 = vsub.f32 %v13928_v52, %v16853_v22  ;;  %v17830_v56 = vld [vmem:[#allocation39_spill] sm:$0xff]  ;;  %v17837_v41 = vand.u32 4294901760, %v13978_v11 }
 0x229   :  { %9273 = vmatprep.subr.mxu0 %v13789_v38  ;;  %9260 = vmatpush3.msra.mxu1 %v13398_v14  ;;  %v240_v14 = vld [vmem:[%s16428_s2 + $0x5b8] sm:$0xff]  ;;  %17829 = vst [vmem:[#allocation36_spill] sm:$0xff] %v14014_v26  ;;  %v14031_v0 = vsub.f32 %v13918_v17, %v16854_v19  ;;  %v14044_v22 = vsub.f32 %v225_v25, %v13988_v54 }
 0x22a   :  { %9274 = vmatpush3.msra.mxu0 %v13809_v18  ;;  %9261 = vmatprep.subr.mxu1 %v17763_v8  ;;  %17827 = vst [vmem:[#allocation27_spill] sm:$0xff] %v14007_v23  ;;  %v14046_v19 = vand.u32 4294901760, %v240_v14  ;;  %v14051_v8 = vsub.f32 %v13934_v36, %v16855_v32  ;;  %v14063_v25 = vsub.f32 %v224_v2, %v14007_v23  ;;  %v238_v2 = vld [vmem:[%s16428_s2 + $0x5a8] sm:$0xff] }
 0x22b   :  { %9275 = vmatprep.subr.mxu0 %v13823_v62  ;;  %4785 = vmatprep.mubr.f32.mxu0 %v17828_v43  ;;  %17831 = vst [vmem:[#allocation29_spill] sm:$0xff] %v14044_v22  ;;  %v14066_v16 = vsub.f32 %v241_v60, %v14001_v46  ;;  %v14086_v32 = vsub.f32 %v13983_v29, %v16857_v6  ;;  %v221_v60 = vld [vmem:[%s16428_s2 + $0x520] sm:$0xff] }
 0x22c   :  { %9262 = vmatpush3.msra.mxu1 %v13420_v39  ;;  %9276 = vmatpush3.msra.mxu0 %v13825_v61  ;;  %v223_v39 = vld [vmem:[%s16428_s2 + $0x530] sm:$0xff]  ;;  %17832 = vst [vmem:[#allocation14_spill] sm:$0xff] %v14046_v19  ;;  %17833 = vst [vmem:[#allocation34_spill] sm:$0xff] %v14063_v25  ;;  %v14091_v12 = vsub.f32 %v13978_v11, %v17837_v41  ;;  %v14107_v41 = vld [vmem:[%s16428_s2 + $0x5a0] sm:$0xff]  ;;  %v14114_v57 = vsub.f32 %v240_v14, %v14046_v19  ;;  %v14132_v14 = vand.u32 4294901760, %v238_v2 }
 0x22d   :  { %4787 = vmatmul.mubr.f32.gmra.mxu0 %v17830_v56  ;;  %9263 = vmatprep.subr.mxu1 %v13494_v1  ;;  %v14060_v1 = vsub.f32 %v13952_v15, %v16856_v58  ;;  %17834 = vst [vmem:[#allocation38_spill] sm:$0xff] %v14066_v16  ;;  %v14073_v21 = vand.u32 4294901760, %v223_v39  ;;  %v222_v58 = vld [vmem:[%s16428_s2 + $0x528] sm:$0xff]  ;;  %v17859_v61 = vand.u32 4294901760, %v14026_v47  ;;  %v17860_v47 = vand.u32 4294901760, %v14031_v0 }
 0x22e   :  { %9277 = vmatprep.subr.mxu0 %v13851_v63  ;;  %9264 = vmatpush3.msra.mxu1 %v13512_v24  ;;  %v14071_v24 = vand.u32 4294901760, %v239_v42  ;;  %17839 = vst [vmem:[#allocation15_spill] sm:$0xff] %v14114_v57  ;;  %17842 = vst [vmem:[#allocation10_spill] sm:$0xff] %v14132_v14  ;;  %v17865_v11 = vand.u32 4294901760, %v14051_v8 }
 0x22f   :  { %9278 = vmatpush3.msra.mxu0 %v13863_v3  ;;  %9265 = vmatprep.subr.mxu1 %v13532_v4  ;;  %17836 = vst [vmem:[#allocation7_spill] sm:$0xff] %v14073_v21  ;;  %v17838_v4 = vand.u32 4294901760, %v13992_v27  ;;  %v17851_v3 = vand.u32 4294901760, %v14063_v25 }
 0x230   :  { %17835 = vst [vmem:[#allocation24_spill] sm:$0xff] %v14071_v24  ;;  %9279 = vmatprep.subr.mxu0 %v13874_v34  ;;  %9266 = vmatpush3.msra.mxu1 %v13534_v28  ;;  %v14119_v28 = vand.u32 4294901760, %v222_v58  ;;  %v220_v34 = vld [vmem:[%s16428_s2 + $0x518] sm:$0xff] }
 0x231   :  { %4889 = vmatprep.mubr.f32.mxu1 %v17820_v31  ;;  %9280 = vmatpush3.msra.mxu0 %v13876_v44  ;;  %v14102_v6 = vsub.f32 %v13992_v27, %v17838_v4  ;;  %v17841_v31 = vand.u32 4294901760, %v13898_v53  ;;  %v17843_v4 = vand.u32 4294901760, %v14014_v26  ;;  %v219_v53 = vld [vmem:[%s16428_s2 + $0x510] sm:$0xff]  ;;  %v14171_v63 = vand.u32 4294901760, %v220_v34 }
 0x232   :  { %4891 = vmatmul.mubr.f32.vlgmr.msra.gmra.mxu1 %v17822_v45  ;;  %9281 = vmatprep.subr.mxu0 %v13893_v50  ;;  %17840 = vst [vmem:[#allocation28_spill] sm:$0xff] %v14119_v28  ;;  %v14130_v45 = vsub.f32 %v223_v39, %v14073_v21  ;;  %v14140_v50 = vsub.f32 %v239_v42, %v14071_v24  ;;  %v236_v42 = vld [vmem:[%s16428_s2 + $0x598] sm:$0xff]  ;;  %v17848_v39 = vand.u32 4294901760, %v14044_v22  ;;  %v35_v27 = vld [vmem:[%s16429_s0 + $0x50] sm:$0xff] }
 0x233   :  { %9311 = vmatprep.subr.mxu1 %v17841_v31  ;;  %9282 = vmatpush3.msra.mxu0 %v13881_v33  ;;  %v14137_v44 = vsub.f32 %v14014_v26, %v17843_v4  ;;  %v17845_v31 = vand.u32 4294901760, %v13939_v37  ;;  %v14151_v33 = vand.u32 4294901760, %v14107_v41  ;;  %v14153_v4 = vand.u32 4294901760, %v221_v60  ;;  %v36_v37 = vld [vmem:[%s16429_s0 + $0x58] sm:$0xff] }
 0x234   :  { %17844 = vst [vmem:[#allocation33_spill] sm:$0xff] %v14140_v50  ;;  %9283 = vmatprep.subr.mxu0 %v13920_v5  ;;  %4896 = vmatprep.mubr.f32.mxu1 %v17828_v43  ;;  %v14168_v5 = vsub.f32 %v14044_v22, %v17848_v39  ;;  %v14180_v43 = vsub.f32 %v222_v58, %v14119_v28  ;;  %v14195_v22 = vand.u32 4294901760, %v219_v53  ;;  %v14200_v58 = vand.u32 4294901760, %v236_v42 }
 0x235   :  { %9312 = vmatpush3.msra.mxu1 %v17845_v31  ;;  %17846 = vst [vmem:[#allocation9_spill] sm:$0xff] %v14153_v4  ;;  %v17847_v31 = vand.u32 4294901760, %v13959_v51  ;;  %9284 = vmatpush3.msra.mxu0 %v13922_v9  ;;  %v17849_v51 = vand.u32 4294901760, %v13964_v48  ;;  %v14190_v26 = vsub.f32 %v14063_v25, %v17851_v3  ;;  %v235_v9 = vld [vmem:[%s16428_s2 + $0x590] sm:$0xff]  ;;  %v17854_v3 = vand.u32 4294901760, %v13999_v20  ;;  %v234_v48 = vld [vmem:[%s16428_s2 + $0x588] sm:$0xff] }
 0x236   :  { %4898 = vmatmul.mubr.f32.gmra.mxu1 %v17830_v56  ;;  %9285 = vmatprep.subr.mxu0 %v13941_v10  ;;  %17852 = vst [vmem:[#allocation20_spill] sm:$0xff] %v14200_v58  ;;  %v14209_v25 = vsub.f32 %v221_v60, %v14153_v4  ;;  %v14216_v10 = vsub.f32 %v238_v2, %v14132_v14  ;;  %v52_v20 = vld [vmem:[%s16429_s0 + $0xd8] sm:$0xff]  ;;  %v5084_v60 = vand.u32 4294901760, %v14168_v5  ;;  %v17857_v56 = vand.u32 4294901760, %v14114_v57 }
 0x237   :  { %9313 = vmatprep.subr.mxu1 %v17847_v31  ;;  %v17850_v31 = vand.u32 4294901760, %v14066_v16  ;;  %9286 = vmatpush3.msra.mxu0 %v13966_v59  ;;  %v14233_v2 = vsub.f32 %v220_v34, %v14171_v63  ;;  %v14243_v5 = vsub.f32 %v219_v53, %v14195_v22  ;;  %v14250_v34 = vsub.f32 %v14107_v41, %v14151_v33  ;;  %v233_v41 = vld [vmem:[%s16428_s2 + $0x580] sm:$0xff] }
 0x238   :  { %9314 = vmatpush3.msra.mxu1 %v17849_v51  ;;  %v14218_v51 = vand.u32 4294901760, %v35_v27  ;;  %9287 = vmatprep.subr.mxu0 %v14001_v46  ;;  %v14230_v59 = vsub.f32 %v14114_v57, %v17857_v56  ;;  %v218_v56 = vld [vmem:[%s16428_s2 + $0x508] sm:$0xff]  ;;  %v17861_v53 = vand.u32 4294901760, %v14140_v50  ;;  %v17870_v8 = vand.u32 4294901760, %v14102_v6 }
 0x239   :  { %v14185_v39 = vsub.f32 %v14066_v16, %v17850_v31  ;;  %v14203_v31 = vand.u32 4294901760, %v36_v37  ;;  %9315 = vmatprep.subr.mxu1 %v17854_v3  ;;  %v17856_v3 = vand.u32 4294901760, %v14019_v7  ;;  %v14235_v16 = vand.u32 4294901760, %v235_v9  ;;  %9288 = vmatpush3.msra.mxu0 %v13988_v54  ;;  %v217_v54 = vld [vmem:[%s16428_s2 + $0x500] sm:$0xff] }
 0x23a   :  { %17855 = vst [vmem:[#allocation17_spill] sm:$0xff] %v14218_v51  ;;  %9289 = vmatprep.subr.mxu0 %v14046_v19  ;;  %v17863_v19 = vand.u32 4294901760, %v14060_v1  ;;  %v14286_v57 = vsub.f32 %v35_v27, %v14218_v51  ;;  %v14295_v1 = vand.u32 4294901760, %v218_v56  ;;  %v14303_v27 = vand.u32 4294901760, %v233_v41 }
 0x23b   :  { %17853 = vst [vmem:[#allocation8_spill] sm:$0xff] %v14203_v31  ;;  %9316 = vmatpush3.msra.mxu1 %v17856_v3  ;;  %17858 = vst [vmem:[#allocation31_spill] sm:$0xff] %v14235_v16  ;;  %v5196_v7 = vand.u32 4294901760, %v14185_v39  ;;  %v14261_v39 = vsub.f32 %v14140_v50, %v17861_v53  ;;  %v14263_v3 = vand.u32 4294901760, %v234_v48  ;;  %v14272_v0 = vsub.f32 %v36_v37, %v14203_v31 }
 0x23c   :  { %9317 = vmatprep.subr.mxu1 %v17859_v61  ;;  %v51_v61 = vld [vmem:[%s16429_s0 + $0xd0] sm:$0xff]  ;;  %9290 = vmatpush3.msra.mxu0 %v14007_v23  ;;  %v17864_v53 = vand.u32 4294901760, %v14130_v45  ;;  %v14289_v37 = vsub.f32 %v236_v42, %v14200_v58  ;;  %v17867_v50 = vand.u32 4294901760, %v14086_v32  ;;  %v14309_v42 = vsub.f32 %v235_v9, %v14235_v16 }
 0x23d   :  { %9318 = vmatpush3.msra.mxu1 %v17860_v47  ;;  %v14274_v47 = vand.u32 4294901760, %v52_v20  ;;  %9291 = vmatprep.subr.mxu0 %v14071_v24  ;;  %v14298_v23 = vand.u32 4294901760, %v51_v61  ;;  %v17872_v32 = vand.u32 4294901760, %v14137_v44  ;;  %v17873_v6 = vand.u32 4294901760, %v14180_v43 }
 0x23e   :  { %9319 = vmatprep.subr.mxu1 %v17863_v19  ;;  %v14282_v46 = vsub.f32 %v14130_v45, %v17864_v53  ;;  %v5203_v19 = vand.u32 4294901760, %v14230_v59  ;;  %9292 = vmatpush3.msra.mxu0 %v14073_v21  ;;  %v17869_v59 = vand.u32 4294901760, %v14091_v12  ;;  %v5210_v53 = vand.u32 4294901760, %v14261_v39 }
 0x23f   :  { %17862 = vst [vmem:[#allocation4_spill] sm:$0xff] %v14274_v47  ;;  %9320 = vmatpush3.msra.mxu1 %v17865_v11  ;;  %17866 = vst [vmem:[#allocation37_spill] sm:$0xff] %v14298_v23  ;;  %v14306_v11 = vand.u32 4294901760, %v217_v54  ;;  %9293 = vmatprep.subr.mxu0 %v14132_v14  ;;  %v14318_v21 = vsub.f32 %v52_v20, %v14274_v47  ;;  %v17871_v12 = vand.u32 4294901760, %v14216_v10 }
 0x240   :  { %9321 = vmatprep.subr.mxu1 %v17867_v50  ;;  %9294 = vmatpush3.msra.mxu0 %v14119_v28  ;;  %v5098_v9 = vand.u32 4294901760, %v14282_v46  ;;  %v5104_v20 = vsub.f32 %v14180_v43, %v17873_v6  ;;  %v14337_v46 = vsub.f32 %v51_v61, %v14298_v23  ;;  %v14344_v44 = vsub.f32 %v218_v56, %v14295_v1 }
 0x241   :  { %17868 = vst [vmem:[#allocation32_spill] sm:$0xff] %v14306_v11  ;;  %9322 = vmatpush3.msra.mxu1 %v17869_v59  ;;  %v5216_v59 = vsub.f32 %v14216_v10, %v17871_v12  ;;  %9295 = vmatprep.subr.mxu0 %v14151_v33  ;;  %v14340_v12 = vsub.f32 %v234_v48, %v14263_v3  ;;  %v17876_v48 = vand.u32 4294901760, %v14272_v0  ;;  %v17877_v61 = vand.u32 4294901760, %v14209_v25 }
 0x242   :  { %9323 = vmatprep.subr.mxu1 %v17870_v8  ;;  %9296 = vmatpush3.msra.mxu0 %v14153_v4  ;;  %v14350_v6 = vsub.f32 %v217_v54, %v14306_v11  ;;  %v17883_v4 = vand.u32 4294901760, %v14309_v42 }
 0x243   :  { %9324 = vmatpush3.msra.mxu1 %v17872_v32  ;;  %v17874_v32 = vand.u32 4294901760, %v14250_v34  ;;  %9297 = vmatprep.subr.mxu0 %v14200_v58  ;;  %v5111_v56 = vsub.f32 %v14209_v25, %v17877_v61  ;;  %v5217_v54 = vand.u32 4294901760, %v5216_v59  ;;  %v17880_v58 = vand.u32 4294901760, %v14289_v37 }
 0x244   :  { %9325 = vmatprep.subr.mxu1 %v5196_v7  ;;  %17875 = vst [vmem:[#allocation39_spill] sm:$0xff] %v14350_v6  ;;  %v5002_v7 = vsub.f32 %v14272_v0, %v17876_v48  ;;  %9298 = vmatpush3.msra.mxu0 %v14171_v63  ;;  %v17881_v61 = vand.u32 4294901760, %v14190_v26  ;;  %v5237_v26 = vsub.f32 %v14309_v42, %v17883_v4  ;;  %v17885_v4 = vand.u32 4294901760, %v14243_v5 }
 0x245   :  { %v5223_v50 = vsub.f32 %v14250_v34, %v17874_v32  ;;  %9326 = vmatpush3.msra.mxu1 %v5084_v60  ;;  %v14362_v32 = vsub.f32 %v233_v41, %v14303_v27  ;;  %v17879_v60 = vand.u32 4294901760, %v14286_v57  ;;  %v5230_v48 = vsub.f32 %v14289_v37, %v17880_v58  ;;  %9299 = vmatprep.subr.mxu0 %v14235_v16 }
 0x246   :  { %9327 = vmatprep.subr.mxu1 %v5203_v19  ;;  %v5105_v41 = vand.u32 4294901760, %v5104_v20  ;;  %v17882_v19 = vand.u32 4294901760, %v14233_v2  ;;  %9300 = vmatpush3.msra.mxu0 %v14195_v22  ;;  %v5003_v20 = vand.u32 4294901760, %v5002_v7  ;;  %v5112_v16 = vand.u32 4294901760, %v5111_v56 }
 0x247   :  { %17878 = vst [vmem:[#allocation40_spill] sm:$0xff] %v14362_v32  ;;  %v5008_v8 = vsub.f32 %v14286_v57, %v17879_v60  ;;  %9328 = vmatpush3.msra.mxu1 %v17881_v61  ;;  %v5224_v58 = vand.u32 4294901760, %v5223_v50  ;;  %9301 = vmatprep.subr.mxu0 %v14263_v3  ;;  %v5231_v60 = vand.u32 4294901760, %v5230_v48  ;;  %v5125_v61 = vsub.f32 %v14243_v5, %v17885_v4 }
 0x248   :  { %v5118_v59 = vsub.f32 %v14233_v2, %v17882_v19  ;;  %9329 = vmatprep.subr.mxu1 %v5210_v53  ;;  %v17884_v19 = vand.u32 4294901760, %v14318_v21  ;;  %9302 = vmatpush3.msra.mxu0 %v14295_v1  ;;  %v17886_v56 = vand.u32 4294901760, %v14337_v46  ;;  %v17888_v48 = vand.u32 4294901760, %v14344_v44 }
 0x249   :  { %9330 = vmatpush3.msra.mxu1 %v5098_v9  ;;  %v5009_v50 = vand.u32 4294901760, %v5008_v8  ;;  %9303 = vmatprep.subr.mxu0 %v14303_v27  ;;  %v5238_v8 = vand.u32 4294901760, %v5237_v26 }
 0x24a   :  { %v5017_v39 = vsub.f32 %v14318_v21, %v17884_v19  ;;  %9331 = vmatprep.subr.mxu1 %v5217_v54  ;;  %v5119_v7 = vand.u32 4294901760, %v5118_v59  ;;  %v5023_v19 = vsub.f32 %v14337_v46, %v17886_v56  ;;  %v17887_v54 = vand.u32 4294901760, %v14340_v12  ;;  %9304 = vmatpush3.msra.mxu0 %v14306_v11 }
 0x24b   :  { %9332 = vmatpush3.msra.mxu1 %v5105_v41  ;;  %v5132_v4 = vsub.f32 %v14344_v44, %v17888_v48  ;;  %5004 = vmatprep.mubr.f32.mxu0 %v5003_v20  ;;  %v17889_v59 = vand.u32 4294901760, %v14362_v32  ;;  %v5126_v56 = vand.u32 4294901760, %v5125_v61  ;;  %v17892_v61 = vld [vmem:[#allocation35_spill] sm:$0xff]  ;;  %v17893_v20 = vld [vmem:[#allocation25_spill] sm:$0xff]  ;;  %v17900_v48 = vld [vmem:[#allocation6_spill] sm:$0xff] }
 0x24c   :  { %v5244_v53 = vsub.f32 %v14340_v12, %v17887_v54  ;;  %9333 = vmatprep.subr.mxu1 %v5224_v58  ;;  %v5018_v41 = vand.u32 4294901760, %v5017_v39  ;;  %5010 = vmatmul.mubr.f32.vlgmr.msra.gmra.mxu0 %v5009_v50  ;;  %v17890_v54 = vand.u32 4294901760, %v14350_v6  ;;  %v5024_v26 = vand.u32 4294901760, %v5023_v19  ;;  %v17895_v50 = vld [vmem:[#allocation36_spill] sm:$0xff]  ;;  %v17898_v19 = vld [vmem:[#allocation2_spill] sm:$0xff] }
 0x24d   :  { %9334 = vmatpush3.msra.mxu1 %v5112_v16  ;;  %v5251_v9 = vsub.f32 %v14362_v32, %v17889_v59  ;;  %9349 = vmatprep.subr.mxu0 %v13818_v49  ;;  %v5133_v16 = vand.u32 4294901760, %v5132_v4  ;;  %v17901_v4 = vld [vmem:[#allocation15_spill] sm:$0xff]  ;;  %v17903_v59 = vld [vmem:[#allocation34_spill] sm:$0xff] }
 0x24e   :  { %9335 = vmatprep.subr.mxu1 %v5231_v60  ;;  %v5139_v58 = vsub.f32 %v14350_v6, %v17890_v54  ;;  %v5245_v11 = vand.u32 4294901760, %v5244_v53  ;;  %9350 = vmatpush3.msra.mxu0 %v13840_v35  ;;  %v17894_v53 = vld [vmem:[#allocation21_spill] sm:$0xff] }
 0x24f   :  { %9336 = vmatpush3.msra.mxu1 %v5119_v7  ;;  %9351 = vmatprep.subr.mxu0 %v13869_v55  ;;  %v5252_v39 = vand.u32 4294901760, %v5251_v9  ;;  %v17896_v9 = vld [vmem:[#allocation23_spill] sm:$0xff]  ;;  %v17897_v7 = vld [vmem:[#allocation38_spill] sm:$0xff]  ;;  %v17905_v54 = vld [vmem:[#allocation33_spill] sm:$0xff] }
 0x250   :  { %9337 = vmatprep.subr.mxu1 %v5238_v8  ;;  %5019 = vmatprep.mubr.f32.mxu0 %v5018_v41  ;;  %v5140_v60 = vand.u32 4294901760, %v5139_v58  ;;  %v17899_v8 = vld [vmem:[#allocation29_spill] sm:$0xff]  ;;  %v17902_v41 = vld [vmem:[#allocation11_spill] sm:$0xff] }
 0x251   :  { %9338 = vmatpush3.msra.mxu1 %v5126_v56  ;;  %9352 = vmatpush3.msra.mxu0 %v13861_v13  ;;  %v17904_v56 = vld [vmem:[#allocation26_spill] sm:$0xff]  ;;  %v17906_v58 = vld [vmem:[#allocation13_spill] sm:$0xff] }
 0x252   :  { %5025 = vmatmul.mubr.f32.gmra.mxu0 %v5024_v26  ;;  %9339 = vmatprep.subr.mxu1 %v5245_v11  ;;  %v17891_v11 = vld [vmem:[#allocation30_spill] sm:$0xff]  ;;  %v17907_v26 = vld [vmem:[#allocation12_spill] sm:$0xff] }
 0x253   :  { %9353 = vmatprep.subr.mxu0 %v13904_v40  ;;  %9340 = vmatpush3.msra.mxu1 %v5133_v16  ;;  %v17908_v16 = vld [vmem:[#allocation22_spill] sm:$0xff] }
 0x254   :  { %9354 = vmatpush3.msra.mxu0 %v13910_v30  ;;  %9341 = vmatprep.subr.mxu1 %v5252_v39  ;;  %v17909_v39 = vld [vmem:[#allocation19_spill] sm:$0xff] }
 0x255   :  { %9355 = vmatprep.subr.mxu0 %v13928_v52  ;;  %9342 = vmatpush3.msra.mxu1 %v5140_v60  ;;  %v17910_v60 = vld [vmem:[#allocation3_spill] sm:$0xff] }
 0x256   :  { %5255 = vmatprep.mubr.f32.mxu1 %v14203_v31  ;;  %9356 = vmatpush3.msra.mxu0 %v13918_v17  ;;  %v17914_v31 = vld [vmem:[#allocation7_spill] sm:$0xff] }
 0x257   :  { %5257 = vmatmul.mubr.f32.vlgmr.msra.gmra.mxu1 %v14218_v51  ;;  %9357 = vmatprep.subr.mxu0 %v13952_v15  ;;  %v17913_v51 = vld [vmem:[#allocation27_spill] sm:$0xff] }
 0x258   :  { %9387 = vmatprep.subr.mxu1 %v13789_v38  ;;  %9358 = vmatpush3.msra.mxu0 %v13934_v36 }
 0x259   :  { %9388 = vmatpush3.msra.mxu1 %v13809_v18  ;;  %9359 = vmatprep.subr.mxu0 %v13983_v29 }
 0x25a   :  { %9389 = vmatprep.subr.mxu1 %v13823_v62  ;;  %5262 = vmatprep.mubr.f32.mxu1 %v14274_v47  ;;  %v17912_v47 = vld [vmem:[#allocation14_spill] sm:$0xff] }
 0x25b   :  { %9360 = vmatpush3.msra.mxu0 %v17891_v11  ;;  %9390 = vmatpush3.msra.mxu1 %v17892_v61 }
 0x25c   :  { %5264 = vmatmul.mubr.f32.gmra.mxu1 %v14298_v23  ;;  %9361 = vmatprep.subr.mxu0 %v17893_v20  ;;  %v17911_v23 = vld [vmem:[#allocation16_spill] sm:$0xff] }
 0x25d   :  { %9391 = vmatprep.subr.mxu1 %v17894_v53  ;;  %9362 = vmatpush3.msra.mxu0 %v17895_v50 }
 0x25e   :  { %9392 = vmatpush3.msra.mxu1 %v17896_v9  ;;  %9363 = vmatprep.subr.mxu0 %v17897_v7 }
 0x25f   :  { %9393 = vmatprep.subr.mxu1 %v17898_v19  ;;  %9364 = vmatpush3.msra.mxu0 %v17899_v8 }
 0x260   :  { %9394 = vmatpush3.msra.mxu1 %v17900_v48  ;;  %9365 = vmatprep.subr.mxu0 %v17901_v4 }
 0x261   :  { %9395 = vmatprep.subr.mxu1 %v17902_v41  ;;  %9366 = vmatpush3.msra.mxu0 %v17903_v59 }
 0x262   :  { %9396 = vmatpush3.msra.mxu1 %v17904_v56  ;;  %9367 = vmatprep.subr.mxu0 %v17905_v54 }
 0x263   :  { %9397 = vmatprep.subr.mxu1 %v17906_v58  ;;  %9368 = vmatpush3.msra.mxu0 %v14130_v45 }
 0x264   :  { %9398 = vmatpush3.msra.mxu1 %v17907_v26  ;;  %9369 = vmatprep.subr.mxu0 %v14216_v10 }
 0x265   :  { %9399 = vmatprep.subr.mxu1 %v17908_v16  ;;  %9370 = vmatpush3.msra.mxu0 %v14180_v43 }
 0x266   :  { %9400 = vmatpush3.msra.mxu1 %v17909_v39  ;;  %9371 = vmatprep.subr.mxu0 %v14250_v34 }
 0x267   :  { %9401 = vmatprep.subr.mxu1 %v17910_v60  ;;  %9372 = vmatpush3.msra.mxu0 %v14209_v25 }
 0x268   :  { %9402 = vmatpush3.msra.mxu1 %v17911_v23  ;;  %9373 = vmatprep.subr.mxu0 %v14289_v37 }
 0x269   :  { %9403 = vmatprep.subr.mxu1 %v17912_v47  ;;  %9374 = vmatpush3.msra.mxu0 %v14233_v2 }
 0x26a   :  { %9404 = vmatpush3.msra.mxu1 %v17913_v51  ;;  %9375 = vmatprep.subr.mxu0 %v14309_v42 }
 0x26b   :  { %9405 = vmatprep.subr.mxu1 %v14071_v24  ;;  %9376 = vmatpush3.msra.mxu0 %v14243_v5  ;;  %v17915_v24 = vld [vmem:[#allocation9_spill] sm:$0xff] }
 0x26c   :  { %9406 = vmatpush3.msra.mxu1 %v17914_v31  ;;  %9377 = vmatprep.subr.mxu0 %v14340_v12  ;;  %v17916_v31 = vld [vmem:[#allocation20_spill] sm:$0xff] }
 0x26d   :  { %9407 = vmatprep.subr.mxu1 %v14132_v14  ;;  %9378 = vmatpush3.msra.mxu0 %v14344_v44  ;;  %v17917_v14 = vand.u32 4294901760, %v13818_v49  ;;  %v17922_v49 = vand.u32 4294901760, %v13904_v40  ;;  %v17928_v40 = vand.u32 4294901760, %v14286_v57 }
 0x26e   :  { %9408 = vmatpush3.msra.mxu1 %v14119_v28  ;;  %9379 = vmatprep.subr.mxu0 %v14362_v32  ;;  %v17918_v28 = vand.u32 4294901760, %v13840_v35  ;;  %v17919_v32 = vld [vmem:[#allocation31_spill] sm:$0xff]  ;;  %v17923_v35 = vand.u32 4294901760, %v13910_v30  ;;  %v17930_v30 = vand.u32 4294901760, %v13934_v36  ;;  %v17935_v36 = vand.u32 4294901760, %v17893_v20 }
 0x26f   :  { %9409 = vmatprep.subr.mxu1 %v14151_v33  ;;  %9380 = vmatpush3.msra.mxu0 %v14350_v6  ;;  %v17920_v6 = vand.u32 4294901760, %v13869_v55  ;;  %v17924_v55 = vand.u32 4294901760, %v13928_v52  ;;  %v17931_v52 = vand.u32 4294901760, %v13983_v29  ;;  %v17941_v20 = vand.u32 4294901760, %v17905_v54 }
 0x270   :  { %5399 = vmatprep.mubr.f32.mxu0 %v14272_v0  ;;  %9410 = vmatpush3.msra.mxu1 %v17915_v24  ;;  %v17921_v24 = vand.u32 4294901760, %v13861_v13  ;;  %v17926_v13 = vand.u32 4294901760, %v14272_v0  ;;  %v264_v0 = vld [vmem:[%s16428_s2 + $0x678] sm:$0xff] }
 0x271   :  { %5402 = vmatmul.mubr.f32.vlgmr.msra.gmra.mxu0 %v14286_v57  ;;  %9411 = vmatprep.subr.mxu1 %v17916_v31  ;;  %v17933_v57 = vand.u32 4294901760, %v17891_v11  ;;  %v279_v11 = vld [vmem:[%s16428_s2 + $0x6f0] sm:$0xff] }
 0x272   :  { %9425 = vmatprep.subr.mxu0 %v17917_v14  ;;  %9412 = vmatpush3.msra.mxu1 %v14171_v63  ;;  %v17929_v14 = vand.u32 4294901760, %v13952_v15  ;;  %v17938_v15 = vand.u32 4294901760, %v17899_v8 }
 0x273   :  { %9426 = vmatpush3.msra.mxu0 %v17918_v28  ;;  %9413 = vmatprep.subr.mxu1 %v17919_v32  ;;  %v17925_v28 = vld [vmem:[#allocation32_spill] sm:$0xff] }
 0x274   :  { %9427 = vmatprep.subr.mxu0 %v17920_v6  ;;  %5408 = vmatprep.mubr.f32.mxu0 %v14318_v21  ;;  %v17940_v6 = vand.u32 4294901760, %v17903_v59  ;;  %v277_v59 = vld [vmem:[%s16428_s2 + $0x6e0] sm:$0xff] }
 0x275   :  { %9414 = vmatpush3.msra.mxu1 %v14195_v22  ;;  %9428 = vmatpush3.msra.mxu0 %v17921_v24  ;;  %v17927_v24 = vand.u32 4294901760, %v13918_v17  ;;  %v17932_v17 = vand.u32 4294901760, %v14318_v21  ;;  %v17937_v21 = vand.u32 4294901760, %v17897_v7  ;;  %v17943_v7 = vand.u32 4294901760, %v14216_v10 }
 0x276   :  { %5411 = vmatmul.mubr.f32.gmra.mxu0 %v14337_v46  ;;  %9415 = vmatprep.subr.mxu1 %v14263_v3  ;;  %v17946_v10 = vand.u32 4294901760, %v14250_v34 }
 0x277   :  { %9429 = vmatprep.subr.mxu0 %v17922_v49  ;;  %9416 = vmatpush3.msra.mxu1 %v14295_v1  ;;  %v17951_v49 = vand.u32 4294901760, %v14233_v2  ;;  %v259_v2 = vld [vmem:[%s16428_s2 + $0x650] sm:$0xff] }
 0x278   :  { %9430 = vmatpush3.msra.mxu0 %v17923_v35  ;;  %9417 = vmatprep.subr.mxu1 %v14303_v27  ;;  %v17954_v35 = vand.u32 4294901760, %v14309_v42 }
 0x279   :  { %9431 = vmatprep.subr.mxu0 %v17924_v55  ;;  %9418 = vmatpush3.msra.mxu1 %v17925_v28 }
 0x27a   :  { %5515 = vmatprep.mubr.f32.mxu1 %v17926_v13  ;;  %9432 = vmatpush3.msra.mxu0 %v17927_v24  ;;  %v17956_v24 = vld [vmem:[#allocation24_spill] sm:$0xff] }
 0x27b   :  { %5519 = vmatmul.mubr.f32.vlgmr.msra.gmra.mxu1 %v17928_v40  ;;  %9433 = vmatprep.subr.mxu0 %v17929_v14  ;;  %v17957_v40 = vand.u32 4294901760, %v14243_v5  ;;  %v274_v14 = vld [vmem:[%s16428_s2 + $0x6c8] sm:$0xff] }
 0x27c   :  { %9463 = vmatprep.subr.mxu1 %v13789_v38  ;;  %9434 = vmatpush3.msra.mxu0 %v17930_v30  ;;  %v17934_v38 = vand.u32 4294901760, %v14337_v46  ;;  %v17939_v46 = vand.u32 4294901760, %v17901_v4  ;;  %v262_v4 = vld [vmem:[%s16428_s2 + $0x668] sm:$0xff] }
 0x27d   :  { %9464 = vmatpush3.msra.mxu1 %v13809_v18  ;;  %9435 = vmatprep.subr.mxu0 %v17931_v52  ;;  %v280_v18 = vld [vmem:[%s16428_s2 + $0x6f8] sm:$0xff]  ;;  %v17959_v52 = vld [vmem:[#allocation7_spill] sm:$0xff] }
 0x27e   :  { %9465 = vmatprep.subr.mxu1 %v13823_v62  ;;  %5526 = vmatprep.mubr.f32.mxu1 %v17932_v17  ;;  %v17936_v62 = vand.u32 4294901760, %v17895_v50  ;;  %v14534_v29 = vand.u32 4294901760, %v280_v18  ;;  %v17942_v50 = vand.u32 4294901760, %v14130_v45  ;;  %v17945_v45 = vand.u32 4294901760, %v14180_v43  ;;  %v261_v43 = vld [vmem:[%s16428_s2 + $0x660] sm:$0xff] }
 0x27f   :  { %9436 = vmatpush3.msra.mxu0 %v17933_v57  ;;  %9466 = vmatpush3.msra.mxu1 %v17892_v61  ;;  %v263_v61 = vld [vmem:[%s16428_s2 + $0x670] sm:$0xff]  ;;  %v17960_v17 = vand.u32 4294901760, %v14340_v12  ;;  %v258_v12 = vld [vmem:[%s16428_s2 + $0x648] sm:$0xff] }
 0x280   :  { %5530 = vmatmul.mubr.f32.gmra.mxu1 %v17934_v38  ;;  %9437 = vmatprep.subr.mxu0 %v17935_v36  ;;  %v14567_v8 = vand.u32 4294901760, %v263_v61  ;;  %v17961_v36 = vld [vmem:[#allocation10_spill] sm:$0xff] }
 0x281   :  { %9467 = vmatprep.subr.mxu1 %v17894_v53  ;;  %9438 = vmatpush3.msra.mxu0 %v17936_v62  ;;  %v14554_v53 = vand.u32 4294901760, %v264_v0 }
 0x282   :  { %9468 = vmatpush3.msra.mxu1 %v17896_v9  ;;  %9439 = vmatprep.subr.mxu0 %v17937_v21  ;;  %v14560_v9 = vsub.f32 %v280_v18, %v14534_v29  ;;  %17944 = vst [vmem:[#allocation30_spill] sm:$0xff] %v14567_v8  ;;  %v17962_v18 = vand.u32 4294901760, %v14344_v44 }
 0x283   :  { %9469 = vmatprep.subr.mxu1 %v17898_v19  ;;  %9440 = vmatpush3.msra.mxu0 %v17938_v15  ;;  %v14565_v19 = vand.u32 4294901760, %v279_v11  ;;  %v14664_v15 = vand.u32 4294901760, %v259_v2 }
 0x284   :  { %9470 = vmatpush3.msra.mxu1 %v17900_v48  ;;  %9441 = vmatprep.subr.mxu0 %v17939_v46  ;;  %v278_v48 = vld [vmem:[%s16428_s2 + $0x6e8] sm:$0xff]  ;;  %v16934_v34 = vand.u32 4294901760, %v14560_v9  ;;  %v17965_v46 = vld [vmem:[#allocation28_spill] sm:$0xff] }
 0x285   :  { %9471 = vmatprep.subr.mxu1 %v17902_v41  ;;  %9442 = vmatpush3.msra.mxu0 %v17940_v6  ;;  %v14582_v41 = vsub.f32 %v264_v0, %v14554_v53  ;;  %v14593_v54 = vand.u32 4294901760, %v278_v48  ;;  %17964 = vst [vmem:[#allocation29_spill] sm:$0xff] %v14664_v15  ;;  %v17966_v6 = vld [vmem:[#allocation40_spill] sm:$0xff] }
 0x286   :  { %9472 = vmatpush3.msra.mxu1 %v17904_v56  ;;  %9443 = vmatprep.subr.mxu0 %v17941_v20  ;;  %v17947_v56 = vand.u32 4294901760, %v14209_v25  ;;  %v276_v25 = vld [vmem:[%s16428_s2 + $0x6d8] sm:$0xff]  ;;  %v14640_v42 = vsub.f32 %v14560_v9, %v16934_v34  ;;  %v14683_v20 = vand.u32 4294901760, %v274_v14 }
 0x287   :  { %9473 = vmatprep.subr.mxu1 %v17906_v58  ;;  %9444 = vmatpush3.msra.mxu0 %v17942_v50  ;;  %17948 = vst [vmem:[#allocation35_spill] sm:$0xff] %v14593_v54  ;;  %v260_v58 = vld [vmem:[%s16428_s2 + $0x658] sm:$0xff]  ;;  %v16931_v13 = vand.u32 4294901760, %v14582_v41  ;;  %v14646_v30 = vsub.f32 %v278_v48, %v14593_v54  ;;  %v17969_v50 = vld [vmem:[#allocation39_spill] sm:$0xff] }
 0x288   :  { %9474 = vmatpush3.msra.mxu1 %v17907_v26  ;;  %9445 = vmatprep.subr.mxu0 %v17943_v7  ;;  %v17949_v26 = vand.u32 4294901760, %v14289_v37  ;;  %v14618_v37 = vand.u32 4294901760, %v261_v43  ;;  %v14623_v55 = vand.u32 4294901760, %v260_v58  ;;  %17968 = vst [vmem:[#allocation6_spill] sm:$0xff] %v14683_v20  ;;  %v17970_v7 = vand.u32 4294901760, %v17969_v50 }
 0x289   :  { %9475 = vmatprep.subr.mxu1 %v17908_v16  ;;  %9446 = vmatpush3.msra.mxu0 %v17945_v45  ;;  %v14603_v16 = vsub.f32 %v263_v61, %v14567_v8  ;;  %v14681_v61 = vsub.f32 %v14582_v41, %v16931_v13  ;;  %v16927_v45 = vand.u32 4294901760, %v14646_v30  ;;  %v17982_v13 = vld [vmem:[#allocation37_spill] sm:$0xff] }
 0x28a   :  { %9476 = vmatpush3.msra.mxu1 %v17909_v39  ;;  %9447 = vmatprep.subr.mxu0 %v17946_v10  ;;  %v14605_v39 = vand.u32 4294901760, %v262_v4  ;;  %17953 = vst [vmem:[#allocation36_spill] sm:$0xff] %v14618_v37  ;;  %17955 = vst [vmem:[#allocation23_spill] sm:$0xff] %v14623_v55  ;;  %v14660_v62 = vsub.f32 %v261_v43, %v14618_v37  ;;  %v14676_v44 = vsub.f32 %v260_v58, %v14623_v55  ;;  %v17972_v43 = vld [vmem:[#allocation9_spill] sm:$0xff] }
 0x28b   :  { %9477 = vmatprep.subr.mxu1 %v17910_v60  ;;  %9448 = vmatpush3.msra.mxu0 %v17947_v56  ;;  %v14611_v60 = vsub.f32 %v279_v11, %v14565_v19  ;;  %v16928_v38 = vand.u32 4294901760, %v14603_v16  ;;  %v17967_v11 = vand.u32 4294901760, %v17966_v6  ;;  %v14708_v58 = vand.u32 4294901760, %v258_v12 }
 0x28c   :  { %9478 = vmatpush3.msra.mxu1 %v17911_v23  ;;  %9449 = vmatprep.subr.mxu0 %v17949_v26  ;;  %17950 = vst [vmem:[#allocation25_spill] sm:$0xff] %v14605_v39  ;;  %v14616_v23 = vand.u32 4294901760, %v277_v59  ;;  %v14652_v5 = vsub.f32 %v262_v4, %v14605_v39  ;;  %v257_v4 = vld [vmem:[%s16428_s2 + $0x640] sm:$0xff] }
 0x28d   :  { %9479 = vmatprep.subr.mxu1 %v17912_v47  ;;  %9450 = vmatpush3.msra.mxu0 %v17951_v49  ;;  %v275_v47 = vld [vmem:[%s16428_s2 + $0x6d0] sm:$0xff]  ;;  %v16930_v57 = vand.u32 4294901760, %v14611_v60  ;;  %v14706_v56 = vsub.f32 %v14603_v16, %v16928_v38  ;;  %17973 = vst [vmem:[#allocation15_spill] sm:$0xff] %v14708_v58  ;;  %v256_v49 = vld [vmem:[%s16428_s2 + $0x638] sm:$0xff] }
 0x28e   :  { %17952 = vst [vmem:[#allocation21_spill] sm:$0xff] %v14616_v23  ;;  %9480 = vmatpush3.msra.mxu1 %v17913_v51  ;;  %9451 = vmatprep.subr.mxu0 %v17954_v35  ;;  %v14635_v51 = vand.u32 4294901760, %v276_v25  ;;  %v14662_v21 = vand.u32 4294901760, %v275_v47  ;;  %v14670_v0 = vsub.f32 %v277_v59, %v14616_v23  ;;  %v17971_v59 = vld [vmem:[#allocation8_spill] sm:$0xff]  ;;  %v16929_v26 = vand.u32 4294901760, %v14652_v5  ;;  %v17974_v35 = vld [vmem:[#allocation17_spill] sm:$0xff] }
 0x28f   :  { %9481 = vmatprep.subr.mxu1 %v17956_v24  ;;  %9452 = vmatpush3.msra.mxu0 %v17957_v40  ;;  %v14720_v24 = vsub.f32 %v259_v2, %v14664_v15  ;;  %v14734_v2 = vsub.f32 %v274_v14, %v14683_v20  ;;  %v17980_v14 = vld [vmem:[#allocation4_spill] sm:$0xff] }
 0x290   :  { %17958 = vst [vmem:[#allocation38_spill] sm:$0xff] %v14635_v51  ;;  %9482 = vmatpush3.msra.mxu1 %v17959_v52  ;;  %9453 = vmatprep.subr.mxu0 %v17960_v17  ;;  %17963 = vst [vmem:[#allocation2_spill] sm:$0xff] %v14662_v21  ;;  %v14694_v10 = vsub.f32 %v276_v25, %v14635_v51  ;;  %v273_v25 = vld [vmem:[%s16428_s2 + $0x6c0] sm:$0xff]  ;;  %v16932_v40 = vand.u32 4294901760, %v14670_v0  ;;  %v16933_v52 = vand.u32 4294901760, %v14660_v62 }
 0x291   :  { %9483 = vmatprep.subr.mxu1 %v17961_v36  ;;  %9454 = vmatpush3.msra.mxu0 %v17962_v18  ;;  %17975 = vst [vmem:[#allocation11_spill] sm:$0xff] %v14720_v24  ;;  %v14725_v17 = vsub.f32 %v275_v47, %v14662_v21  ;;  %v14730_v18 = vand.u32 4294901760, %v257_v4  ;;  %17977 = vst [vmem:[#allocation26_spill] sm:$0xff] %v14734_v2  ;;  %v14741_v47 = vsub.f32 %v14646_v30, %v16927_v45 }
 0x292   :  { %9484 = vmatpush3.msra.mxu1 %v17965_v46  ;;  %9455 = vmatprep.subr.mxu0 %v17967_v11  ;;  %v14743_v46 = vand.u32 4294901760, %v273_v25  ;;  %v16936_v6 = vand.u32 4294901760, %v14694_v10  ;;  %v14749_v11 = vand.u32 4294901760, %v256_v49  ;;  %v14768_v45 = vsub.f32 %v14670_v0, %v16932_v40 }
 0x293   :  { %9485 = vmatprep.subr.mxu1 %v14151_v33  ;;  %9456 = vmatpush3.msra.mxu0 %v17970_v7  ;;  %v14701_v33 = vsub.f32 %v14611_v60, %v16930_v57  ;;  %17976 = vst [vmem:[#allocation34_spill] sm:$0xff] %v14730_v18  ;;  %v14756_v7 = vsub.f32 %v258_v12, %v14708_v58  ;;  %v271_v12 = vld [vmem:[%s16428_s2 + $0x6b0] sm:$0xff]  ;;  %v16938_v57 = vand.u32 4294901760, %v14720_v24  ;;  %v16939_v50 = vand.u32 4294901760, %v14734_v2 }
 0x294   :  { %5696 = vmatprep.mubr.f32.mxu0 %v17971_v59  ;;  %9486 = vmatpush3.msra.mxu1 %v17972_v43  ;;  %17978 = vst [vmem:[#allocation33_spill] sm:$0xff] %v14743_v46  ;;  %17979 = vst [vmem:[#allocation13_spill] sm:$0xff] %v14749_v11  ;;  %v14761_v43 = vsub.f32 %v14652_v5, %v16929_v26  ;;  %v14773_v38 = vsub.f32 %v14660_v62, %v16933_v52  ;;  %v16937_v26 = vand.u32 4294901760, %v14725_v17 }
 0x295   :  { %5698 = vmatmul.mubr.f32.vlgmr.msra.gmra.mxu0 %v17974_v35  ;;  %9487 = vmatprep.subr.mxu1 %v17916_v31  ;;  %v16935_v31 = vand.u32 4294901760, %v14676_v44  ;;  %17981 = vst [vmem:[#allocation12_spill] sm:$0xff] %v14756_v7  ;;  %v14786_v40 = vsub.f32 %v257_v4, %v14730_v18  ;;  %v14805_v4 = vsub.f32 %v256_v49, %v14749_v11  ;;  %v270_v49 = vld [vmem:[%s16428_s2 + $0x6a8] sm:$0xff] }
 0x296   :  { %9501 = vmatprep.subr.mxu0 %v14534_v29  ;;  %9488 = vmatpush3.msra.mxu1 %v14171_v63  ;;  %v272_v63 = vld [vmem:[%s16428_s2 + $0x6b8] sm:$0xff]  ;;  %v14808_v36 = vsub.f32 %v273_v25, %v14743_v46  ;;  %v14833_v48 = vsub.f32 %v14720_v24, %v16938_v57  ;;  %v14849_v57 = vld [vmem:[%s16428_s2 + $0x6a0] sm:$0xff] }
 0x297   :  { %9502 = vmatpush3.msra.mxu0 %v14554_v53  ;;  %9489 = vmatprep.subr.mxu1 %v17919_v32  ;;  %17983 = vst [vmem:[#allocation22_spill] sm:$0xff] %v14786_v40  ;;  %v14788_v52 = vand.u32 4294901760, %v272_v63  ;;  %v14793_v34 = vsub.f32 %v14676_v44, %v16935_v31  ;;  %17985 = vst [vmem:[#allocation3_spill] sm:$0xff] %v14805_v4  ;;  %v14828_v31 = vsub.f32 %v14725_v17, %v16937_v26 }
 0x298   :  { %9503 = vmatprep.subr.mxu0 %v14565_v19  ;;  %5703 = vmatprep.mubr.f32.mxu0 %v17980_v14  ;;  %17986 = vst [vmem:[#allocation16_spill] sm:$0xff] %v14808_v36  ;;  %v14844_v26 = vsub.f32 %v14734_v2, %v16939_v50  ;;  %v17993_v50 = vand.u32 4294901760, %v14756_v7  ;;  %v37_v2 = vld [vmem:[%s16429_s0 + $0x60] sm:$0xff] }
 0x299   :  { %9490 = vmatpush3.msra.mxu1 %v14195_v22  ;;  %9504 = vmatpush3.msra.mxu0 %v14567_v8  ;;  %v255_v22 = vld [vmem:[%s16428_s2 + $0x630] sm:$0xff]  ;;  %17984 = vst [vmem:[#allocation19_spill] sm:$0xff] %v14788_v52  ;;  %v14856_v25 = vsub.f32 %v272_v63, %v14788_v52  ;;  %v14874_v63 = vand.u32 4294901760, %v270_v49  ;;  %v18009_v8 = vand.u32 4294901760, %v14768_v45  ;;  %v18010_v45 = vand.u32 4294901760, %v14773_v38 }
 0x29a   :  { %5705 = vmatmul.mubr.f32.gmra.mxu0 %v17982_v13  ;;  %9491 = vmatprep.subr.mxu1 %v14263_v3  ;;  %v14802_v3 = vsub.f32 %v14694_v10, %v16936_v6  ;;  %v14815_v32 = vand.u32 4294901760, %v255_v22  ;;  %v254_v6 = vld [vmem:[%s16428_s2 + $0x628] sm:$0xff]  ;;  %v18015_v24 = vand.u32 4294901760, %v14793_v34  ;;  %v18020_v34 = vand.u32 4294901760, %v14844_v26 }
 0x29b   :  { %9505 = vmatprep.subr.mxu0 %v14593_v54  ;;  %9492 = vmatpush3.msra.mxu1 %v14295_v1  ;;  %v14813_v1 = vand.u32 4294901760, %v271_v12  ;;  %17989 = vst [vmem:[#allocation20_spill] sm:$0xff] %v14856_v25  ;;  %17992 = vst [vmem:[#allocation32_spill] sm:$0xff] %v14874_v63 }
 0x29c   :  { %9506 = vmatpush3.msra.mxu0 %v14605_v39  ;;  %9493 = vmatprep.subr.mxu1 %v14303_v27  ;;  %17988 = vst [vmem:[#allocation27_spill] sm:$0xff] %v14815_v32  ;;  %v253_v27 = vld [vmem:[%s16428_s2 + $0x620] sm:$0xff]  ;;  %v18001_v39 = vand.u32 4294901760, %v14805_v4 }
 0x29d   :  { %17987 = vst [vmem:[#allocation14_spill] sm:$0xff] %v14813_v1  ;;  %9507 = vmatprep.subr.mxu0 %v14616_v23  ;;  %9494 = vmatpush3.msra.mxu1 %v17925_v28  ;;  %v14861_v28 = vand.u32 4294901760, %v254_v6  ;;  %v252_v23 = vld [vmem:[%s16428_s2 + $0x618] sm:$0xff] }
 0x29e   :  { %5807 = vmatprep.mubr.f32.mxu1 %v17971_v59  ;;  %9508 = vmatpush3.msra.mxu0 %v14618_v37  ;;  %v17991_v59 = vand.u32 4294901760, %v14640_v42  ;;  %v14879_v37 = vsub.f32 %v14756_v7, %v17993_v50  ;;  %v251_v42 = vld [vmem:[%s16428_s2 + $0x610] sm:$0xff]  ;;  %v14895_v50 = vand.u32 4294901760, %v253_v27  ;;  %v14913_v54 = vand.u32 4294901760, %v252_v23 }
 0x29f   :  { %5809 = vmatmul.mubr.f32.vlgmr.msra.gmra.mxu1 %v17974_v35  ;;  %9509 = vmatprep.subr.mxu0 %v14635_v51  ;;  %17990 = vst [vmem:[#allocation31_spill] sm:$0xff] %v14861_v28  ;;  %v14872_v35 = vsub.f32 %v255_v22, %v14815_v32  ;;  %v14882_v51 = vsub.f32 %v271_v12, %v14813_v1  ;;  %v268_v12 = vld [vmem:[%s16428_s2 + $0x698] sm:$0xff]  ;;  %v17998_v22 = vand.u32 4294901760, %v14786_v40 }
 0x2a0   :  { %9539 = vmatprep.subr.mxu1 %v17991_v59  ;;  %9510 = vmatpush3.msra.mxu0 %v14623_v55  ;;  %v17995_v59 = vand.u32 4294901760, %v14681_v61  ;;  %v14893_v55 = vand.u32 4294901760, %v14849_v57  ;;  %17996 = vst [vmem:[#allocation7_spill] sm:$0xff] %v14895_v50  ;;  %v38_v61 = vld [vmem:[%s16429_s0 + $0x68] sm:$0xff]  ;;  %v14932_v7 = vsub.f32 %v14805_v4, %v18001_v39  ;;  %v18004_v39 = vand.u32 4294901760, %v14741_v47 }
 0x2a1   :  { %17994 = vst [vmem:[#allocation24_spill] sm:$0xff] %v14882_v51  ;;  %9511 = vmatprep.subr.mxu0 %v14662_v21  ;;  %5814 = vmatprep.mubr.f32.mxu1 %v17980_v14  ;;  %v14910_v21 = vsub.f32 %v14786_v40, %v17998_v22  ;;  %v14922_v14 = vsub.f32 %v254_v6, %v14861_v28  ;;  %v14937_v40 = vand.u32 4294901760, %v251_v42  ;;  %v14942_v6 = vand.u32 4294901760, %v268_v12  ;;  %v54_v47 = vld [vmem:[%s16429_s0 + $0xe8] sm:$0xff] }
 0x2a2   :  { %9540 = vmatpush3.msra.mxu1 %v17995_v59  ;;  %v17997_v59 = vand.u32 4294901760, %v14701_v33  ;;  %9512 = vmatpush3.msra.mxu0 %v14664_v15  ;;  %v17999_v33 = vand.u32 4294901760, %v14706_v56  ;;  %v267_v15 = vld [vmem:[%s16428_s2 + $0x690] sm:$0xff]  ;;  %v14951_v4 = vsub.f32 %v253_v27, %v14895_v50  ;;  %v266_v56 = vld [vmem:[%s16428_s2 + $0x688] sm:$0xff] }
 0x2a3   :  { %5816 = vmatmul.mubr.f32.gmra.mxu1 %v17982_v13  ;;  %9513 = vmatprep.subr.mxu0 %v14683_v20  ;;  %18002 = vst [vmem:[#allocation10_spill] sm:$0xff] %v14942_v6  ;;  %v14958_v20 = vsub.f32 %v270_v49, %v14874_v63  ;;  %v6002_v27 = vand.u32 4294901760, %v14910_v21  ;;  %v18007_v13 = vand.u32 4294901760, %v14856_v25  ;;  %v14975_v49 = vsub.f32 %v252_v23, %v14913_v54 }
 0x2a4   :  { %9541 = vmatprep.subr.mxu1 %v17997_v59  ;;  %v18000_v59 = vand.u32 4294901760, %v14808_v36  ;;  %9514 = vmatpush3.msra.mxu0 %v14708_v58  ;;  %v14985_v21 = vsub.f32 %v251_v42, %v14937_v40  ;;  %v14992_v23 = vsub.f32 %v14849_v57, %v14893_v55  ;;  %v18011_v42 = vand.u32 4294901760, %v14882_v51  ;;  %v265_v57 = vld [vmem:[%s16428_s2 + $0x680] sm:$0xff] }
 0x2a5   :  { %9542 = vmatpush3.msra.mxu1 %v17999_v33  ;;  %v14960_v33 = vand.u32 4294901760, %v37_v2  ;;  %9515 = vmatprep.subr.mxu0 %v14743_v46  ;;  %v14972_v58 = vsub.f32 %v14856_v25, %v18007_v13  ;;  %v250_v13 = vld [vmem:[%s16428_s2 + $0x608] sm:$0xff]  ;;  %v18023_v26 = vand.u32 4294901760, %v14922_v14 }
 0x2a6   :  { %v14927_v22 = vsub.f32 %v14808_v36, %v18000_v59  ;;  %v14945_v59 = vand.u32 4294901760, %v38_v61  ;;  %9543 = vmatprep.subr.mxu1 %v18004_v39  ;;  %v18006_v39 = vand.u32 4294901760, %v14761_v43  ;;  %v14977_v36 = vand.u32 4294901760, %v267_v15  ;;  %9516 = vmatpush3.msra.mxu0 %v14730_v18  ;;  %v249_v18 = vld [vmem:[%s16428_s2 + $0x600] sm:$0xff] }
 0x2a7   :  { %18005 = vst [vmem:[#allocation40_spill] sm:$0xff] %v14960_v33  ;;  %9517 = vmatprep.subr.mxu0 %v14788_v52  ;;  %v18013_v52 = vand.u32 4294901760, %v14802_v3  ;;  %v15028_v25 = vsub.f32 %v37_v2, %v14960_v33  ;;  %v15037_v3 = vand.u32 4294901760, %v250_v13  ;;  %v15045_v2 = vand.u32 4294901760, %v265_v57 }
 0x2a8   :  { %18003 = vst [vmem:[#allocation28_spill] sm:$0xff] %v14945_v59  ;;  %9544 = vmatpush3.msra.mxu1 %v18006_v39  ;;  %18008 = vst [vmem:[#allocation39_spill] sm:$0xff] %v14977_v36  ;;  %v6114_v43 = vand.u32 4294901760, %v14927_v22  ;;  %v15003_v22 = vsub.f32 %v14882_v51, %v18011_v42  ;;  %v15005_v39 = vand.u32 4294901760, %v266_v56  ;;  %v15014_v38 = vsub.f32 %v38_v61, %v14945_v59 }
 0x2a9   :  { %9545 = vmatprep.subr.mxu1 %v18009_v8  ;;  %v53_v8 = vld [vmem:[%s16429_s0 + $0xe0] sm:$0xff]  ;;  %9518 = vmatpush3.msra.mxu0 %v14749_v11  ;;  %v18014_v42 = vand.u32 4294901760, %v14872_v35  ;;  %v15031_v61 = vsub.f32 %v268_v12, %v14942_v6  ;;  %v18017_v51 = vand.u32 4294901760, %v14828_v31  ;;  %v15051_v12 = vsub.f32 %v267_v15, %v14977_v36 }
 0x2aa   :  { %9546 = vmatpush3.msra.mxu1 %v18010_v45  ;;  %v15016_v45 = vand.u32 4294901760, %v54_v47  ;;  %9519 = vmatprep.subr.mxu0 %v14813_v1  ;;  %v15040_v11 = vand.u32 4294901760, %v53_v8  ;;  %v18022_v31 = vand.u32 4294901760, %v14879_v37  ;;  %v15086_v37 = vsub.f32 %v250_v13, %v15037_v3 }
 0x2ab   :  { %9547 = vmatprep.subr.mxu1 %v18013_v52  ;;  %v15024_v46 = vsub.f32 %v14872_v35, %v18014_v42  ;;  %v6121_v52 = vand.u32 4294901760, %v14972_v58  ;;  %9520 = vmatpush3.msra.mxu0 %v14815_v32  ;;  %v18019_v58 = vand.u32 4294901760, %v14833_v48  ;;  %v6128_v42 = vand.u32 4294901760, %v15003_v22 }
 0x2ac   :  { %18012 = vst [vmem:[#allocation8_spill] sm:$0xff] %v15016_v45  ;;  %9548 = vmatpush3.msra.mxu1 %v18015_v24  ;;  %18016 = vst [vmem:[#allocation9_spill] sm:$0xff] %v15040_v11  ;;  %v15048_v24 = vand.u32 4294901760, %v249_v18  ;;  %9521 = vmatprep.subr.mxu0 %v14874_v63  ;;  %v15060_v32 = vsub.f32 %v54_v47, %v15016_v45  ;;  %v18021_v48 = vand.u32 4294901760, %v14958_v20 }
 0x2ad   :  { %9549 = vmatprep.subr.mxu1 %v18017_v51  ;;  %9522 = vmatpush3.msra.mxu0 %v14861_v28  ;;  %v6016_v15 = vand.u32 4294901760, %v15024_v46  ;;  %v6022_v47 = vsub.f32 %v14922_v14, %v18023_v26  ;;  %v15079_v46 = vsub.f32 %v53_v8, %v15040_v11  ;;  %v18027_v8 = vand.u32 4294901760, %v14951_v4 }
 0x2ae   :  { %18018 = vst [vmem:[#allocation17_spill] sm:$0xff] %v15048_v24  ;;  %9550 = vmatpush3.msra.mxu1 %v18019_v58  ;;  %v6134_v58 = vsub.f32 %v14958_v20, %v18021_v48  ;;  %9523 = vmatprep.subr.mxu0 %v14893_v55  ;;  %v15082_v48 = vsub.f32 %v266_v56, %v15005_v39  ;;  %v18026_v56 = vand.u32 4294901760, %v15014_v38 }
 0x2af   :  { %9551 = vmatprep.subr.mxu1 %v18020_v34  ;;  %9524 = vmatpush3.msra.mxu0 %v14895_v50  ;;  %v15092_v26 = vsub.f32 %v249_v18, %v15048_v24  ;;  %v6029_v13 = vsub.f32 %v14951_v4, %v18027_v8  ;;  %v18031_v8 = vand.u32 4294901760, %v14932_v7  ;;  %v18033_v50 = vand.u32 4294901760, %v15051_v12 }
 0x2b0   :  { %9552 = vmatpush3.msra.mxu1 %v18022_v31  ;;  %v18024_v31 = vand.u32 4294901760, %v14992_v23  ;;  %9525 = vmatprep.subr.mxu0 %v14942_v6  ;;  %v6135_v18 = vand.u32 4294901760, %v6134_v58  ;;  %v18030_v6 = vand.u32 4294901760, %v15031_v61 }
 0x2b1   :  { %9553 = vmatprep.subr.mxu1 %v6114_v43  ;;  %18025 = vst [vmem:[#allocation4_spill] sm:$0xff] %v15092_v26  ;;  %v5920_v43 = vsub.f32 %v15014_v38, %v18026_v56  ;;  %9526 = vmatpush3.msra.mxu0 %v14913_v54  ;;  %v6155_v7 = vsub.f32 %v15051_v12, %v18033_v50  ;;  %v18035_v50 = vand.u32 4294901760, %v14985_v21 }
 0x2b2   :  { %v6141_v51 = vsub.f32 %v14992_v23, %v18024_v31  ;;  %9554 = vmatpush3.msra.mxu1 %v6002_v27  ;;  %v15104_v31 = vsub.f32 %v265_v57, %v15045_v2  ;;  %v18029_v27 = vand.u32 4294901760, %v15028_v25  ;;  %v6148_v56 = vsub.f32 %v15031_v61, %v18030_v6  ;;  %9527 = vmatprep.subr.mxu0 %v14977_v36 }
 0x2b3   :  { %9555 = vmatprep.subr.mxu1 %v6121_v52  ;;  %v6023_v57 = vand.u32 4294901760, %v6022_v47  ;;  %v18032_v52 = vand.u32 4294901760, %v14975_v49  ;;  %9528 = vmatpush3.msra.mxu0 %v14937_v40  ;;  %v5921_v47 = vand.u32 4294901760, %v5920_v43  ;;  %v6030_v36 = vand.u32 4294901760, %v6029_v13 }
 0x2b4   :  { %18028 = vst [vmem:[#allocation37_spill] sm:$0xff] %v15104_v31  ;;  %v5926_v34 = vsub.f32 %v15028_v25, %v18029_v27  ;;  %9556 = vmatpush3.msra.mxu1 %v18031_v8  ;;  %v6142_v6 = vand.u32 4294901760, %v6141_v51  ;;  %9529 = vmatprep.subr.mxu0 %v15005_v39  ;;  %v6149_v27 = vand.u32 4294901760, %v6148_v56  ;;  %v6043_v8 = vsub.f32 %v14985_v21, %v18035_v50 }
 0x2b5   :  { %v6036_v58 = vsub.f32 %v14975_v49, %v18032_v52  ;;  %9557 = vmatprep.subr.mxu1 %v6128_v42  ;;  %v18034_v52 = vand.u32 4294901760, %v15060_v32  ;;  %9530 = vmatpush3.msra.mxu0 %v15037_v3  ;;  %v18036_v13 = vand.u32 4294901760, %v15079_v46  ;;  %v18038_v56 = vand.u32 4294901760, %v15086_v37 }
 0x2b6   :  { %9558 = vmatpush3.msra.mxu1 %v6016_v15  ;;  %v5927_v51 = vand.u32 4294901760, %v5926_v34  ;;  %9531 = vmatprep.subr.mxu0 %v15045_v2  ;;  %v6156_v34 = vand.u32 4294901760, %v6155_v7 }
 0x2b7   :  { %v5935_v22 = vsub.f32 %v15060_v32, %v18034_v52  ;;  %9559 = vmatprep.subr.mxu1 %v6135_v18  ;;  %v6037_v43 = vand.u32 4294901760, %v6036_v58  ;;  %v5941_v52 = vsub.f32 %v15079_v46, %v18036_v13  ;;  %v18037_v18 = vand.u32 4294901760, %v15082_v48  ;;  %9532 = vmatpush3.msra.mxu0 %v15048_v24 }
 0x2b8   :  { %9560 = vmatpush3.msra.mxu1 %v6023_v57  ;;  %v6050_v50 = vsub.f32 %v15086_v37, %v18038_v56  ;;  %5922 = vmatprep.mubr.f32.mxu0 %v5921_v47  ;;  %v18039_v58 = vand.u32 4294901760, %v15104_v31  ;;  %v6044_v13 = vand.u32 4294901760, %v6043_v8  ;;  %v18042_v8 = vld [vmem:[#allocation30_spill] sm:$0xff]  ;;  %v18050_v56 = vld [vmem:[#allocation36_spill] sm:$0xff] }
 0x2b9   :  { %v6162_v42 = vsub.f32 %v15082_v48, %v18037_v18  ;;  %9561 = vmatprep.subr.mxu1 %v6142_v6  ;;  %v5936_v57 = vand.u32 4294901760, %v5935_v22  ;;  %5928 = vmatmul.mubr.f32.vlgmr.msra.gmra.mxu0 %v5927_v51  ;;  %v18040_v18 = vand.u32 4294901760, %v15092_v26  ;;  %v5942_v7 = vand.u32 4294901760, %v5941_v52  ;;  %v18043_v47 = vld [vmem:[#allocation26_spill] sm:$0xff]  ;;  %v18045_v51 = vld [vmem:[#allocation12_spill] sm:$0xff]  ;;  %v18048_v52 = vld [vmem:[#allocation21_spill] sm:$0xff] }
 0x2ba   :  { %9562 = vmatpush3.msra.mxu1 %v6030_v36  ;;  %v6169_v15 = vsub.f32 %v15104_v31, %v18039_v58  ;;  %9577 = vmatprep.subr.mxu0 %v14560_v9  ;;  %v6051_v36 = vand.u32 4294901760, %v6050_v50  ;;  %v18051_v50 = vld [vmem:[#allocation20_spill] sm:$0xff]  ;;  %v18053_v58 = vld [vmem:[#allocation3_spill] sm:$0xff] }
 0x2bb   :  { %9563 = vmatprep.subr.mxu1 %v6149_v27  ;;  %v6057_v6 = vsub.f32 %v15092_v26, %v18040_v18  ;;  %v6163_v24 = vand.u32 4294901760, %v6162_v42  ;;  %9578 = vmatpush3.msra.mxu0 %v14582_v41  ;;  %v18044_v42 = vld [vmem:[#allocation35_spill] sm:$0xff]  ;;  %v18055_v18 = vld [vmem:[#allocation24_spill] sm:$0xff] }
 0x2bc   :  { %9564 = vmatpush3.msra.mxu1 %v6037_v43  ;;  %9579 = vmatprep.subr.mxu0 %v14611_v60  ;;  %v6170_v22 = vand.u32 4294901760, %v6169_v15  ;;  %v18046_v15 = vld [vmem:[#allocation25_spill] sm:$0xff]  ;;  %v18047_v43 = vld [vmem:[#allocation16_spill] sm:$0xff] }
 0x2bd   :  { %9565 = vmatprep.subr.mxu1 %v6156_v34  ;;  %5937 = vmatprep.mubr.f32.mxu0 %v5936_v57  ;;  %v6058_v27 = vand.u32 4294901760, %v6057_v6  ;;  %v18049_v34 = vld [vmem:[#allocation22_spill] sm:$0xff] }
 0x2be   :  { %9566 = vmatpush3.msra.mxu1 %v6044_v13  ;;  %9580 = vmatpush3.msra.mxu0 %v14603_v16  ;;  %v18052_v57 = vld [vmem:[#allocation38_spill] sm:$0xff]  ;;  %v18054_v13 = vld [vmem:[#allocation23_spill] sm:$0xff] }
 0x2bf   :  { %5943 = vmatmul.mubr.f32.gmra.mxu0 %v5942_v7  ;;  %9567 = vmatprep.subr.mxu1 %v6163_v24  ;;  %v18041_v24 = vld [vmem:[#allocation11_spill] sm:$0xff]  ;;  %v18056_v6 = vld [vmem:[#allocation2_spill] sm:$0xff]  ;;  %v18057_v7 = vld [vmem:[#allocation29_spill] sm:$0xff] }
 0x2c0   :  { %9581 = vmatprep.subr.mxu0 %v14646_v30  ;;  %9568 = vmatpush3.msra.mxu1 %v6051_v36  ;;  %v18058_v36 = vld [vmem:[#allocation6_spill] sm:$0xff] }
 0x2c1   :  { %9582 = vmatpush3.msra.mxu0 %v14652_v5  ;;  %9569 = vmatprep.subr.mxu1 %v6170_v22  ;;  %v18059_v22 = vld [vmem:[#allocation15_spill] sm:$0xff] }
 0x2c2   :  { %9583 = vmatprep.subr.mxu0 %v14670_v0  ;;  %9570 = vmatpush3.msra.mxu1 %v6058_v27  ;;  %v18060_v27 = vld [vmem:[#allocation33_spill] sm:$0xff] }
 0x2c3   :  { %6173 = vmatprep.mubr.f32.mxu1 %v14945_v59  ;;  %9584 = vmatpush3.msra.mxu0 %v14660_v62  ;;  %v18064_v59 = vld [vmem:[#allocation27_spill] sm:$0xff] }
 0x2c4   :  { %6175 = vmatmul.mubr.f32.vlgmr.msra.gmra.mxu1 %v14960_v33  ;;  %9585 = vmatprep.subr.mxu0 %v14694_v10  ;;  %v18063_v33 = vld [vmem:[#allocation13_spill] sm:$0xff] }
 0x2c5   :  { %9615 = vmatprep.subr.mxu1 %v14534_v29  ;;  %9586 = vmatpush3.msra.mxu0 %v14676_v44 }
 0x2c6   :  { %9616 = vmatpush3.msra.mxu1 %v14554_v53  ;;  %9587 = vmatprep.subr.mxu0 %v14725_v17 }
 0x2c7   :  { %9617 = vmatprep.subr.mxu1 %v14565_v19  ;;  %6180 = vmatprep.mubr.f32.mxu1 %v15016_v45  ;;  %v18062_v45 = vld [vmem:[#allocation19_spill] sm:$0xff] }
 0x2c8   :  { %9588 = vmatpush3.msra.mxu0 %v18041_v24  ;;  %9618 = vmatpush3.msra.mxu1 %v18042_v8 }
 0x2c9   :  { %6182 = vmatmul.mubr.f32.gmra.mxu1 %v15040_v11  ;;  %9589 = vmatprep.subr.mxu0 %v18043_v47  ;;  %v18061_v11 = vld [vmem:[#allocation34_spill] sm:$0xff] }
 0x2ca   :  { %9619 = vmatprep.subr.mxu1 %v18044_v42  ;;  %9590 = vmatpush3.msra.mxu0 %v18045_v51 }
 0x2cb   :  { %9620 = vmatpush3.msra.mxu1 %v18046_v15  ;;  %9591 = vmatprep.subr.mxu0 %v18047_v43 }
 0x2cc   :  { %9621 = vmatprep.subr.mxu1 %v18048_v52  ;;  %9592 = vmatpush3.msra.mxu0 %v18049_v34 }
 0x2cd   :  { %9622 = vmatpush3.msra.mxu1 %v18050_v56  ;;  %9593 = vmatprep.subr.mxu0 %v18051_v50 }
 0x2ce   :  { %9623 = vmatprep.subr.mxu1 %v18052_v57  ;;  %9594 = vmatpush3.msra.mxu0 %v18053_v58 }
 0x2cf   :  { %9624 = vmatpush3.msra.mxu1 %v18054_v13  ;;  %9595 = vmatprep.subr.mxu0 %v18055_v18 }
 0x2d0   :  { %9625 = vmatprep.subr.mxu1 %v18056_v6  ;;  %9596 = vmatpush3.msra.mxu0 %v14872_v35 }
 0x2d1   :  { %9626 = vmatpush3.msra.mxu1 %v18057_v7  ;;  %9597 = vmatprep.subr.mxu0 %v14958_v20 }
 0x2d2   :  { %9627 = vmatprep.subr.mxu1 %v18058_v36  ;;  %9598 = vmatpush3.msra.mxu0 %v14922_v14 }
 0x2d3   :  { %9628 = vmatpush3.msra.mxu1 %v18059_v22  ;;  %9599 = vmatprep.subr.mxu0 %v14992_v23 }
 0x2d4   :  { %9629 = vmatprep.subr.mxu1 %v18060_v27  ;;  %9600 = vmatpush3.msra.mxu0 %v14951_v4 }
 0x2d5   :  { %9630 = vmatpush3.msra.mxu1 %v18061_v11  ;;  %9601 = vmatprep.subr.mxu0 %v15031_v61 }
 0x2d6   :  { %9631 = vmatprep.subr.mxu1 %v18062_v45  ;;  %9602 = vmatpush3.msra.mxu0 %v14975_v49 }
 0x2d7   :  { %9632 = vmatpush3.msra.mxu1 %v18063_v33  ;;  %9603 = vmatprep.subr.mxu0 %v15051_v12 }
 0x2d8   :  { %9633 = vmatprep.subr.mxu1 %v14813_v1  ;;  %9604 = vmatpush3.msra.mxu0 %v14985_v21  ;;  %v18065_v1 = vld [vmem:[#allocation7_spill] sm:$0xff] }
 0x2d9   :  { %9634 = vmatpush3.msra.mxu1 %v18064_v59  ;;  %9605 = vmatprep.subr.mxu0 %v15082_v48  ;;  %v18066_v59 = vld [vmem:[#allocation10_spill] sm:$0xff] }
 0x2da   :  { %9635 = vmatprep.subr.mxu1 %v14874_v63  ;;  %9606 = vmatpush3.msra.mxu0 %v15086_v37  ;;  %v18067_v63 = vand.u32 4294901760, %v14560_v9  ;;  %v18072_v9 = vand.u32 4294901760, %v14646_v30  ;;  %v18078_v30 = vand.u32 4294901760, %v15028_v25 }
 0x2db   :  { %9636 = vmatpush3.msra.mxu1 %v14861_v28  ;;  %9607 = vmatprep.subr.mxu0 %v15104_v31  ;;  %v18068_v28 = vand.u32 4294901760, %v14582_v41  ;;  %v18069_v31 = vld [vmem:[#allocation39_spill] sm:$0xff]  ;;  %v18073_v41 = vand.u32 4294901760, %v14652_v5  ;;  %v18080_v5 = vand.u32 4294901760, %v14676_v44  ;;  %v18085_v44 = vand.u32 4294901760, %v18043_v47 }
 0x2dc   :  { %9637 = vmatprep.subr.mxu1 %v14893_v55  ;;  %9608 = vmatpush3.msra.mxu0 %v15092_v26  ;;  %v18070_v26 = vand.u32 4294901760, %v14611_v60  ;;  %v18074_v60 = vand.u32 4294901760, %v14670_v0  ;;  %v18081_v0 = vand.u32 4294901760, %v14725_v17  ;;  %v18088_v17 = vand.u32 4294901760, %v18049_v34 }
 0x2dd   :  { %6317 = vmatprep.mubr.f32.mxu0 %v15014_v38  ;;  %9638 = vmatpush3.msra.mxu1 %v18065_v1  ;;  %v18071_v1 = vand.u32 4294901760, %v14603_v16  ;;  %v18076_v16 = vand.u32 4294901760, %v15014_v38  ;;  %v296_v38 = vld [vmem:[%s16428_s2 + $0x778] sm:$0xff]  ;;  %v18091_v47 = vand.u32 4294901760, %v18055_v18 }
 0x2de   :  { %6320 = vmatmul.mubr.f32.vlgmr.msra.gmra.mxu0 %v15028_v25  ;;  %9639 = vmatprep.subr.mxu1 %v18066_v59  ;;  %v18083_v25 = vand.u32 4294901760, %v18041_v24  ;;  %v311_v24 = vld [vmem:[%s16428_s2 + $0x7f0] sm:$0xff] }
 0x2df   :  { %9653 = vmatprep.subr.mxu0 %v18067_v63  ;;  %9640 = vmatpush3.msra.mxu1 %v14913_v54  ;;  %v18079_v63 = vand.u32 4294901760, %v14694_v10  ;;  %v18087_v10 = vand.u32 4294901760, %v18047_v43  ;;  %v18093_v43 = vand.u32 4294901760, %v14958_v20  ;;  %v18096_v20 = vand.u32 4294901760, %v14992_v23 }
 0x2e0   :  { %9654 = vmatpush3.msra.mxu0 %v18068_v28  ;;  %9641 = vmatprep.subr.mxu1 %v18069_v31  ;;  %v18075_v28 = vld [vmem:[#allocation17_spill] sm:$0xff] }
 0x2e1   :  { %9655 = vmatprep.subr.mxu0 %v18070_v26  ;;  %6326 = vmatprep.mubr.f32.mxu0 %v15060_v32  ;;  %v18090_v26 = vand.u32 4294901760, %v18053_v58  ;;  %v309_v58 = vld [vmem:[%s16428_s2 + $0x7e0] sm:$0xff] }
 0x2e2   :  { %9642 = vmatpush3.msra.mxu1 %v14937_v40  ;;  %9656 = vmatpush3.msra.mxu0 %v18071_v1  ;;  %v18077_v1 = vand.u32 4294901760, %v14660_v62  ;;  %v18082_v62 = vand.u32 4294901760, %v15060_v32 }
 0x2e3   :  { %6329 = vmatmul.mubr.f32.gmra.mxu0 %v15079_v46  ;;  %9643 = vmatprep.subr.mxu1 %v15005_v39 }
 0x2e4   :  { %9657 = vmatprep.subr.mxu0 %v18072_v9  ;;  %9644 = vmatpush3.msra.mxu1 %v15037_v3  ;;  %v18101_v9 = vand.u32 4294901760, %v14975_v49  ;;  %v291_v49 = vld [vmem:[%s16428_s2 + $0x750] sm:$0xff] }
 0x2e5   :  { %9658 = vmatpush3.msra.mxu0 %v18073_v41  ;;  %9645 = vmatprep.subr.mxu1 %v15045_v2  ;;  %v18104_v41 = vand.u32 4294901760, %v15051_v12 }
 0x2e6   :  { %9659 = vmatprep.subr.mxu0 %v18074_v60  ;;  %9646 = vmatpush3.msra.mxu1 %v18075_v28 }
 0x2e7   :  { %6433 = vmatprep.mubr.f32.mxu1 %v18076_v16  ;;  %9660 = vmatpush3.msra.mxu0 %v18077_v1  ;;  %v18106_v1 = vld [vmem:[#allocation14_spill] sm:$0xff] }
 0x2e8   :  { %6437 = vmatmul.mubr.f32.vlgmr.msra.gmra.mxu1 %v18078_v30  ;;  %9661 = vmatprep.subr.mxu0 %v18079_v63  ;;  %v18107_v30 = vand.u32 4294901760, %v14985_v21  ;;  %v306_v63 = vld [vmem:[%s16428_s2 + $0x7c8] sm:$0xff] }
 0x2e9   :  { %9691 = vmatprep.subr.mxu1 %v14534_v29  ;;  %9662 = vmatpush3.msra.mxu0 %v18080_v5  ;;  %v18084_v29 = vand.u32 4294901760, %v15079_v46  ;;  %v18089_v46 = vand.u32 4294901760, %v18051_v50  ;;  %v294_v50 = vld [vmem:[%s16428_s2 + $0x768] sm:$0xff] }
 0x2ea   :  { %9692 = vmatpush3.msra.mxu1 %v14554_v53  ;;  %9663 = vmatprep.subr.mxu0 %v18081_v0  ;;  %v312_v53 = vld [vmem:[%s16428_s2 + $0x7f8] sm:$0xff]  ;;  %v18109_v0 = vld [vmem:[#allocation27_spill] sm:$0xff] }
 0x2eb   :  { %9693 = vmatprep.subr.mxu1 %v14565_v19  ;;  %6444 = vmatprep.mubr.f32.mxu1 %v18082_v62  ;;  %v18086_v19 = vand.u32 4294901760, %v18045_v51  ;;  %v15276_v32 = vand.u32 4294901760, %v312_v53  ;;  %v18092_v51 = vand.u32 4294901760, %v14872_v35  ;;  %v18095_v35 = vand.u32 4294901760, %v14922_v14  ;;  %v293_v14 = vld [vmem:[%s16428_s2 + $0x760] sm:$0xff] }
 0x2ec   :  { %9664 = vmatpush3.msra.mxu0 %v18083_v25  ;;  %9694 = vmatpush3.msra.mxu1 %v18042_v8  ;;  %v295_v8 = vld [vmem:[%s16428_s2 + $0x770] sm:$0xff]  ;;  %v18110_v62 = vand.u32 4294901760, %v15082_v48  ;;  %v290_v48 = vld [vmem:[%s16428_s2 + $0x748] sm:$0xff] }
 0x2ed   :  { %6448 = vmatmul.mubr.f32.gmra.mxu1 %v18084_v29  ;;  %9665 = vmatprep.subr.mxu0 %v18085_v44  ;;  %v15309_v34 = vand.u32 4294901760, %v295_v8  ;;  %v18111_v44 = vld [vmem:[#allocation32_spill] sm:$0xff] }
 0x2ee   :  { %9695 = vmatprep.subr.mxu1 %v18044_v42  ;;  %9666 = vmatpush3.msra.mxu0 %v18086_v19  ;;  %v15296_v42 = vand.u32 4294901760, %v296_v38 }
 0x2ef   :  { %9696 = vmatpush3.msra.mxu1 %v18046_v15  ;;  %9667 = vmatprep.subr.mxu0 %v18087_v10  ;;  %v15302_v15 = vsub.f32 %v312_v53, %v15276_v32  ;;  %18094 = vst [vmem:[#allocation11_spill] sm:$0xff] %v15309_v34  ;;  %v18112_v53 = vand.u32 4294901760, %v15086_v37 }
 0x2f0   :  { %9697 = vmatprep.subr.mxu1 %v18048_v52  ;;  %9668 = vmatpush3.msra.mxu0 %v18088_v17  ;;  %v15307_v52 = vand.u32 4294901760, %v311_v24  ;;  %v15406_v17 = vand.u32 4294901760, %v291_v49 }
 0x2f1   :  { %9698 = vmatpush3.msra.mxu1 %v18050_v56  ;;  %9669 = vmatprep.subr.mxu0 %v18089_v46  ;;  %v310_v56 = vld [vmem:[%s16428_s2 + $0x7e8] sm:$0xff]  ;;  %v17016_v23 = vand.u32 4294901760, %v15302_v15 }
 0x2f2   :  { %9699 = vmatprep.subr.mxu1 %v18052_v57  ;;  %9670 = vmatpush3.msra.mxu0 %v18090_v26  ;;  %v15324_v57 = vsub.f32 %v296_v38, %v15296_v42  ;;  %v15335_v18 = vand.u32 4294901760, %v310_v56  ;;  %18114 = vst [vmem:[#allocation22_spill] sm:$0xff] %v15406_v17  ;;  %v18115_v46 = vld [vmem:[#allocation31_spill] sm:$0xff]  ;;  %v18116_v26 = vld [vmem:[#allocation37_spill] sm:$0xff] }
 0x2f3   :  { %9700 = vmatpush3.msra.mxu1 %v18054_v13  ;;  %9671 = vmatprep.subr.mxu0 %v18091_v47  ;;  %v18097_v13 = vand.u32 4294901760, %v14951_v4  ;;  %v308_v4 = vld [vmem:[%s16428_s2 + $0x7d8] sm:$0xff]  ;;  %v15382_v12 = vsub.f32 %v15302_v15, %v17016_v23  ;;  %v15425_v47 = vand.u32 4294901760, %v306_v63 }
 0x2f4   :  { %9701 = vmatprep.subr.mxu1 %v18056_v6  ;;  %9672 = vmatpush3.msra.mxu0 %v18092_v51  ;;  %18098 = vst [vmem:[#allocation30_spill] sm:$0xff] %v15335_v18  ;;  %v292_v6 = vld [vmem:[%s16428_s2 + $0x758] sm:$0xff]  ;;  %v17013_v16 = vand.u32 4294901760, %v15324_v57  ;;  %v15388_v5 = vsub.f32 %v310_v56, %v15335_v18  ;;  %v18119_v51 = vld [vmem:[#allocation4_spill] sm:$0xff] }
 0x2f5   :  { %9702 = vmatpush3.msra.mxu1 %v18057_v7  ;;  %9673 = vmatprep.subr.mxu0 %v18093_v43  ;;  %v18099_v7 = vand.u32 4294901760, %v15031_v61  ;;  %v15360_v61 = vand.u32 4294901760, %v293_v14  ;;  %v15365_v60 = vand.u32 4294901760, %v292_v6  ;;  %18118 = vst [vmem:[#allocation36_spill] sm:$0xff] %v15425_v47  ;;  %v18120_v43 = vand.u32 4294901760, %v18119_v51 }
 0x2f6   :  { %9703 = vmatprep.subr.mxu1 %v18058_v36  ;;  %9674 = vmatpush3.msra.mxu0 %v18095_v35  ;;  %v15345_v36 = vsub.f32 %v295_v8, %v15309_v34  ;;  %v15423_v8 = vsub.f32 %v15324_v57, %v17013_v16  ;;  %v17009_v35 = vand.u32 4294901760, %v15388_v5  ;;  %v18132_v16 = vld [vmem:[#allocation9_spill] sm:$0xff] }
 0x2f7   :  { %9704 = vmatpush3.msra.mxu1 %v18059_v22  ;;  %9675 = vmatprep.subr.mxu0 %v18096_v20  ;;  %v15347_v22 = vand.u32 4294901760, %v294_v50  ;;  %18103 = vst [vmem:[#allocation12_spill] sm:$0xff] %v15360_v61  ;;  %18105 = vst [vmem:[#allocation25_spill] sm:$0xff] %v15365_v60  ;;  %v15402_v19 = vsub.f32 %v293_v14, %v15360_v61  ;;  %v15418_v37 = vsub.f32 %v292_v6, %v15365_v60  ;;  %v18122_v14 = vld [vmem:[#allocation7_spill] sm:$0xff] }
 0x2f8   :  { %9705 = vmatprep.subr.mxu1 %v18060_v27  ;;  %9676 = vmatpush3.msra.mxu0 %v18097_v13  ;;  %v15353_v27 = vsub.f32 %v311_v24, %v15307_v52  ;;  %v17010_v29 = vand.u32 4294901760, %v15345_v36  ;;  %v18117_v24 = vand.u32 4294901760, %v18116_v26  ;;  %v15450_v6 = vand.u32 4294901760, %v290_v48 }
 0x2f9   :  { %9706 = vmatpush3.msra.mxu1 %v18061_v11  ;;  %9677 = vmatprep.subr.mxu0 %v18099_v7  ;;  %18100 = vst [vmem:[#allocation26_spill] sm:$0xff] %v15347_v22  ;;  %v15358_v11 = vand.u32 4294901760, %v309_v58  ;;  %v15394_v21 = vsub.f32 %v294_v50, %v15347_v22  ;;  %v289_v50 = vld [vmem:[%s16428_s2 + $0x740] sm:$0xff] }
 0x2fa   :  { %9707 = vmatprep.subr.mxu1 %v18062_v45  ;;  %9678 = vmatpush3.msra.mxu0 %v18101_v9  ;;  %v307_v45 = vld [vmem:[%s16428_s2 + $0x7d0] sm:$0xff]  ;;  %v17012_v25 = vand.u32 4294901760, %v15353_v27  ;;  %v15448_v13 = vsub.f32 %v15345_v36, %v17010_v29  ;;  %18123 = vst [vmem:[#allocation20_spill] sm:$0xff] %v15450_v6  ;;  %v288_v9 = vld [vmem:[%s16428_s2 + $0x738] sm:$0xff] }
 0x2fb   :  { %18102 = vst [vmem:[#allocation35_spill] sm:$0xff] %v15358_v11  ;;  %9708 = vmatpush3.msra.mxu1 %v18063_v33  ;;  %9679 = vmatprep.subr.mxu0 %v18104_v41  ;;  %v15377_v33 = vand.u32 4294901760, %v308_v4  ;;  %v15404_v10 = vand.u32 4294901760, %v307_v45  ;;  %v15412_v38 = vsub.f32 %v309_v58, %v15358_v11  ;;  %v18121_v58 = vld [vmem:[#allocation28_spill] sm:$0xff]  ;;  %v17011_v7 = vand.u32 4294901760, %v15394_v21 }
 0x2fc   :  { %9709 = vmatprep.subr.mxu1 %v18106_v1  ;;  %9680 = vmatpush3.msra.mxu0 %v18107_v30  ;;  %v18124_v41 = vld [vmem:[#allocation40_spill] sm:$0xff]  ;;  %v15462_v1 = vsub.f32 %v291_v49, %v15406_v17  ;;  %v15476_v49 = vsub.f32 %v306_v63, %v15425_v47 }
 0x2fd   :  { %18108 = vst [vmem:[#allocation16_spill] sm:$0xff] %v15377_v33  ;;  %9710 = vmatpush3.msra.mxu1 %v18109_v0  ;;  %9681 = vmatprep.subr.mxu0 %v18110_v62  ;;  %18113 = vst [vmem:[#allocation21_spill] sm:$0xff] %v15404_v10  ;;  %v15436_v20 = vsub.f32 %v308_v4, %v15377_v33  ;;  %v305_v4 = vld [vmem:[%s16428_s2 + $0x7c0] sm:$0xff]  ;;  %v17014_v30 = vand.u32 4294901760, %v15412_v38  ;;  %v17015_v0 = vand.u32 4294901760, %v15402_v19  ;;  %v18130_v63 = vld [vmem:[#allocation8_spill] sm:$0xff] }
 0x2fe   :  { %9711 = vmatprep.subr.mxu1 %v18111_v44  ;;  %9682 = vmatpush3.msra.mxu0 %v18112_v53  ;;  %18125 = vst [vmem:[#allocation38_spill] sm:$0xff] %v15462_v1  ;;  %v15467_v62 = vsub.f32 %v307_v45, %v15404_v10  ;;  %v15472_v53 = vand.u32 4294901760, %v289_v50  ;;  %18127 = vst [vmem:[#allocation23_spill] sm:$0xff] %v15476_v49  ;;  %v15483_v45 = vsub.f32 %v15388_v5, %v17009_v35 }
 0x2ff   :  { %9712 = vmatpush3.msra.mxu1 %v18115_v46  ;;  %9683 = vmatprep.subr.mxu0 %v18117_v24  ;;  %v15485_v46 = vand.u32 4294901760, %v305_v4  ;;  %v17018_v26 = vand.u32 4294901760, %v15436_v20  ;;  %v15491_v24 = vand.u32 4294901760, %v288_v9  ;;  %v15510_v35 = vsub.f32 %v15412_v38, %v17014_v30 }
 0x300   :  { %9713 = vmatprep.subr.mxu1 %v14893_v55  ;;  %9684 = vmatpush3.msra.mxu0 %v18120_v43  ;;  %v15443_v55 = vsub.f32 %v15353_v27, %v17012_v25  ;;  %18126 = vst [vmem:[#allocation3_spill] sm:$0xff] %v15472_v53  ;;  %v15498_v43 = vsub.f32 %v290_v48, %v15450_v6  ;;  %v303_v48 = vld [vmem:[%s16428_s2 + $0x7b0] sm:$0xff]  ;;  %v17020_v25 = vand.u32 4294901760, %v15462_v1  ;;  %v17021_v51 = vand.u32 4294901760, %v15476_v49 }
 0x301   :  { %6614 = vmatprep.mubr.f32.mxu0 %v18121_v58  ;;  %9714 = vmatpush3.msra.mxu1 %v18122_v14  ;;  %18128 = vst [vmem:[#allocation24_spill] sm:$0xff] %v15485_v46  ;;  %18129 = vst [vmem:[#allocation2_spill] sm:$0xff] %v15491_v24  ;;  %v15503_v14 = vsub.f32 %v15394_v21, %v17011_v7  ;;  %v15515_v29 = vsub.f32 %v15402_v19, %v17015_v0  ;;  %v17019_v7 = vand.u32 4294901760, %v15467_v62 }
 0x302   :  { %6616 = vmatmul.mubr.f32.vlgmr.msra.gmra.mxu0 %v18124_v41  ;;  %9715 = vmatprep.subr.mxu1 %v18066_v59  ;;  %v17017_v59 = vand.u32 4294901760, %v15418_v37  ;;  %18131 = vst [vmem:[#allocation29_spill] sm:$0xff] %v15498_v43  ;;  %v15528_v30 = vsub.f32 %v289_v50, %v15472_v53  ;;  %v15547_v50 = vsub.f32 %v288_v9, %v15491_v24  ;;  %v302_v9 = vld [vmem:[%s16428_s2 + $0x7a8] sm:$0xff] }
 0x303   :  { %9729 = vmatprep.subr.mxu0 %v15276_v32  ;;  %9716 = vmatpush3.msra.mxu1 %v14913_v54  ;;  %v304_v54 = vld [vmem:[%s16428_s2 + $0x7b8] sm:$0xff]  ;;  %v15550_v44 = vsub.f32 %v305_v4, %v15485_v46  ;;  %v15575_v56 = vsub.f32 %v15462_v1, %v17020_v25  ;;  %v15591_v25 = vld [vmem:[%s16428_s2 + $0x7a0] sm:$0xff] }
 0x304   :  { %9730 = vmatpush3.msra.mxu0 %v15296_v42  ;;  %9717 = vmatprep.subr.mxu1 %v18069_v31  ;;  %18133 = vst [vmem:[#allocation6_spill] sm:$0xff] %v15528_v30  ;;  %v15530_v0 = vand.u32 4294901760, %v304_v54  ;;  %v15535_v23 = vsub.f32 %v15418_v37, %v17017_v59  ;;  %18135 = vst [vmem:[#allocation33_spill] sm:$0xff] %v15547_v50  ;;  %v15570_v59 = vsub.f32 %v15467_v62, %v17019_v7 }
 0x305   :  { %9731 = vmatprep.subr.mxu0 %v15307_v52  ;;  %6621 = vmatprep.mubr.f32.mxu0 %v18130_v63  ;;  %18136 = vst [vmem:[#allocation34_spill] sm:$0xff] %v15550_v44  ;;  %v15586_v7 = vsub.f32 %v15476_v49, %v17021_v51  ;;  %v18143_v51 = vand.u32 4294901760, %v15498_v43  ;;  %v39_v49 = vld [vmem:[%s16429_s0 + $0x70] sm:$0xff] }
 0x306   :  { %9718 = vmatpush3.msra.mxu1 %v14937_v40  ;;  %9732 = vmatpush3.msra.mxu0 %v15309_v34  ;;  %v287_v40 = vld [vmem:[%s16428_s2 + $0x730] sm:$0xff]  ;;  %18134 = vst [vmem:[#allocation15_spill] sm:$0xff] %v15530_v0  ;;  %v15598_v4 = vsub.f32 %v304_v54, %v15530_v0  ;;  %v15616_v54 = vand.u32 4294901760, %v302_v9  ;;  %v18159_v34 = vand.u32 4294901760, %v15510_v35  ;;  %v18160_v35 = vand.u32 4294901760, %v15515_v29 }
 0x307   :  { %6623 = vmatmul.mubr.f32.gmra.mxu0 %v18132_v16  ;;  %9719 = vmatprep.subr.mxu1 %v15005_v39  ;;  %v15544_v39 = vsub.f32 %v15436_v20, %v17018_v26  ;;  %v15557_v31 = vand.u32 4294901760, %v287_v40  ;;  %v286_v26 = vld [vmem:[%s16428_s2 + $0x728] sm:$0xff]  ;;  %v18165_v1 = vand.u32 4294901760, %v15535_v23  ;;  %v18170_v23 = vand.u32 4294901760, %v15586_v7 }
 0x308   :  { %9733 = vmatprep.subr.mxu0 %v15335_v18  ;;  %9720 = vmatpush3.msra.mxu1 %v15037_v3  ;;  %v15555_v3 = vand.u32 4294901760, %v303_v48  ;;  %18139 = vst [vmem:[#allocation10_spill] sm:$0xff] %v15598_v4  ;;  %18142 = vst [vmem:[#allocation17_spill] sm:$0xff] %v15616_v54 }
 0x309   :  { %9734 = vmatpush3.msra.mxu0 %v15347_v22  ;;  %9721 = vmatprep.subr.mxu1 %v15045_v2  ;;  %18138 = vst [vmem:[#allocation13_spill] sm:$0xff] %v15557_v31  ;;  %v285_v2 = vld [vmem:[%s16428_s2 + $0x720] sm:$0xff]  ;;  %v18151_v22 = vand.u32 4294901760, %v15547_v50 }
 0x30a   :  { %18137 = vst [vmem:[#allocation19_spill] sm:$0xff] %v15555_v3  ;;  %9735 = vmatprep.subr.mxu0 %v15358_v11  ;;  %9722 = vmatpush3.msra.mxu1 %v18075_v28  ;;  %v15603_v28 = vand.u32 4294901760, %v286_v26  ;;  %v284_v11 = vld [vmem:[%s16428_s2 + $0x718] sm:$0xff] }
 0x30b   :  { %6725 = vmatprep.mubr.f32.mxu1 %v18121_v58  ;;  %9736 = vmatpush3.msra.mxu0 %v15360_v61  ;;  %v18141_v58 = vand.u32 4294901760, %v15382_v12  ;;  %v15621_v61 = vsub.f32 %v15498_v43, %v18143_v51  ;;  %v283_v12 = vld [vmem:[%s16428_s2 + $0x710] sm:$0xff]  ;;  %v15637_v51 = vand.u32 4294901760, %v285_v2  ;;  %v15655_v18 = vand.u32 4294901760, %v284_v11 }
 0x30c   :  { %6727 = vmatmul.mubr.f32.vlgmr.msra.gmra.mxu1 %v18124_v41  ;;  %9737 = vmatprep.subr.mxu0 %v15377_v33  ;;  %18140 = vst [vmem:[#allocation39_spill] sm:$0xff] %v15603_v28  ;;  %v15614_v41 = vsub.f32 %v287_v40, %v15557_v31  ;;  %v15624_v33 = vsub.f32 %v303_v48, %v15555_v3  ;;  %v300_v48 = vld [vmem:[%s16428_s2 + $0x798] sm:$0xff]  ;;  %v18148_v40 = vand.u32 4294901760, %v15528_v30 }
 0x30d   :  { %9767 = vmatprep.subr.mxu1 %v18141_v58  ;;  %9738 = vmatpush3.msra.mxu0 %v15365_v60  ;;  %v18145_v58 = vand.u32 4294901760, %v15423_v8  ;;  %v15635_v60 = vand.u32 4294901760, %v15591_v25  ;;  %18146 = vst [vmem:[#allocation27_spill] sm:$0xff] %v15637_v51  ;;  %v40_v8 = vld [vmem:[%s16429_s0 + $0x78] sm:$0xff]  ;;  %v15674_v43 = vsub.f32 %v15547_v50, %v18151_v22  ;;  %v18154_v22 = vand.u32 4294901760, %v15483_v45 }
 0x30e   :  { %18144 = vst [vmem:[#allocation14_spill] sm:$0xff] %v15624_v33  ;;  %9739 = vmatprep.subr.mxu0 %v15404_v10  ;;  %6732 = vmatprep.mubr.f32.mxu1 %v18130_v63  ;;  %v15652_v10 = vsub.f32 %v15528_v30, %v18148_v40  ;;  %v15664_v63 = vsub.f32 %v286_v26, %v15603_v28  ;;  %v15679_v30 = vand.u32 4294901760, %v283_v12  ;;  %v15684_v26 = vand.u32 4294901760, %v300_v48  ;;  %v56_v45 = vld [vmem:[%s16429_s0 + $0xf8] sm:$0xff] }
 0x30f   :  { %9768 = vmatpush3.msra.mxu1 %v18145_v58  ;;  %v18147_v58 = vand.u32 4294901760, %v15443_v55  ;;  %9740 = vmatpush3.msra.mxu0 %v15406_v17  ;;  %v18149_v55 = vand.u32 4294901760, %v15448_v13  ;;  %v299_v17 = vld [vmem:[%s16428_s2 + $0x790] sm:$0xff]  ;;  %v15693_v50 = vsub.f32 %v285_v2, %v15637_v51  ;;  %v298_v13 = vld [vmem:[%s16428_s2 + $0x788] sm:$0xff] }
 0x310   :  { %6734 = vmatmul.mubr.f32.gmra.mxu1 %v18132_v16  ;;  %9741 = vmatprep.subr.mxu0 %v15425_v47  ;;  %18152 = vst [vmem:[#allocation32_spill] sm:$0xff] %v15684_v26  ;;  %v15700_v47 = vsub.f32 %v302_v9, %v15616_v54  ;;  %v6920_v2 = vand.u32 4294901760, %v15652_v10  ;;  %v18157_v16 = vand.u32 4294901760, %v15598_v4  ;;  %v15717_v9 = vsub.f32 %v284_v11, %v15655_v18 }
 0x311   :  { %9769 = vmatprep.subr.mxu1 %v18147_v58  ;;  %v18150_v58 = vand.u32 4294901760, %v15550_v44  ;;  %9742 = vmatpush3.msra.mxu0 %v15450_v6  ;;  %v15727_v10 = vsub.f32 %v283_v12, %v15679_v30  ;;  %v15734_v11 = vsub.f32 %v15591_v25, %v15635_v60  ;;  %v18161_v12 = vand.u32 4294901760, %v15624_v33  ;;  %v297_v25 = vld [vmem:[%s16428_s2 + $0x780] sm:$0xff] }
 0x312   :  { %9770 = vmatpush3.msra.mxu1 %v18149_v55  ;;  %v15702_v55 = vand.u32 4294901760, %v39_v49  ;;  %9743 = vmatprep.subr.mxu0 %v15485_v46  ;;  %v15714_v6 = vsub.f32 %v15598_v4, %v18157_v16  ;;  %v282_v16 = vld [vmem:[%s16428_s2 + $0x708] sm:$0xff]  ;;  %v18173_v7 = vand.u32 4294901760, %v15664_v63 }
 0x313   :  { %v15669_v40 = vsub.f32 %v15550_v44, %v18150_v58  ;;  %v15687_v58 = vand.u32 4294901760, %v40_v8  ;;  %9771 = vmatprep.subr.mxu1 %v18154_v22  ;;  %v18156_v22 = vand.u32 4294901760, %v15503_v14  ;;  %v15719_v44 = vand.u32 4294901760, %v299_v17  ;;  %9744 = vmatpush3.msra.mxu0 %v15472_v53  ;;  %v281_v53 = vld [vmem:[%s16428_s2 + $0x700] sm:$0xff] }
 0x314   :  { %18155 = vst [vmem:[#allocation37_spill] sm:$0xff] %v15702_v55  ;;  %9745 = vmatprep.subr.mxu0 %v15530_v0  ;;  %v18163_v0 = vand.u32 4294901760, %v15544_v39  ;;  %v15770_v4 = vsub.f32 %v39_v49, %v15702_v55  ;;  %v15779_v39 = vand.u32 4294901760, %v282_v16  ;;  %v15787_v49 = vand.u32 4294901760, %v297_v25 }
 0x315   :  { %18153 = vst [vmem:[#allocation31_spill] sm:$0xff] %v15687_v58  ;;  %9772 = vmatpush3.msra.mxu1 %v18156_v22  ;;  %18158 = vst [vmem:[#allocation4_spill] sm:$0xff] %v15719_v44  ;;  %v7032_v14 = vand.u32 4294901760, %v15669_v40  ;;  %v15745_v40 = vsub.f32 %v15624_v33, %v18161_v12  ;;  %v15747_v22 = vand.u32 4294901760, %v298_v13  ;;  %v15756_v29 = vsub.f32 %v40_v8, %v15687_v58 }
 0x316   :  { %9773 = vmatprep.subr.mxu1 %v18159_v34  ;;  %v55_v34 = vld [vmem:[%s16429_s0 + $0xf0] sm:$0xff]  ;;  %9746 = vmatpush3.msra.mxu0 %v15491_v24  ;;  %v18164_v12 = vand.u32 4294901760, %v15614_v41  ;;  %v15773_v8 = vsub.f32 %v300_v48, %v15684_v26  ;;  %v18167_v33 = vand.u32 4294901760, %v15570_v59  ;;  %v15793_v48 = vsub.f32 %v299_v17, %v15719_v44 }
 0x317   :  { %9774 = vmatpush3.msra.mxu1 %v18160_v35  ;;  %v15758_v35 = vand.u32 4294901760, %v56_v45  ;;  %9747 = vmatprep.subr.mxu0 %v15555_v3  ;;  %v15782_v24 = vand.u32 4294901760, %v55_v34  ;;  %v18172_v59 = vand.u32 4294901760, %v15621_v61  ;;  %v15828_v61 = vsub.f32 %v282_v16, %v15779_v39 }
 0x318   :  { %9775 = vmatprep.subr.mxu1 %v18163_v0  ;;  %v15766_v46 = vsub.f32 %v15614_v41, %v18164_v12  ;;  %v7039_v0 = vand.u32 4294901760, %v15714_v6  ;;  %9748 = vmatpush3.msra.mxu0 %v15557_v31  ;;  %v18169_v6 = vand.u32 4294901760, %v15575_v56  ;;  %v7046_v12 = vand.u32 4294901760, %v15745_v40 }
 0x319   :  { %18162 = vst [vmem:[#allocation28_spill] sm:$0xff] %v15758_v35  ;;  %9776 = vmatpush3.msra.mxu1 %v18165_v1  ;;  %18166 = vst [vmem:[#allocation7_spill] sm:$0xff] %v15782_v24  ;;  %v15790_v1 = vand.u32 4294901760, %v281_v53  ;;  %9749 = vmatprep.subr.mxu0 %v15616_v54  ;;  %v15802_v31 = vsub.f32 %v56_v45, %v15758_v35  ;;  %v18171_v56 = vand.u32 4294901760, %v15700_v47 }
 0x31a   :  { %9777 = vmatprep.subr.mxu1 %v18167_v33  ;;  %9750 = vmatpush3.msra.mxu0 %v15603_v28  ;;  %v6934_v17 = vand.u32 4294901760, %v15766_v46  ;;  %v6940_v45 = vsub.f32 %v15664_v63, %v18173_v7  ;;  %v15821_v46 = vsub.f32 %v55_v34, %v15782_v24  ;;  %v18177_v34 = vand.u32 4294901760, %v15693_v50 }
 0x31b   :  { %18168 = vst [vmem:[#allocation40_spill] sm:$0xff] %v15790_v1  ;;  %9778 = vmatpush3.msra.mxu1 %v18169_v6  ;;  %v7052_v6 = vsub.f32 %v15700_v47, %v18171_v56  ;;  %9751 = vmatprep.subr.mxu0 %v15635_v60  ;;  %v15824_v56 = vsub.f32 %v298_v13, %v15747_v22  ;;  %v18176_v13 = vand.u32 4294901760, %v15756_v29 }
 0x31c   :  { %9779 = vmatprep.subr.mxu1 %v18170_v23  ;;  %9752 = vmatpush3.msra.mxu0 %v15637_v51  ;;  %v15834_v7 = vsub.f32 %v281_v53, %v15790_v1  ;;  %v6947_v16 = vsub.f32 %v15693_v50, %v18177_v34  ;;  %v18181_v34 = vand.u32 4294901760, %v15674_v43  ;;  %v18183_v51 = vand.u32 4294901760, %v15793_v48 }
 0x31d   :  { %9780 = vmatpush3.msra.mxu1 %v18172_v59  ;;  %v18174_v59 = vand.u32 4294901760, %v15734_v11  ;;  %9753 = vmatprep.subr.mxu0 %v15684_v26  ;;  %v7053_v53 = vand.u32 4294901760, %v7052_v6  ;;  %v18180_v26 = vand.u32 4294901760, %v15773_v8 }
 0x31e   :  { %9781 = vmatprep.subr.mxu1 %v7032_v14  ;;  %18175 = vst [vmem:[#allocation8_spill] sm:$0xff] %v15834_v7  ;;  %v6838_v14 = vsub.f32 %v15756_v29, %v18176_v13  ;;  %9754 = vmatpush3.msra.mxu0 %v15655_v18  ;;  %v7073_v43 = vsub.f32 %v15793_v48, %v18183_v51  ;;  %v18185_v51 = vand.u32 4294901760, %v15727_v10 }
 0x31f   :  { %v7059_v33 = vsub.f32 %v15734_v11, %v18174_v59  ;;  %9782 = vmatpush3.msra.mxu1 %v6920_v2  ;;  %v15846_v59 = vsub.f32 %v297_v25, %v15787_v49  ;;  %v18179_v2 = vand.u32 4294901760, %v15770_v4  ;;  %v7066_v13 = vsub.f32 %v15773_v8, %v18180_v26  ;;  %9755 = vmatprep.subr.mxu0 %v15719_v44 }
 0x320   :  { %9783 = vmatprep.subr.mxu1 %v7039_v0  ;;  %v6941_v25 = vand.u32 4294901760, %v6940_v45  ;;  %v18182_v0 = vand.u32 4294901760, %v15717_v9  ;;  %9756 = vmatpush3.msra.mxu0 %v15679_v30  ;;  %v6839_v45 = vand.u32 4294901760, %v6838_v14  ;;  %v6948_v44 = vand.u32 4294901760, %v6947_v16 }
 0x321   :  { %18178 = vst [vmem:[#allocation9_spill] sm:$0xff] %v15846_v59  ;;  %v6844_v23 = vsub.f32 %v15770_v4, %v18179_v2  ;;  %9784 = vmatpush3.msra.mxu1 %v18181_v34  ;;  %v7060_v26 = vand.u32 4294901760, %v7059_v33  ;;  %9757 = vmatprep.subr.mxu0 %v15747_v22  ;;  %v7067_v2 = vand.u32 4294901760, %v7066_v13  ;;  %v6961_v34 = vsub.f32 %v15727_v10, %v18185_v51 }
 0x322   :  { %v6954_v6 = vsub.f32 %v15717_v9, %v18182_v0  ;;  %9785 = vmatprep.subr.mxu1 %v7046_v12  ;;  %v18184_v0 = vand.u32 4294901760, %v15802_v31  ;;  %9758 = vmatpush3.msra.mxu0 %v15779_v39  ;;  %v18186_v16 = vand.u32 4294901760, %v15821_v46  ;;  %v18188_v13 = vand.u32 4294901760, %v15828_v61 }
 0x323   :  { %9786 = vmatpush3.msra.mxu1 %v6934_v17  ;;  %v6845_v33 = vand.u32 4294901760, %v6844_v23  ;;  %9759 = vmatprep.subr.mxu0 %v15787_v49  ;;  %v7074_v23 = vand.u32 4294901760, %v7073_v43 }
 0x324   :  { %v6853_v40 = vsub.f32 %v15802_v31, %v18184_v0  ;;  %9787 = vmatprep.subr.mxu1 %v7053_v53  ;;  %v6955_v14 = vand.u32 4294901760, %v6954_v6  ;;  %v6859_v0 = vsub.f32 %v15821_v46, %v18186_v16  ;;  %v18187_v53 = vand.u32 4294901760, %v15824_v56  ;;  %9760 = vmatpush3.msra.mxu0 %v15790_v1 }
 0x325   :  { %9788 = vmatpush3.msra.mxu1 %v6941_v25  ;;  %v6968_v51 = vsub.f32 %v15828_v61, %v18188_v13  ;;  %6840 = vmatprep.mubr.f32.mxu0 %v6839_v45  ;;  %v18189_v6 = vand.u32 4294901760, %v15846_v59  ;;  %v6962_v16 = vand.u32 4294901760, %v6961_v34  ;;  %v18192_v34 = vld [vmem:[#allocation11_spill] sm:$0xff]  ;;  %v18200_v13 = vld [vmem:[#allocation12_spill] sm:$0xff] }
 0x326   :  { %v7080_v12 = vsub.f32 %v15824_v56, %v18187_v53  ;;  %9789 = vmatprep.subr.mxu1 %v7060_v26  ;;  %v6854_v25 = vand.u32 4294901760, %v6853_v40  ;;  %6846 = vmatmul.mubr.f32.vlgmr.msra.gmra.mxu0 %v6845_v33  ;;  %v18190_v53 = vand.u32 4294901760, %v15834_v7  ;;  %v6860_v43 = vand.u32 4294901760, %v6859_v0  ;;  %v18193_v45 = vld [vmem:[#allocation23_spill] sm:$0xff]  ;;  %v18195_v33 = vld [vmem:[#allocation29_spill] sm:$0xff] }
 0x327   :  { %9790 = vmatpush3.msra.mxu1 %v6948_v44  ;;  %v7087_v17 = vsub.f32 %v15846_v59, %v18189_v6  ;;  %9805 = vmatprep.subr.mxu0 %v15302_v15  ;;  %v6969_v44 = vand.u32 4294901760, %v6968_v51  ;;  %v18198_v0 = vld [vmem:[#allocation35_spill] sm:$0xff]  ;;  %v18201_v51 = vld [vmem:[#allocation10_spill] sm:$0xff]  ;;  %v18203_v6 = vld [vmem:[#allocation33_spill] sm:$0xff] }
 0x328   :  { %9791 = vmatprep.subr.mxu1 %v7067_v2  ;;  %v6975_v26 = vsub.f32 %v15834_v7, %v18190_v53  ;;  %v7081_v1 = vand.u32 4294901760, %v7080_v12  ;;  %9806 = vmatpush3.msra.mxu0 %v15324_v57  ;;  %v18194_v12 = vld [vmem:[#allocation30_spill] sm:$0xff] }
 0x329   :  { %9792 = vmatpush3.msra.mxu1 %v6955_v14  ;;  %9807 = vmatprep.subr.mxu0 %v15353_v27  ;;  %v7088_v40 = vand.u32 4294901760, %v7087_v17  ;;  %v18196_v17 = vld [vmem:[#allocation26_spill] sm:$0xff] }
 0x32a   :  { %9793 = vmatprep.subr.mxu1 %v7074_v23  ;;  %6855 = vmatprep.mubr.f32.mxu0 %v6854_v25  ;;  %v6976_v2 = vand.u32 4294901760, %v6975_v26  ;;  %v18197_v14 = vld [vmem:[#allocation34_spill] sm:$0xff]  ;;  %v18202_v25 = vld [vmem:[#allocation16_spill] sm:$0xff]  ;;  %v18206_v26 = vld [vmem:[#allocation21_spill] sm:$0xff] }
 0x32b   :  { %9794 = vmatpush3.msra.mxu1 %v6962_v16  ;;  %9808 = vmatpush3.msra.mxu0 %v15345_v36  ;;  %v18199_v23 = vld [vmem:[#allocation6_spill] sm:$0xff]  ;;  %v18204_v16 = vld [vmem:[#allocation25_spill] sm:$0xff] }
 0x32c   :  { %6861 = vmatmul.mubr.f32.gmra.mxu0 %v6860_v43  ;;  %9795 = vmatprep.subr.mxu1 %v7081_v1  ;;  %v18191_v1 = vld [vmem:[#allocation38_spill] sm:$0xff] }
 0x32d   :  { %9809 = vmatprep.subr.mxu0 %v15388_v5  ;;  %9796 = vmatpush3.msra.mxu1 %v6969_v44  ;;  %v18205_v53 = vld [vmem:[#allocation14_spill] sm:$0xff]  ;;  %v18208_v44 = vld [vmem:[#allocation36_spill] sm:$0xff] }
 0x32e   :  { %9810 = vmatpush3.msra.mxu0 %v15394_v21  ;;  %9797 = vmatprep.subr.mxu1 %v7088_v40  ;;  %v18207_v43 = vld [vmem:[#allocation22_spill] sm:$0xff]  ;;  %v18209_v40 = vld [vmem:[#allocation20_spill] sm:$0xff] }
 0x32f   :  { %9811 = vmatprep.subr.mxu0 %v15412_v38  ;;  %9798 = vmatpush3.msra.mxu1 %v6976_v2  ;;  %v18210_v2 = vld [vmem:[#allocation24_spill] sm:$0xff] }
 0x330   :  { %7091 = vmatprep.mubr.f32.mxu1 %v15687_v58  ;;  %9812 = vmatpush3.msra.mxu0 %v15402_v19  ;;  %v18214_v58 = vld [vmem:[#allocation13_spill] sm:$0xff] }
 0x331   :  { %7093 = vmatmul.mubr.f32.vlgmr.msra.gmra.mxu1 %v15702_v55  ;;  %9813 = vmatprep.subr.mxu0 %v15436_v20  ;;  %v18213_v55 = vld [vmem:[#allocation2_spill] sm:$0xff] }
 0x332   :  { %9843 = vmatprep.subr.mxu1 %v15276_v32  ;;  %9814 = vmatpush3.msra.mxu0 %v15418_v37 }
 0x333   :  { %9844 = vmatpush3.msra.mxu1 %v15296_v42  ;;  %9815 = vmatprep.subr.mxu0 %v15467_v62 }
 0x334   :  { %9845 = vmatprep.subr.mxu1 %v15307_v52  ;;  %7098 = vmatprep.mubr.f32.mxu1 %v15758_v35  ;;  %v18212_v35 = vld [vmem:[#allocation15_spill] sm:$0xff] }
 0x335   :  { %9816 = vmatpush3.msra.mxu0 %v18191_v1  ;;  %9846 = vmatpush3.msra.mxu1 %v18192_v34 }
 0x336   :  { %7100 = vmatmul.mubr.f32.gmra.mxu1 %v15782_v24  ;;  %9817 = vmatprep.subr.mxu0 %v18193_v45  ;;  %v18211_v24 = vld [vmem:[#allocation3_spill] sm:$0xff] }
 0x337   :  { %9847 = vmatprep.subr.mxu1 %v18194_v12  ;;  %9818 = vmatpush3.msra.mxu0 %v18195_v33 }
 0x338   :  { %9848 = vmatpush3.msra.mxu1 %v18196_v17  ;;  %9819 = vmatprep.subr.mxu0 %v18197_v14 }
 0x339   :  { %9849 = vmatprep.subr.mxu1 %v18198_v0  ;;  %9820 = vmatpush3.msra.mxu0 %v18199_v23 }
 0x33a   :  { %9850 = vmatpush3.msra.mxu1 %v18200_v13  ;;  %9821 = vmatprep.subr.mxu0 %v18201_v51 }
 0x33b   :  { %9851 = vmatprep.subr.mxu1 %v18202_v25  ;;  %9822 = vmatpush3.msra.mxu0 %v18203_v6 }
 0x33c   :  { %9852 = vmatpush3.msra.mxu1 %v18204_v16  ;;  %9823 = vmatprep.subr.mxu0 %v18205_v53 }
 0x33d   :  { %9853 = vmatprep.subr.mxu1 %v18206_v26  ;;  %9824 = vmatpush3.msra.mxu0 %v15614_v41 }
 0x33e   :  { %9854 = vmatpush3.msra.mxu1 %v18207_v43  ;;  %9825 = vmatprep.subr.mxu0 %v15700_v47 }
 0x33f   :  { %9855 = vmatprep.subr.mxu1 %v18208_v44  ;;  %9826 = vmatpush3.msra.mxu0 %v15664_v63 }
 0x340   :  { %9856 = vmatpush3.msra.mxu1 %v18209_v40  ;;  %9827 = vmatprep.subr.mxu0 %v15734_v11 }
 0x341   :  { %9857 = vmatprep.subr.mxu1 %v18210_v2  ;;  %9828 = vmatpush3.msra.mxu0 %v15693_v50 }
 0x342   :  { %9858 = vmatpush3.msra.mxu1 %v18211_v24  ;;  %9829 = vmatprep.subr.mxu0 %v15773_v8 }
 0x343   :  { %9859 = vmatprep.subr.mxu1 %v18212_v35  ;;  %9830 = vmatpush3.msra.mxu0 %v15717_v9 }
 0x344   :  { %9860 = vmatpush3.msra.mxu1 %v18213_v55  ;;  %9831 = vmatprep.subr.mxu0 %v15793_v48 }
 0x345   :  { %9861 = vmatprep.subr.mxu1 %v15555_v3  ;;  %9832 = vmatpush3.msra.mxu0 %v15727_v10  ;;  %v18215_v3 = vld [vmem:[#allocation27_spill] sm:$0xff] }
 0x346   :  { %9862 = vmatpush3.msra.mxu1 %v18214_v58  ;;  %9833 = vmatprep.subr.mxu0 %v15824_v56  ;;  %v18216_v58 = vld [vmem:[#allocation32_spill] sm:$0xff] }
 0x347   :  { %9863 = vmatprep.subr.mxu1 %v15616_v54  ;;  %9834 = vmatpush3.msra.mxu0 %v15828_v61  ;;  %v18217_v54 = vand.u32 4294901760, %v15302_v15  ;;  %v18222_v15 = vand.u32 4294901760, %v15388_v5  ;;  %v18228_v5 = vand.u32 4294901760, %v15770_v4 }
 0x348   :  { %9864 = vmatpush3.msra.mxu1 %v15603_v28  ;;  %9835 = vmatprep.subr.mxu0 %v15846_v59  ;;  %v18218_v28 = vand.u32 4294901760, %v15324_v57  ;;  %v18219_v59 = vld [vmem:[#allocation4_spill] sm:$0xff]  ;;  %v18223_v57 = vand.u32 4294901760, %v15394_v21  ;;  %v18230_v21 = vand.u32 4294901760, %v15418_v37  ;;  %v18235_v37 = vand.u32 4294901760, %v18193_v45 }
 0x349   :  { %9865 = vmatprep.subr.mxu1 %v15635_v60  ;;  %9836 = vmatpush3.msra.mxu0 %v15834_v7  ;;  %v18220_v7 = vand.u32 4294901760, %v15353_v27  ;;  %v18224_v27 = vand.u32 4294901760, %v15412_v38  ;;  %v18231_v38 = vand.u32 4294901760, %v15467_v62  ;;  %v18239_v62 = vand.u32 4294901760, %v18201_v51 }
 0x34a   :  { %7235 = vmatprep.mubr.f32.mxu0 %v15756_v29  ;;  %9866 = vmatpush3.msra.mxu1 %v18215_v3  ;;  %v18221_v3 = vand.u32 4294901760, %v15345_v36  ;;  %v18226_v36 = vand.u32 4294901760, %v15756_v29  ;;  %v7663_v29 = vld [vmem:[%s16430_s1] sm:$0x3]  ;;  %v18255_v51 = vand.u32 4294901760, %v15828_v61 }
 0x34b   :  { %7238 = vmatmul.mubr.f32.vlgmr.msra.gmra.mxu0 %v15770_v4  ;;  %9867 = vmatprep.subr.mxu1 %v18216_v58  ;;  %v18233_v4 = vand.u32 4294901760, %v18191_v1  ;;  %v7664_v1 = vld [vmem:[%s16431_s3] sm:$0xff]  ;;  %v7674_v45 = vsel %vm7672_vm0, %v7663_v29, 0 }
 0x34c   :  { %9881 = vmatprep.subr.mxu0 %v18217_v54  ;;  %9868 = vmatpush3.msra.mxu1 %v15655_v18  ;;  %v18229_v54 = vand.u32 4294901760, %v15436_v20  ;;  %v18238_v20 = vand.u32 4294901760, %v18199_v23 }
 0x34d   :  { %9882 = vmatpush3.msra.mxu0 %v18218_v28  ;;  %9869 = vmatprep.subr.mxu1 %v18219_v59  ;;  %v18225_v28 = vld [vmem:[#allocation40_spill] sm:$0xff] }
 0x34e   :  { %9883 = vmatprep.subr.mxu0 %v18220_v7  ;;  %7244 = vmatprep.mubr.f32.mxu0 %v15802_v31  ;;  %v18242_v7 = vand.u32 4294901760, %v15614_v41  ;;  %v18245_v41 = vand.u32 4294901760, %v15734_v11  ;;  %v18248_v11 = vand.u32 4294901760, %v15717_v9  ;;  %v18253_v9 = vand.u32 4294901760, %v15824_v56 }
 0x34f   :  { %9870 = vmatpush3.msra.mxu1 %v15679_v30  ;;  %9884 = vmatpush3.msra.mxu0 %v18221_v3  ;;  %v18227_v3 = vand.u32 4294901760, %v15402_v19  ;;  %v18232_v19 = vand.u32 4294901760, %v15802_v31  ;;  %v18240_v31 = vand.u32 4294901760, %v18203_v6  ;;  %v18257_v6 = vld [vmem:[#allocation9_spill] sm:$0xff] }
 0x350   :  { %7247 = vmatmul.mubr.f32.gmra.mxu0 %v15821_v46  ;;  %9871 = vmatprep.subr.mxu1 %v15747_v22 }
 0x351   :  { %9885 = vmatprep.subr.mxu0 %v18222_v15  ;;  %9872 = vmatpush3.msra.mxu1 %v15779_v39  ;;  %v18264_v15 = vld [vmem:[#allocation28_spill] sm:$0xff] }
 0x352   :  { %9886 = vmatpush3.msra.mxu0 %v18223_v57  ;;  %9873 = vmatprep.subr.mxu1 %v15787_v49 }
 0x353   :  { %9887 = vmatprep.subr.mxu0 %v18224_v27  ;;  %9874 = vmatpush3.msra.mxu1 %v18225_v28  ;;  %v10001_v27 = vmov 0.0  }
 0x354   :  { %7351 = vmatprep.mubr.f32.mxu1 %v18226_v36  ;;  %9888 = vmatpush3.msra.mxu0 %v18227_v3 }
 0x355   :  { %7355 = vmatmul.mubr.f32.vlgmr.msra.gmra.mxu1 %v18228_v5  ;;  %9889 = vmatprep.subr.mxu0 %v18229_v54 }
 0x356   :  { %9919 = vmatprep.subr.mxu1 %v15276_v32  ;;  %9890 = vmatpush3.msra.mxu0 %v18230_v21  ;;  %v18234_v32 = vand.u32 4294901760, %v15821_v46  ;;  %v18241_v46 = vand.u32 4294901760, %v18205_v53 }
 0x357   :  { %9920 = vmatpush3.msra.mxu1 %v15296_v42  ;;  %9891 = vmatprep.subr.mxu0 %v18231_v38  ;;  %v18236_v42 = vand.u32 4294901760, %v18195_v33  ;;  %v16042_v33 = vand.u32 4294901760, %v7664_v1 }
 0x358   :  { %9921 = vmatprep.subr.mxu1 %v15307_v52  ;;  %7362 = vmatprep.mubr.f32.mxu1 %v18232_v19  ;;  %v18237_v52 = vand.u32 4294901760, %v18197_v14  ;;  %v16049_v14 = vand.u32 4294901760, %v7674_v45 }
 0x359   :  { %9892 = vmatpush3.msra.mxu0 %v18233_v4  ;;  %9922 = vmatpush3.msra.mxu1 %v18192_v34  ;;  %v18243_v34 = vand.u32 4294901760, %v15700_v47  ;;  %v18246_v47 = vand.u32 4294901760, %v15693_v50  ;;  %v7784_v50 = vsub.f32 %v7664_v1, %v16042_v33 }
 0x35a   :  { %7366 = vmatmul.mubr.f32.gmra.mxu1 %v18234_v32  ;;  %9893 = vmatprep.subr.mxu0 %v18235_v37 }
 0x35b   :  { %9923 = vmatprep.subr.mxu1 %v18194_v12  ;;  %9894 = vmatpush3.msra.mxu0 %v18236_v42  ;;  %v18244_v12 = vand.u32 4294901760, %v15664_v63  ;;  %v18247_v63 = vand.u32 4294901760, %v15773_v8  ;;  %v16067_v8 = vsub.f32 %v7674_v45, %v16049_v14 }
 0x35c   :  { %9924 = vmatpush3.msra.mxu1 %v18196_v17  ;;  %9895 = vmatprep.subr.mxu0 %v18237_v52  ;;  %v16044_v17 = vpop.f32.mrf.mxu1 }
 0x35d   :  { %9925 = vmatprep.subr.mxu1 %v18198_v0  ;;  %9896 = vmatpush3.msra.mxu0 %v18238_v20  ;;  %v18249_v0 = vand.u32 4294901760, %v15793_v48  ;;  %v18254_v48 = vld [vmem:[#allocation17_spill] sm:$0xff] }
 0x35e   :  { %9926 = vmatpush3.msra.mxu1 %v18200_v13  ;;  %9897 = vmatprep.subr.mxu0 %v18239_v62  ;;  %v16061_v23 = vpop.f32.mrf.mxu1  ;;  %v18250_v13 = vld [vmem:[#allocation19_spill] sm:$0xff] }
 0x35f   :  { %9927 = vmatprep.subr.mxu1 %v18202_v25  ;;  %9898 = vmatpush3.msra.mxu0 %v18240_v31  ;;  %v18256_v25 = vld [vmem:[#allocation39_spill] sm:$0xff] }
 0x360   :  { %9928 = vmatpush3.msra.mxu1 %v18204_v16  ;;  %9899 = vmatprep.subr.mxu0 %v18241_v46  ;;  %v7785_v16 = vand.u32 4294901760, %v7784_v50  ;;  %v16080_v53 = vpop.f32.mrf.mxu1 }
 0x361   :  { %9929 = vmatprep.subr.mxu1 %v18206_v26  ;;  %9900 = vmatpush3.msra.mxu0 %v18242_v7  ;;  %v18259_v26 = vld [vmem:[#allocation8_spill] sm:$0xff] }
 0x362   :  { %9930 = vmatpush3.msra.mxu1 %v18207_v43  ;;  %9901 = vmatprep.subr.mxu0 %v18243_v34  ;;  %v18260_v56 = vand.u32 4294901760, %v18259_v26  ;;  %v7744_v43 = vand.u32 4294901760, %v16067_v8  ;;  %v16094_v57 = vpop.f32.mrf.mxu1 }
 0x363   :  { %9931 = vmatprep.subr.mxu1 %v18208_v44  ;;  %9902 = vmatpush3.msra.mxu0 %v18244_v12  ;;  %v18261_v44 = vld [vmem:[#allocation31_spill] sm:$0xff] }
 0x364   :  { %9932 = vmatpush3.msra.mxu1 %v18209_v40  ;;  %9903 = vmatprep.subr.mxu0 %v18245_v41  ;;  %v18262_v40 = vld [vmem:[#allocation27_spill] sm:$0xff]  ;;  %v7745_v36 = vsub.f32 %v16067_v8, %v7744_v43 }
 0x365   :  { %9933 = vmatprep.subr.mxu1 %v18210_v2  ;;  %9904 = vmatpush3.msra.mxu0 %v18246_v47  ;;  %v18263_v2 = vld [vmem:[#allocation37_spill] sm:$0xff] }
 0x366   :  { %9934 = vmatpush3.msra.mxu1 %v18211_v24  ;;  %9905 = vmatprep.subr.mxu0 %v18247_v63  ;;  %v18251_v24 = vand.u32 4294901760, %v15727_v10  ;;  %v18258_v10 = vand.u32 4294901760, %v18257_v6 }
 0x367   :  { %9935 = vmatprep.subr.mxu1 %v18212_v35  ;;  %9906 = vmatpush3.msra.mxu0 %v18248_v11  ;;  %v18252_v35 = vld [vmem:[#allocation13_spill] sm:$0xff] }
 0x368   :  { %9936 = vmatpush3.msra.mxu1 %v18213_v55  ;;  %9907 = vmatprep.subr.mxu0 %v18249_v0  ;;  %v16072_v55 = vpop.f32.mrf.mxu0 }
 0x369   :  { %9937 = vmatprep.subr.mxu1 %v18250_v13  ;;  %9908 = vmatpush3.msra.mxu0 %v18251_v24 }
 0x36a   :  { %9938 = vmatpush3.msra.mxu1 %v18252_v35  ;;  %9909 = vmatprep.subr.mxu0 %v18253_v9  ;;  %v16088_v61 = vpop.f32.mrf.mxu0 }
 0x36b   :  { %9939 = vmatprep.subr.mxu1 %v18254_v48  ;;  %9910 = vmatpush3.msra.mxu0 %v18255_v51 }
 0x36c   :  { %9940 = vmatpush3.msra.mxu1 %v18256_v25  ;;  %9911 = vmatprep.subr.mxu0 %v18258_v10  ;;  %v16100_v3 = vpop.f32.mrf.mxu0 }
 0x36d   :  { %9941 = vmatprep.subr.mxu1 %v15635_v60  ;;  %9912 = vmatpush3.msra.mxu0 %v18260_v56  ;;  %v7786_v60 = vsub.f32 %v7784_v50, %v7785_v16 }
 0x36e   :  { %7532 = vmatprep.mubr.f32.mxu0 %v18261_v44  ;;  %9942 = vmatpush3.msra.mxu1 %v18262_v40  ;;  %v16111_v5 = vpop.f32.mrf.mxu0 }
 0x36f   :  { %7534 = vmatmul.mubr.f32.vlgmr.msra.gmra.mxu0 %v18263_v2  ;;  %9943 = vmatprep.subr.mxu1 %v18216_v58  ;;  %v16102_v58 = vpop.f32.mrf.mxu1 }
 0x370   :  { %9944 = vmatpush3.msra.mxu1 %v15655_v18  ;;  %7539 = vmatprep.mubr.f32.mxu0 %v18264_v15  ;;  %v18265_v18 = vld [vmem:[#allocation7_spill] sm:$0xff] }
 0x371   :  { %9945 = vmatprep.subr.mxu1 %v18219_v59  ;;  %9969 = vmatprep.subr.mxu0 %v10001_v27  ;;  %v7787_v59 = vand.u32 4294901760, %v7786_v60  ;;  %v16113_v54 = vpop.f32.mrf.mxu1 }
 0x372   :  { %9946 = vmatpush3.msra.mxu1 %v15679_v30  ;;  %7643 = vmatprep.mubr.f32.mxu1 %v18261_v44  ;;  %v7746_v30 = vand.u32 4294901760, %v7745_v36 }
 0x373   :  { %7541 = vmatmul.mubr.f32.gmra.mxu0 %v18265_v18  ;;  %9947 = vmatprep.subr.mxu1 %v15747_v22  ;;  %v16117_v22 = vpop.f32.mrf.mxu0 }
 0x374   :  { %9948 = vmatpush3.msra.mxu1 %v15779_v39  ;;  %9970 = vmatpush3.msra.mxu0 %v16042_v33  ;;  %v16120_v39 = vpop.f32.mrf.mxu1 }
 0x375   :  { %9949 = vmatprep.subr.mxu1 %v15787_v49  ;;  %9971 = vmatprep.mubr.msk.f32.mxu0 %vm10002_vm1, %v10001_v27  ;;  %v16124_v49 = vpop.f32.mrf.mxu0 }
 0x376   :  { %9950 = vmatpush3.msra.mxu1 %v18225_v28  ;;  %9979 = vmatprep.subr.mxu0 %v10001_v27  ;;  %v16128_v28 = vpop.f32.mrf.mxu1 }
 0x377   :  { %7645 = vmatmul.mubr.f32.vlgmr.msra.gmra.mxu1 %v18263_v2  ;;  %9974 = vmatprep.subr.mxu1 %v10001_v27  ;;  %v16133_v21 = vpop.f32.mrf.mxu0 }
 0x378   :  { %9975 = vmatpush3.msra.mxu1 %v7787_v59  ;;  %7650 = vmatprep.mubr.f32.mxu1 %v18264_v15  ;;  %v16135_v38 = vpop.f32.mrf.mxu1 }
 0x379   :  { %9972 = vmatmul.mubr.f32.vlgmr.msra.gmra.mxu0 %v7746_v30  ;;  %9984 = vmatprep.subr.mxu1 %v10001_v27  ;;  %v16140_v19 = vpop.f32.mrf.mxu0 }
 0x37a   :  { %9980 = vmatpush3.msra.mxu0 %v7784_v50  ;;  %9981 = vmatprep.mubr.msk.f32.mxu0 %vm10002_vm1, %v10001_v27  ;;  %v16142_v4 = vpop.f32.mrf.mxu1 }
 0x37b   :  { %7652 = vmatmul.mubr.f32.gmra.mxu1 %v18265_v18  ;;  %9989 = vmatprep.subr.mxu0 %v10001_v27  ;;  %v16144_v32 = vpop.f32.mrf.mxu0 }
 0x37c   :  { %9976 = vmatprep.mubr.msk.f32.mxu1 %vm10002_vm1, %v10001_v27  ;;  %v16147_v37 = vpop.f32.mrf.mxu1 }
 0x37d   :  { %9982 = vmatmul.mubr.f32.vlgmr.msra.gmra.mxu0 %v16067_v8  ;;  %v16149_v42 = vpop.f32.mrf.mxu0 }
 0x37e   :  { %9990 = vmatpush3.msra.mxu0 %v7785_v16  ;;  %9991 = vmatprep.mubr.msk.f32.mxu0 %vm10002_vm1, %v10001_v27  ;;  %v16151_v52 = vpop.f32.mrf.mxu1 }
 0x37f   :  { %9977 = vmatmul.mubr.f32.vlgmr.msra.gmra.mxu1 %v16049_v14  ;;  %v16153_v20 = vpop.f32.mrf.mxu0 }
 0x380   :  { %9985 = vmatpush3.msra.mxu1 %v16042_v33  ;;  %9986 = vmatprep.mubr.msk.f32.mxu1 %vm10002_vm1, %v10001_v27  ;;  %v16155_v62 = vpop.f32.mrf.mxu1 }
 0x381   :  { %9994 = vmatprep.subr.mxu1 %v10001_v27  ;;  %9992 = vmatmul.mubr.f32.vlgmr.msra.gmra.mxu0 %v16049_v14  ;;  %v16157_v31 = vpop.f32.mrf.mxu0 }
 0x382   :  { %v16159_v29 = vpop.f32.mrf.mxu1 }
 0x383   :  { %9987 = vmatmul.mubr.f32.vlgmr.msra.gmra.mxu1 %v7744_v43  ;;  %v16161_v46 = vpop.f32.mrf.mxu0 }
 0x384   :  { %9995 = vmatpush3.msra.mxu1 %v16042_v33  ;;  %9996 = vmatprep.mubr.msk.f32.mxu1 %vm10002_vm1, %v10001_v27  ;;  %v16163_v7 = vpop.f32.mrf.mxu1 }
 0x385   :  { %v16165_v1 = vpop.f32.mrf.mxu0 }
 0x386   :  { %v16167_v34 = vpop.f32.mrf.mxu1 }
 0x387   :  { %9997 = vmatmul.mubr.f32.vlgmr.msra.gmra.mxu1 %v16049_v14  ;;  %v16169_v45 = vpop.f32.mrf.mxu0 }
 0x388   :  { %v16171_v12 = vpop.f32.mrf.mxu1 }
 0x389   :  { %v16173_v41 = vpop.f32.mrf.mxu0 }
 0x38a   :  { %v16175_v33 = vpop.f32.mrf.mxu1 }
 0x38b   :  { %v16177_v47 = vpop.f32.mrf.mxu0 }
 0x38c   :  { %v16179_v14 = vpop.f32.mrf.mxu1 }
 0x38d   :  { %v16181_v63 = vpop.f32.mrf.mxu0 }
 0x38e   :  { %v16183_v11 = vpop.f32.mrf.mxu1 }
 0x38f   :  { %v16185_v0 = vpop.f32.mrf.mxu0 }
 0x390   :  { %v16187_v50 = vpop.f32.mrf.mxu1 }
 0x391   :  { %v16189_v13 = vpop.f32.mrf.mxu0 }
 0x392   :  { %v16191_v24 = vpop.f32.mrf.mxu1 }
 0x393   :  { %v16193_v8 = vpop.f32.mrf.mxu0 }
 0x394   :  { %v16195_v35 = vpop.f32.mrf.mxu1 }
 0x395   :  { %v16197_v9 = vpop.f32.mrf.mxu0 }
 0x396   :  { %v16199_v48 = vpop.f32.mrf.mxu1 }
 0x397   :  { %v16201_v51 = vpop.f32.mrf.mxu0 }
 0x398   :  { %v16203_v25 = vpop.f32.mrf.mxu1 }
 0x399   :  { %v16205_v6 = vpop.f32.mrf.mxu0 }
 0x39a   :  { %v16207_v10 = vpop.f32.mrf.mxu1 }
 0x39b   :  { %v16209_v16 = vpop.f32.mrf.mxu0 }
 0x39c   :  { %v16211_v26 = vpop.f32.mrf.mxu1 }
 0x39d   :  { %v16213_v56 = vpop.f32.mrf.mxu0 }
 0x39e   :  { %v16215_v43 = vpop.f32.mrf.mxu1 }
 0x39f   :  { %18266 = vst [vmem:[#allocation38_spill] sm:$0xff] %v16215_v43  ;;  %v16217_v44 = vpop.f32.mrf.mxu0 }
 0x3a0   :  { %18267 = vst [vmem:[#allocation11_spill] sm:$0xff] %v16217_v44  ;;  %v16219_v40 = vpop.f32.mrf.mxu1 }
 0x3a1   :  { %18268 = vst [vmem:[#allocation23_spill] sm:$0xff] %v16219_v40  ;;  %v16221_v2 = vpop.f32.mrf.mxu0 }
 0x3a2   :  { %18269 = vst [vmem:[#allocation30_spill] sm:$0xff] %v16221_v2  ;;  %v16223_v15 = vpop.f32.mrf.mxu1 }
 0x3a3   :  { %18270 = vst [vmem:[#allocation29_spill] sm:$0xff] %v16223_v15  ;;  %v16225_v60 = vpop.f32.mrf.mxu0 }
 0x3a4   :  { %18271 = vst [vmem:[#allocation26_spill] sm:$0xff] %v16225_v60  ;;  %v16227_v27 = vpop.f32.mrf.mxu1 }
 0x3a5   :  { %18272 = vst [vmem:[#allocation34_spill] sm:$0xff] %v16227_v27  ;;  %v16229_v36 = vpop.f32.mrf.mxu0 }
 0x3a6   :  { %18273 = vst [vmem:[#allocation35_spill] sm:$0xff] %v16229_v36  ;;  %v16231_v18 = vpop.f32.mrf.mxu1 }
 0x3a7   :  { %18274 = vst [vmem:[#allocation6_spill] sm:$0xff] %v16231_v18  ;;  %v16233_v59 = vpop.f32.mrf.mxu0 }
 0x3a8   :  { %18275 = vst [vmem:[#allocation12_spill] sm:$0xff] %v16233_v59  ;;  %v16235_v30 = vpop.f32.mrf.mxu1 }
 0x3a9   :  { %18276 = vst [vmem:[#allocation10_spill] sm:$0xff] %v16235_v30  ;;  %v16237_v43 = vpop.f32.mrf.mxu0 }
 0x3aa   :  { %18277 = vst [vmem:[#allocation16_spill] sm:$0xff] %v16237_v43  ;;  %v16239_v44 = vpop.f32.mrf.mxu1 }
 0x3ab   :  { %18278 = vst [vmem:[#allocation33_spill] sm:$0xff] %v16239_v44  ;;  %v16241_v40 = vpop.f32.mrf.mxu0 }
 0x3ac   :  { %18279 = vst [vmem:[#allocation25_spill] sm:$0xff] %v16241_v40  ;;  %v16243_v2 = vpop.f32.mrf.mxu1 }
 0x3ad   :  { %18280 = vst [vmem:[#allocation14_spill] sm:$0xff] %v16243_v2  ;;  %v16245_v15 = vpop.f32.mrf.mxu0 }
 0x3ae   :  { %18281 = vst [vmem:[#allocation21_spill] sm:$0xff] %v16245_v15  ;;  %v16247_v60 = vpop.f32.mrf.mxu1 }
 0x3af   :  { %18282 = vst [vmem:[#allocation22_spill] sm:$0xff] %v16247_v60  ;;  %v16249_v27 = vpop.f32.mrf.mxu0 }
 0x3b0   :  { %18283 = vst [vmem:[#allocation36_spill] sm:$0xff] %v16249_v27  ;;  %v16251_v36 = vpop.f32.mrf.mxu1 }
 0x3b1   :  { %18284 = vst [vmem:[#allocation20_spill] sm:$0xff] %v16251_v36  ;;  %v16253_v18 = vpop.f32.mrf.mxu0 }
 0x3b2   :  { %18285 = vst [vmem:[#allocation24_spill] sm:$0xff] %v16253_v18  ;;  %v16255_v59 = vpop.f32.mrf.mxu1 }
 0x3b3   :  { %18286 = vst [vmem:[#allocation3_spill] sm:$0xff] %v16255_v59  ;;  %v16257_v30 = vpop.f32.mrf.mxu0 }
 0x3b4   :  { %v16259_v43 = vpop.f32.mrf.mxu1 }
 0x3b5   :  { %18287 = vst [vmem:[#allocation15_spill] sm:$0xff] %v16259_v43  ;;  %v16261_v44 = vpop.f32.mrf.mxu0  ;;  %v8813_v43 = vadd.f32 %v16061_v23, %v16044_v17  ;;  %v8854_v17 = vadd.f32 %v16111_v5, %v16100_v3  ;;  %v8927_v23 = vadd.f32 %v16124_v49, %v16117_v22  ;;  %v8930_v5 = vadd.f32 %v16140_v19, %v16133_v21 }
 0x3b6   :  { %18288 = vst [vmem:[#allocation2_spill] sm:$0xff] %v16261_v44  ;;  %v16263_v40 = vpop.f32.mrf.mxu1  ;;  %v9003_v22 = vadd.f32 %v16149_v42, %v16144_v32  ;;  %v9006_v21 = vadd.f32 %v16157_v31, %v16153_v20  ;;  %v9079_v19 = vadd.f32 %v16165_v1, %v16161_v46  ;;  %v9082_v20 = vadd.f32 %v16173_v41, %v16169_v45 }
 0x3b7   :  { %18289 = vst [vmem:[#allocation32_spill] sm:$0xff] %v16263_v40  ;;  %v16265_v2 = vpop.f32.mrf.mxu0  ;;  %v9155_v31 = vadd.f32 %v16181_v63, %v16177_v47  ;;  %v9158_v45 = vadd.f32 %v16189_v13, %v16185_v0  ;;  %v9231_v41 = vadd.f32 %v16197_v9, %v16193_v8  ;;  %v9234_v0 = vadd.f32 %v16205_v6, %v16201_v51  ;;  %v18307_v51 = vld [vmem:[#allocation35_spill] sm:$0xff] }
 0x3b8   :  { %18290 = vst [vmem:[#allocation4_spill] sm:$0xff] %v16265_v2  ;;  %v16267_v15 = vpop.f32.mrf.mxu1  ;;  %v8851_v2 = vadd.f32 %v16088_v61, %v16072_v55  ;;  %v9307_v13 = vadd.f32 %v16213_v56, %v16209_v16 }
 0x3b9   :  { %18291 = vst [vmem:[#allocation40_spill] sm:$0xff] %v16267_v15  ;;  %v16269_v60 = vpop.f32.mrf.mxu0 }
 0x3ba   :  { %18292 = vst [vmem:[#allocation19_spill] sm:$0xff] %v16269_v60  ;;  %v16271_v27 = vpop.f32.mrf.mxu1  ;;  %v18299_v60 = vld [vmem:[#allocation5_spill] sm:$0xff] }
 0x3bb   :  { %18293 = vst [vmem:[#allocation13_spill] sm:$0xff] %v16271_v27  ;;  %v16273_v36 = vpop.f32.mrf.mxu0  ;;  %v3057_v27 = vadd.f32 %v8813_v43, %v18299_v60 }
 0x3bc   :  { %18294 = vst [vmem:[#allocation17_spill] sm:$0xff] %v16273_v36  ;;  %v16275_v18 = vpop.f32.mrf.mxu1  ;;  %v8816_v36 = vadd.f32 %v16094_v57, %v16080_v53  ;;  %v8892_v53 = vadd.f32 %v16128_v28, %v16120_v39  ;;  %v8965_v57 = vadd.f32 %v16142_v4, %v16135_v38  ;;  %v8968_v39 = vadd.f32 %v16151_v52, %v16147_v37 }
 0x3bd   :  { %18295 = vst [vmem:[#allocation39_spill] sm:$0xff] %v16275_v18  ;;  %v16277_v59 = vpop.f32.mrf.mxu0  ;;  %v8889_v18 = vadd.f32 %v16113_v54, %v16102_v58  ;;  %v9041_v28 = vadd.f32 %v16159_v29, %v16155_v62  ;;  %v9044_v37 = vadd.f32 %v16167_v34, %v16163_v7  ;;  %v9117_v52 = vadd.f32 %v16175_v33, %v16171_v12 }
 0x3be   :  { %18296 = vst [vmem:[#allocation9_spill] sm:$0xff] %v16277_v59  ;;  %v16281_v44 = vpop.f32.mrf.mxu1  ;;  %v3176_v59 = vadd.f32 %v8851_v2, %v3057_v27  ;;  %v9120_v7 = vadd.f32 %v16183_v11, %v16179_v14  ;;  %v9193_v34 = vadd.f32 %v16191_v24, %v16187_v50  ;;  %v9196_v14 = vadd.f32 %v16199_v48, %v16195_v35  ;;  %v18302_v35 = vld [vmem:[#allocation23_spill] sm:$0xff]  ;;  %v18303_v48 = vld [vmem:[#allocation29_spill] sm:$0xff] }
 0x3bf   :  { %v16285_v40 = vpop.f32.mrf.mxu0  ;;  %v9269_v11 = vadd.f32 %v16207_v10, %v16203_v25 }
 0x3c0   :  { %18297 = vst [vmem:[#allocation8_spill] sm:$0xff] %v16285_v40  ;;  %v16287_v15 = vpop.f32.mrf.mxu1  ;;  %v18300_v40 = vld [vmem:[#allocation18_spill] sm:$0xff]  ;;  %v3423_v43 = vadd.f32 %v8889_v18, %v3176_v59 }
 0x3c1   :  { %18298 = vst [vmem:[#allocation31_spill] sm:$0xff] %v16287_v15  ;;  %v16298_v55 = vpop.f32.mrf.mxu0  ;;  %v3064_v15 = vadd.f32 %v8816_v36, %v18300_v40 }
 0x3c2   :  { %v16300_v61 = vpop.f32.mrf.mxu1  ;;  %v3568_v3 = vadd.f32 %v8927_v23, %v3423_v43 }
 0x3c3   :  { %v16307_v58 = vpop.f32.mrf.mxu0  ;;  %v3191_v54 = vadd.f32 %v8854_v17, %v3064_v15 }
 0x3c4   :  { %v16313_v49 = vpop.f32.mrf.mxu1  ;;  %v3685_v2 = vadd.f32 %v8965_v57, %v3568_v3 }
 0x3c5   :  { %v3430_v40 = vadd.f32 %v8892_v53, %v3191_v54  ;;  %v16319_v38 = vpop.f32.mrf.mxu0  ;;  %v18301_v53 = vld [vmem:[#allocation38_spill] sm:$0xff]  ;;  %v9345_v54 = vadd.f32 %v18303_v48, %v18302_v35 }
 0x3c6   :  { %v3864_v15 = vadd.f32 %v9003_v22, %v3685_v2  ;;  %v16325_v32 = vpop.f32.mrf.mxu1  ;;  %v9272_v57 = vadd.f32 %v18301_v53, %v16211_v26  ;;  %v18305_v22 = vld [vmem:[#allocation30_spill] sm:$0xff] }
 0x3c7   :  { %v3577_v4 = vadd.f32 %v8930_v5, %v3430_v40  ;;  %v16331_v62 = vpop.f32.mrf.mxu0  ;;  %v18304_v5 = vld [vmem:[#allocation11_spill] sm:$0xff]  ;;  %v18306_v2 = vld [vmem:[#allocation26_spill] sm:$0xff] }
 0x3c8   :  { %v3975_v60 = vadd.f32 %v9041_v28, %v3864_v15  ;;  %v9310_v40 = vadd.f32 %v18305_v22, %v18304_v5  ;;  %v9383_v6 = vadd.f32 %v18307_v51, %v18306_v2  ;;  %v18309_v15 = vld [vmem:[#allocation6_spill] sm:$0xff]  ;;  %v18325_v5 = vld [vmem:[#allocation40_spill] sm:$0xff]  ;;  %v18326_v22 = vld [vmem:[#allocation13_spill] sm:$0xff] }
 0x3c9   :  { %v3696_v42 = vadd.f32 %v8968_v39, %v3577_v4  ;;  %v16343_v12 = vpop.f32.mrf.mxu0  ;;  %v18308_v4 = vld [vmem:[#allocation34_spill] sm:$0xff] }
 0x3ca   :  { %v4094_v36 = vadd.f32 %v9079_v19, %v3975_v60  ;;  %v18310_v26 = vld [vmem:[#allocation10_spill] sm:$0xff]  ;;  %v18311_v19 = vld [vmem:[#allocation33_spill] sm:$0xff] }
 0x3cb   :  { %v3871_v27 = vadd.f32 %v9006_v21, %v3696_v42  ;;  %v9348_v21 = vadd.f32 %v18309_v15, %v18308_v4  ;;  %v9421_v42 = vadd.f32 %v18311_v19, %v18310_v26  ;;  %v18329_v15 = vld [vmem:[#allocation17_spill] sm:$0xff] }
 0x3cc   :  { %v16333_v29 = vpop.f32.mrf.mxu1  ;;  %v4341_v1 = vadd.f32 %v9117_v52, %v4094_v36  ;;  %v18312_v52 = vld [vmem:[#allocation12_spill] sm:$0xff] }
 0x3cd   :  { %v3982_v46 = vadd.f32 %v9044_v37, %v3871_v27  ;;  %v18313_v27 = vld [vmem:[#allocation16_spill] sm:$0xff] }
 0x3ce   :  { %v16345_v33 = vpop.f32.mrf.mxu1  ;;  %v4486_v59 = vadd.f32 %v9155_v31, %v4341_v1  ;;  %v9386_v36 = vadd.f32 %v18313_v27, %v18312_v52  ;;  %v18315_v31 = vld [vmem:[#allocation21_spill] sm:$0xff]  ;;  %v18332_v52 = vld [vmem:[#allocation31_spill] sm:$0xff] }
 0x3cf   :  { %v4109_v18 = vadd.f32 %v9082_v20, %v3982_v46  ;;  %v18314_v20 = vld [vmem:[#allocation25_spill] sm:$0xff]  ;;  %v9649_v27 = vadd.f32 %v16300_v61, %v18332_v52 }
 0x3d0   :  { %v4603_v17 = vadd.f32 %v9193_v34, %v4486_v59  ;;  %v16357_v50 = vpop.f32.mrf.mxu1  ;;  %v9459_v46 = vadd.f32 %v18315_v31, %v18314_v20  ;;  %v18316_v59 = vld [vmem:[#allocation14_spill] sm:$0xff] }
 0x3d1   :  { %v4348_v63 = vadd.f32 %v9120_v7, %v4109_v18 }
 0x3d2   :  { %v4782_v23 = vadd.f32 %v9231_v41, %v4603_v17  ;;  %v9727_v25 = vpop.f32.mrf.mxu1  ;;  %v18319_v17 = vld [vmem:[#allocation3_spill] sm:$0xff] }
 0x3d3   :  { %v4495_v24 = vadd.f32 %v9158_v45, %v4348_v63  ;;  %v18317_v45 = vld [vmem:[#allocation22_spill] sm:$0xff]  ;;  %v18318_v63 = vld [vmem:[#allocation20_spill] sm:$0xff] }
 0x3d4   :  { %v4893_v43 = vadd.f32 %v9269_v11, %v4782_v23  ;;  %v9424_v41 = vadd.f32 %v18317_v45, %v18316_v59  ;;  %v9687_v59 = vadd.f32 %v16319_v38, %v16307_v58  ;;  %v9728_v38 = vadd.f32 %v9727_v25, %v16357_v50 }
 0x3d5   :  { %v4614_v9 = vadd.f32 %v9196_v14, %v4495_v24  ;;  %v9497_v14 = vadd.f32 %v18319_v17, %v18318_v63  ;;  %v9652_v63 = vadd.f32 %v16325_v32, %v16313_v49 }
 0x3d6   :  { %v5012_v3 = vadd.f32 %v9307_v13, %v4893_v43  ;;  %v18321_v13 = vld [vmem:[#allocation24_spill] sm:$0xff]  ;;  %v18322_v43 = vld [vmem:[#allocation2_spill] sm:$0xff] }
 0x3d7   :  { %v4789_v10 = vadd.f32 %v9234_v0, %v4614_v9  ;;  %v18320_v0 = vld [vmem:[#allocation36_spill] sm:$0xff]  ;;  %v9535_v53 = vadd.f32 %v18322_v43, %v16257_v30 }
 0x3d8   :  { %v5259_v28 = vadd.f32 %v9345_v54, %v5012_v3  ;;  %v9462_v9 = vadd.f32 %v18321_v13, %v18320_v0  ;;  %v18323_v54 = vld [vmem:[#allocation15_spill] sm:$0xff] }
 0x3d9   :  { %v4900_v56 = vadd.f32 %v9272_v57, %v4789_v10  ;;  %v18324_v10 = vld [vmem:[#allocation32_spill] sm:$0xff] }
 0x3da   :  { %v5404_v37 = vadd.f32 %v9383_v6, %v5259_v28  ;;  %v9500_v3 = vadd.f32 %v18324_v10, %v18323_v54  ;;  %v18328_v28 = vld [vmem:[#allocation19_spill] sm:$0xff] }
 0x3db   :  { %v5027_v60 = vadd.f32 %v9310_v40, %v4900_v56  ;;  %v9573_v40 = vadd.f32 %v18326_v22, %v18325_v5  ;;  %v18327_v56 = vld [vmem:[#allocation4_spill] sm:$0xff] }
 0x3dc   :  { %v5521_v18 = vadd.f32 %v9421_v42, %v5404_v37  ;;  %v9538_v4 = vadd.f32 %v18328_v28, %v18327_v56 }
 0x3dd   :  { %v5266_v34 = vadd.f32 %v9348_v21, %v5027_v60  ;;  %v18330_v21 = vld [vmem:[#allocation9_spill] sm:$0xff]  ;;  %v18331_v60 = vld [vmem:[#allocation39_spill] sm:$0xff] }
 0x3de   :  { %v5700_v23 = vadd.f32 %v9459_v46, %v5521_v18  ;;  %v9611_v26 = vadd.f32 %v18330_v21, %v18329_v15  ;;  %v9576_v37 = vadd.f32 %v16281_v44, %v18331_v60  ;;  %v9725_v44 = vadd.f32 %v16345_v33, %v16333_v29 }
 0x3df   :  { %v5413_v24 = vadd.f32 %v9386_v36, %v5266_v34  ;;  %v18333_v34 = vld [vmem:[#allocation8_spill] sm:$0xff] }
 0x3e0   :  { %v5811_v48 = vadd.f32 %v9497_v14, %v5700_v23  ;;  %v9614_v18 = vadd.f32 %v16298_v55, %v18333_v34  ;;  %v9690_v23 = vadd.f32 %v16343_v12, %v16331_v62 }
 0x3e1   :  { %v5532_v35 = vadd.f32 %v9424_v41, %v5413_v24 }
 0x3e2   :  { %v5930_v6 = vadd.f32 %v9535_v53, %v5811_v48 }
 0x3e3   :  { %v5707_v51 = vadd.f32 %v9462_v9, %v5532_v35 }
 0x3e4   :  { %v6177_v42 = vadd.f32 %v9573_v40, %v5930_v6  ;;  %v7657_v6 = vld [vmem:[%s16433_s4] sm:$0xff] }
 0x3e5   :  { %v5818_v30 = vadd.f32 %v9500_v3, %v5707_v51 }
 0x3e6   :  { %v16351_v47 = vpop.f32.mrf.mxu0  ;;  %v6322_v46 = vadd.f32 %v9611_v26, %v6177_v42 }
 0x3e7   :  { %v5945_v31 = vadd.f32 %v9538_v4, %v5818_v30 }
 0x3e8   :  { %v9762_v8 = vpop.f32.mrf.mxu0  ;;  %v6439_v41 = vadd.f32 %v9649_v27, %v6322_v46 }
 0x3e9   :  { %v6184_v45 = vadd.f32 %v9576_v37, %v5945_v31  ;;  %v9763_v55 = vadd.f32 %v9762_v8, %v16351_v47 }
 0x3ea   :  { %v6618_v24 = vadd.f32 %v9687_v59, %v6439_v41 }
 0x3eb   :  { %v6331_v14 = vadd.f32 %v9614_v18, %v6184_v45 }
 0x3ec   :  { %v9764_v39 = vpop.f32.mrf.mxu0  ;;  %v6729_v58 = vadd.f32 %v9725_v44, %v6618_v24 }
 0x3ed   :  { %v6450_v13 = vadd.f32 %v9652_v63, %v6331_v14 }
 0x3ee   :  { %v9765_v1 = vpop.f32.mrf.mxu0  ;;  %v6848_v53 = vadd.f32 %v9763_v55, %v6729_v58 }
 0x3ef   :  { %v6625_v32 = vadd.f32 %v9690_v23, %v6450_v13  ;;  %v9766_v29 = vadd.f32 %v9765_v1, %v9764_v39  ;;  %v8132_v39 = vld [vmem:[%s16432_s5] ss:$0 sm:$0xff] }
 0x3f1   :  { %v9799_v16 = vpop.f32.mrf.mxu1  ;;  %v6736_v48 = vadd.f32 %v9728_v38, %v6625_v32 }
 0x3f3   :  { %v9800_v7 = vpop.f32.mrf.mxu1  ;;  %v6863_v12 = vadd.f32 %v9766_v29, %v6736_v48 }
 0x3f4   :  { %v9801_v9 = vadd.f32 %v9800_v7, %v9799_v16 }
 0x3f6   :  { %v9802_v57 = vpop.f32.mrf.mxu1  ;;  %v7095_v54 = vadd.f32 %v9801_v9, %v6848_v53 }
 0x3f8   :  { %v9803_v19 = vpop.f32.mrf.mxu1 }
 0x3f9   :  { %v9804_v10 = vadd.f32 %v9803_v19, %v9802_v57 }
 0x3fb   :  { %v7102_v50 = vadd.f32 %v9804_v10, %v6863_v12 }
 0x40b   :  { %v9837_v11 = vpop.f32.mrf.mxu0 }
 0x40d   :  { %v9838_v2 = vpop.f32.mrf.mxu0 }
 0x40e   :  { %v9839_v33 = vadd.f32 %v9838_v2, %v9837_v11 }
 0x410   :  { %v9840_v36 = vpop.f32.mrf.mxu0  ;;  %v7240_v47 = vadd.f32 %v9839_v33, %v7095_v54 }
 0x412   :  { %v9841_v17 = vpop.f32.mrf.mxu0 }
 0x413   :  { %v9842_v8 = vadd.f32 %v9841_v17, %v9840_v36 }
 0x415   :  { %v9875_v20 = vpop.f32.mrf.mxu1  ;;  %v7249_v11 = vadd.f32 %v9842_v8, %v7102_v50 }
 0x417   :  { %v9876_v61 = vpop.f32.mrf.mxu1 }
 0x418   :  { %v9877_v3 = vadd.f32 %v9876_v61, %v9875_v20 }
 0x41a   :  { %v9878_v43 = vpop.f32.mrf.mxu1  ;;  %v7357_v25 = vadd.f32 %v9877_v3, %v7240_v47 }
 0x41c   :  { %v9879_v62 = vpop.f32.mrf.mxu1 }
 0x41d   :  { %v9880_v16 = vadd.f32 %v9879_v62, %v9878_v43 }
 0x41f   :  { %v7368_v4 = vadd.f32 %v9880_v16, %v7249_v11 }
 0x42f   :  { %v9913_v0 = vpop.f32.mrf.mxu0 }
 0x431   :  { %v9914_v49 = vpop.f32.mrf.mxu0 }
 0x432   :  { %v9915_v5 = vadd.f32 %v9914_v49, %v9913_v0 }
 0x433   :  { %v9916_v35 = vpop.f32.mrf.mxu0 }
 0x434   :  { %v7536_v2 = vadd.f32 %v9915_v5, %v7357_v25 }
 0x435   :  { %v9917_v22 = vpop.f32.mrf.mxu0 }
 0x436   :  { %v9918_v57 = vadd.f32 %v9917_v22, %v9916_v35 }
 0x437   :  { %v9951_v40 = vpop.f32.mrf.mxu1 }
 0x438   :  { %v7543_v30 = vadd.f32 %v9918_v57, %v7368_v4 }
 0x439   :  { %v9952_v7 = vpop.f32.mrf.mxu1  ;;  %v7748_v1 = vpop.f32.mrf.mxu0 }
 0x43a   :  { %v9953_v51 = vadd.f32 %v9952_v7, %v9951_v40  ;;  %v7749_v21 = vadd.f32 %v8132_v39, %v7748_v1 }
 0x43b   :  { %v9954_v56 = vpop.f32.mrf.mxu1  ;;  %v9973_v28 = vpop.f32.mrf.mxu0 }
 0x43c   :  { %v7647_v15 = vadd.f32 %v9953_v51, %v7536_v2 }
 0x43d   :  { %v9955_v26 = vpop.f32.mrf.mxu1  ;;  %v7898_v19 = vpop.f32.mrf.mxu0 }
 0x43e   :  { %v7658_v42 = vadd.f32 %v7657_v6, %v7647_v15  ;;  %v9956_v60 = vadd.f32 %v9955_v26, %v9954_v56 }
 0x43f   :  { %v7824_v37 = vpop.f32.mrf.mxu1  ;;  %v9983_v52 = vpop.f32.mrf.mxu0 }
 0x440   :  { %7661 = vst.msk [vmem:[%s16434_s6] sm:$0xff] %vm7660_vm2, %v7658_v42  ;;  %v7654_v27 = vadd.f32 %v9956_v60, %v7543_v30  ;;  %v7825_v36 = vadd.f32 %v7824_v37, %v7749_v21 }
 0x441   :  { %v9978_v20 = vpop.f32.mrf.mxu1  ;;  %v8046_v31 = vpop.f32.mrf.mxu0 }
 0x442   :  { %v7659_v46 = vadd.f32 %v7657_v6, %v7654_v27  ;;  %v7899_v34 = vadd.f32 %v7898_v19, %v7825_v36 }
 0x443   :  { %v7972_v18 = vpop.f32.mrf.mxu1  ;;  %v9993_v59 = vpop.f32.mrf.mxu0 }
 0x444   :  { %7662 = vst.msk [vmem:[%s16434_s6 + $0x8] sm:$0xff] %vm7660_vm2, %v7659_v46  ;;  %v7973_v45 = vadd.f32 %v7972_v18, %v7899_v34 }
 0x445   :  { %v9988_v41 = vpop.f32.mrf.mxu1 }
 0x446   :  { %v8047_v63 = vadd.f32 %v8046_v31, %v7973_v45 }
 0x447   :  { %v8118_v44 = vpop.f32.mrf.mxu1 }
 0x448   :  { %v8119_v17 = vadd.f32 %v8118_v44, %v8047_v63 }
 0x449   :  { %v9998_v61 = vpop.f32.mrf.mxu1 }
 0x44a   :  { %8123 = vst.msk [vmem:[%s16435_s7] sm:$0x3] %vm8122_vm3, %v8119_v17 }

</bundles_post_ra>
